<compile_context>
chip_gen: v6e
topology: v6e:2x2x1
jax: 0.10.0
libtpu: 0.0.40
codegen_flags: <defaults>
</compile_context>

<pallas_src>
import functools

import jax
import jax.numpy as jnp
from jax import lax
from jax.experimental import pallas as pl
from jax.experimental.pallas import tpu as pltpu

# ---------------------------------------------------------------------------
# Static geometry implied by the PyTorch module.
# ---------------------------------------------------------------------------
H, W = 85, 3                       # spatial size implied by 85*3*32 flatten
HP, WP = H + 2, W + 2              # zero-padded spatial dims (87, 5)
QP = HP * WP                       # padded-flattened spatial size per image (435)
C1, C2 = 16, 32                    # conv channel counts
FC1_OUT = 128
EXT = 6                            # max |tap offset| in padded-flattened coords
# tap t = di*3 + dj  ->  lane offset (di-1)*WP + (dj-1), range [-6, 6]
TAP_OFFS = tuple((di - 1) * WP + (dj - 1) for di in range(3) for dj in range(3))


# ---------------------------------------------------------------------------
# The fused kernel.
# ---------------------------------------------------------------------------
def _mycnn_kernel(x_ref, mask_ref, w1_ref, b1_ref, w2_ref, b2_ref,
                  w1b_hbm, fb1_ref, fw2_ref, fb2_ref,          # inputs
                  o_ref,                                       # output
                  a1_ref, a2_ref, flat_ref, w1b_vmem, dma_sem,  # scratch
                  *, n_images):
    L = n_images * QP

    # Kick off the big fc1-weight HBM->VMEM DMA immediately; it overlaps the
    # conv1/conv2 work below and is waited on right before the fc1 matmul.
    w1b_copy = pltpu.make_async_copy(w1b_hbm, w1b_vmem, dma_sem)
    w1b_copy.start()

    mask = mask_ref[...]                                   # (1, L) 1.0 at interior

    # ---- conv1 (1 -> 16) + ReLU: 9 shifted VPU FMAs (C_in=1, skip the MXU) ----
    acc1 = jnp.broadcast_to(b1_ref[...], (C1, L))          # (16, L)
    for t, off in enumerate(TAP_OFFS):
        xs = x_ref[:, pl.ds(EXT + off, L)]                 # (1, L) static lane shift
        acc1 = acc1 + w1_ref[:, t:t + 1] * xs              # (16,1)*(1,L) -> (16,L)
    a1 = jnp.maximum(acc1, 0.0) * mask                     # zero the padding positions

    # Store conv1 output into an extended (zero-edged) buffer so conv2's
    # shifted reads stay in bounds.
    a1_ref[...] = jnp.zeros((C1, L + 2 * EXT), jnp.float32)
    a1_ref[:, pl.ds(EXT, L)] = a1

    # ---- conv2 (16 -> 32) + ReLU: 9 accumulated MXU matmuls ----
    acc2 = jnp.broadcast_to(b2_ref[...], (C2, L))          # (32, L)
    for t, off in enumerate(TAP_OFFS):
        sh = a1_ref[:, pl.ds(EXT + off, L)]                # (16, L) shifted conv1 out
        wt = w2_ref[:, t * C1:(t + 1) * C1]                # (32, 16) tap weights
        acc2 = acc2 + jnp.dot(wt, sh, preferred_element_type=jnp.float32)
    a2_ref[...] = jnp.maximum(acc2, 0.0)                   # (32, L), stays in VMEM

    # ---- rearrange (C2, n*QP) -> (n_images, C2*QP) flatten, order (c, q) ----
    # fc1's weight rows were host-permuted (and zero-padded at invalid q) to
    # exactly match this order, so no NCHW/NHWC transposes are needed anywhere.
    for c in range(C2):
        for n in range(n_images):
            flat_ref[n:n + 1, pl.ds(c * QP, QP)] = \
                a2_ref[c:c + 1, n * QP:(n + 1) * QP]

    # ---- fc1 (+ReLU) and fc2, fused; bf16 MXU matmul, f32 epilogue ----
    w1b_copy.wait()
    h = jnp.dot(flat_ref[...].astype(jnp.bfloat16), w1b_vmem[...],
                preferred_element_type=jnp.float32)        # (n_images, 128)
    h = jnp.maximum(h + fb1_ref[...], 0.0)
    # TODO(synk): Dropout(p=0.5) is identity here (eval-mode); training-mode
    # parity would need an in-kernel PRNG mask (pltpu.prng_seed/prng_random_bits).
    out = jnp.sum(h * fw2_ref[...], axis=-1, keepdims=True) + fb2_ref[...]
    o_ref[...] = out.astype(o_ref.dtype)


# ---------------------------------------------------------------------------
# One-time host-side repack of PyTorch-layout weights into kernel layout.
# ---------------------------------------------------------------------------
def prepare_params(params):
    w1 = params["conv1_w"].astype(jnp.float32).reshape(C1, 9)        # col = di*3+dj
    b1 = params["conv1_b"].astype(jnp.float32).reshape(C1, 1)
    w2 = (params["conv2_w"].astype(jnp.float32)
          .transpose(0, 2, 3, 1).reshape(C2, 9 * C1))                # col = t*16 + k
    b2 = params["conv2_b"].astype(jnp.float32).reshape(C2, 1)

    # fc1_w is (128, 32*85*3) with input index c*255 + h*3 + w (PyTorch flatten).
    # Re-order rows to the kernel flatten (c, padded hp, padded wp), zero rows
    # at padding positions, store bf16.
    fc1_w = params["fc1_w"].astype(jnp.float32)
    w1b = fc1_w.T.reshape(C2, H, W, FC1_OUT)
    w1b = jnp.pad(w1b, ((0, 0), (1, 1), (1, 1), (0, 0)))             # (32, 87, 5, 128)
    w1b = w1b.reshape(C2 * QP, FC1_OUT).astype(jnp.bfloat16)         # (13920, 128)

    fb1 = params["fc1_b"].astype(jnp.float32).reshape(1, FC1_OUT)
    fw2 = params["fc2_w"].astype(jnp.float32).reshape(1, FC1_OUT)
    fb2 = params["fc2_b"].astype(jnp.float32).reshape(1, 1)
    return dict(w1=w1, b1=b1, w2=w2, b2=b2, w1b=w1b, fb1=fb1, fw2=fw2, fb2=fb2)


# ---------------------------------------------------------------------------
# Forward wrapper: tiny input prep + a single fused pallas_call.
# ---------------------------------------------------------------------------
@jax.jit
def mycnn_forward(x, kp):
    n_images = x.shape[0]
    assert x.shape[1:] == (1, H, W), x.shape
    L = n_images * QP

    # Zero-pad spatial and flatten to the (1, L) padded layout; extend by EXT
    # zero lanes on each side so all 9 tap shifts are in-bounds static slices.
    xp = jnp.pad(x[:, 0].astype(jnp.float32), ((0, 0), (1, 1), (1, 1)))   # (N,87,5)
    x_ext = jnp.pad(xp.reshape(1, L), ((0, 0), (EXT, EXT)))               # (1, L+12)

    # Interior mask (1 at real pixels, 0 at padding positions) in the same layout.
    m = jnp.zeros((HP, WP), jnp.float32).at[1:1 + H, 1:1 + W].set(1.0)
    mask = jnp.tile(m.reshape(1, QP), (1, n_images))                      # (1, L)

    kernel = functools.partial(_mycnn_kernel, n_images=n_images)
    vm = pl.BlockSpec(memory_space=pltpu.MemorySpace.VMEM)

    return pl.pallas_call(
        kernel,
        out_shape=jax.ShapeDtypeStruct((n_images, 1), jnp.float32),
        in_specs=[vm, vm, vm, vm, vm, vm,
                  pl.BlockSpec(memory_space=pl.ANY),   # fc1 weight stays in HBM
                  vm, vm, vm],
        out_specs=vm,
        scratch_shapes=[
            pltpu.VMEM((C1, L + 2 * EXT), jnp.float32),    # conv1 output (extended)
            pltpu.VMEM((C2, L), jnp.float32),              # conv2 output
            pltpu.VMEM((n_images, C2 * QP), jnp.float32),  # flattened fc1 input
            pltpu.VMEM((C2 * QP, FC1_OUT), jnp.bfloat16),  # fc1 weight landing buffer
            pltpu.SemaphoreType.DMA,                       # fc1 weight DMA semaphore
        ],
    )(x_ext, mask, kp["w1"], kp["b1"], kp["w2"], kp["b2"],
      kp["w1b"], kp["fb1"], kp["fw2"], kp["fb2"])


# ---------------------------------------------------------------------------
# Pure-JAX reference (PyTorch semantics, eval mode) for a sanity check.
# ---------------------------------------------------------------------------
def mycnn_reference(x, params):
    dn = ("NCHW", "OIHW", "NCHW")
    y = lax.conv_general_dilated(x, params["conv1_w"], (1, 1),
                                 ((1, 1), (1, 1)), dimension_numbers=dn)
    y = jnp.maximum(y + params["conv1_b"][None, :, None, None], 0.0)
    y = lax.conv_general_dilated(y, params["conv2_w"], (1, 1),
                                 ((1, 1), (1, 1)), dimension_numbers=dn)
    y = jnp.maximum(y + params["conv2_b"][None, :, None, None], 0.0)
    y = y.reshape(y.shape[0], -1)                      # NCHW flatten = x.view(-1, 8160)
    y = jnp.maximum(y @ params["fc1_w"].T + params["fc1_b"], 0.0)
    return y @ params["fc2_w"].T + params["fc2_b"]


def init_params(key):
    ks = jax.random.split(key, 8)
    s = 0.05
    return {
        "conv1_w": s * jax.random.normal(ks[0], (C1, 1, 3, 3), jnp.float32),
        "conv1_b": s * jax.random.normal(ks[1], (C1,), jnp.float32),
        "conv2_w": s * jax.random.normal(ks[2], (C2, C1, 3, 3), jnp.float32),
        "conv2_b": s * jax.random.normal(ks[3], (C2,), jnp.float32),
        "fc1_w": s * jax.random.normal(ks[4], (FC1_OUT, H * W * C2), jnp.float32),
        "fc1_b": s * jax.random.normal(ks[5], (FC1_OUT,), jnp.float32),
        "fc2_w": s * jax.random.normal(ks[6], (1, FC1_OUT), jnp.float32),
        "fc2_b": s * jax.random.normal(ks[7], (1,), jnp.float32),
    }


if __name__ == "__main__":
    key = jax.random.PRNGKey(0)
    pkey, xkey = jax.random.split(key)
    params = init_params(pkey)
    kp = prepare_params(params)                       # one-time weight repack

    # Input shape implied by the flatten 85*3*32: (N, 1, 85, 3), batch=2.
    x = jax.random.normal(xkey, (2, 1, H, W), jnp.float32)

    out = mycnn_forward(x, kp)
    out = jax.block_until_ready(out)
    assert out.shape == (2, 1), out.shape

    # Loose-tolerance check vs a pure-JAX reference (fc1 runs in bf16 on the MXU).
    ref = mycnn_reference(x, params)
    assert jnp.allclose(out, ref, rtol=2e-2, atol=2e-2), (out, ref)

    print("KERNEL_OK")
</pallas_src>

<mosaic_0001>
module attributes {stable_mosaic.version = 11 : i64} {
  func.func @_mycnn_kernel(%arg0: memref<1x882xf32, #tpu.memory_space<vmem>>, %arg1: memref<1x870xf32, #tpu.memory_space<vmem>>, %arg2: memref<16x9xf32, #tpu.memory_space<vmem>>, %arg3: memref<16x1xf32, #tpu.memory_space<vmem>>, %arg4: memref<32x144xf32, #tpu.memory_space<vmem>>, %arg5: memref<32x1xf32, #tpu.memory_space<vmem>>, %arg6: memref<13920x128xbf16, #tpu.memory_space<any>>, %arg7: memref<1x128xf32, #tpu.memory_space<vmem>>, %arg8: memref<1x128xf32, #tpu.memory_space<vmem>>, %arg9: memref<1x1xf32, #tpu.memory_space<vmem>>, %arg10: memref<2x1xf32, #tpu.memory_space<vmem>>, %arg11: memref<16x882xf32, #tpu.memory_space<vmem>>, %arg12: memref<32x870xf32, #tpu.memory_space<vmem>>, %arg13: memref<2x13920xf32, #tpu.memory_space<vmem>>, %arg14: memref<13920x128xbf16, #tpu.memory_space<vmem>>, %arg15: memref<!tpu.dma_semaphore, #tpu.memory_space<semaphore_mem>>) attributes {dimension_semantics = [], scalar_prefetch = 0 : i64, scratch_operands = 5 : i64, tpu.core_type = #tpu.core_type<tc>} {
    tpu.enqueue_dma source(%arg6 : memref<13920x128xbf16, #tpu.memory_space<any>>) target(%arg14 : memref<13920x128xbf16, #tpu.memory_space<vmem>>) target_semaphore(%arg15 : memref<!tpu.dma_semaphore, #tpu.memory_space<semaphore_mem>>)
    %c0 = arith.constant 0 : index
    %c0_0 = arith.constant 0 : index
    %0 = vector.load %arg1[%c0, %c0_0] : memref<1x870xf32, #tpu.memory_space<vmem>>, vector<1x870xf32>
    %c0_1 = arith.constant 0 : index
    %c0_2 = arith.constant 0 : index
    %1 = vector.load %arg3[%c0_1, %c0_2] : memref<16x1xf32, #tpu.memory_space<vmem>>, vector<16x1xf32>
    %2 = vector.shape_cast %1 : vector<16x1xf32> to vector<16x1xf32>
    %3 = vector.broadcast %2 : vector<16x1xf32> to vector<16x870xf32>
    %c0_3 = arith.constant 0 : index
    %c0_4 = arith.constant 0 : index
    %4 = vector.load %arg0[%c0_3, %c0_4] : memref<1x882xf32, #tpu.memory_space<vmem>>, vector<1x870xf32>
    %c0_5 = arith.constant 0 : index
    %c0_6 = arith.constant 0 : index
    %5 = vector.load %arg2[%c0_5, %c0_6] : memref<16x9xf32, #tpu.memory_space<vmem>>, vector<16x1xf32>
    %6 = vector.broadcast %5 : vector<16x1xf32> to vector<16x870xf32>
    %7 = vector.broadcast %4 : vector<1x870xf32> to vector<16x870xf32>
    %8 = arith.mulf %6, %7 : vector<16x870xf32>
    %9 = arith.addf %3, %8 : vector<16x870xf32>
    %c0_7 = arith.constant 0 : index
    %c1 = arith.constant 1 : index
    %10 = vector.load %arg0[%c0_7, %c1] : memref<1x882xf32, #tpu.memory_space<vmem>>, vector<1x870xf32>
    %c0_8 = arith.constant 0 : index
    %c1_9 = arith.constant 1 : index
    %11 = vector.load %arg2[%c0_8, %c1_9] : memref<16x9xf32, #tpu.memory_space<vmem>>, vector<16x1xf32>
    %12 = vector.broadcast %11 : vector<16x1xf32> to vector<16x870xf32>
    %13 = vector.broadcast %10 : vector<1x870xf32> to vector<16x870xf32>
    %14 = arith.mulf %12, %13 : vector<16x870xf32>
    %15 = arith.addf %9, %14 : vector<16x870xf32>
    %c0_10 = arith.constant 0 : index
    %c2 = arith.constant 2 : index
    %16 = vector.load %arg0[%c0_10, %c2] : memref<1x882xf32, #tpu.memory_space<vmem>>, vector<1x870xf32>
    %c0_11 = arith.constant 0 : index
    %c2_12 = arith.constant 2 : index
    %17 = vector.load %arg2[%c0_11, %c2_12] : memref<16x9xf32, #tpu.memory_space<vmem>>, vector<16x1xf32>
    %18 = vector.broadcast %17 : vector<16x1xf32> to vector<16x870xf32>
    %19 = vector.broadcast %16 : vector<1x870xf32> to vector<16x870xf32>
    %20 = arith.mulf %18, %19 : vector<16x870xf32>
    %21 = arith.addf %15, %20 : vector<16x870xf32>
    %c0_13 = arith.constant 0 : index
    %c5 = arith.constant 5 : index
    %22 = vector.load %arg0[%c0_13, %c5] : memref<1x882xf32, #tpu.memory_space<vmem>>, vector<1x870xf32>
    %c0_14 = arith.constant 0 : index
    %c3 = arith.constant 3 : index
    %23 = vector.load %arg2[%c0_14, %c3] : memref<16x9xf32, #tpu.memory_space<vmem>>, vector<16x1xf32>
    %24 = vector.broadcast %23 : vector<16x1xf32> to vector<16x870xf32>
    %25 = vector.broadcast %22 : vector<1x870xf32> to vector<16x870xf32>
    %26 = arith.mulf %24, %25 : vector<16x870xf32>
    %27 = arith.addf %21, %26 : vector<16x870xf32>
    %c0_15 = arith.constant 0 : index
    %c6 = arith.constant 6 : index
    %28 = vector.load %arg0[%c0_15, %c6] : memref<1x882xf32, #tpu.memory_space<vmem>>, vector<1x870xf32>
    %c0_16 = arith.constant 0 : index
    %c4 = arith.constant 4 : index
    %29 = vector.load %arg2[%c0_16, %c4] : memref<16x9xf32, #tpu.memory_space<vmem>>, vector<16x1xf32>
    %30 = vector.broadcast %29 : vector<16x1xf32> to vector<16x870xf32>
    %31 = vector.broadcast %28 : vector<1x870xf32> to vector<16x870xf32>
    %32 = arith.mulf %30, %31 : vector<16x870xf32>
    %33 = arith.addf %27, %32 : vector<16x870xf32>
    %c0_17 = arith.constant 0 : index
    %c7 = arith.constant 7 : index
    %34 = vector.load %arg0[%c0_17, %c7] : memref<1x882xf32, #tpu.memory_space<vmem>>, vector<1x870xf32>
    %c0_18 = arith.constant 0 : index
    %c5_19 = arith.constant 5 : index
    %35 = vector.load %arg2[%c0_18, %c5_19] : memref<16x9xf32, #tpu.memory_space<vmem>>, vector<16x1xf32>
    %36 = vector.broadcast %35 : vector<16x1xf32> to vector<16x870xf32>
    %37 = vector.broadcast %34 : vector<1x870xf32> to vector<16x870xf32>
    %38 = arith.mulf %36, %37 : vector<16x870xf32>
    %39 = arith.addf %33, %38 : vector<16x870xf32>
    %c0_20 = arith.constant 0 : index
    %c10 = arith.constant 10 : index
    %40 = vector.load %arg0[%c0_20, %c10] : memref<1x882xf32, #tpu.memory_space<vmem>>, vector<1x870xf32>
    %c0_21 = arith.constant 0 : index
    %c6_22 = arith.constant 6 : index
    %41 = vector.load %arg2[%c0_21, %c6_22] : memref<16x9xf32, #tpu.memory_space<vmem>>, vector<16x1xf32>
    %42 = vector.broadcast %41 : vector<16x1xf32> to vector<16x870xf32>
    %43 = vector.broadcast %40 : vector<1x870xf32> to vector<16x870xf32>
    %44 = arith.mulf %42, %43 : vector<16x870xf32>
    %45 = arith.addf %39, %44 : vector<16x870xf32>
    %c0_23 = arith.constant 0 : index
    %c11 = arith.constant 11 : index
    %46 = vector.load %arg0[%c0_23, %c11] : memref<1x882xf32, #tpu.memory_space<vmem>>, vector<1x870xf32>
    %c0_24 = arith.constant 0 : index
    %c7_25 = arith.constant 7 : index
    %47 = vector.load %arg2[%c0_24, %c7_25] : memref<16x9xf32, #tpu.memory_space<vmem>>, vector<16x1xf32>
    %48 = vector.broadcast %47 : vector<16x1xf32> to vector<16x870xf32>
    %49 = vector.broadcast %46 : vector<1x870xf32> to vector<16x870xf32>
    %50 = arith.mulf %48, %49 : vector<16x870xf32>
    %51 = arith.addf %45, %50 : vector<16x870xf32>
    %c0_26 = arith.constant 0 : index
    %c12 = arith.constant 12 : index
    %52 = vector.load %arg0[%c0_26, %c12] : memref<1x882xf32, #tpu.memory_space<vmem>>, vector<1x870xf32>
    %c0_27 = arith.constant 0 : index
    %c8 = arith.constant 8 : index
    %53 = vector.load %arg2[%c0_27, %c8] : memref<16x9xf32, #tpu.memory_space<vmem>>, vector<16x1xf32>
    %54 = vector.broadcast %53 : vector<16x1xf32> to vector<16x870xf32>
    %55 = vector.broadcast %52 : vector<1x870xf32> to vector<16x870xf32>
    %56 = arith.mulf %54, %55 : vector<16x870xf32>
    %57 = arith.addf %51, %56 : vector<16x870xf32>
    %cst = arith.constant 0.000000e+00 : f32
    %58 = vector.broadcast %cst : f32 to vector<16x870xf32>
    %59 = arith.maximumf %57, %58 : vector<16x870xf32>
    %60 = vector.broadcast %0 : vector<1x870xf32> to vector<16x870xf32>
    %61 = arith.mulf %59, %60 : vector<16x870xf32>
    %cst_28 = arith.constant 0.000000e+00 : f32
    %62 = vector.broadcast %cst_28 : f32 to vector<16x882xf32>
    %c0_29 = arith.constant 0 : index
    %c0_30 = arith.constant 0 : index
    %63 = vector.load %arg11[%c0_29, %c0_30] : memref<16x882xf32, #tpu.memory_space<vmem>>, vector<16x882xf32>
    tpu.vector_store %arg11[%c0_29, %c0_30], %62 {strides = array<i32>} : memref<16x882xf32, #tpu.memory_space<vmem>>, vector<16x882xf32>,
    %c0_31 = arith.constant 0 : index
    %c6_32 = arith.constant 6 : index
    %64 = vector.load %arg11[%c0_31, %c6_32] : memref<16x882xf32, #tpu.memory_space<vmem>>, vector<16x870xf32>
    tpu.vector_store %arg11[%c0_31, %c6_32], %61 {strides = array<i32>} : memref<16x882xf32, #tpu.memory_space<vmem>>, vector<16x870xf32>,
    %c0_33 = arith.constant 0 : index
    %c0_34 = arith.constant 0 : index
    %65 = vector.load %arg5[%c0_33, %c0_34] : memref<32x1xf32, #tpu.memory_space<vmem>>, vector<32x1xf32>
    %66 = vector.shape_cast %65 : vector<32x1xf32> to vector<32x1xf32>
    %67 = vector.broadcast %66 : vector<32x1xf32> to vector<32x870xf32>
    %c0_35 = arith.constant 0 : index
    %c0_36 = arith.constant 0 : index
    %68 = vector.load %arg11[%c0_35, %c0_36] : memref<16x882xf32, #tpu.memory_space<vmem>>, vector<16x870xf32>
    %c0_37 = arith.constant 0 : index
    %c0_38 = arith.constant 0 : index
    %69 = vector.load %arg4[%c0_37, %c0_38] : memref<32x144xf32, #tpu.memory_space<vmem>>, vector<32x16xf32>
    %cst_39 = arith.constant dense<0.000000e+00> : vector<32x870xf32>
    %70 = tpu.matmul %69, %68, %cst_39 {dimension_numbers = #tpu.dot_dimension_numbers<[1], [0], [0], [1], [0, 0, 1, 1], [], []>} : vector<32x16xf32>, vector<16x870xf32>, vector<32x870xf32> -> vector<32x870xf32>
    %71 = arith.addf %67, %70 : vector<32x870xf32>
    %c0_40 = arith.constant 0 : index
    %c1_41 = arith.constant 1 : index
    %72 = vector.load %arg11[%c0_40, %c1_41] : memref<16x882xf32, #tpu.memory_space<vmem>>, vector<16x870xf32>
    %c0_42 = arith.constant 0 : index
    %c16 = arith.constant 16 : index
    %73 = vector.load %arg4[%c0_42, %c16] : memref<32x144xf32, #tpu.memory_space<vmem>>, vector<32x16xf32>
    %cst_43 = arith.constant dense<0.000000e+00> : vector<32x870xf32>
    %74 = tpu.matmul %73, %72, %cst_43 {dimension_numbers = #tpu.dot_dimension_numbers<[1], [0], [0], [1], [0, 0, 1, 1], [], []>} : vector<32x16xf32>, vector<16x870xf32>, vector<32x870xf32> -> vector<32x870xf32>
    %75 = arith.addf %71, %74 : vector<32x870xf32>
    %c0_44 = arith.constant 0 : index
    %c2_45 = arith.constant 2 : index
    %76 = vector.load %arg11[%c0_44, %c2_45] : memref<16x882xf32, #tpu.memory_space<vmem>>, vector<16x870xf32>
    %c0_46 = arith.constant 0 : index
    %c32 = arith.constant 32 : index
    %77 = vector.load %arg4[%c0_46, %c32] : memref<32x144xf32, #tpu.memory_space<vmem>>, vector<32x16xf32>
    %cst_47 = arith.constant dense<0.000000e+00> : vector<32x870xf32>
    %78 = tpu.matmul %77, %76, %cst_47 {dimension_numbers = #tpu.dot_dimension_numbers<[1], [0], [0], [1], [0, 0, 1, 1], [], []>} : vector<32x16xf32>, vector<16x870xf32>, vector<32x870xf32> -> vector<32x870xf32>
    %79 = arith.addf %75, %78 : vector<32x870xf32>
    %c0_48 = arith.constant 0 : index
    %c5_49 = arith.constant 5 : index
    %80 = vector.load %arg11[%c0_48, %c5_49] : memref<16x882xf32, #tpu.memory_space<vmem>>, vector<16x870xf32>
    %c0_50 = arith.constant 0 : index
    %c48 = arith.constant 48 : index
    %81 = vector.load %arg4[%c0_50, %c48] : memref<32x144xf32, #tpu.memory_space<vmem>>, vector<32x16xf32>
    %cst_51 = arith.constant dense<0.000000e+00> : vector<32x870xf32>
    %82 = tpu.matmul %81, %80, %cst_51 {dimension_numbers = #tpu.dot_dimension_numbers<[1], [0], [0], [1], [0, 0, 1, 1], [], []>} : vector<32x16xf32>, vector<16x870xf32>, vector<32x870xf32> -> vector<32x870xf32>
    %83 = arith.addf %79, %82 : vector<32x870xf32>
    %c0_52 = arith.constant 0 : index
    %c6_53 = arith.constant 6 : index
    %84 = vector.load %arg11[%c0_52, %c6_53] : memref<16x882xf32, #tpu.memory_space<vmem>>, vector<16x870xf32>
    %c0_54 = arith.constant 0 : index
    %c64 = arith.constant 64 : index
    %85 = vector.load %arg4[%c0_54, %c64] : memref<32x144xf32, #tpu.memory_space<vmem>>, vector<32x16xf32>
    %cst_55 = arith.constant dense<0.000000e+00> : vector<32x870xf32>
    %86 = tpu.matmul %85, %84, %cst_55 {dimension_numbers = #tpu.dot_dimension_numbers<[1], [0], [0], [1], [0, 0, 1, 1], [], []>} : vector<32x16xf32>, vector<16x870xf32>, vector<32x870xf32> -> vector<32x870xf32>
    %87 = arith.addf %83, %86 : vector<32x870xf32>
    %c0_56 = arith.constant 0 : index
    %c7_57 = arith.constant 7 : index
    %88 = vector.load %arg11[%c0_56, %c7_57] : memref<16x882xf32, #tpu.memory_space<vmem>>, vector<16x870xf32>
    %c0_58 = arith.constant 0 : index
    %c80 = arith.constant 80 : index
    %89 = vector.load %arg4[%c0_58, %c80] : memref<32x144xf32, #tpu.memory_space<vmem>>, vector<32x16xf32>
    %cst_59 = arith.constant dense<0.000000e+00> : vector<32x870xf32>
    %90 = tpu.matmul %89, %88, %cst_59 {dimension_numbers = #tpu.dot_dimension_numbers<[1], [0], [0], [1], [0, 0, 1, 1], [], []>} : vector<32x16xf32>, vector<16x870xf32>, vector<32x870xf32> -> vector<32x870xf32>
    %91 = arith.addf %87, %90 : vector<32x870xf32>
    %c0_60 = arith.constant 0 : index
    %c10_61 = arith.constant 10 : index
    %92 = vector.load %arg11[%c0_60, %c10_61] : memref<16x882xf32, #tpu.memory_space<vmem>>, vector<16x870xf32>
    %c0_62 = arith.constant 0 : index
    %c96 = arith.constant 96 : index
    %93 = vector.load %arg4[%c0_62, %c96] : memref<32x144xf32, #tpu.memory_space<vmem>>, vector<32x16xf32>
    %cst_63 = arith.constant dense<0.000000e+00> : vector<32x870xf32>
    %94 = tpu.matmul %93, %92, %cst_63 {dimension_numbers = #tpu.dot_dimension_numbers<[1], [0], [0], [1], [0, 0, 1, 1], [], []>} : vector<32x16xf32>, vector<16x870xf32>, vector<32x870xf32> -> vector<32x870xf32>
    %95 = arith.addf %91, %94 : vector<32x870xf32>
    %c0_64 = arith.constant 0 : index
    %c11_65 = arith.constant 11 : index
    %96 = vector.load %arg11[%c0_64, %c11_65] : memref<16x882xf32, #tpu.memory_space<vmem>>, vector<16x870xf32>
    %c0_66 = arith.constant 0 : index
    %c112 = arith.constant 112 : index
    %97 = vector.load %arg4[%c0_66, %c112] : memref<32x144xf32, #tpu.memory_space<vmem>>, vector<32x16xf32>
    %cst_67 = arith.constant dense<0.000000e+00> : vector<32x870xf32>
    %98 = tpu.matmul %97, %96, %cst_67 {dimension_numbers = #tpu.dot_dimension_numbers<[1], [0], [0], [1], [0, 0, 1, 1], [], []>} : vector<32x16xf32>, vector<16x870xf32>, vector<32x870xf32> -> vector<32x870xf32>
    %99 = arith.addf %95, %98 : vector<32x870xf32>
    %c0_68 = arith.constant 0 : index
    %c12_69 = arith.constant 12 : index
    %100 = vector.load %arg11[%c0_68, %c12_69] : memref<16x882xf32, #tpu.memory_space<vmem>>, vector<16x870xf32>
    %c0_70 = arith.constant 0 : index
    %c128 = arith.constant 128 : index
    %101 = vector.load %arg4[%c0_70, %c128] : memref<32x144xf32, #tpu.memory_space<vmem>>, vector<32x16xf32>
    %cst_71 = arith.constant dense<0.000000e+00> : vector<32x870xf32>
    %102 = tpu.matmul %101, %100, %cst_71 {dimension_numbers = #tpu.dot_dimension_numbers<[1], [0], [0], [1], [0, 0, 1, 1], [], []>} : vector<32x16xf32>, vector<16x870xf32>, vector<32x870xf32> -> vector<32x870xf32>
    %103 = arith.addf %99, %102 : vector<32x870xf32>
    %cst_72 = arith.constant 0.000000e+00 : f32
    %104 = vector.broadcast %cst_72 : f32 to vector<32x870xf32>
    %105 = arith.maximumf %103, %104 : vector<32x870xf32>
    %c0_73 = arith.constant 0 : index
    %c0_74 = arith.constant 0 : index
    %106 = vector.load %arg12[%c0_73, %c0_74] : memref<32x870xf32, #tpu.memory_space<vmem>>, vector<32x870xf32>
    tpu.vector_store %arg12[%c0_73, %c0_74], %105 {strides = array<i32>} : memref<32x870xf32, #tpu.memory_space<vmem>>, vector<32x870xf32>,
    %c0_75 = arith.constant 0 : index
    %c0_76 = arith.constant 0 : index
    %107 = vector.load %arg12[%c0_75, %c0_76] : memref<32x870xf32, #tpu.memory_space<vmem>>, vector<1x435xf32>
    %c0_77 = arith.constant 0 : index
    %c0_78 = arith.constant 0 : index
    %108 = vector.load %arg13[%c0_77, %c0_78] : memref<2x13920xf32, #tpu.memory_space<vmem>>, vector<1x435xf32>
    tpu.vector_store %arg13[%c0_77, %c0_78], %107 {strides = array<i32>} : memref<2x13920xf32, #tpu.memory_space<vmem>>, vector<1x435xf32>,
    %c0_79 = arith.constant 0 : index
    %c435 = arith.constant 435 : index
    %109 = vector.load %arg12[%c0_79, %c435] : memref<32x870xf32, #tpu.memory_space<vmem>>, vector<1x435xf32>
    %c1_80 = arith.constant 1 : index
    %c0_81 = arith.constant 0 : index
    %110 = vector.load %arg13[%c1_80, %c0_81] : memref<2x13920xf32, #tpu.memory_space<vmem>>, vector<1x435xf32>
    tpu.vector_store %arg13[%c1_80, %c0_81], %109 {strides = array<i32>} : memref<2x13920xf32, #tpu.memory_space<vmem>>, vector<1x435xf32>,
    %c1_82 = arith.constant 1 : index
    %c0_83 = arith.constant 0 : index
    %111 = vector.load %arg12[%c1_82, %c0_83] : memref<32x870xf32, #tpu.memory_space<vmem>>, vector<1x435xf32>
    %c0_84 = arith.constant 0 : index
    %c435_85 = arith.constant 435 : index
    %112 = vector.load %arg13[%c0_84, %c435_85] : memref<2x13920xf32, #tpu.memory_space<vmem>>, vector<1x435xf32>
    tpu.vector_store %arg13[%c0_84, %c435_85], %111 {strides = array<i32>} : memref<2x13920xf32, #tpu.memory_space<vmem>>, vector<1x435xf32>,
    %c1_86 = arith.constant 1 : index
    %c435_87 = arith.constant 435 : index
    %113 = vector.load %arg12[%c1_86, %c435_87] : memref<32x870xf32, #tpu.memory_space<vmem>>, vector<1x435xf32>
    %c1_88 = arith.constant 1 : index
    %c435_89 = arith.constant 435 : index
    %114 = vector.load %arg13[%c1_88, %c435_89] : memref<2x13920xf32, #tpu.memory_space<vmem>>, vector<1x435xf32>
    tpu.vector_store %arg13[%c1_88, %c435_89], %113 {strides = array<i32>} : memref<2x13920xf32, #tpu.memory_space<vmem>>, vector<1x435xf32>,
    %c2_90 = arith.constant 2 : index
    %c0_91 = arith.constant 0 : index
    %115 = vector.load %arg12[%c2_90, %c0_91] : memref<32x870xf32, #tpu.memory_space<vmem>>, vector<1x435xf32>
    %c0_92 = arith.constant 0 : index
    %c870 = arith.constant 870 : index
    %116 = vector.load %arg13[%c0_92, %c870] : memref<2x13920xf32, #tpu.memory_space<vmem>>, vector<1x435xf32>
    tpu.vector_store %arg13[%c0_92, %c870], %115 {strides = array<i32>} : memref<2x13920xf32, #tpu.memory_space<vmem>>, vector<1x435xf32>,
    %c2_93 = arith.constant 2 : index
    %c435_94 = arith.constant 435 : index
    %117 = vector.load %arg12[%c2_93, %c435_94] : memref<32x870xf32, #tpu.memory_space<vmem>>, vector<1x435xf32>
    %c1_95 = arith.constant 1 : index
    %c870_96 = arith.constant 870 : index
    %118 = vector.load %arg13[%c1_95, %c870_96] : memref<2x13920xf32, #tpu.memory_space<vmem>>, vector<1x435xf32>
    tpu.vector_store %arg13[%c1_95, %c870_96], %117 {strides = array<i32>} : memref<2x13920xf32, #tpu.memory_space<vmem>>, vector<1x435xf32>,
    %c3_97 = arith.constant 3 : index
    %c0_98 = arith.constant 0 : index
    %119 = vector.load %arg12[%c3_97, %c0_98] : memref<32x870xf32, #tpu.memory_space<vmem>>, vector<1x435xf32>
    %c0_99 = arith.constant 0 : index
    %c1305 = arith.constant 1305 : index
    %120 = vector.load %arg13[%c0_99, %c1305] : memref<2x13920xf32, #tpu.memory_space<vmem>>, vector<1x435xf32>
    tpu.vector_store %arg13[%c0_99, %c1305], %119 {strides = array<i32>} : memref<2x13920xf32, #tpu.memory_space<vmem>>, vector<1x435xf32>,
    %c3_100 = arith.constant 3 : index
    %c435_101 = arith.constant 435 : index
    %121 = vector.load %arg12[%c3_100, %c435_101] : memref<32x870xf32, #tpu.memory_space<vmem>>, vector<1x435xf32>
    %c1_102 = arith.constant 1 : index
    %c1305_103 = arith.constant 1305 : index
    %122 = vector.load %arg13[%c1_102, %c1305_103] : memref<2x13920xf32, #tpu.memory_space<vmem>>, vector<1x435xf32>
    tpu.vector_store %arg13[%c1_102, %c1305_103], %121 {strides = array<i32>} : memref<2x13920xf32, #tpu.memory_space<vmem>>, vector<1x435xf32>,
    %c4_104 = arith.constant 4 : index
    %c0_105 = arith.constant 0 : index
    %123 = vector.load %arg12[%c4_104, %c0_105] : memref<32x870xf32, #tpu.memory_space<vmem>>, vector<1x435xf32>
    %c0_106 = arith.constant 0 : index
    %c1740 = arith.constant 1740 : index
    %124 = vector.load %arg13[%c0_106, %c1740] : memref<2x13920xf32, #tpu.memory_space<vmem>>, vector<1x435xf32>
    tpu.vector_store %arg13[%c0_106, %c1740], %123 {strides = array<i32>} : memref<2x13920xf32, #tpu.memory_space<vmem>>, vector<1x435xf32>,
    %c4_107 = arith.constant 4 : index
    %c435_108 = arith.constant 435 : index
    %125 = vector.load %arg12[%c4_107, %c435_108] : memref<32x870xf32, #tpu.memory_space<vmem>>, vector<1x435xf32>
    %c1_109 = arith.constant 1 : index
    %c1740_110 = arith.constant 1740 : index
    %126 = vector.load %arg13[%c1_109, %c1740_110] : memref<2x13920xf32, #tpu.memory_space<vmem>>, vector<1x435xf32>
    tpu.vector_store %arg13[%c1_109, %c1740_110], %125 {strides = array<i32>} : memref<2x13920xf32, #tpu.memory_space<vmem>>, vector<1x435xf32>,
    %c5_111 = arith.constant 5 : index
    %c0_112 = arith.constant 0 : index
    %127 = vector.load %arg12[%c5_111, %c0_112] : memref<32x870xf32, #tpu.memory_space<vmem>>, vector<1x435xf32>
    %c0_113 = arith.constant 0 : index
    %c2175 = arith.constant 2175 : index
    %128 = vector.load %arg13[%c0_113, %c2175] : memref<2x13920xf32, #tpu.memory_space<vmem>>, vector<1x435xf32>
    tpu.vector_store %arg13[%c0_113, %c2175], %127 {strides = array<i32>} : memref<2x13920xf32, #tpu.memory_space<vmem>>, vector<1x435xf32>,
    %c5_114 = arith.constant 5 : index
    %c435_115 = arith.constant 435 : index
    %129 = vector.load %arg12[%c5_114, %c435_115] : memref<32x870xf32, #tpu.memory_space<vmem>>, vector<1x435xf32>
    %c1_116 = arith.constant 1 : index
    %c2175_117 = arith.constant 2175 : index
    %130 = vector.load %arg13[%c1_116, %c2175_117] : memref<2x13920xf32, #tpu.memory_space<vmem>>, vector<1x435xf32>
    tpu.vector_store %arg13[%c1_116, %c2175_117], %129 {strides = array<i32>} : memref<2x13920xf32, #tpu.memory_space<vmem>>, vector<1x435xf32>,
    %c6_118 = arith.constant 6 : index
    %c0_119 = arith.constant 0 : index
    %131 = vector.load %arg12[%c6_118, %c0_119] : memref<32x870xf32, #tpu.memory_space<vmem>>, vector<1x435xf32>
    %c0_120 = arith.constant 0 : index
    %c2610 = arith.constant 2610 : index
    %132 = vector.load %arg13[%c0_120, %c2610] : memref<2x13920xf32, #tpu.memory_space<vmem>>, vector<1x435xf32>
    tpu.vector_store %arg13[%c0_120, %c2610], %131 {strides = array<i32>} : memref<2x13920xf32, #tpu.memory_space<vmem>>, vector<1x435xf32>,
    %c6_121 = arith.constant 6 : index
    %c435_122 = arith.constant 435 : index
    %133 = vector.load %arg12[%c6_121, %c435_122] : memref<32x870xf32, #tpu.memory_space<vmem>>, vector<1x435xf32>
    %c1_123 = arith.constant 1 : index
    %c2610_124 = arith.constant 2610 : index
    %134 = vector.load %arg13[%c1_123, %c2610_124] : memref<2x13920xf32, #tpu.memory_space<vmem>>, vector<1x435xf32>
    tpu.vector_store %arg13[%c1_123, %c2610_124], %133 {strides = array<i32>} : memref<2x13920xf32, #tpu.memory_space<vmem>>, vector<1x435xf32>,
    %c7_125 = arith.constant 7 : index
    %c0_126 = arith.constant 0 : index
    %135 = vector.load %arg12[%c7_125, %c0_126] : memref<32x870xf32, #tpu.memory_space<vmem>>, vector<1x435xf32>
    %c0_127 = arith.constant 0 : index
    %c3045 = arith.constant 3045 : index
    %136 = vector.load %arg13[%c0_127, %c3045] : memref<2x13920xf32, #tpu.memory_space<vmem>>, vector<1x435xf32>
    tpu.vector_store %arg13[%c0_127, %c3045], %135 {strides = array<i32>} : memref<2x13920xf32, #tpu.memory_space<vmem>>, vector<1x435xf32>,
    %c7_128 = arith.constant 7 : index
    %c435_129 = arith.constant 435 : index
    %137 = vector.load %arg12[%c7_128, %c435_129] : memref<32x870xf32, #tpu.memory_space<vmem>>, vector<1x435xf32>
    %c1_130 = arith.constant 1 : index
    %c3045_131 = arith.constant 3045 : index
    %138 = vector.load %arg13[%c1_130, %c3045_131] : memref<2x13920xf32, #tpu.memory_space<vmem>>, vector<1x435xf32>
    tpu.vector_store %arg13[%c1_130, %c3045_131], %137 {strides = array<i32>} : memref<2x13920xf32, #tpu.memory_space<vmem>>, vector<1x435xf32>,
    %c8_132 = arith.constant 8 : index
    %c0_133 = arith.constant 0 : index
    %139 = vector.load %arg12[%c8_132, %c0_133] : memref<32x870xf32, #tpu.memory_space<vmem>>, vector<1x435xf32>
    %c0_134 = arith.constant 0 : index
    %c3480 = arith.constant 3480 : index
    %140 = vector.load %arg13[%c0_134, %c3480] : memref<2x13920xf32, #tpu.memory_space<vmem>>, vector<1x435xf32>
    tpu.vector_store %arg13[%c0_134, %c3480], %139 {strides = array<i32>} : memref<2x13920xf32, #tpu.memory_space<vmem>>, vector<1x435xf32>,
    %c8_135 = arith.constant 8 : index
    %c435_136 = arith.constant 435 : index
    %141 = vector.load %arg12[%c8_135, %c435_136] : memref<32x870xf32, #tpu.memory_space<vmem>>, vector<1x435xf32>
    %c1_137 = arith.constant 1 : index
    %c3480_138 = arith.constant 3480 : index
    %142 = vector.load %arg13[%c1_137, %c3480_138] : memref<2x13920xf32, #tpu.memory_space<vmem>>, vector<1x435xf32>
    tpu.vector_store %arg13[%c1_137, %c3480_138], %141 {strides = array<i32>} : memref<2x13920xf32, #tpu.memory_space<vmem>>, vector<1x435xf32>,
    %c9 = arith.constant 9 : index
    %c0_139 = arith.constant 0 : index
    %143 = vector.load %arg12[%c9, %c0_139] : memref<32x870xf32, #tpu.memory_space<vmem>>, vector<1x435xf32>
    %c0_140 = arith.constant 0 : index
    %c3915 = arith.constant 3915 : index
    %144 = vector.load %arg13[%c0_140, %c3915] : memref<2x13920xf32, #tpu.memory_space<vmem>>, vector<1x435xf32>
    tpu.vector_store %arg13[%c0_140, %c3915], %143 {strides = array<i32>} : memref<2x13920xf32, #tpu.memory_space<vmem>>, vector<1x435xf32>,
    %c9_141 = arith.constant 9 : index
    %c435_142 = arith.constant 435 : index
    %145 = vector.load %arg12[%c9_141, %c435_142] : memref<32x870xf32, #tpu.memory_space<vmem>>, vector<1x435xf32>
    %c1_143 = arith.constant 1 : index
    %c3915_144 = arith.constant 3915 : index
    %146 = vector.load %arg13[%c1_143, %c3915_144] : memref<2x13920xf32, #tpu.memory_space<vmem>>, vector<1x435xf32>
    tpu.vector_store %arg13[%c1_143, %c3915_144], %145 {strides = array<i32>} : memref<2x13920xf32, #tpu.memory_space<vmem>>, vector<1x435xf32>,
    %c10_145 = arith.constant 10 : index
    %c0_146 = arith.constant 0 : index
    %147 = vector.load %arg12[%c10_145, %c0_146] : memref<32x870xf32, #tpu.memory_space<vmem>>, vector<1x435xf32>
    %c0_147 = arith.constant 0 : index
    %c4350 = arith.constant 4350 : index
    %148 = vector.load %arg13[%c0_147, %c4350] : memref<2x13920xf32, #tpu.memory_space<vmem>>, vector<1x435xf32>
    tpu.vector_store %arg13[%c0_147, %c4350], %147 {strides = array<i32>} : memref<2x13920xf32, #tpu.memory_space<vmem>>, vector<1x435xf32>,
    %c10_148 = arith.constant 10 : index
    %c435_149 = arith.constant 435 : index
    %149 = vector.load %arg12[%c10_148, %c435_149] : memref<32x870xf32, #tpu.memory_space<vmem>>, vector<1x435xf32>
    %c1_150 = arith.constant 1 : index
    %c4350_151 = arith.constant 4350 : index
    %150 = vector.load %arg13[%c1_150, %c4350_151] : memref<2x13920xf32, #tpu.memory_space<vmem>>, vector<1x435xf32>
    tpu.vector_store %arg13[%c1_150, %c4350_151], %149 {strides = array<i32>} : memref<2x13920xf32, #tpu.memory_space<vmem>>, vector<1x435xf32>,
    %c11_152 = arith.constant 11 : index
    %c0_153 = arith.constant 0 : index
    %151 = vector.load %arg12[%c11_152, %c0_153] : memref<32x870xf32, #tpu.memory_space<vmem>>, vector<1x435xf32>
    %c0_154 = arith.constant 0 : index
    %c4785 = arith.constant 4785 : index
    %152 = vector.load %arg13[%c0_154, %c4785] : memref<2x13920xf32, #tpu.memory_space<vmem>>, vector<1x435xf32>
    tpu.vector_store %arg13[%c0_154, %c4785], %151 {strides = array<i32>} : memref<2x13920xf32, #tpu.memory_space<vmem>>, vector<1x435xf32>,
    %c11_155 = arith.constant 11 : index
    %c435_156 = arith.constant 435 : index
    %153 = vector.load %arg12[%c11_155, %c435_156] : memref<32x870xf32, #tpu.memory_space<vmem>>, vector<1x435xf32>
    %c1_157 = arith.constant 1 : index
    %c4785_158 = arith.constant 4785 : index
    %154 = vector.load %arg13[%c1_157, %c4785_158] : memref<2x13920xf32, #tpu.memory_space<vmem>>, vector<1x435xf32>
    tpu.vector_store %arg13[%c1_157, %c4785_158], %153 {strides = array<i32>} : memref<2x13920xf32, #tpu.memory_space<vmem>>, vector<1x435xf32>,
    %c12_159 = arith.constant 12 : index
    %c0_160 = arith.constant 0 : index
    %155 = vector.load %arg12[%c12_159, %c0_160] : memref<32x870xf32, #tpu.memory_space<vmem>>, vector<1x435xf32>
    %c0_161 = arith.constant 0 : index
    %c5220 = arith.constant 5220 : index
    %156 = vector.load %arg13[%c0_161, %c5220] : memref<2x13920xf32, #tpu.memory_space<vmem>>, vector<1x435xf32>
    tpu.vector_store %arg13[%c0_161, %c5220], %155 {strides = array<i32>} : memref<2x13920xf32, #tpu.memory_space<vmem>>, vector<1x435xf32>,
    %c12_162 = arith.constant 12 : index
    %c435_163 = arith.constant 435 : index
    %157 = vector.load %arg12[%c12_162, %c435_163] : memref<32x870xf32, #tpu.memory_space<vmem>>, vector<1x435xf32>
    %c1_164 = arith.constant 1 : index
    %c5220_165 = arith.constant 5220 : index
    %158 = vector.load %arg13[%c1_164, %c5220_165] : memref<2x13920xf32, #tpu.memory_space<vmem>>, vector<1x435xf32>
    tpu.vector_store %arg13[%c1_164, %c5220_165], %157 {strides = array<i32>} : memref<2x13920xf32, #tpu.memory_space<vmem>>, vector<1x435xf32>,
    %c13 = arith.constant 13 : index
    %c0_166 = arith.constant 0 : index
    %159 = vector.load %arg12[%c13, %c0_166] : memref<32x870xf32, #tpu.memory_space<vmem>>, vector<1x435xf32>
    %c0_167 = arith.constant 0 : index
    %c5655 = arith.constant 5655 : index
    %160 = vector.load %arg13[%c0_167, %c5655] : memref<2x13920xf32, #tpu.memory_space<vmem>>, vector<1x435xf32>
    tpu.vector_store %arg13[%c0_167, %c5655], %159 {strides = array<i32>} : memref<2x13920xf32, #tpu.memory_space<vmem>>, vector<1x435xf32>,
    %c13_168 = arith.constant 13 : index
    %c435_169 = arith.constant 435 : index
    %161 = vector.load %arg12[%c13_168, %c435_169] : memref<32x870xf32, #tpu.memory_space<vmem>>, vector<1x435xf32>
    %c1_170 = arith.constant 1 : index
    %c5655_171 = arith.constant 5655 : index
    %162 = vector.load %arg13[%c1_170, %c5655_171] : memref<2x13920xf32, #tpu.memory_space<vmem>>, vector<1x435xf32>
    tpu.vector_store %arg13[%c1_170, %c5655_171], %161 {strides = array<i32>} : memref<2x13920xf32, #tpu.memory_space<vmem>>, vector<1x435xf32>,
    %c14 = arith.constant 14 : index
    %c0_172 = arith.constant 0 : index
    %163 = vector.load %arg12[%c14, %c0_172] : memref<32x870xf32, #tpu.memory_space<vmem>>, vector<1x435xf32>
    %c0_173 = arith.constant 0 : index
    %c6090 = arith.constant 6090 : index
    %164 = vector.load %arg13[%c0_173, %c6090] : memref<2x13920xf32, #tpu.memory_space<vmem>>, vector<1x435xf32>
    tpu.vector_store %arg13[%c0_173, %c6090], %163 {strides = array<i32>} : memref<2x13920xf32, #tpu.memory_space<vmem>>, vector<1x435xf32>,
    %c14_174 = arith.constant 14 : index
    %c435_175 = arith.constant 435 : index
    %165 = vector.load %arg12[%c14_174, %c435_175] : memref<32x870xf32, #tpu.memory_space<vmem>>, vector<1x435xf32>
    %c1_176 = arith.constant 1 : index
    %c6090_177 = arith.constant 6090 : index
    %166 = vector.load %arg13[%c1_176, %c6090_177] : memref<2x13920xf32, #tpu.memory_space<vmem>>, vector<1x435xf32>
    tpu.vector_store %arg13[%c1_176, %c6090_177], %165 {strides = array<i32>} : memref<2x13920xf32, #tpu.memory_space<vmem>>, vector<1x435xf32>,
    %c15 = arith.constant 15 : index
    %c0_178 = arith.constant 0 : index
    %167 = vector.load %arg12[%c15, %c0_178] : memref<32x870xf32, #tpu.memory_space<vmem>>, vector<1x435xf32>
    %c0_179 = arith.constant 0 : index
    %c6525 = arith.constant 6525 : index
    %168 = vector.load %arg13[%c0_179, %c6525] : memref<2x13920xf32, #tpu.memory_space<vmem>>, vector<1x435xf32>
    tpu.vector_store %arg13[%c0_179, %c6525], %167 {strides = array<i32>} : memref<2x13920xf32, #tpu.memory_space<vmem>>, vector<1x435xf32>,
    %c15_180 = arith.constant 15 : index
    %c435_181 = arith.constant 435 : index
    %169 = vector.load %arg12[%c15_180, %c435_181] : memref<32x870xf32, #tpu.memory_space<vmem>>, vector<1x435xf32>
    %c1_182 = arith.constant 1 : index
    %c6525_183 = arith.constant 6525 : index
    %170 = vector.load %arg13[%c1_182, %c6525_183] : memref<2x13920xf32, #tpu.memory_space<vmem>>, vector<1x435xf32>
    tpu.vector_store %arg13[%c1_182, %c6525_183], %169 {strides = array<i32>} : memref<2x13920xf32, #tpu.memory_space<vmem>>, vector<1x435xf32>,
    %c16_184 = arith.constant 16 : index
    %c0_185 = arith.constant 0 : index
    %171 = vector.load %arg12[%c16_184, %c0_185] : memref<32x870xf32, #tpu.memory_space<vmem>>, vector<1x435xf32>
    %c0_186 = arith.constant 0 : index
    %c6960 = arith.constant 6960 : index
    %172 = vector.load %arg13[%c0_186, %c6960] : memref<2x13920xf32, #tpu.memory_space<vmem>>, vector<1x435xf32>
    tpu.vector_store %arg13[%c0_186, %c6960], %171 {strides = array<i32>} : memref<2x13920xf32, #tpu.memory_space<vmem>>, vector<1x435xf32>,
    %c16_187 = arith.constant 16 : index
    %c435_188 = arith.constant 435 : index
    %173 = vector.load %arg12[%c16_187, %c435_188] : memref<32x870xf32, #tpu.memory_space<vmem>>, vector<1x435xf32>
    %c1_189 = arith.constant 1 : index
    %c6960_190 = arith.constant 6960 : index
    %174 = vector.load %arg13[%c1_189, %c6960_190] : memref<2x13920xf32, #tpu.memory_space<vmem>>, vector<1x435xf32>
    tpu.vector_store %arg13[%c1_189, %c6960_190], %173 {strides = array<i32>} : memref<2x13920xf32, #tpu.memory_space<vmem>>, vector<1x435xf32>,
    %c17 = arith.constant 17 : index
    %c0_191 = arith.constant 0 : index
    %175 = vector.load %arg12[%c17, %c0_191] : memref<32x870xf32, #tpu.memory_space<vmem>>, vector<1x435xf32>
    %c0_192 = arith.constant 0 : index
    %c7395 = arith.constant 7395 : index
    %176 = vector.load %arg13[%c0_192, %c7395] : memref<2x13920xf32, #tpu.memory_space<vmem>>, vector<1x435xf32>
    tpu.vector_store %arg13[%c0_192, %c7395], %175 {strides = array<i32>} : memref<2x13920xf32, #tpu.memory_space<vmem>>, vector<1x435xf32>,
    %c17_193 = arith.constant 17 : index
    %c435_194 = arith.constant 435 : index
    %177 = vector.load %arg12[%c17_193, %c435_194] : memref<32x870xf32, #tpu.memory_space<vmem>>, vector<1x435xf32>
    %c1_195 = arith.constant 1 : index
    %c7395_196 = arith.constant 7395 : index
    %178 = vector.load %arg13[%c1_195, %c7395_196] : memref<2x13920xf32, #tpu.memory_space<vmem>>, vector<1x435xf32>
    tpu.vector_store %arg13[%c1_195, %c7395_196], %177 {strides = array<i32>} : memref<2x13920xf32, #tpu.memory_space<vmem>>, vector<1x435xf32>,
    %c18 = arith.constant 18 : index
    %c0_197 = arith.constant 0 : index
    %179 = vector.load %arg12[%c18, %c0_197] : memref<32x870xf32, #tpu.memory_space<vmem>>, vector<1x435xf32>
    %c0_198 = arith.constant 0 : index
    %c7830 = arith.constant 7830 : index
    %180 = vector.load %arg13[%c0_198, %c7830] : memref<2x13920xf32, #tpu.memory_space<vmem>>, vector<1x435xf32>
    tpu.vector_store %arg13[%c0_198, %c7830], %179 {strides = array<i32>} : memref<2x13920xf32, #tpu.memory_space<vmem>>, vector<1x435xf32>,
    %c18_199 = arith.constant 18 : index
    %c435_200 = arith.constant 435 : index
    %181 = vector.load %arg12[%c18_199, %c435_200] : memref<32x870xf32, #tpu.memory_space<vmem>>, vector<1x435xf32>
    %c1_201 = arith.constant 1 : index
    %c7830_202 = arith.constant 7830 : index
    %182 = vector.load %arg13[%c1_201, %c7830_202] : memref<2x13920xf32, #tpu.memory_space<vmem>>, vector<1x435xf32>
    tpu.vector_store %arg13[%c1_201, %c7830_202], %181 {strides = array<i32>} : memref<2x13920xf32, #tpu.memory_space<vmem>>, vector<1x435xf32>,
    %c19 = arith.constant 19 : index
    %c0_203 = arith.constant 0 : index
    %183 = vector.load %arg12[%c19, %c0_203] : memref<32x870xf32, #tpu.memory_space<vmem>>, vector<1x435xf32>
    %c0_204 = arith.constant 0 : index
    %c8265 = arith.constant 8265 : index
    %184 = vector.load %arg13[%c0_204, %c8265] : memref<2x13920xf32, #tpu.memory_space<vmem>>, vector<1x435xf32>
    tpu.vector_store %arg13[%c0_204, %c8265], %183 {strides = array<i32>} : memref<2x13920xf32, #tpu.memory_space<vmem>>, vector<1x435xf32>,
    %c19_205 = arith.constant 19 : index
    %c435_206 = arith.constant 435 : index
    %185 = vector.load %arg12[%c19_205, %c435_206] : memref<32x870xf32, #tpu.memory_space<vmem>>, vector<1x435xf32>
    %c1_207 = arith.constant 1 : index
    %c8265_208 = arith.constant 8265 : index
    %186 = vector.load %arg13[%c1_207, %c8265_208] : memref<2x13920xf32, #tpu.memory_space<vmem>>, vector<1x435xf32>
    tpu.vector_store %arg13[%c1_207, %c8265_208], %185 {strides = array<i32>} : memref<2x13920xf32, #tpu.memory_space<vmem>>, vector<1x435xf32>,
    %c20 = arith.constant 20 : index
    %c0_209 = arith.constant 0 : index
    %187 = vector.load %arg12[%c20, %c0_209] : memref<32x870xf32, #tpu.memory_space<vmem>>, vector<1x435xf32>
    %c0_210 = arith.constant 0 : index
    %c8700 = arith.constant 8700 : index
    %188 = vector.load %arg13[%c0_210, %c8700] : memref<2x13920xf32, #tpu.memory_space<vmem>>, vector<1x435xf32>
    tpu.vector_store %arg13[%c0_210, %c8700], %187 {strides = array<i32>} : memref<2x13920xf32, #tpu.memory_space<vmem>>, vector<1x435xf32>,
    %c20_211 = arith.constant 20 : index
    %c435_212 = arith.constant 435 : index
    %189 = vector.load %arg12[%c20_211, %c435_212] : memref<32x870xf32, #tpu.memory_space<vmem>>, vector<1x435xf32>
    %c1_213 = arith.constant 1 : index
    %c8700_214 = arith.constant 8700 : index
    %190 = vector.load %arg13[%c1_213, %c8700_214] : memref<2x13920xf32, #tpu.memory_space<vmem>>, vector<1x435xf32>
    tpu.vector_store %arg13[%c1_213, %c8700_214], %189 {strides = array<i32>} : memref<2x13920xf32, #tpu.memory_space<vmem>>, vector<1x435xf32>,
    %c21 = arith.constant 21 : index
    %c0_215 = arith.constant 0 : index
    %191 = vector.load %arg12[%c21, %c0_215] : memref<32x870xf32, #tpu.memory_space<vmem>>, vector<1x435xf32>
    %c0_216 = arith.constant 0 : index
    %c9135 = arith.constant 9135 : index
    %192 = vector.load %arg13[%c0_216, %c9135] : memref<2x13920xf32, #tpu.memory_space<vmem>>, vector<1x435xf32>
    tpu.vector_store %arg13[%c0_216, %c9135], %191 {strides = array<i32>} : memref<2x13920xf32, #tpu.memory_space<vmem>>, vector<1x435xf32>,
    %c21_217 = arith.constant 21 : index
    %c435_218 = arith.constant 435 : index
    %193 = vector.load %arg12[%c21_217, %c435_218] : memref<32x870xf32, #tpu.memory_space<vmem>>, vector<1x435xf32>
    %c1_219 = arith.constant 1 : index
    %c9135_220 = arith.constant 9135 : index
    %194 = vector.load %arg13[%c1_219, %c9135_220] : memref<2x13920xf32, #tpu.memory_space<vmem>>, vector<1x435xf32>
    tpu.vector_store %arg13[%c1_219, %c9135_220], %193 {strides = array<i32>} : memref<2x13920xf32, #tpu.memory_space<vmem>>, vector<1x435xf32>,
    %c22 = arith.constant 22 : index
    %c0_221 = arith.constant 0 : index
    %195 = vector.load %arg12[%c22, %c0_221] : memref<32x870xf32, #tpu.memory_space<vmem>>, vector<1x435xf32>
    %c0_222 = arith.constant 0 : index
    %c9570 = arith.constant 9570 : index
    %196 = vector.load %arg13[%c0_222, %c9570] : memref<2x13920xf32, #tpu.memory_space<vmem>>, vector<1x435xf32>
    tpu.vector_store %arg13[%c0_222, %c9570], %195 {strides = array<i32>} : memref<2x13920xf32, #tpu.memory_space<vmem>>, vector<1x435xf32>,
    %c22_223 = arith.constant 22 : index
    %c435_224 = arith.constant 435 : index
    %197 = vector.load %arg12[%c22_223, %c435_224] : memref<32x870xf32, #tpu.memory_space<vmem>>, vector<1x435xf32>
    %c1_225 = arith.constant 1 : index
    %c9570_226 = arith.constant 9570 : index
    %198 = vector.load %arg13[%c1_225, %c9570_226] : memref<2x13920xf32, #tpu.memory_space<vmem>>, vector<1x435xf32>
    tpu.vector_store %arg13[%c1_225, %c9570_226], %197 {strides = array<i32>} : memref<2x13920xf32, #tpu.memory_space<vmem>>, vector<1x435xf32>,
    %c23 = arith.constant 23 : index
    %c0_227 = arith.constant 0 : index
    %199 = vector.load %arg12[%c23, %c0_227] : memref<32x870xf32, #tpu.memory_space<vmem>>, vector<1x435xf32>
    %c0_228 = arith.constant 0 : index
    %c10005 = arith.constant 10005 : index
    %200 = vector.load %arg13[%c0_228, %c10005] : memref<2x13920xf32, #tpu.memory_space<vmem>>, vector<1x435xf32>
    tpu.vector_store %arg13[%c0_228, %c10005], %199 {strides = array<i32>} : memref<2x13920xf32, #tpu.memory_space<vmem>>, vector<1x435xf32>,
    %c23_229 = arith.constant 23 : index
    %c435_230 = arith.constant 435 : index
    %201 = vector.load %arg12[%c23_229, %c435_230] : memref<32x870xf32, #tpu.memory_space<vmem>>, vector<1x435xf32>
    %c1_231 = arith.constant 1 : index
    %c10005_232 = arith.constant 10005 : index
    %202 = vector.load %arg13[%c1_231, %c10005_232] : memref<2x13920xf32, #tpu.memory_space<vmem>>, vector<1x435xf32>
    tpu.vector_store %arg13[%c1_231, %c10005_232], %201 {strides = array<i32>} : memref<2x13920xf32, #tpu.memory_space<vmem>>, vector<1x435xf32>,
    %c24 = arith.constant 24 : index
    %c0_233 = arith.constant 0 : index
    %203 = vector.load %arg12[%c24, %c0_233] : memref<32x870xf32, #tpu.memory_space<vmem>>, vector<1x435xf32>
    %c0_234 = arith.constant 0 : index
    %c10440 = arith.constant 10440 : index
    %204 = vector.load %arg13[%c0_234, %c10440] : memref<2x13920xf32, #tpu.memory_space<vmem>>, vector<1x435xf32>
    tpu.vector_store %arg13[%c0_234, %c10440], %203 {strides = array<i32>} : memref<2x13920xf32, #tpu.memory_space<vmem>>, vector<1x435xf32>,
    %c24_235 = arith.constant 24 : index
    %c435_236 = arith.constant 435 : index
    %205 = vector.load %arg12[%c24_235, %c435_236] : memref<32x870xf32, #tpu.memory_space<vmem>>, vector<1x435xf32>
    %c1_237 = arith.constant 1 : index
    %c10440_238 = arith.constant 10440 : index
    %206 = vector.load %arg13[%c1_237, %c10440_238] : memref<2x13920xf32, #tpu.memory_space<vmem>>, vector<1x435xf32>
    tpu.vector_store %arg13[%c1_237, %c10440_238], %205 {strides = array<i32>} : memref<2x13920xf32, #tpu.memory_space<vmem>>, vector<1x435xf32>,
    %c25 = arith.constant 25 : index
    %c0_239 = arith.constant 0 : index
    %207 = vector.load %arg12[%c25, %c0_239] : memref<32x870xf32, #tpu.memory_space<vmem>>, vector<1x435xf32>
    %c0_240 = arith.constant 0 : index
    %c10875 = arith.constant 10875 : index
    %208 = vector.load %arg13[%c0_240, %c10875] : memref<2x13920xf32, #tpu.memory_space<vmem>>, vector<1x435xf32>
    tpu.vector_store %arg13[%c0_240, %c10875], %207 {strides = array<i32>} : memref<2x13920xf32, #tpu.memory_space<vmem>>, vector<1x435xf32>,
    %c25_241 = arith.constant 25 : index
    %c435_242 = arith.constant 435 : index
    %209 = vector.load %arg12[%c25_241, %c435_242] : memref<32x870xf32, #tpu.memory_space<vmem>>, vector<1x435xf32>
    %c1_243 = arith.constant 1 : index
    %c10875_244 = arith.constant 10875 : index
    %210 = vector.load %arg13[%c1_243, %c10875_244] : memref<2x13920xf32, #tpu.memory_space<vmem>>, vector<1x435xf32>
    tpu.vector_store %arg13[%c1_243, %c10875_244], %209 {strides = array<i32>} : memref<2x13920xf32, #tpu.memory_space<vmem>>, vector<1x435xf32>,
    %c26 = arith.constant 26 : index
    %c0_245 = arith.constant 0 : index
    %211 = vector.load %arg12[%c26, %c0_245] : memref<32x870xf32, #tpu.memory_space<vmem>>, vector<1x435xf32>
    %c0_246 = arith.constant 0 : index
    %c11310 = arith.constant 11310 : index
    %212 = vector.load %arg13[%c0_246, %c11310] : memref<2x13920xf32, #tpu.memory_space<vmem>>, vector<1x435xf32>
    tpu.vector_store %arg13[%c0_246, %c11310], %211 {strides = array<i32>} : memref<2x13920xf32, #tpu.memory_space<vmem>>, vector<1x435xf32>,
    %c26_247 = arith.constant 26 : index
    %c435_248 = arith.constant 435 : index
    %213 = vector.load %arg12[%c26_247, %c435_248] : memref<32x870xf32, #tpu.memory_space<vmem>>, vector<1x435xf32>
    %c1_249 = arith.constant 1 : index
    %c11310_250 = arith.constant 11310 : index
    %214 = vector.load %arg13[%c1_249, %c11310_250] : memref<2x13920xf32, #tpu.memory_space<vmem>>, vector<1x435xf32>
    tpu.vector_store %arg13[%c1_249, %c11310_250], %213 {strides = array<i32>} : memref<2x13920xf32, #tpu.memory_space<vmem>>, vector<1x435xf32>,
    %c27 = arith.constant 27 : index
    %c0_251 = arith.constant 0 : index
    %215 = vector.load %arg12[%c27, %c0_251] : memref<32x870xf32, #tpu.memory_space<vmem>>, vector<1x435xf32>
    %c0_252 = arith.constant 0 : index
    %c11745 = arith.constant 11745 : index
    %216 = vector.load %arg13[%c0_252, %c11745] : memref<2x13920xf32, #tpu.memory_space<vmem>>, vector<1x435xf32>
    tpu.vector_store %arg13[%c0_252, %c11745], %215 {strides = array<i32>} : memref<2x13920xf32, #tpu.memory_space<vmem>>, vector<1x435xf32>,
    %c27_253 = arith.constant 27 : index
    %c435_254 = arith.constant 435 : index
    %217 = vector.load %arg12[%c27_253, %c435_254] : memref<32x870xf32, #tpu.memory_space<vmem>>, vector<1x435xf32>
    %c1_255 = arith.constant 1 : index
    %c11745_256 = arith.constant 11745 : index
    %218 = vector.load %arg13[%c1_255, %c11745_256] : memref<2x13920xf32, #tpu.memory_space<vmem>>, vector<1x435xf32>
    tpu.vector_store %arg13[%c1_255, %c11745_256], %217 {strides = array<i32>} : memref<2x13920xf32, #tpu.memory_space<vmem>>, vector<1x435xf32>,
    %c28 = arith.constant 28 : index
    %c0_257 = arith.constant 0 : index
    %219 = vector.load %arg12[%c28, %c0_257] : memref<32x870xf32, #tpu.memory_space<vmem>>, vector<1x435xf32>
    %c0_258 = arith.constant 0 : index
    %c12180 = arith.constant 12180 : index
    %220 = vector.load %arg13[%c0_258, %c12180] : memref<2x13920xf32, #tpu.memory_space<vmem>>, vector<1x435xf32>
    tpu.vector_store %arg13[%c0_258, %c12180], %219 {strides = array<i32>} : memref<2x13920xf32, #tpu.memory_space<vmem>>, vector<1x435xf32>,
    %c28_259 = arith.constant 28 : index
    %c435_260 = arith.constant 435 : index
    %221 = vector.load %arg12[%c28_259, %c435_260] : memref<32x870xf32, #tpu.memory_space<vmem>>, vector<1x435xf32>
    %c1_261 = arith.constant 1 : index
    %c12180_262 = arith.constant 12180 : index
    %222 = vector.load %arg13[%c1_261, %c12180_262] : memref<2x13920xf32, #tpu.memory_space<vmem>>, vector<1x435xf32>
    tpu.vector_store %arg13[%c1_261, %c12180_262], %221 {strides = array<i32>} : memref<2x13920xf32, #tpu.memory_space<vmem>>, vector<1x435xf32>,
    %c29 = arith.constant 29 : index
    %c0_263 = arith.constant 0 : index
    %223 = vector.load %arg12[%c29, %c0_263] : memref<32x870xf32, #tpu.memory_space<vmem>>, vector<1x435xf32>
    %c0_264 = arith.constant 0 : index
    %c12615 = arith.constant 12615 : index
    %224 = vector.load %arg13[%c0_264, %c12615] : memref<2x13920xf32, #tpu.memory_space<vmem>>, vector<1x435xf32>
    tpu.vector_store %arg13[%c0_264, %c12615], %223 {strides = array<i32>} : memref<2x13920xf32, #tpu.memory_space<vmem>>, vector<1x435xf32>,
    %c29_265 = arith.constant 29 : index
    %c435_266 = arith.constant 435 : index
    %225 = vector.load %arg12[%c29_265, %c435_266] : memref<32x870xf32, #tpu.memory_space<vmem>>, vector<1x435xf32>
    %c1_267 = arith.constant 1 : index
    %c12615_268 = arith.constant 12615 : index
    %226 = vector.load %arg13[%c1_267, %c12615_268] : memref<2x13920xf32, #tpu.memory_space<vmem>>, vector<1x435xf32>
    tpu.vector_store %arg13[%c1_267, %c12615_268], %225 {strides = array<i32>} : memref<2x13920xf32, #tpu.memory_space<vmem>>, vector<1x435xf32>,
    %c30 = arith.constant 30 : index
    %c0_269 = arith.constant 0 : index
    %227 = vector.load %arg12[%c30, %c0_269] : memref<32x870xf32, #tpu.memory_space<vmem>>, vector<1x435xf32>
    %c0_270 = arith.constant 0 : index
    %c13050 = arith.constant 13050 : index
    %228 = vector.load %arg13[%c0_270, %c13050] : memref<2x13920xf32, #tpu.memory_space<vmem>>, vector<1x435xf32>
    tpu.vector_store %arg13[%c0_270, %c13050], %227 {strides = array<i32>} : memref<2x13920xf32, #tpu.memory_space<vmem>>, vector<1x435xf32>,
    %c30_271 = arith.constant 30 : index
    %c435_272 = arith.constant 435 : index
    %229 = vector.load %arg12[%c30_271, %c435_272] : memref<32x870xf32, #tpu.memory_space<vmem>>, vector<1x435xf32>
    %c1_273 = arith.constant 1 : index
    %c13050_274 = arith.constant 13050 : index
    %230 = vector.load %arg13[%c1_273, %c13050_274] : memref<2x13920xf32, #tpu.memory_space<vmem>>, vector<1x435xf32>
    tpu.vector_store %arg13[%c1_273, %c13050_274], %229 {strides = array<i32>} : memref<2x13920xf32, #tpu.memory_space<vmem>>, vector<1x435xf32>,
    %c31 = arith.constant 31 : index
    %c0_275 = arith.constant 0 : index
    %231 = vector.load %arg12[%c31, %c0_275] : memref<32x870xf32, #tpu.memory_space<vmem>>, vector<1x435xf32>
    %c0_276 = arith.constant 0 : index
    %c13485 = arith.constant 13485 : index
    %232 = vector.load %arg13[%c0_276, %c13485] : memref<2x13920xf32, #tpu.memory_space<vmem>>, vector<1x435xf32>
    tpu.vector_store %arg13[%c0_276, %c13485], %231 {strides = array<i32>} : memref<2x13920xf32, #tpu.memory_space<vmem>>, vector<1x435xf32>,
    %c31_277 = arith.constant 31 : index
    %c435_278 = arith.constant 435 : index
    %233 = vector.load %arg12[%c31_277, %c435_278] : memref<32x870xf32, #tpu.memory_space<vmem>>, vector<1x435xf32>
    %c1_279 = arith.constant 1 : index
    %c13485_280 = arith.constant 13485 : index
    %234 = vector.load %arg13[%c1_279, %c13485_280] : memref<2x13920xf32, #tpu.memory_space<vmem>>, vector<1x435xf32>
    tpu.vector_store %arg13[%c1_279, %c13485_280], %233 {strides = array<i32>} : memref<2x13920xf32, #tpu.memory_space<vmem>>, vector<1x435xf32>,
    tpu.wait_dma2 semaphore(%arg15 : memref<!tpu.dma_semaphore, #tpu.memory_space<semaphore_mem>>) src(%arg6 : memref<13920x128xbf16, #tpu.memory_space<any>>) dst(%arg14 : memref<13920x128xbf16, #tpu.memory_space<vmem>>)
    %c0_281 = arith.constant 0 : index
    %c0_282 = arith.constant 0 : index
    %235 = vector.load %arg13[%c0_281, %c0_282] : memref<2x13920xf32, #tpu.memory_space<vmem>>, vector<2x13920xf32>
    %236 = arith.truncf %235 : vector<2x13920xf32> to vector<2x13920xbf16>
    %c0_283 = arith.constant 0 : index
    %c0_284 = arith.constant 0 : index
    %237 = vector.load %arg14[%c0_283, %c0_284] : memref<13920x128xbf16, #tpu.memory_space<vmem>>, vector<13920x128xbf16>
    %cst_285 = arith.constant dense<0.000000e+00> : vector<2x128xf32>
    %238 = tpu.matmul %236, %237, %cst_285 {dimension_numbers = #tpu.dot_dimension_numbers<[1], [0], [0], [1], [0, 0, 1, 1], [], []>} : vector<2x13920xbf16>, vector<13920x128xbf16>, vector<2x128xf32> -> vector<2x128xf32>
    %c0_286 = arith.constant 0 : index
    %c0_287 = arith.constant 0 : index
    %239 = vector.load %arg7[%c0_286, %c0_287] : memref<1x128xf32, #tpu.memory_space<vmem>>, vector<1x128xf32>
    %240 = vector.broadcast %239 : vector<1x128xf32> to vector<2x128xf32>
    %241 = arith.addf %238, %240 : vector<2x128xf32>
    %cst_288 = arith.constant 0.000000e+00 : f32
    %242 = vector.broadcast %cst_288 : f32 to vector<2x128xf32>
    %243 = arith.maximumf %241, %242 : vector<2x128xf32>
    %c0_289 = arith.constant 0 : index
    %c0_290 = arith.constant 0 : index
    %244 = vector.load %arg8[%c0_289, %c0_290] : memref<1x128xf32, #tpu.memory_space<vmem>>, vector<1x128xf32>
    %245 = vector.broadcast %244 : vector<1x128xf32> to vector<2x128xf32>
    %246 = arith.mulf %243, %245 : vector<2x128xf32>
    %cst_291 = arith.constant dense<0.000000e+00> : vector<2xf32>
    %247 = vector.multi_reduction <add>, %246, %cst_291 [1] : vector<2x128xf32> to vector<2xf32>
    %248 = vector.shape_cast %247 : vector<2xf32> to vector<2x1xf32>
    %c0_292 = arith.constant 0 : index
    %c0_293 = arith.constant 0 : index
    %249 = vector.load %arg9[%c0_292, %c0_293] : memref<1x1xf32, #tpu.memory_space<vmem>>, vector<1x1xf32>
    %250 = vector.broadcast %249 : vector<1x1xf32> to vector<2x1xf32>
    %251 = arith.addf %248, %250 : vector<2x1xf32>
    %c0_294 = arith.constant 0 : index
    %c0_295 = arith.constant 0 : index
    %252 = vector.load %arg10[%c0_294, %c0_295] : memref<2x1xf32, #tpu.memory_space<vmem>>, vector<2x1xf32>
    tpu.vector_store %arg10[%c0_294, %c0_295], %251 {strides = array<i32>} : memref<2x1xf32, #tpu.memory_space<vmem>>, vector<2x1xf32>,
    return
  }
}

</mosaic_0001>

<bundles_post_ra>
// kernel: mycnn_forward.1
= control target key start
LH: loop header
LB: loop body
LE: loop exit
PB: predicated region body
PF: predicated region fallthrough
CT: control target
= control target key end

     0   :  { %s23060_s0 = inlined_call_operand.vmem [shape: f32[1,882], index: 0, kind: input, shape index: {}]   ;;  %s23061_s1 = inlined_call_operand.vmem [shape: f32[1,870], index: 1, kind: input, shape index: {}]   ;;  %s23062_s2 = inlined_call_operand.hbm [shape: f32[16,9], index: 2, kind: input, shape index: {}]   ;;  %s23063_s3 = inlined_call_operand.vmem [shape: f32[16,1], index: 3, kind: input, shape index: {}]   ;;  %s23064_s4 = inlined_call_operand.hbm [shape: f32[32,144], index: 4, kind: input, shape index: {}]   ;;  %s23065_s5 = inlined_call_operand.vmem [shape: f32[32,1], index: 5, kind: input, shape index: {}]   ;;  %s23066_s6 = inlined_call_operand.hbm [shape: bf16[13920,128], index: 6, kind: input, shape index: {}]   ;;  %s23067_s7 = inlined_call_operand.hbm [shape: f32[1,128], index: 7, kind: input, shape index: {}]   ;;  %s23068_s8 = inlined_call_operand.hbm [shape: f32[1,128], index: 8, kind: input, shape index: {}]   ;;  %s23069_s9 = inlined_call_operand.<no memory space> [shape: f32[1,1], index: 9, kind: input, shape index: {}]   ;;  %s23070_s10 = inlined_call_operand.vmem [shape: f32[2,1], index: 10, kind: output, shape index: {}]  }
   0x1   :  { %v15_v0 = vstv %s23069_s9 }
   0x2   :  { %16 = vst [vmem:[#allocation7] sm:$0x1] %v15_v0 }
   0x3   :  { %17 = vsyncpa [#allocation9], 0 }
   0x4   :  { %18 = vsyncpa [#allocation11], 0 }
   0x5   :  { %19 = vsyncpa [#allocation14], 0  ;;  %s19460_s15 = smov [#allocation10]  }
   0x6   :  { %s43_s16 = sshll.u32 %s19460_s15, 4  ;;  %s44_s16 = int_to_ptr.vmem [resolvable:$true] %s43_s16 }
   0x7   :  { %s19360_s17 = scalar_lea.vmem %s44_s16, 1024  ;;  %p19365_p1 = scmp.lt.s32.totalorder %s44_s16, %s44_s16 }
   0x8   :  { %p19361_p0 = scmp.ne.s32.totalorder %s44_s16, %s19360_s17  ;;  %p19366_p2 = scmp.lt.s32.totalorder %s19360_s17, %s19360_s17 }
   0xa   :  { %p19367_p3 = por %p19366_p2, %p19365_p1 }
   0xc   :  { %p19368_p4 = pnand %p19367_p3, %p19361_p0 }
   0xe   :  { %19371 = shalt.err (!%p19368_p4)
}
   0xf   :  { %s19461_s18 = smov 256   ;;  %s19462_s19 = smov 16  }
  0x10   :  { %49 = dma.hbm_to_vmem [thread:$0]  %s23064_s4, 1024, %s44_s16, [#allocation11], %s19461_s18, %s19461_s18, %s19462_s19  }
  0x11   :  { %s19463_s9 = smov [#allocation8]  }
  0x12   :  { %s29_s22 = sshll.u32 %s19463_s9, 4  ;;  %s30_s22 = int_to_ptr.vmem [resolvable:$true] %s29_s22 }
  0x13   :  { %s19380_s23 = scalar_lea.vmem %s30_s22, 256  ;;  %p19385_p6 = scmp.lt.s32.totalorder %s30_s22, %s30_s22 }
  0x14   :  { %p19381_p5 = scmp.ne.s32.totalorder %s30_s22, %s19380_s23  ;;  %p19386_p7 = scmp.lt.s32.totalorder %s19380_s23, %s19380_s23 }
  0x16   :  { %p19387_p8 = por %p19386_p7, %p19385_p6 }
  0x18   :  { %p19388_p9 = pnand %p19387_p8, %p19381_p5 }
  0x1a   :  { %19391 = shalt.err (!%p19388_p9)
}
  0x1b   :  { %s19464_s24 = smov 128   ;;  %s19465_s25 = smov 8  }
  0x1c   :  { %35 = dma.hbm_to_vmem [thread:$0]  %s23062_s2, 256, %s30_s22, [#allocation9], %s19464_s24, %s19464_s24, %s19465_s25  }
  0x1d   :  { %s19466_s28 = smov [#allocation12]   ;;  %s19467_s30 = smov [#allocation13]  }
  0x1e   :  { %s58_s29 = sshll.u32 %s19466_s28, 4  ;;  %s68_s4 = sshll.u32 %s19467_s30, 4  ;;  %s59_s29 = int_to_ptr.vmem [resolvable:$true] %s58_s29  ;;  %s69_s4 = int_to_ptr.vmem [resolvable:$true] %s68_s4 }
  0x1f   :  { %s19400_s11 = scalar_lea.vmem %s59_s29, 16  ;;  %s19404_s12 = scalar_lea.vmem %s59_s29, 32 }
  0x20   :  { %p19401_p10 = scmp.ne.s32.totalorder %s59_s29, %s19400_s11  ;;  %p19405_p11 = scmp.lt.s32.totalorder %s59_s29, %s59_s29 }
  0x21   :  { %p19406_p12 = scmp.lt.s32.totalorder %s19404_s12, %s19400_s11 }
  0x23   :  { %p19407_p13 = por %p19406_p12, %p19405_p11 }
  0x25   :  { %p19408_p0 = pnand %p19407_p13, %p19401_p10 }
  0x27   :  { %19411 = shalt.err (!%p19408_p0)
}
  0x28   :  { %61 = dma.hbm_to_vmem [thread:$0]  %s23067_s7, 16, %s59_s29, [#allocation11]  }
  0x29   :  { %s19420_s15 = scalar_lea.vmem %s69_s4, 16  ;;  %s19424_s2 = scalar_lea.vmem %s69_s4, 32 }
  0x2a   :  { %p19421_p1 = scmp.ne.s32.totalorder %s69_s4, %s19420_s15  ;;  %p19425_p2 = scmp.lt.s32.totalorder %s69_s4, %s69_s4 }
  0x2b   :  { %p19426_p3 = scmp.lt.s32.totalorder %s19424_s2, %s19420_s15 }
  0x2d   :  { %p19427_p4 = por %p19426_p3, %p19425_p2 }
  0x2f   :  { %p19428_p5 = pnand %p19427_p4, %p19421_p1 }
  0x31   :  { %19431 = shalt.err (!%p19428_p5)
}
  0x32   :  { %71 = dma.hbm_to_vmem [thread:$0]  %s23068_s8, 16, %s69_s4, [#allocation14]  }
  0x33   :  { %19452 = dma.done.wait [#allocation9], 256  }
  0x34   :  { %19453 = vsyncadd [#allocation9], 4294967040 }
  0x35   :  { %19454 = dma.done.wait [#allocation11], 1040  }
  0x36   :  { %19455 = vsyncadd [#allocation11], 4294966256 }
  0x37   :  { %19456 = dma.done.wait [#allocation14], 16  }
  0x38   :  { %19457 = vsyncadd [#allocation14], 4294967280  ;;  %v19468_v1 = vmov 1   ;;  %v19469_v2 = vmov 2   ;;  %v113_v3 = vld [vmem:[#allocation8 + $0x8] sm:$0xff]  ;;  %v112_v4 = vld [vmem:[#allocation8] sm:$0xff]  ;;  %v23071_v14 = vlaneseq }
  0x39   :  { %18441 = vset.pattern.permute.xlu0 %v19468_v1  ;;  %18442 = vset.pattern.permute.xlu1 %v19469_v2  ;;  %v19470_v5 = vmov 3   ;;  %v19471_v6 = vmov 4   ;;  %v19472_v7 = vmov 5   ;;  %v19473_v8 = vmov 6   ;;  %v99_v11 = vld [vmem:[%s23063_s3] sm:$0xff]  ;;  %v100_v13 = vld [vmem:[%s23063_s3 + $0x8] sm:$0xff] }
  0x3a   :  { %193 = vperm.xlu0 %18441, %v113_v3   ;;  %298 = vperm.xlu1 %18442, %v113_v3   ;;  %v19474_v9 = vmov 7   ;;  %v19475_v10 = vmov 0   ;;  %v19476_v12 = vmov 8   ;;  %v19601_v15 = vshrl.u32 %v23071_v14, 7  ;;  %v19608_v18 = vld [vmem:[%s23060_s0] sm:$0x7f] }
  0x3b   :  { %s19477_s0 = smov 127   ;;  %s19478_s3 = smov 126   ;;  %vm23124_vm0 = vcmask 1039360   ;;  %vm23122_vm1 = vcmask 1031168   ;;  %vm23114_vm2 = vcmask 1006592   ;;  %vm23113_vm3 = vcmask 998400  }
  0x3c   :  { %23221 = vst [vmem:[#allocation23_spill] sm:$0xff] %v19601_v15  ;;  %v23079_v16 = vsub.s32 0, %v19601_v15  ;;  %v23078_v17 = vsub.s32 1, %v19601_v15  ;;  %v23077_v21 = vsub.s32 2, %v19601_v15  ;;  %v23076_v22 = vsub.s32 3, %v19601_v15  ;;  %s19479_s22 = smov 123  }
  0x3d   :  { %v23075_v58 = vsub.s32 4, %v19601_v15  ;;  %v23073_v59 = vsub.s32 5, %v19601_v15  ;;  %s19480_s23 = smov 122   ;;  %s19481_s24 = smov 121   ;;  %vm672_vm4 = vcmask 990208   ;;  %vm777_vm5 = vcmask 965632  }
  0x3e   :  { %189 = vperm.xlu0 %18441, %v112_v4   ;;  %294 = vperm.xlu1 %18442, %v112_v4   ;;  %v19613_v19 = vrot.slane %v19608_v18, %v23079_v16  ;;  %v19618_v20 = vrot.slane %v19608_v18, %v23078_v17  ;;  %v19631_v26 = vrot.slane %v19608_v18, %v23077_v21  ;;  %s19482_s25 = smov 118   ;;  %s19483_s26 = smov 117   ;;  %vm882_vm6 = vcmask 957440  }
  0x3f   :  { %v19636_v27 = vrot.slane %v19608_v18, %v23076_v22  ;;  %v19733_v62 = vrot.slane %v19608_v18, %v23075_v58  ;;  %v19738_v63 = vrot.slane %v19608_v18, %v23073_v59  ;;  %s19484_s27 = smov 116   ;;  %vm987_vm7 = vcmask 949248   ;;  %s19487_s30 = smov 112  }
  0x40   :  { %vm1098_vm8 = vcmask 932864   ;;  %s19488_s4 = smov 96   ;;  %s19489_s11 = smov 80   ;;  %vm1176_vm9 = vcmask 1047600   ;;  %vm1149_vm10 = vcmask 48128   ;;  %vm1234_vm11 = vcmask 130048  }
  0x41   :  { %23222 = vst [vmem:[#allocation24_spill] sm:$0xff] %v19636_v27  ;;  %23223 = vst [vmem:[#allocation25_spill] sm:$0xff] %v19733_v62  ;;  %vm1183_vm12 = vcmask 883712   ;;  %s19490_s12 = smov 64   ;;  %s19491_s13 = smov 48   ;;  %vm23115_vm13 = vcmask 834560  }
  0x42   :  { %18443 = vset.pattern.permute.xlu0 %v19470_v5  ;;  %18444 = vset.pattern.permute.xlu1 %v19470_v5  ;;  %23224 = vst [vmem:[#allocation26_spill] sm:$0xff] %v19738_v63  ;;  %s19492_s14 = smov 32   ;;  %s19494_s20 = smov 51  }
  0x43   :  { %403 = vperm.xlu0 %18443, %v113_v3   ;;  %399 = vperm.xlu1 %18444, %v112_v4   ;;  %s19495_s21 = smov 25   ;;  %s19496_s9 = smov 76  }
  0x44   :  { %s19501_s28 = smov 49   ;;  %s19502_s29 = smov 100  }
  0x45   :  { %s19511_s15 = smov 98   ;;  %s19513_s2 = smov 77  }
  0x46   :  { %s19514_s16 = smov 72   ;;  %s19516_s17 = smov 97  }
  0x47   :  { %18445 = vset.pattern.permute.xlu1 %v19471_v6  ;;  %18446 = vset.pattern.permute.xlu0 %v19471_v6  ;;  %s19517_s7 = smov 20   ;;  %s19518_s8 = smov 71  }
  0x48   :  { %508 = vperm.xlu1 %18445, %v113_v3   ;;  %504 = vperm.xlu0 %18446, %v112_v4   ;;  %s19520_s18 = smov [#allocation5]  }
  0x4c   :  { %18447 = vset.pattern.permute.xlu1 %v19472_v7  ;;  %18448 = vset.pattern.permute.xlu0 %v19473_v8 }
  0x4d   :  { %613 = vperm.xlu1 %18447, %v113_v3   ;;  %718 = vperm.xlu0 %18448, %v113_v3  }
  0x51   :  { %609 = vperm.xlu1 %18447, %v112_v4   ;;  %18451 = vset.pattern.permute.xlu0 %v19474_v9 }
  0x52   :  { %819 = vperm.xlu0 %18451, %v112_v4  }
  0x55   :  { %18449 = vset.pattern.permute.xlu1 %v19473_v8 }
  0x56   :  { %714 = vperm.xlu1 %18449, %v112_v4   ;;  %18453 = vset.pattern.permute.xlu0 %v19475_v10 }
  0x57   :  { %121 = vperm.xlu0 %18453, %v113_v3  }
  0x5a   :  { %18450 = vset.pattern.permute.xlu1 %v19474_v9 }
  0x5b   :  { %823 = vperm.xlu1 %18450, %v113_v3   ;;  %103 = vperm.xlu0 %18453, %v99_v11  }
  0x5f   :  { %18452 = vset.pattern.permute.xlu1 %v19476_v12 }
  0x60   :  { %928 = vperm.xlu1 %18452, %v113_v3  }
  0x64   :  { %924 = vperm.xlu1 %18452, %v112_v4  }
  0x68   :  { %18454 = vset.pattern.permute.xlu1 %v19475_v10 }
  0x69   :  { %108 = vperm.xlu1 %18454, %v100_v13  }
  0x6d   :  { %116 = vperm.xlu1 %18454, %v112_v4  }
  0xb5   :  { %v19622_v23 = vpop.permute.xlu0 %193  ;;  %v19658_v35 = vpop.permute.xlu1 %298 }
  0xb6   :  { %v203_v24 = vmul.f32 %v19622_v23, %v19613_v19  ;;  %v204_v25 = vmul.f32 %v19622_v23, %v19618_v20  ;;  %v205_v28 = vmul.f32 %v19622_v23, %v19631_v26  ;;  %v206_v29 = vmul.f32 %v19622_v23, %v19636_v27 }
  0xb7   :  { %v308_v36 = vmul.f32 %v19658_v35, %v19613_v19  ;;  %v309_v37 = vmul.f32 %v19658_v35, %v19618_v20  ;;  %v310_v38 = vmul.f32 %v19658_v35, %v19631_v26  ;;  %v311_v39 = vmul.f32 %v19658_v35, %v19636_v27 }
  0xb8   :  { %238 = vrot.lane.b32.xlu1 %v203_v24, %s19477_s0  ;;  %240 = vrot.lane.b32.xlu0 %v204_v25, %s19477_s0  ;;  %v207_v1 = vmul.f32 %v19622_v23, %v19733_v62  ;;  %v208_v2 = vmul.f32 %v19622_v23, %v19738_v63  ;;  %v312_v25 = vmul.f32 %v19658_v35, %v19733_v62 }
  0xb9   :  { %v19644_v30 = vpop.permute.xlu0 %189  ;;  %v19672_v40 = vpop.permute.xlu1 %294 }
  0xba   :  { %v196_v31 = vmul.f32 %v19644_v30, %v19613_v19  ;;  %v197_v32 = vmul.f32 %v19644_v30, %v19618_v20  ;;  %v198_v33 = vmul.f32 %v19644_v30, %v19631_v26  ;;  %v199_v34 = vmul.f32 %v19644_v30, %v19636_v27 }
  0xbb   :  { %v301_v41 = vmul.f32 %v19672_v40, %v19613_v19  ;;  %v302_v42 = vmul.f32 %v19672_v40, %v19618_v20  ;;  %v303_v44 = vmul.f32 %v19672_v40, %v19631_v26  ;;  %v304_v45 = vmul.f32 %v19672_v40, %v19636_v27 }
  0xbc   :  { %242 = vrot.lane.b32.xlu1 %v205_v28, %s19477_s0  ;;  %244 = vrot.lane.b32.xlu0 %v206_v29, %s19477_s0  ;;  %v200_v12 = vmul.f32 %v19644_v30, %v19733_v62  ;;  %v201_v13 = vmul.f32 %v19644_v30, %v19738_v63  ;;  %v313_v28 = vmul.f32 %v19658_v35, %v19738_v63 }
  0xbe   :  { %v19682_v43 = vpop.permute.xlu0 %403  ;;  %v19696_v48 = vpop.permute.xlu1 %399 }
  0xbf   :  { %v413_v46 = vmul.f32 %v19682_v43, %v19613_v19  ;;  %v414_v47 = vmul.f32 %v19682_v43, %v19618_v20  ;;  %v415_v49 = vmul.f32 %v19682_v43, %v19631_v26  ;;  %v416_v50 = vmul.f32 %v19682_v43, %v19636_v27 }
  0xc0   :  { %224 = vrot.lane.b32.xlu1 %v196_v31, %s19477_s0  ;;  %226 = vrot.lane.b32.xlu0 %v197_v32, %s19477_s0  ;;  %v406_v51 = vmul.f32 %v19696_v48, %v19613_v19  ;;  %v407_v52 = vmul.f32 %v19696_v48, %v19618_v20  ;;  %v408_v54 = vmul.f32 %v19696_v48, %v19631_v26 }
  0xc1   :  { %v409_v55 = vmul.f32 %v19696_v48, %v19636_v27 }
  0xc3   :  { %v19710_v53 = vpop.permute.xlu1 %508  ;;  %v19742_v0 = vpop.permute.xlu0 %504 }
  0xc4   :  { %228 = vrot.lane.b32.xlu1 %v198_v33, %s19477_s0  ;;  %230 = vrot.lane.b32.xlu0 %v199_v34, %s19477_s0  ;;  %v518_v56 = vmul.f32 %v19710_v53, %v19613_v19  ;;  %v519_v57 = vmul.f32 %v19710_v53, %v19618_v20  ;;  %v520_v60 = vmul.f32 %v19710_v53, %v19631_v26 }
  0xc5   :  { %v521_v61 = vmul.f32 %v19710_v53, %v19636_v27  ;;  %v511_v3 = vmul.f32 %v19742_v0, %v19613_v19  ;;  %v512_v4 = vmul.f32 %v19742_v0, %v19618_v20  ;;  %v513_v5 = vmul.f32 %v19742_v0, %v19631_v26 }
  0xc6   :  { %v514_v6 = vmul.f32 %v19742_v0, %v19636_v27 }
  0xc8   :  { %343 = vrot.lane.b32.xlu1 %v308_v36, %s19478_s3  ;;  %345 = vrot.lane.b32.xlu0 %v309_v37, %s19478_s3  ;;  %v19760_v7 = vpop.permute.xlu1 %613  ;;  %v19798_v33 = vpop.permute.xlu0 %718 }
  0xc9   :  { %v623_v8 = vmul.f32 %v19760_v7, %v19613_v19  ;;  %v624_v9 = vmul.f32 %v19760_v7, %v19618_v20  ;;  %v625_v10 = vmul.f32 %v19760_v7, %v19631_v26  ;;  %v626_v11 = vmul.f32 %v19760_v7, %v19636_v27 }
  0xcc   :  { %347 = vrot.lane.b32.xlu1 %v310_v38, %s19478_s3  ;;  %349 = vrot.lane.b32.xlu0 %v311_v39, %s19478_s3  ;;  %v19780_v24 = vpop.permute.xlu1 %609  ;;  %v728_v38 = vmul.f32 %v19798_v33, %v19613_v19  ;;  %v729_v39 = vmul.f32 %v19798_v33, %v19618_v20 }
  0xcd   :  { %v616_v31 = vmul.f32 %v19780_v24, %v19613_v19  ;;  %v617_v32 = vmul.f32 %v19780_v24, %v19618_v20  ;;  %v618_v34 = vmul.f32 %v19780_v24, %v19631_v26  ;;  %v619_v36 = vmul.f32 %v19780_v24, %v19636_v27 }
  0xd0   :  { %329 = vrot.lane.b32.xlu1 %v301_v41, %s19478_s3  ;;  %331 = vrot.lane.b32.xlu0 %v302_v42, %s19478_s3  ;;  %v730_v42 = vmul.f32 %v19798_v33, %v19631_v26 }
  0xd1   :  { %v19790_v29 = vpop.permute.xlu1 %714 }
  0xd4   :  { %333 = vrot.lane.b32.xlu1 %v303_v44, %s19478_s3  ;;  %335 = vrot.lane.b32.xlu0 %v304_v45, %s19478_s3  ;;  %v731_v44 = vmul.f32 %v19798_v33, %v19636_v27 }
  0xd6   :  { %v19804_v37 = vpop.permute.xlu1 %823 }
  0xd8   :  { %448 = vrot.lane.b32.xlu1 %v413_v46, %s19479_s22  ;;  %450 = vrot.lane.b32.xlu0 %v414_v47, %s19479_s22  ;;  %v19824_v46 = vpop.permute.xlu0 %819  ;;  %v305_v47 = vmul.f32 %v19672_v40, %v19733_v62 }
  0xdb   :  { %v19814_v41 = vpop.permute.xlu1 %928 }
  0xdc   :  { %452 = vrot.lane.b32.xlu1 %v415_v49, %s19479_s22  ;;  %454 = vrot.lane.b32.xlu0 %v416_v50, %s19479_s22  ;;  %v306_v49 = vmul.f32 %v19672_v40, %v19738_v63  ;;  %v417_v50 = vmul.f32 %v19682_v43, %v19733_v62 }
  0xdf   :  { %v19822_v45 = vpop.permute.xlu1 %924 }
  0xe0   :  { %434 = vrot.lane.b32.xlu1 %v406_v51, %s19479_s22  ;;  %436 = vrot.lane.b32.xlu0 %v407_v52, %s19479_s22  ;;  %v418_v51 = vmul.f32 %v19682_v43, %v19738_v63 }
  0xe4   :  { %438 = vrot.lane.b32.xlu1 %v408_v54, %s19479_s22  ;;  %440 = vrot.lane.b32.xlu0 %v409_v55, %s19479_s22  ;;  %v19836_v52 = vpop.permute.xlu1 %108  ;;  %v19838_v54 = vpop.permute.xlu0 %121  ;;  %v721_v55 = vmul.f32 %v19790_v29, %v19613_v19 }
  0xe5   :  { %23225 = vst [vmem:[#allocation27_spill] sm:$0xff] %v19838_v54 }
  0xe8   :  { %553 = vrot.lane.b32.xlu1 %v518_v56, %s19480_s23  ;;  %555 = vrot.lane.b32.xlu0 %v519_v57, %s19480_s23  ;;  %v722_v56 = vmul.f32 %v19790_v29, %v19618_v20  ;;  %v19848_v57 = vpop.permute.xlu1 %116 }
  0xec   :  { %557 = vrot.lane.b32.xlu1 %v520_v60, %s19480_s23  ;;  %559 = vrot.lane.b32.xlu0 %v521_v61, %s19480_s23  ;;  %v19850_v60 = vpop.permute.xlu0 %103  ;;  %v723_v61 = vmul.f32 %v19790_v29, %v19631_v26 }
  0xf0   :  { %246 = vrot.lane.b32.xlu1 %v207_v1, %s19477_s0  ;;  %248 = vrot.lane.b32.xlu0 %v208_v2, %s19477_s0  ;;  %v724_v1 = vmul.f32 %v19790_v29, %v19636_v27 }
  0xf4   :  { %539 = vrot.lane.b32.xlu1 %v511_v3, %s19480_s23  ;;  %541 = vrot.lane.b32.xlu0 %v512_v4, %s19480_s23  ;;  %v833_v4 = vmul.f32 %v19804_v37, %v19613_v19 }
  0xf8   :  { %543 = vrot.lane.b32.xlu1 %v513_v5, %s19480_s23  ;;  %545 = vrot.lane.b32.xlu0 %v514_v6, %s19480_s23  ;;  %v834_v5 = vmul.f32 %v19804_v37, %v19618_v20 }
  0xfc   :  { %658 = vrot.lane.b32.xlu1 %v623_v8, %s19481_s24  ;;  %660 = vrot.lane.b32.xlu0 %v624_v9, %s19481_s24  ;;  %v835_v9 = vmul.f32 %v19804_v37, %v19631_v26 }
 0x100   :  { %662 = vrot.lane.b32.xlu1 %v625_v10, %s19481_s24  ;;  %664 = vrot.lane.b32.xlu0 %v626_v11, %s19481_s24  ;;  %v836_v10 = vmul.f32 %v19804_v37, %v19636_v27 }
 0x104   :  { %232 = vrot.lane.b32.xlu1 %v200_v12, %s19477_s0  ;;  %234 = vrot.lane.b32.xlu0 %v201_v13, %s19477_s0  ;;  %v410_v13 = vmul.f32 %v19696_v48, %v19733_v62 }
 0x108   :  { %351 = vrot.lane.b32.xlu1 %v312_v25, %s19478_s3  ;;  %353 = vrot.lane.b32.xlu0 %v313_v28, %s19478_s3  ;;  %v411_v25 = vmul.f32 %v19696_v48, %v19738_v63 }
 0x10c   :  { %644 = vrot.lane.b32.xlu1 %v616_v31, %s19481_s24  ;;  %646 = vrot.lane.b32.xlu0 %v617_v32, %s19481_s24  ;;  %v522_v32 = vmul.f32 %v19710_v53, %v19733_v62 }
 0x110   :  { %648 = vrot.lane.b32.xlu1 %v618_v34, %s19481_s24  ;;  %650 = vrot.lane.b32.xlu0 %v619_v36, %s19481_s24  ;;  %v523_v34 = vmul.f32 %v19710_v53, %v19738_v63 }
 0x114   :  { %763 = vrot.lane.b32.xlu1 %v728_v38, %s19482_s25  ;;  %765 = vrot.lane.b32.xlu0 %v729_v39, %s19482_s25  ;;  %v826_v39 = vmul.f32 %v19824_v46, %v19613_v19 }
 0x118   :  { %767 = vrot.lane.b32.xlu1 %v730_v42, %s19482_s25  ;;  %769 = vrot.lane.b32.xlu0 %v731_v44, %s19482_s25  ;;  %v827_v42 = vmul.f32 %v19824_v46, %v19618_v20 }
 0x11c   :  { %337 = vrot.lane.b32.xlu1 %v305_v47, %s19478_s3  ;;  %339 = vrot.lane.b32.xlu0 %v306_v49, %s19478_s3  ;;  %v828_v49 = vmul.f32 %v19824_v46, %v19631_v26 }
 0x120   :  { %456 = vrot.lane.b32.xlu1 %v417_v50, %s19479_s22  ;;  %458 = vrot.lane.b32.xlu0 %v418_v51, %s19479_s22  ;;  %v829_v50 = vmul.f32 %v19824_v46, %v19636_v27 }
 0x124   :  { %749 = vrot.lane.b32.xlu1 %v721_v55, %s19482_s25  ;;  %751 = vrot.lane.b32.xlu0 %v722_v56, %s19482_s25  ;;  %v938_v56 = vmul.f32 %v19814_v41, %v19613_v19 }
 0x128   :  { %753 = vrot.lane.b32.xlu1 %v723_v61, %s19482_s25  ;;  %755 = vrot.lane.b32.xlu0 %v724_v1, %s19482_s25  ;;  %v939_v61 = vmul.f32 %v19814_v41, %v19618_v20  ;;  %v23074_v1 = vsub.s32 6, %v19601_v15 }
 0x12a   :  { %v19858_v2 = vpop.permute.xlu1 %238  ;;  %v19860_v3 = vpop.permute.xlu0 %240 }
 0x12c   :  { %868 = vrot.lane.b32.xlu1 %v833_v4, %s19483_s26  ;;  %870 = vrot.lane.b32.xlu0 %v834_v5, %s19483_s26 }
 0x12e   :  { %v19868_v6 = vpop.permute.xlu1 %242  ;;  %v19870_v8 = vpop.permute.xlu0 %244 }
 0x12f   :  { %23226 = vst [vmem:[#allocation28_spill] sm:$0xff] %v19870_v8 }
 0x130   :  { %872 = vrot.lane.b32.xlu1 %v835_v9, %s19483_s26  ;;  %874 = vrot.lane.b32.xlu0 %v836_v10, %s19483_s26  ;;  %v940_v9 = vmul.f32 %v19814_v41, %v19631_v26  ;;  %v941_v10 = vmul.f32 %v19814_v41, %v19636_v27 }
 0x132   :  { %v19878_v11 = vpop.permute.xlu1 %224  ;;  %v19880_v12 = vpop.permute.xlu0 %226 }
 0x134   :  { %442 = vrot.lane.b32.xlu1 %v410_v13, %s19479_s22  ;;  %444 = vrot.lane.b32.xlu0 %v411_v25, %s19479_s22  ;;  %v19940_v13 = vrot.slane %v19608_v18, %v23074_v1 }
 0x136   :  { %v19888_v28 = vpop.permute.xlu1 %228  ;;  %v19890_v31 = vpop.permute.xlu0 %230  ;;  %23227 = vst [vmem:[#allocation29_spill] sm:$0xff] %v19940_v13 }
 0x138   :  { %561 = vrot.lane.b32.xlu1 %v522_v32, %s19480_s23  ;;  %563 = vrot.lane.b32.xlu0 %v523_v34, %s19480_s23  ;;  %v209_v34 = vmul.f32 %v19622_v23, %v19940_v13 }
 0x13a   :  { %v19898_v36 = vpop.permute.xlu1 %343  ;;  %v19900_v38 = vpop.permute.xlu0 %345 }
 0x13c   :  { %854 = vrot.lane.b32.xlu1 %v826_v39, %s19483_s26  ;;  %856 = vrot.lane.b32.xlu0 %v827_v42, %s19483_s26  ;;  %v515_v39 = vmul.f32 %v19742_v0, %v19733_v62 }
 0x13e   :  { %v19908_v44 = vpop.permute.xlu1 %347  ;;  %v19910_v47 = vpop.permute.xlu0 %349 }
 0x140   :  { %858 = vrot.lane.b32.xlu1 %v828_v49, %s19483_s26  ;;  %860 = vrot.lane.b32.xlu0 %v829_v50, %s19483_s26  ;;  %v516_v49 = vmul.f32 %v19742_v0, %v19738_v63  ;;  %v627_v50 = vmul.f32 %v19760_v7, %v19733_v62 }
 0x142   :  { %v19918_v51 = vpop.permute.xlu1 %329  ;;  %v19920_v55 = vpop.permute.xlu0 %331 }
 0x144   :  { %973 = vrot.lane.b32.xlu1 %v938_v56, %s19484_s27  ;;  %975 = vrot.lane.b32.xlu0 %v939_v61, %s19484_s27  ;;  %v628_v61 = vmul.f32 %v19760_v7, %v19738_v63 }
 0x146   :  { %v19929_v4 = vpop.permute.xlu1 %333  ;;  %v19931_v5 = vpop.permute.xlu0 %335 }
 0x148   :  { %977 = vrot.lane.b32.xlu1 %v940_v9, %s19484_s27  ;;  %979 = vrot.lane.b32.xlu0 %v941_v10, %s19484_s27  ;;  %v931_v9 = vmul.f32 %v19822_v45, %v19613_v19 }
 0x14a   :  { %v19944_v25 = vpop.permute.xlu1 %448  ;;  %v19946_v32 = vpop.permute.xlu0 %450 }
 0x14c   :  { %250 = vrot.lane.b32.xlu1 %v209_v34, %s19477_s0  ;;  %547 = vrot.lane.b32.xlu0 %v515_v39, %s19480_s23  ;;  %v932_v39 = vmul.f32 %v19822_v45, %v19618_v20 }
 0x14e   :  { %v19954_v18 = vpop.permute.xlu1 %452  ;;  %v19956_v42 = vpop.permute.xlu0 %454 }
 0x150   :  { %549 = vrot.lane.b32.xlu1 %v516_v49, %s19480_s23  ;;  %666 = vrot.lane.b32.xlu0 %v627_v50, %s19481_s24  ;;  %v933_v49 = vmul.f32 %v19822_v45, %v19631_v26 }
 0x152   :  { %v19964_v23 = vpop.permute.xlu1 %434  ;;  %v19966_v56 = vpop.permute.xlu0 %436 }
 0x154   :  { %668 = vrot.lane.b32.xlu1 %v628_v61, %s19481_s24  ;;  %959 = vrot.lane.b32.xlu0 %v931_v9, %s19484_s27  ;;  %v934_v61 = vmul.f32 %v19822_v45, %v19636_v27  ;;  %v202_v9 = vmul.f32 %v19644_v30, %v19940_v13 }
 0x156   :  { %v19974_v10 = vpop.permute.xlu1 %438  ;;  %v19976_v34 = vpop.permute.xlu0 %440 }
 0x158   :  { %961 = vrot.lane.b32.xlu1 %v932_v39, %s19484_s27  ;;  %963 = vrot.lane.b32.xlu0 %v933_v49, %s19484_s27  ;;  %v314_v39 = vmul.f32 %v19658_v35, %v19940_v13  ;;  %v620_v49 = vmul.f32 %v19780_v24, %v19733_v62 }
 0x15a   :  { %v19984_v50 = vpop.permute.xlu1 %553  ;;  %v19986_v14 = vpop.permute.xlu0 %555 }
 0x15c   :  { %965 = vrot.lane.b32.xlu1 %v934_v61, %s19484_s27  ;;  %236 = vrot.lane.b32.xlu0 %v202_v9, %s19477_s0  ;;  %v621_v61 = vmul.f32 %v19780_v24, %v19738_v63  ;;  %v732_v9 = vmul.f32 %v19798_v33, %v19733_v62 }
 0x15e   :  { %v19994_v59 = vpop.permute.xlu1 %557  ;;  %v19996_v1 = vpop.permute.xlu0 %559 }
 0x160   :  { %355 = vrot.lane.b32.xlu1 %v314_v39, %s19478_s3  ;;  %652 = vrot.lane.b32.xlu0 %v620_v49, %s19481_s24  ;;  %v733_v39 = vmul.f32 %v19798_v33, %v19738_v63  ;;  %v307_v49 = vmul.f32 %v19672_v40, %v19940_v13 }
 0x162   :  { %v20004_v58 = vpop.permute.xlu1 %246  ;;  %v20006_v30 = vpop.permute.xlu0 %248 }
 0x163   :  { %23228 = vst [vmem:[#allocation30_spill] sm:$0xff] %v20004_v58  ;;  %23229 = vst [vmem:[#allocation31_spill] sm:$0xff] %v20006_v30 }
 0x164   :  { %654 = vrot.lane.b32.xlu1 %v621_v61, %s19481_s24  ;;  %771 = vrot.lane.b32.xlu0 %v732_v9, %s19482_s25  ;;  %v419_v61 = vmul.f32 %v19682_v43, %v19940_v13  ;;  %v725_v9 = vmul.f32 %v19790_v29, %v19733_v62 }
 0x166   :  { %v20014_v35 = vpop.permute.xlu1 %539  ;;  %v20016_v22 = vpop.permute.xlu0 %541 }
 0x168   :  { %773 = vrot.lane.b32.xlu1 %v733_v39, %s19482_s25  ;;  %341 = vrot.lane.b32.xlu0 %v307_v49, %s19478_s3  ;;  %v726_v39 = vmul.f32 %v19790_v29, %v19738_v63  ;;  %v837_v49 = vmul.f32 %v19804_v37, %v19733_v62 }
 0x16a   :  { %v20024_v21 = vpop.permute.xlu1 %543  ;;  %v20026_v17 = vpop.permute.xlu0 %545 }
 0x16b   :  { %23230 = vst [vmem:[#allocation32_spill] sm:$0xff] %v20026_v17 }
 0x16c   :  { %460 = vrot.lane.b32.xlu1 %v419_v61, %s19479_s22  ;;  %757 = vrot.lane.b32.xlu0 %v725_v9, %s19482_s25  ;;  %v838_v61 = vmul.f32 %v19804_v37, %v19738_v63  ;;  %v412_v9 = vmul.f32 %v19696_v48, %v19940_v13 }
 0x16e   :  { %v20034_v16 = vpop.permute.xlu1 %658  ;;  %v20036_v40 = vpop.permute.xlu0 %660 }
 0x170   :  { %759 = vrot.lane.b32.xlu1 %v726_v39, %s19482_s25  ;;  %876 = vrot.lane.b32.xlu0 %v837_v49, %s19483_s26  ;;  %v524_v39 = vmul.f32 %v19710_v53, %v19940_v13  ;;  %v830_v49 = vmul.f32 %v19824_v46, %v19733_v62 }
 0x172   :  { %v20044_v43 = vpop.permute.xlu1 %662  ;;  %v20046_v30 = vpop.permute.xlu0 %664 }
 0x174   :  { %878 = vrot.lane.b32.xlu1 %v838_v61, %s19483_s26  ;;  %446 = vrot.lane.b32.xlu0 %v412_v9, %s19479_s22  ;;  %v831_v61 = vmul.f32 %v19824_v46, %v19738_v63  ;;  %v942_v9 = vmul.f32 %v19814_v41, %v19733_v62 }
 0x176   :  { %v20054_v58 = vpop.permute.xlu1 %232  ;;  %v20056_v27 = vpop.permute.xlu0 %234 }
 0x177   :  { %23231 = vst [vmem:[#allocation33_spill] sm:$0xff] %v20054_v58  ;;  %23232 = vst [vmem:[#allocation34_spill] sm:$0xff] %v20056_v27 }
 0x178   :  { %565 = vrot.lane.b32.xlu1 %v524_v39, %s19480_s23  ;;  %862 = vrot.lane.b32.xlu0 %v830_v49, %s19483_s26  ;;  %v943_v39 = vmul.f32 %v19814_v41, %v19738_v63  ;;  %v517_v49 = vmul.f32 %v19742_v0, %v19940_v13 }
 0x17a   :  { %v20064_v17 = vpop.permute.xlu1 %351  ;;  %v20066_v48 = vpop.permute.xlu0 %353 }
 0x17b   :  { %23233 = vst [vmem:[#allocation35_spill] sm:$0xff] %v20064_v17  ;;  %23234 = vst [vmem:[#allocation36_spill] sm:$0xff] %v20066_v48 }
 0x17c   :  { %864 = vrot.lane.b32.xlu1 %v831_v61, %s19483_s26  ;;  %981 = vrot.lane.b32.xlu0 %v942_v9, %s19484_s27  ;;  %v629_v61 = vmul.f32 %v19760_v7, %v19940_v13  ;;  %v935_v9 = vmul.f32 %v19822_v45, %v19733_v62 }
 0x17e   :  { %v20074_v53 = vpop.permute.xlu1 %644  ;;  %v20076_v27 = vpop.permute.xlu0 %646 }
 0x180   :  { %983 = vrot.lane.b32.xlu1 %v943_v39, %s19484_s27  ;;  %551 = vrot.lane.b32.xlu0 %v517_v49, %s19480_s23  ;;  %v936_v39 = vmul.f32 %v19822_v45, %v19738_v63  ;;  %v622_v49 = vmul.f32 %v19780_v24, %v19940_v13 }
 0x182   :  { %v20084_v58 = vpop.permute.xlu1 %648  ;;  %v20086_v48 = vpop.permute.xlu0 %650 }
 0x183   :  { %23235 = vst [vmem:[#allocation37_spill] sm:$0xff] %v20086_v48  ;;  %v169_v48 = vmul.f32 %v19631_v26, %v19838_v54 }
 0x184   :  { %670 = vrot.lane.b32.xlu1 %v629_v61, %s19481_s24  ;;  %967 = vrot.lane.b32.xlu0 %v935_v9, %s19484_s27  ;;  %v734_v61 = vmul.f32 %v19798_v33, %v19940_v13  ;;  %v727_v9 = vmul.f32 %v19790_v29, %v19940_v13 }
 0x186   :  { %v20094_v17 = vpop.permute.xlu1 %763  ;;  %v20096_v0 = vpop.permute.xlu0 %765 }
 0x188   :  { %969 = vrot.lane.b32.xlu1 %v936_v39, %s19484_s27  ;;  %656 = vrot.lane.b32.xlu0 %v622_v49, %s19481_s24  ;;  %v839_v39 = vmul.f32 %v19804_v37, %v19940_v13  ;;  %v832_v49 = vmul.f32 %v19824_v46, %v19940_v13 }
 0x18a   :  { %v20104_v7 = vpop.permute.xlu1 %767  ;;  %v20106_v62 = vpop.permute.xlu0 %769 }
 0x18c   :  { %775 = vrot.lane.b32.xlu1 %v734_v61, %s19482_s25  ;;  %761 = vrot.lane.b32.xlu0 %v727_v9, %s19482_s25  ;;  %v944_v61 = vmul.f32 %v19814_v41, %v19940_v13  ;;  %v937_v9 = vmul.f32 %v19822_v45, %v19940_v13 }
 0x18e   :  { %v20114_v63 = vpop.permute.xlu1 %337  ;;  %v20116_v24 = vpop.permute.xlu0 %339 }
 0x18f   :  { %23236 = vst [vmem:[#allocation38_spill] sm:$0xff] %v20114_v63  ;;  %23237 = vst [vmem:[#allocation39_spill] sm:$0xff] %v20116_v24 }
 0x190   :  { %880 = vrot.lane.b32.xlu1 %v839_v39, %s19483_s26  ;;  %866 = vrot.lane.b32.xlu0 %v832_v49, %s19483_s26 }
 0x192   :  { %v20124_v33 = vpop.permute.xlu1 %456  ;;  %v20126_v29 = vpop.permute.xlu0 %458 }
 0x193   :  { %23238 = vst [vmem:[#allocation40_spill] sm:$0xff] %v20124_v33  ;;  %23239 = vst [vmem:[#allocation41_spill] sm:$0xff] %v20126_v29  ;;  %v23100_v29 = vmov 0.0   ;;  %v259_v33 = vsel %vm23124_vm0, %v19858_v2, %v19860_v3  ;;  %v260_v2 = vsel %vm23124_vm0, %v19860_v3, %v19868_v6  ;;  %v366_v3 = vsel %vm23122_vm1, %v19908_v44, %v19910_v47 }
 0x194   :  { %985 = vrot.lane.b32.xlu1 %v944_v61, %s19484_s27  ;;  %971 = vrot.lane.b32.xlu0 %v937_v9, %s19484_s27  ;;  %1100 = vst [vmem:[#allocation2 + $0x38] sm:$0xff] %v23100_v29  ;;  %1092 = vst [vmem:[#allocation2] sm:$0xff] %v23100_v29  ;;  %v167_v61 = vmul.f32 %v19613_v19, %v19838_v54 }
 0x195   :  { %1317 = vmatprep.mubr.f32.mxu1 %v23100_v29  ;;  %1311 = vmatprep.mubr.f32.mxu0 %v23100_v29  ;;  %v168_v29 = vmul.f32 %v19618_v20, %v19838_v54  ;;  %v469_v54 = vsel %vm23114_vm2, %v19944_v25, %v19946_v32 }
 0x196   :  { %v20134_v37 = vpop.permute.xlu1 %749  ;;  %v20136_v46 = vpop.permute.xlu0 %751 }
 0x197   :  { %23240 = vst [vmem:[#allocation42_spill] sm:$0xff] %v20134_v37 }
 0x19a   :  { %v20138_v39 = vpop.permute.xlu1 %753  ;;  %v20140_v49 = vpop.permute.xlu0 %755 }
 0x19b   :  { %23241 = vst [vmem:[#allocation43_spill] sm:$0xff] %v20138_v39  ;;  %23242 = vst [vmem:[#allocation44_spill] sm:$0xff] %v20140_v49  ;;  %v181_v49 = vadd.f32 %v167_v61, %v19836_v52  ;;  %v364_v39 = vsel %vm23122_vm1, %v19898_v36, %v19900_v38  ;;  %v261_v61 = vsel %vm23124_vm0, %v19868_v6, %v19870_v8 }
 0x19c   :  { %v182_v36 = vadd.f32 %v168_v29, %v19836_v52  ;;  %v574_v6 = vsel %vm23113_vm3, %v19984_v50, %v19986_v14  ;;  %v679_v50 = vsel %vm672_vm4, %v20034_v16, %v20036_v40 }
 0x19e   :  { %v869_v24 = vpop.permute.xlu1 %868  ;;  %v20142_v63 = vpop.permute.xlu0 %870 }
 0x1a2   :  { %v20148_v41 = vpop.permute.xlu1 %872  ;;  %v20150_v45 = vpop.permute.xlu0 %874 }
 0x1a6   :  { %v20154_v9 = vpop.permute.xlu1 %442  ;;  %v20156_v13 = vpop.permute.xlu0 %444 }
 0x1a7   :  { %23243 = vst [vmem:[#allocation45_spill] sm:$0xff] %v20154_v9  ;;  %23244 = vst [vmem:[#allocation46_spill] sm:$0xff] %v20156_v13  ;;  %v286_v9 = vadd.f32 %v259_v33, %v181_v49  ;;  %v183_v33 = vadd.f32 %v169_v48, %v19836_v52 }
 0x1a9   :  { %v391_v49 = vadd.f32 %v364_v39, %v286_v9  ;;  %v288_v25 = vadd.f32 %v261_v61, %v183_v33 }
 0x1aa   :  { %v20169_v13 = vpop.permute.xlu1 %561  ;;  %v20171_v37 = vpop.permute.xlu0 %563 }
 0x1ab   :  { %23245 = vst [vmem:[#allocation47_spill] sm:$0xff] %v20169_v13  ;;  %23246 = vst [vmem:[#allocation48_spill] sm:$0xff] %v20171_v37  ;;  %v365_v37 = vsel %vm23122_vm1, %v19900_v38, %v19908_v44  ;;  %v287_v13 = vadd.f32 %v260_v2, %v182_v36  ;;  %v496_v8 = vadd.f32 %v469_v54, %v391_v49 }
 0x1ac   :  { %v470_v38 = vsel %vm23114_vm2, %v19946_v32, %v19954_v18  ;;  %v471_v44 = vsel %vm23114_vm2, %v19954_v18, %v19956_v42  ;;  %v393_v9 = vadd.f32 %v366_v3, %v288_v25  ;;  %v575_v2 = vsel %vm23113_vm3, %v19986_v14, %v19994_v59 }
 0x1ad   :  { %v392_v39 = vadd.f32 %v365_v37, %v287_v13  ;;  %v601_v54 = vadd.f32 %v574_v6, %v496_v8  ;;  %v576_v32 = vsel %vm23113_vm3, %v19994_v59, %v19996_v1  ;;  %v784_v18 = vsel %vm777_vm5, %v20094_v17, %v20096_v0 }
 0x1ae   :  { %v20193_v29 = vpop.permute.xlu1 %854  ;;  %v20195_v48 = vpop.permute.xlu0 %856  ;;  %v498_v36 = vadd.f32 %v471_v44, %v393_v9  ;;  %v680_v8 = vsel %vm672_vm4, %v20036_v40, %v20044_v43  ;;  %v681_v14 = vsel %vm672_vm4, %v20044_v43, %v20046_v30  ;;  %v889_v59 = vsel %vm882_vm6, %v869_v24, %v20142_v63  ;;  %v20240_v24 = vld [vmem:[%s23061_s1] sm:$0x7f]  ;;  %s19486_s1 = smov 6  }
 0x1af   :  { %v497_v61 = vadd.f32 %v470_v38, %v392_v39  ;;  %v706_v33 = vadd.f32 %v679_v50, %v601_v54  ;;  %v160_v3 = vmul.f32 %v19613_v19, %v19848_v57  ;;  %v161_v6 = vmul.f32 %v19618_v20, %v19848_v57 }
 0x1b0   :  { %v603_v17 = vadd.f32 %v576_v32, %v498_v36  ;;  %v785_v40 = vsel %vm777_vm5, %v20096_v0, %v20104_v7  ;;  %v786_v43 = vsel %vm777_vm5, %v20104_v7, %v20106_v62  ;;  %v890_v20 = vsel %vm882_vm6, %v20142_v63, %v20148_v41 }
 0x1b1   :  { %v602_v37 = vadd.f32 %v575_v2, %v497_v61  ;;  %v811_v49 = vadd.f32 %v784_v18, %v706_v33  ;;  %v891_v0 = vsel %vm882_vm6, %v20148_v41, %v20150_v45  ;;  %v23247_v2 = vsub.s32 0, %v19601_v15 }
 0x1b2   :  { %v20215_v16 = vpop.permute.xlu1 %858  ;;  %v20217_v13 = vpop.permute.xlu0 %860  ;;  %v708_v38 = vadd.f32 %v681_v14, %v603_v17  ;;  %v174_v18 = vadd.f32 %v160_v3, %v19850_v60  ;;  %v175_v61 = vadd.f32 %v161_v6, %v19850_v60  ;;  %v162_v63 = vmul.f32 %v19631_v26, %v19848_v57 }
 0x1b3   :  { %v707_v25 = vadd.f32 %v680_v8, %v602_v37  ;;  %v916_v44 = vadd.f32 %v889_v59, %v811_v49  ;;  %v20252_v32 = vrot.slane %v20240_v24, %v23247_v2  ;;  %v253_v41 = vsel %vm23124_vm0, %v19878_v11, %v19880_v12 }
 0x1b4   :  { %v813_v9 = vadd.f32 %v786_v43, %v708_v38  ;;  %v254_v37 = vsel %vm23124_vm0, %v19880_v12, %v19888_v28  ;;  %v23248_v49 = vsub.s32 1, %v19601_v15  ;;  %v23249_v43 = vsub.s32 2, %v19601_v15 }
 0x1b5   :  { %v812_v39 = vadd.f32 %v785_v40, %v707_v25  ;;  %v358_v12 = vsel %vm23122_vm1, %v19918_v51, %v19920_v55  ;;  %v359_v38 = vsel %vm23122_vm1, %v19920_v55, %v19929_v4  ;;  %v255_v51 = vsel %vm23124_vm0, %v19888_v28, %v19890_v31 }
 0x1b6   :  { %v974_v19 = vpop.permute.xlu1 %973  ;;  %v976_v50 = vpop.permute.xlu0 %975  ;;  %v918_v33 = vadd.f32 %v891_v0, %v813_v9  ;;  %v20270_v26 = vrot.slane %v20240_v24, %v23248_v49  ;;  %v20278_v25 = vrot.slane %v20240_v24, %v23249_v43  ;;  %v463_v55 = vsel %vm23114_vm2, %v19964_v23, %v19966_v56  ;;  %v23250_v49 = vld [vmem:[#allocation32_spill] sm:$0xff] }
 0x1b7   :  { %v994_v7 = vsel %vm987_vm7, %v974_v19, %v976_v50  ;;  %v917_v36 = vadd.f32 %v890_v20, %v812_v39  ;;  %v280_v19 = vadd.f32 %v254_v37, %v175_v61  ;;  %v176_v39 = vadd.f32 %v162_v63, %v19850_v60 }
 0x1b8   :  { %v1021_v54 = vadd.f32 %v994_v7, %v916_v44  ;;  %v279_v44 = vadd.f32 %v253_v41, %v174_v18  ;;  %v464_v9 = vsel %vm23114_vm2, %v19966_v56, %v19974_v10  ;;  %v360_v63 = vsel %vm23122_vm1, %v19929_v4, %v19931_v5 }
 0x1b9   :  { %v385_v2 = vadd.f32 %v359_v38, %v280_v19  ;;  %v568_v28 = vsel %vm23113_vm3, %v20014_v35, %v20016_v22  ;;  %v569_v23 = vsel %vm23113_vm3, %v20016_v22, %v20024_v21  ;;  %v281_v41 = vadd.f32 %v255_v51, %v176_v39  ;;  %v23254_v51 = vld [vmem:[#allocation44_spill] sm:$0xff] }
 0x1ba   :  { %v1035_v8 = vmax.f32 %v1021_v54, 0.0  ;;  %v978_v14 = vpop.permute.xlu1 %977  ;;  %v20261_v59 = vpop.permute.xlu0 %979  ;;  %v384_v54 = vadd.f32 %v358_v12, %v279_v44  ;;  %v465_v4 = vsel %vm23114_vm2, %v19974_v10, %v19976_v34  ;;  %v673_v35 = vsel %vm672_vm4, %v20074_v53, %v20076_v27  ;;  %v23252_v10 = vld [vmem:[#allocation43_spill] sm:$0xff]  ;;  %v23253_v44 = vld [vmem:[#allocation37_spill] sm:$0xff] }
 0x1bb   :  { %v995_v17 = vsel %vm987_vm7, %v976_v50, %v978_v14  ;;  %v996_v11 = vsel %vm987_vm7, %v978_v14, %v20261_v59  ;;  %v674_v22 = vsel %vm672_vm4, %v20076_v27, %v20084_v58  ;;  %v386_v14 = vadd.f32 %v360_v63, %v281_v41 }
 0x1bc   :  { %v1085_v3 = vmul.f32 %v20252_v32, %v1035_v8  ;;  %v1022_v6 = vadd.f32 %v995_v17, %v917_v36  ;;  %v1023_v40 = vadd.f32 %v996_v11, %v918_v33  ;;  %v489_v56 = vadd.f32 %v463_v55, %v384_v54 }
 0x1bd   :  { %v490_v36 = vadd.f32 %v464_v9, %v385_v2  ;;  %v570_v11 = vsel %vm23113_vm3, %v20024_v21, %v23250_v49  ;;  %v491_v53 = vadd.f32 %v465_v4, %v386_v14  ;;  %v675_v19 = vsel %vm672_vm4, %v20084_v58, %v23253_v44 }
 0x1be   :  { %v1036_v50 = vmax.f32 %v1022_v6, 0.0  ;;  %v1037_v20 = vmax.f32 %v1023_v40, 0.0  ;;  %v20286_v0 = vpop.permute.xlu1 %250  ;;  %v20288_v7 = vpop.permute.xlu0 %547  ;;  %1135 = vrot.lane.b32.xlu1 %v1085_v3, %s19486_s1  ;;  %v594_v37 = vadd.f32 %v568_v28, %v489_v56  ;;  %v23251_v3 = vld [vmem:[#allocation42_spill] sm:$0xff]  ;;  %v779_v40 = vsel %vm777_vm5, %v20136_v46, %v23252_v10 }
 0x1bf   :  { %v595_v17 = vadd.f32 %v569_v23, %v490_v36  ;;  %v778_v6 = vsel %vm777_vm5, %v23251_v3, %v20136_v46  ;;  %v883_v21 = vsel %vm882_vm6, %v20193_v29, %v20195_v48  ;;  %v780_v55 = vsel %vm777_vm5, %v23252_v10, %v23254_v51 }
 0x1c0   :  { %v1086_v18 = vmul.f32 %v20270_v26, %v1036_v50  ;;  %v1087_v61 = vmul.f32 %v20278_v25, %v1037_v20  ;;  %v699_v43 = vadd.f32 %v673_v35, %v594_v37  ;;  %v884_v50 = vsel %vm882_vm6, %v20195_v48, %v20215_v16 }
 0x1c1   :  { %v700_v12 = vadd.f32 %v674_v22, %v595_v17  ;;  %v596_v20 = vadd.f32 %v570_v11, %v491_v53  ;;  %v885_v29 = vsel %vm882_vm6, %v20215_v16, %v20217_v13  ;;  %v23255_v53 = vld [vmem:[#allocation27_spill] sm:$0xff] }
 0x1c2   :  { %v20312_v33 = vpop.permute.xlu1 %549  ;;  %v20314_v8 = vpop.permute.xlu0 %666  ;;  %1137 = vrot.lane.b32.xlu0 %v1086_v18, %s19486_s1  ;;  %1139 = vrot.lane.b32.xlu1 %v1087_v61, %s19486_s1  ;;  %v804_v46 = vadd.f32 %v778_v6, %v699_v43  ;;  %v23256_v43 = vld [vmem:[#allocation24_spill] sm:$0xff] }
 0x1c3   :  { %v805_v39 = vadd.f32 %v779_v40, %v700_v12  ;;  %v701_v9 = vadd.f32 %v675_v19, %v596_v20  ;;  %v170_v12 = vmul.f32 %v23256_v43, %v23255_v53 }
 0x1c4   :  { %v909_v54 = vadd.f32 %v883_v21, %v804_v46  ;;  %v23257_v21 = vld [vmem:[#allocation30_spill] sm:$0xff]  ;;  %v23259_v46 = vld [vmem:[#allocation25_spill] sm:$0xff] }
 0x1c5   :  { %v910_v2 = vadd.f32 %v884_v50, %v805_v39  ;;  %v806_v63 = vadd.f32 %v780_v55, %v701_v9  ;;  %v23258_v50 = vld [vmem:[#allocation28_spill] sm:$0xff]  ;;  %v184_v20 = vadd.f32 %v170_v12, %v19836_v52  ;;  %v171_v39 = vmul.f32 %v23259_v46, %v23255_v53  ;;  %v23260_v55 = vld [vmem:[#allocation35_spill] sm:$0xff] }
 0x1c6   :  { %v20336_v38 = vpop.permute.xlu1 %668  ;;  %v960_v27 = vpop.permute.xlu0 %959  ;;  %v367_v9 = vsel %vm23122_vm1, %v19910_v47, %v23260_v55  ;;  %v682_v12 = vsel %vm672_vm4, %v20046_v30, %v20314_v8 }
 0x1c7   :  { %v911_v41 = vadd.f32 %v885_v29, %v806_v63  ;;  %v185_v63 = vadd.f32 %v171_v39, %v19836_v52 }
 0x1ca   :  { %v962_v18 = vpop.permute.xlu1 %961  ;;  %v964_v58 = vpop.permute.xlu0 %963 }
 0x1cb   :  { %v988_v61 = vsel %vm987_vm7, %v960_v27, %v962_v18  ;;  %v989_v48 = vsel %vm987_vm7, %v962_v18, %v964_v58 }
 0x1cc   :  { %v1014_v28 = vadd.f32 %v988_v61, %v909_v54  ;;  %v1015_v23 = vadd.f32 %v989_v48, %v910_v2  ;;  %v23262_v61 = vld [vmem:[#allocation40_spill] sm:$0xff] }
 0x1cd   :  { %v472_v48 = vsel %vm23114_vm2, %v19956_v42, %v23262_v61  ;;  %v23265_v42 = vld [vmem:[#allocation33_spill] sm:$0xff] }
 0x1ce   :  { %v1028_v56 = vmax.f32 %v1014_v28, 0.0  ;;  %v1029_v36 = vmax.f32 %v1015_v23, 0.0  ;;  %v20355_v4 = vpop.permute.xlu1 %965  ;;  %v20357_v35 = vpop.permute.xlu0 %236  ;;  %v163_v28 = vmul.f32 %v23256_v43, %v19848_v57 }
 0x1cf   :  { %v990_v22 = vsel %vm987_vm7, %v964_v58, %v20355_v4  ;;  %v23261_v58 = vld [vmem:[#allocation31_spill] sm:$0xff] }
 0x1d0   :  { %v1078_v14 = vmul.f32 %v20252_v32, %v1028_v56  ;;  %v1079_v16 = vmul.f32 %v20270_v26, %v1029_v36  ;;  %v1016_v37 = vadd.f32 %v990_v22, %v911_v41  ;;  %v263_v29 = vsel %vm23124_vm0, %v23257_v21, %v23261_v58  ;;  %v23263_v41 = vld [vmem:[#allocation36_spill] sm:$0xff]  ;;  %v23264_v56 = vld [vmem:[#allocation47_spill] sm:$0xff] }
 0x1d1   :  { %v368_v47 = vsel %vm23122_vm1, %v23260_v55, %v23263_v41  ;;  %v577_v36 = vsel %vm23113_vm3, %v19996_v1, %v23264_v56  ;;  %v290_v22 = vadd.f32 %v263_v29, %v185_v63  ;;  %v177_v1 = vadd.f32 %v163_v28, %v19850_v60 }
 0x1d2   :  { %v1030_v17 = vmax.f32 %v1016_v37, 0.0  ;;  %v20363_v11 = vpop.permute.xlu1 %355  ;;  %v20365_v3 = vpop.permute.xlu0 %652  ;;  %1123 = vrot.lane.b32.xlu1 %v1079_v16, %s19486_s1  ;;  %1121 = vrot.lane.b32.xlu0 %v1078_v14, %s19486_s1 }
 0x1d4   :  { %v1080_v6 = vmul.f32 %v20278_v25, %v1030_v17  ;;  %v262_v25 = vsel %vm23124_vm0, %v23258_v50, %v23257_v21  ;;  %v256_v17 = vsel %vm23124_vm0, %v19890_v31, %v23265_v42  ;;  %v164_v21 = vmul.f32 %v23259_v46, %v19848_v57  ;;  %v23268_v31 = vld [vmem:[#allocation48_spill] sm:$0xff]  ;;  %v23270_v46 = vld [vmem:[#allocation29_spill] sm:$0xff] }
 0x1d5   :  { %v289_v54 = vadd.f32 %v262_v25, %v184_v20  ;;  %v395_v50 = vadd.f32 %v368_v47, %v290_v22  ;;  %v23267_v20 = vld [vmem:[#allocation38_spill] sm:$0xff]  ;;  %v578_v55 = vsel %vm23113_vm3, %v23264_v56, %v23268_v31  ;;  %v282_v29 = vadd.f32 %v256_v17, %v177_v1  ;;  %v23272_v56 = vld [vmem:[#allocation45_spill] sm:$0xff] }
 0x1d6   :  { %v20370_v10 = vpop.permute.xlu1 %654  ;;  %v772_v40 = vpop.permute.xlu0 %771  ;;  %1125 = vrot.lane.b32.xlu0 %v1080_v6, %s19486_s1  ;;  %v23266_v6 = vld [vmem:[#allocation41_spill] sm:$0xff]  ;;  %v361_v39 = vsel %vm23122_vm1, %v19931_v5, %v23267_v20  ;;  %v23271_v5 = vld [vmem:[#allocation34_spill] sm:$0xff] }
 0x1d7   :  { %v394_v23 = vadd.f32 %v367_v9, %v289_v54  ;;  %v473_v43 = vsel %vm23114_vm2, %v23262_v61, %v23266_v6  ;;  %v23269_v9 = vld [vmem:[#allocation26_spill] sm:$0xff]  ;;  %v787_v30 = vsel %vm777_vm5, %v20106_v62, %v772_v40  ;;  %v257_v47 = vsel %vm23124_vm0, %v23265_v42, %v23271_v5 }
 0x1d8   :  { %v172_v54 = vmul.f32 %v23269_v9, %v23255_v53  ;;  %v500_v61 = vadd.f32 %v473_v43, %v395_v50  ;;  %v683_v62 = vsel %vm672_vm4, %v20314_v8, %v20336_v38  ;;  %v23274_v8 = vsub.s32 3, %v19601_v15 }
 0x1d9   :  { %v499_v14 = vadd.f32 %v472_v48, %v394_v23  ;;  %v173_v48 = vmul.f32 %v23270_v46, %v23255_v53  ;;  %v178_v53 = vadd.f32 %v164_v21, %v19850_v60 }
 0x1da   :  { %v20373_v32 = vpop.permute.xlu1 %773  ;;  %v20375_v26 = vpop.permute.xlu0 %341  ;;  %v605_v17 = vadd.f32 %v578_v55, %v500_v61 }
 0x1db   :  { %v604_v25 = vadd.f32 %v577_v36, %v499_v14  ;;  %v466_v36 = vsel %vm23114_vm2, %v19976_v34, %v23272_v56  ;;  %v387_v14 = vadd.f32 %v361_v39, %v282_v29  ;;  %v571_v34 = vsel %vm23113_vm3, %v23250_v49, %v20288_v7 }
 0x1dc   :  { %v788_v1 = vsel %vm777_vm5, %v772_v40, %v20373_v32  ;;  %v283_v21 = vadd.f32 %v257_v47, %v178_v53  ;;  %v676_v49 = vsel %vm672_vm4, %v23253_v44, %v20365_v3  ;;  %v166_v44 = vmul.f32 %v23270_v46, %v19848_v57 }
 0x1dd   :  { %v709_v63 = vadd.f32 %v682_v12, %v604_v25  ;;  %v23273_v12 = vld [vmem:[#allocation39_spill] sm:$0xff]  ;;  %v492_v50 = vadd.f32 %v466_v36, %v387_v14  ;;  %v710_v25 = vadd.f32 %v683_v62, %v605_v17  ;;  %v23276_v46 = vsub.s32 4, %v19601_v15 }
 0x1de   :  { %v20379_v27 = vpop.permute.xlu1 %460  ;;  %v20381_v19 = vpop.permute.xlu0 %757  ;;  %v362_v42 = vsel %vm23122_vm1, %v23267_v20, %v23273_v12  ;;  %v23275_v20 = vld [vmem:[#allocation46_spill] sm:$0xff] }
 0x1df   :  { %v814_v43 = vadd.f32 %v787_v30, %v709_v63  ;;  %v467_v29 = vsel %vm23114_vm2, %v23272_v56, %v23275_v20  ;;  %v388_v63 = vadd.f32 %v362_v42, %v283_v21  ;;  %v597_v47 = vadd.f32 %v571_v34, %v492_v50 }
 0x1e0   :  { %v815_v36 = vadd.f32 %v788_v1, %v710_v25  ;;  %v165_v56 = vmul.f32 %v23269_v9, %v19848_v57  ;;  %v186_v50 = vadd.f32 %v172_v54, %v19836_v52  ;;  %v187_v25 = vadd.f32 %v173_v48, %v19836_v52 }
 0x1e1   :  { %v493_v53 = vadd.f32 %v467_v29, %v388_v63  ;;  %v180_v54 = vadd.f32 %v166_v44, %v19850_v60  ;;  %v258_v52 = vsel %vm23124_vm0, %v23271_v5, %v20357_v35  ;;  %v363_v5 = vsel %vm23122_vm1, %v23273_v12, %v20375_v26 }
 0x1e2   :  { %v20392_v2 = vpop.permute.xlu1 %759  ;;  %v877_v18 = vpop.permute.xlu0 %876 }
 0x1e3   :  { %v892_v22 = vsel %vm882_vm6, %v20150_v45, %v877_v18  ;;  %v20462_v45 = vrot.slane %v20240_v24, %v23274_v8 }
 0x1e4   :  { %v919_v39 = vadd.f32 %v892_v22, %v814_v43  ;;  %v572_v22 = vsel %vm23113_vm3, %v20288_v7, %v20312_v33  ;;  %v677_v7 = vsel %vm672_vm4, %v20365_v3, %v20370_v10  ;;  %v179_v3 = vadd.f32 %v165_v56, %v19850_v60 }
 0x1e5   :  { %v598_v34 = vadd.f32 %v572_v22, %v493_v53  ;;  %v285_v22 = vadd.f32 %v20357_v35, %v180_v54  ;;  %v369_v60 = vsel %vm23122_vm1, %v23263_v41, %v20363_v11  ;;  %v474_v35 = vsel %vm23114_vm2, %v23266_v6, %v20379_v27 }
 0x1e6   :  { %v20409_v16 = vpop.permute.xlu1 %878  ;;  %v20411_v37 = vpop.permute.xlu0 %446 }
 0x1e7   :  { %v893_v40 = vsel %vm882_vm6, %v877_v18, %v20409_v16  ;;  %v781_v18 = vsel %vm777_vm5, %v23254_v51, %v20381_v19  ;;  %v1062_v51 = vrot.slane %v20240_v24, %v23276_v46  ;;  %v390_v53 = vadd.f32 %v20375_v26, %v285_v22 }
 0x1e8   :  { %v920_v14 = vadd.f32 %v893_v40, %v815_v36  ;;  %v468_v41 = vsel %vm23114_vm2, %v23275_v20, %v20411_v37  ;;  %v23279_v22 = vsub.s32 5, %v19601_v15 }
 0x1ea   :  { %v20437_v28 = vpop.permute.xlu1 %565  ;;  %v863_v23 = vpop.permute.xlu0 %862 }
 0x1eb   :  { %v886_v9 = vsel %vm882_vm6, %v20217_v13, %v863_v23  ;;  %v782_v13 = vsel %vm777_vm5, %v20381_v19, %v20392_v2  ;;  %v579_v26 = vsel %vm23113_vm3, %v23268_v31, %v20437_v28 }
 0x1ee   :  { %v20464_v55 = vpop.permute.xlu1 %864  ;;  %v982_v30 = vpop.permute.xlu0 %981 }
 0x1ef   :  { %v997_v61 = vsel %vm987_vm7, %v20261_v59, %v982_v30  ;;  %v702_v59 = vadd.f32 %v676_v49, %v597_v47  ;;  %v887_v19 = vsel %vm882_vm6, %v863_v23, %v20464_v55  ;;  %v284_v23 = vadd.f32 %v258_v52, %v179_v3 }
 0x1f0   :  { %v1024_v62 = vadd.f32 %v997_v61, %v919_v39  ;;  %v264_v39 = vsel %vm23124_vm0, %v23261_v58, %v20286_v0  ;;  %v292_v58 = vadd.f32 %v20286_v0, %v187_v25 }
 0x1f1   :  { %v807_v1 = vadd.f32 %v781_v18, %v702_v59 }
 0x1f2   :  { %v1038_v17 = vmax.f32 %v1024_v62, 0.0  ;;  %v20486_v43 = vpop.permute.xlu1 %983  ;;  %v552_v42 = vpop.permute.xlu0 %551  ;;  %v291_v62 = vadd.f32 %v264_v39, %v186_v50  ;;  %v397_v56 = vadd.f32 %v20363_v11, %v292_v58  ;;  %v389_v11 = vadd.f32 %v363_v5, %v284_v23 }
 0x1f3   :  { %v998_v57 = vsel %vm987_vm7, %v982_v30, %v20486_v43  ;;  %v703_v30 = vadd.f32 %v677_v7, %v598_v34  ;;  %v912_v29 = vadd.f32 %v886_v9, %v807_v1  ;;  %v495_v9 = vadd.f32 %v20411_v37, %v390_v53 }
 0x1f4   :  { %v1088_v8 = vmul.f32 %v20462_v45, %v1038_v17  ;;  %v1025_v21 = vadd.f32 %v998_v57, %v920_v14  ;;  %v396_v59 = vadd.f32 %v369_v60, %v291_v62  ;;  %v502_v7 = vadd.f32 %v20379_v27, %v397_v56 }
 0x1f5   :  { %v808_v63 = vadd.f32 %v782_v13, %v703_v30  ;;  %v573_v6 = vsel %vm23113_vm3, %v20312_v33, %v552_v42  ;;  %v494_v20 = vadd.f32 %v468_v41, %v389_v11  ;;  %v1066_v60 = vrot.slane %v20240_v24, %v23279_v22  ;;  %v20579_v41 = vld [vmem:[#allocation10 + $0x30] sm:$0xff] }
 0x1f6   :  { %v1039_v49 = vmax.f32 %v1025_v21, 0.0  ;;  %v671_v40 = vpop.permute.xlu1 %670  ;;  %v968_v61 = vpop.permute.xlu0 %967  ;;  %1141 = vrot.lane.b32.xlu1 %v1088_v8, %s19486_s1  ;;  %v501_v57 = vadd.f32 %v474_v35, %v396_v59  ;;  %v600_v8 = vadd.f32 %v552_v42, %v495_v9 }
 0x1f7   :  { %v991_v48 = vsel %vm987_vm7, %v20355_v4, %v968_v61  ;;  %v913_v4 = vadd.f32 %v887_v19, %v808_v63  ;;  %v684_v27 = vsel %vm672_vm4, %v20336_v38, %v671_v40  ;;  %v599_v21 = vadd.f32 %v573_v6, %v494_v20 }
 0x1f8   :  { %v1089_v47 = vmul.f32 %v1062_v51, %v1039_v49  ;;  %v1017_v36 = vadd.f32 %v991_v48, %v912_v29  ;;  %v606_v31 = vadd.f32 %v579_v26, %v501_v57  ;;  %v23278_v48 = vsub.s32 6, %v19601_v15 }
 0x1fa   :  { %v1031_v44 = vmax.f32 %v1017_v36, 0.0  ;;  %v970_v0 = vpop.permute.xlu1 %969  ;;  %v657_v18 = vpop.permute.xlu0 %656  ;;  %1143 = vrot.lane.b32.xlu0 %v1089_v47, %s19486_s1  ;;  %v711_v38 = vadd.f32 %v684_v27, %v606_v31  ;;  %v1070_v58 = vrot.slane %v20240_v24, %v23278_v48  ;;  %v20575_v24 = vld [vmem:[#allocation10] sm:$0xff] }
 0x1fb   :  { %v992_v12 = vsel %vm987_vm7, %v968_v61, %v970_v0  ;;  %v678_v37 = vsel %vm672_vm4, %v20370_v10, %v657_v18  ;;  %v705_v25 = vadd.f32 %v657_v18, %v600_v8 }
 0x1fc   :  { %v1081_v14 = vmul.f32 %v20462_v45, %v1031_v44  ;;  %v1018_v17 = vadd.f32 %v992_v12, %v913_v4  ;;  %v607_v45 = vadd.f32 %v20437_v28, %v502_v7  ;;  %v23277_v28 = vmov 0.0   ;;  %v20581_v12 = vld [vmem:[#allocation10 + $0x20] sm:$0xff] }
 0x1fd   :  { %1106 = vst.msk [vmem:[#allocation2 + $0x68] sm:$0xff] %vm1098_vm8, %v23277_v28  ;;  %1099 = vst.msk [vmem:[#allocation2 + $0x30] sm:$0xff] %vm1098_vm8, %v23277_v28  ;;  %v704_v42 = vadd.f32 %v678_v37, %v599_v21 }
 0x1fe   :  { %v1032_v46 = vmax.f32 %v1018_v17, 0.0  ;;  %v776_v34 = vpop.permute.xlu1 %775  ;;  %v762_v1 = vpop.permute.xlu0 %761  ;;  %1127 = vrot.lane.b32.xlu1 %v1081_v14, %s19486_s1  ;;  %v712_v33 = vadd.f32 %v671_v40, %v607_v45 }
 0x1ff   :  { %v789_v3 = vsel %vm777_vm5, %v20373_v32, %v776_v34  ;;  %v783_v13 = vsel %vm777_vm5, %v20392_v2, %v762_v1  ;;  %v810_v30 = vadd.f32 %v762_v1, %v705_v25 }
 0x200   :  { %v1082_v50 = vmul.f32 %v1062_v51, %v1032_v46  ;;  %v817_v51 = vadd.f32 %v776_v34, %v712_v33  ;;  %v816_v49 = vadd.f32 %v789_v3, %v711_v38  ;;  %v809_v2 = vadd.f32 %v783_v13, %v704_v42 }
 0x202   :  { %v881_v39 = vpop.permute.xlu1 %880  ;;  %v867_v10 = vpop.permute.xlu0 %866  ;;  %1129 = vrot.lane.b32.xlu0 %v1082_v50, %s19486_s1 }
 0x203   :  { %v894_v29 = vsel %vm882_vm6, %v20409_v16, %v881_v39  ;;  %v888_v32 = vsel %vm882_vm6, %v20464_v55, %v867_v10  ;;  %v922_v40 = vadd.f32 %v881_v39, %v817_v51  ;;  %v915_v61 = vadd.f32 %v867_v10, %v810_v30 }
 0x204   :  { %v921_v54 = vadd.f32 %v894_v29, %v816_v49  ;;  %v914_v52 = vadd.f32 %v888_v32, %v809_v2 }
 0x206   :  { %v986_v19 = vpop.permute.xlu1 %985  ;;  %v972_v63 = vpop.permute.xlu0 %971 }
 0x207   :  { %v999_v47 = vsel %vm987_vm7, %v20486_v43, %v986_v19  ;;  %v1027_v36 = vadd.f32 %v986_v19, %v922_v40  ;;  %v993_v16 = vsel %vm987_vm7, %v970_v0, %v972_v63  ;;  %v1020_v62 = vadd.f32 %v972_v63, %v915_v61  ;;  %v20573_v0 = vld [vmem:[#allocation10 + $0x10] sm:$0xff] }
 0x208   :  { %v1026_v55 = vadd.f32 %v999_v47, %v921_v54  ;;  %v1019_v5 = vadd.f32 %v993_v16, %v914_v52 }
 0x209   :  { %v1041_v23 = vmax.f32 %v1027_v36, 0.0  ;;  %v1034_v44 = vmax.f32 %v1020_v62, 0.0 }
 0x20a   :  { %v1040_v56 = vmax.f32 %v1026_v55, 0.0  ;;  %v1033_v53 = vmax.f32 %v1019_v5, 0.0 }
 0x20b   :  { %v1091_v4 = vmul.f32 %v1070_v58, %v1041_v23  ;;  %v1084_v43 = vmul.f32 %v1070_v58, %v1034_v44 }
 0x20c   :  { %v1090_v18 = vmul.f32 %v1066_v60, %v1040_v56  ;;  %v1083_v35 = vmul.f32 %v1066_v60, %v1033_v53 }
 0x20d   :  { %1147 = vrot.lane.b32.xlu0 %v1091_v4, %s19486_s1 }
 0x20e   :  { %1145 = vrot.lane.b32.xlu1 %v1090_v18, %s19486_s1 }
 0x211   :  { %1133 = vrot.lane.b32.xlu0 %v1084_v43, %s19486_s1 }
 0x212   :  { %1131 = vrot.lane.b32.xlu1 %v1083_v35, %s19486_s1  ;;  %s19503_s1 = smov 23  }
 0x215   :  { %1629 = vrot.lane.b32.xlu0 %v20573_v0, %s19487_s30 }
 0x216   :  { %1627 = vrot.lane.b32.xlu1 %v20575_v24, %s19487_s30 }
 0x219   :  { %1633 = vrot.lane.b32.xlu0 %v20579_v41, %s19487_s30 }
 0x21a   :  { %1631 = vrot.lane.b32.xlu1 %v20581_v12, %s19487_s30  ;;  %s19505_s30 = smov 125  }
 0x21d   :  { %2093 = vrot.lane.b32.xlu0 %v20573_v0, %s19488_s4 }
 0x21e   :  { %2091 = vrot.lane.b32.xlu1 %v20575_v24, %s19488_s4 }
 0x221   :  { %2097 = vrot.lane.b32.xlu0 %v20579_v41, %s19488_s4 }
 0x222   :  { %2095 = vrot.lane.b32.xlu1 %v20581_v12, %s19488_s4  ;;  %s19506_s4 = smov 99  }
 0x225   :  { %2543 = vrot.lane.b32.xlu0 %v20573_v0, %s19489_s11 }
 0x226   :  { %2541 = vrot.lane.b32.xlu1 %v20575_v24, %s19489_s11 }
 0x230   :  { %v1136_v59 = vpop.permute.xlu1 %1135 }
 0x231   :  { %1185 = vst.msk [vmem:[#allocation2 + $0x38] sm:$0xff] %vm1176_vm9, %v1136_v59 }
 0x234   :  { %v1138_v11 = vpop.permute.xlu0 %1137  ;;  %v1140_v14 = vpop.permute.xlu1 %1139 }
 0x235   :  { %v20595_v17 = vsel %vm1149_vm10, %v1136_v59, %v1138_v11  ;;  %v20598_v7 = vsel %vm1149_vm10, %v1138_v11, %v1140_v14 }
 0x236   :  { %1275 = vmatprep.subr.mxu0 %v20595_v17  ;;  %18374 = vmatprep.subr.mxu1 %v20595_v17 }
 0x238   :  { %v20602_v9 = vld [vmem:[#allocation2 + $0x38] sm:$0xff] }
 0x239   :  { %1663 = vrot.lane.b32.xlu1 %v20602_v9, %s19477_s0  ;;  %1276 = vmatpush1.msra.mxu0 %v20602_v9 }
 0x23a   :  { %18376 = vmatpush1.msra.mxu1 %v20602_v9 }
 0x23d   :  { %2113 = vrot.lane.b32.xlu1 %v20602_v9, %s19478_s3 }
 0x241   :  { %2563 = vrot.lane.b32.xlu1 %v20602_v9, %s19479_s22 }
 0x244   :  { %v1124_v26 = vpop.permute.xlu1 %1123  ;;  %v1122_v6 = vpop.permute.xlu0 %1121 }
 0x245   :  { %v20613_v57 = vsel %vm1149_vm10, %v1122_v6, %v1124_v26  ;;  %1177 = vst.msk [vmem:[#allocation2] sm:$0xff] %vm1176_vm9, %v1122_v6  ;;  %1665 = vrot.lane.b32.xlu1 %v20595_v17, %s19477_s0 }
 0x246   :  { %1277 = vmatprep.subr.mxu0 %v20613_v57  ;;  %18375 = vmatprep.subr.mxu1 %v20613_v57 }
 0x248   :  { %v1126_v20 = vpop.permute.xlu0 %1125 }
 0x249   :  { %v20621_v46 = vsel %vm1149_vm10, %v1124_v26, %v1126_v20 }
 0x24a   :  { %1653 = vrot.lane.b32.xlu1 %v20621_v46, %s19477_s0 }
 0x24c   :  { %v20625_v34 = vld [vmem:[#allocation2] sm:$0xff] }
 0x24d   :  { %1649 = vrot.lane.b32.xlu0 %v20625_v34, %s19477_s0  ;;  %1278 = vmatpush1.msra.mxu0 %v20625_v34 }
 0x24e   :  { %18377 = vmatpush1.msra.mxu1 %v20625_v34  ;;  %15999 = vmatmul.mubr.msk.f32.vlgmr.msra.gmra.mxu0 %vm1234_vm11, %v20575_v24 }
 0x24f   :  { %16000 = vmatmul.mubr.msk.f32.vlgmr.msra.gmra.mxu1 %vm1234_vm11, %v20573_v0  ;;  %1489 = vmatprep.mubr.f32.mxu0 %v23277_v28 }
 0x250   :  { %1323 = vmatprep.mubr.f32.mxu1 %v23277_v28 }
 0x251   :  { %2099 = vrot.lane.b32.xlu0 %v20625_v34, %s19478_s3 }
 0x253   :  { %16001 = vmatmul.mubr.msk.f32.gmra.mxu1 %vm1234_vm11, %v20581_v12 }
 0x254   :  { %1329 = vmatprep.mubr.f32.mxu1 %v23277_v28 }
 0x255   :  { %2549 = vrot.lane.b32.xlu0 %v20625_v34, %s19479_s22 }
 0x257   :  { %16002 = vmatmul.mubr.msk.f32.gmra.mxu1 %vm1234_vm11, %v20579_v41 }
 0x258   :  { %1400 = vmatprep.mubr.f32.mxu1 %v23277_v28 }
 0x259   :  { %1667 = vrot.lane.b32.xlu0 %v20598_v7, %s19477_s0 }
 0x25d   :  { %1651 = vrot.lane.b32.xlu0 %v20613_v57, %s19477_s0 }
 0x268   :  { %v1142_v1 = vpop.permute.xlu1 %1141 }
 0x269   :  { %v20652_v45 = vsel %vm1149_vm10, %v1140_v14, %v1142_v1 }
 0x26a   :  { %1669 = vrot.lane.b32.xlu0 %v20652_v45, %s19477_s0  ;;  %1364 = vmatprep.subr.mxu1 %v20652_v45 }
 0x26b   :  { %1365 = vmatpush1.msra.mxu1 %v20598_v7 }
 0x26c   :  { %v1144_v8 = vpop.permute.xlu0 %1143 }
 0x26d   :  { %v20659_v27 = vsel %vm1149_vm10, %v1142_v1, %v1144_v8 }
 0x26e   :  { %1671 = vrot.lane.b32.xlu1 %v20659_v27, %s19477_s0 }
 0x270   :  { %v1128_v37 = vpop.permute.xlu1 %1127 }
 0x271   :  { %v20664_v31 = vsel %vm1149_vm10, %v1126_v20, %v1128_v37 }
 0x272   :  { %1366 = vmatprep.subr.mxu1 %v20664_v31  ;;  %1655 = vrot.lane.b32.xlu1 %v20664_v31, %s19477_s0 }
 0x273   :  { %1367 = vmatpush1.msra.mxu1 %v20621_v46 }
 0x274   :  { %v1130_v21 = vpop.permute.xlu0 %1129  ;;  %16003 = vmatmul.mubr.msk.f32.vlgmr.msra.gmra.mxu1 %vm1234_vm11, %v20575_v24 }
 0x275   :  { %v20673_v50 = vsel %vm1149_vm10, %v1128_v37, %v1130_v21  ;;  %1406 = vmatprep.mubr.f32.mxu1 %v23277_v28 }
 0x276   :  { %1657 = vrot.lane.b32.xlu0 %v20673_v50, %s19477_s0 }
 0x278   :  { %16004 = vmatmul.mubr.msk.f32.gmra.mxu1 %vm1234_vm11, %v20573_v0 }
 0x279   :  { %1412 = vmatprep.mubr.f32.mxu1 %v23277_v28 }
 0x27c   :  { %16005 = vmatmul.mubr.msk.f32.gmra.mxu1 %vm1234_vm11, %v20581_v12 }
 0x27d   :  { %1418 = vmatprep.mubr.f32.mxu1 %v23277_v28 }
 0x27f   :  { %v1148_v33 = vpop.permute.xlu0 %1147 }
 0x280   :  { %v1146_v25 = vpop.permute.xlu1 %1145  ;;  %16006 = vmatmul.mubr.msk.f32.gmra.mxu1 %vm1234_vm11, %v20579_v41 }
 0x281   :  { %v20687_v3 = vsel %vm1149_vm10, %v1144_v8, %v1146_v25  ;;  %v1161_v13 = vsel %vm1149_vm10, %v1146_v25, %v1148_v33  ;;  %18272 = vmatprep.mubr.msk.f32.mxu1 %vm1234_vm11, %v20575_v24 }
 0x282   :  { %1191 = vst.msk [vmem:[#allocation2 + $0x68] sm:$0xff] %vm1183_vm12, %v1161_v13  ;;  %1453 = vmatprep.subr.mxu0 %v20687_v3  ;;  %1673 = vrot.lane.b32.xlu0 %v20687_v3, %s19477_s0 }
 0x283   :  { %v1134_v38 = vpop.permute.xlu0 %1133  ;;  %1454 = vmatpush1.msra.mxu0 %v20659_v27 }
 0x284   :  { %v1132_v42 = vpop.permute.xlu1 %1131 }
 0x285   :  { %v20697_v39 = vsel %vm1149_vm10, %v1130_v21, %v1132_v42  ;;  %v1155_v10 = vsel %vm1149_vm10, %v1132_v42, %v1134_v38 }
 0x286   :  { %1184 = vst.msk [vmem:[#allocation2 + $0x30] sm:$0xff] %vm1183_vm12, %v1155_v10  ;;  %1455 = vmatprep.subr.mxu0 %v20697_v39  ;;  %vm23119_vm12 = vcmask 203776  }
 0x287   :  { %1456 = vmatpush1.msra.mxu0 %v20673_v50  ;;  %v20755_v49 = vpop.permute.xlu0 %1629 }
 0x288   :  { %16007 = vmatmul.mubr.msk.f32.vlgmr.msra.gmra.mxu0 %vm1234_vm11, %v20575_v24  ;;  %v20743_v29 = vpop.permute.xlu1 %1627 }
 0x289   :  { %v20704_v51 = vld [vmem:[#allocation2 + $0x68] sm:$0xff]  ;;  %1495 = vmatprep.mubr.f32.mxu0 %v23277_v28 }
 0x28a   :  { %1675 = vrot.lane.b32.xlu1 %v20704_v51, %s19477_s0  ;;  %18268 = vmatprep.subr.mxu1 %v20704_v51 }
 0x28b   :  { %18269 = vmatpush3.msra.mxu1 %v20704_v51  ;;  %v20767_v40 = vpop.permute.xlu0 %1633 }
 0x28c   :  { %16008 = vmatmul.mubr.msk.f32.gmra.mxu0 %vm1234_vm11, %v20573_v0  ;;  %v20753_v32 = vpop.permute.xlu1 %1631 }
 0x28d   :  { %v20713_v30 = vld [vmem:[#allocation2 + $0x30] sm:$0xff]  ;;  %1501 = vmatprep.mubr.f32.mxu0 %v23277_v28 }
 0x28e   :  { %1659 = vrot.lane.b32.xlu1 %v20697_v39, %s19477_s0  ;;  %1661 = vrot.lane.b32.xlu0 %v20713_v30, %s19477_s0 }
 0x28f   :  { %18270 = vmatprep.subr.mxu1 %v20713_v30  ;;  %v20775_v54 = vpop.permute.xlu0 %2093 }
 0x290   :  { %18271 = vmatpush3.msra.mxu1 %v20713_v30  ;;  %16009 = vmatmul.mubr.msk.f32.gmra.mxu0 %vm1234_vm11, %v20581_v12  ;;  %v20761_v2 = vpop.permute.xlu1 %2091 }
 0x291   :  { %18273 = vmatmul.mubr.msk.f32.vlgmr.msra.gmra.mxu1 %vm1234_vm11, %v20573_v0  ;;  %1507 = vmatprep.mubr.f32.mxu0 %v23277_v28 }
 0x292   :  { %2115 = vrot.lane.b32.xlu1 %v20595_v17, %s19478_s3  ;;  %2117 = vrot.lane.b32.xlu0 %v20598_v7, %s19478_s3 }
 0x293   :  { %18275 = vmatprep.mubr.msk.f32.mxu1 %vm1234_vm11, %v20581_v12  ;;  %v20787_v19 = vpop.permute.xlu0 %2097 }
 0x294   :  { %16010 = vmatmul.mubr.msk.f32.gmra.mxu0 %vm1234_vm11, %v20579_v41  ;;  %v20773_v61 = vpop.permute.xlu1 %2095 }
 0x295   :  { %18276 = vmatmul.mubr.msk.f32.gmra.mxu1 %vm1234_vm11, %v20579_v41  ;;  %1864 = vmatprep.mubr.f32.mxu0 %v23277_v28 }
 0x296   :  { %2119 = vrot.lane.b32.xlu1 %v20652_v45, %s19478_s3  ;;  %2121 = vrot.lane.b32.xlu0 %v20659_v27, %s19478_s3 }
 0x297   :  { %1775 = vmatprep.mubr.f32.mxu1 %v23277_v28  ;;  %v20793_v58 = vpop.permute.xlu0 %2543 }
 0x298   :  { %v20781_v52 = vpop.permute.xlu1 %2541 }
 0x29a   :  { %2103 = vrot.lane.b32.xlu1 %v20621_v46, %s19478_s3  ;;  %2101 = vrot.lane.b32.xlu0 %v20613_v57, %s19478_s3 }
 0x29e   :  { %2107 = vrot.lane.b32.xlu1 %v20673_v50, %s19478_s3  ;;  %2105 = vrot.lane.b32.xlu0 %v20664_v31, %s19478_s3 }
 0x2a2   :  { %2125 = vrot.lane.b32.xlu1 %v20704_v51, %s19478_s3  ;;  %2123 = vrot.lane.b32.xlu0 %v20687_v3, %s19478_s3 }
 0x2a6   :  { %2109 = vrot.lane.b32.xlu1 %v20697_v39, %s19478_s3  ;;  %2111 = vrot.lane.b32.xlu0 %v20713_v30, %s19478_s3 }
 0x2aa   :  { %2565 = vrot.lane.b32.xlu1 %v20595_v17, %s19479_s22  ;;  %2567 = vrot.lane.b32.xlu0 %v20598_v7, %s19479_s22 }
 0x2ab   :  { %v1664_v48 = vpop.permute.xlu1 %1663 }
 0x2ae   :  { %2553 = vrot.lane.b32.xlu1 %v20621_v46, %s19479_s22  ;;  %2551 = vrot.lane.b32.xlu0 %v20613_v57, %s19479_s22 }
 0x2af   :  { %v20799_v63 = vpop.permute.xlu1 %2113 }
 0x2b2   :  { %2571 = vrot.lane.b32.xlu1 %v20659_v27, %s19479_s22  ;;  %2569 = vrot.lane.b32.xlu0 %v20652_v45, %s19479_s22 }
 0x2b3   :  { %v20809_v36 = vpop.permute.xlu1 %2563 }
 0x2b6   :  { %2555 = vrot.lane.b32.xlu1 %v20664_v31, %s19479_s22  ;;  %2557 = vrot.lane.b32.xlu0 %v20673_v50, %s19479_s22 }
 0x2b7   :  { %v1666_v55 = vpop.permute.xlu1 %1665 }
 0x2b8   :  { %v1683_v5 = vsel %vm23124_vm0, %v1664_v48, %v1666_v55 }
 0x2ba   :  { %2545 = vrot.lane.b32.xlu1 %v20581_v12, %s19489_s11  ;;  %2573 = vrot.lane.b32.xlu0 %v20687_v3, %s19479_s22 }
 0x2bc   :  { %v1654_v23 = vpop.permute.xlu1 %1653 }
 0x2be   :  { %2575 = vrot.lane.b32.xlu1 %v20704_v51, %s19479_s22  ;;  %2547 = vrot.lane.b32.xlu0 %v20579_v41, %s19489_s11  ;;  %s19507_s11 = smov 22  }
 0x2bf   :  { %v1650_v47 = vpop.permute.xlu0 %1649 }
 0x2c2   :  { %2559 = vrot.lane.b32.xlu1 %v20697_v39, %s19479_s22  ;;  %2561 = vrot.lane.b32.xlu0 %v20713_v30, %s19479_s22 }
 0x2c3   :  { %v20811_v16 = vpop.permute.xlu0 %2099 }
 0x2c6   :  { %3015 = vrot.lane.b32.xlu1 %v20595_v17, %s19480_s23  ;;  %3017 = vrot.lane.b32.xlu0 %v20598_v7, %s19480_s23 }
 0x2c7   :  { %v20817_v62 = vpop.permute.xlu0 %2549 }
 0x2ca   :  { %3019 = vrot.lane.b32.xlu1 %v20652_v45, %s19480_s23  ;;  %3021 = vrot.lane.b32.xlu0 %v20659_v27, %s19480_s23 }
 0x2cb   :  { %v1668_v22 = vpop.permute.xlu0 %1667 }
 0x2cc   :  { %v1684_v60 = vsel %vm23124_vm0, %v1666_v55, %v1668_v22 }
 0x2cd   :  { %1739 = vmatprep.subr.mxu1 %v1684_v60 }
 0x2ce   :  { %3013 = vrot.lane.b32.xlu1 %v20602_v9, %s19480_s23  ;;  %3001 = vrot.lane.b32.xlu0 %v20613_v57, %s19480_s23 }
 0x2cf   :  { %1740 = vmatpush1.msra.mxu1 %v1683_v5  ;;  %v1652_v56 = vpop.permute.xlu0 %1651 }
 0x2d0   :  { %v1678_v4 = vsel %vm23124_vm0, %v1652_v56, %v1654_v23  ;;  %v1677_v44 = vsel %vm23124_vm0, %v1650_v47, %v1652_v56 }
 0x2d1   :  { %1741 = vmatprep.subr.mxu1 %v1678_v4 }
 0x2d2   :  { %3003 = vrot.lane.b32.xlu1 %v20621_v46, %s19480_s23  ;;  %3005 = vrot.lane.b32.xlu0 %v20664_v31, %s19480_s23 }
 0x2d3   :  { %1742 = vmatpush1.msra.mxu1 %v1677_v44 }
 0x2d4   :  { %16015 = vmatmul.mubr.msk.f32.vlgmr.msra.gmra.mxu1 %vm1234_vm11, %v20743_v29 }
 0x2d5   :  { %1781 = vmatprep.mubr.f32.mxu1 %v23277_v28 }
 0x2d6   :  { %3007 = vrot.lane.b32.xlu1 %v20673_v50, %s19480_s23  ;;  %2999 = vrot.lane.b32.xlu0 %v20625_v34, %s19480_s23 }
 0x2d8   :  { %16016 = vmatmul.mubr.msk.f32.gmra.mxu1 %vm1234_vm11, %v20755_v49 }
 0x2d9   :  { %1787 = vmatprep.mubr.f32.mxu1 %v23277_v28 }
 0x2da   :  { %2991 = vrot.lane.b32.xlu1 %v20575_v24, %s19490_s12  ;;  %2993 = vrot.lane.b32.xlu0 %v20573_v0, %s19490_s12 }
 0x2dc   :  { %16017 = vmatmul.mubr.msk.f32.gmra.mxu1 %vm1234_vm11, %v20753_v32  ;;  %v1670_v18 = vpop.permute.xlu0 %1669 }
 0x2dd   :  { %1793 = vmatprep.mubr.f32.mxu1 %v23277_v28  ;;  %v1685_v35 = vsel %vm23124_vm0, %v1668_v22, %v1670_v18 }
 0x2de   :  { %2995 = vrot.lane.b32.xlu1 %v20581_v12, %s19490_s12  ;;  %3023 = vrot.lane.b32.xlu0 %v20687_v3, %s19480_s23 }
 0x2e0   :  { %16018 = vmatmul.mubr.msk.f32.gmra.mxu1 %vm1234_vm11, %v20767_v40  ;;  %v1672_v53 = vpop.permute.xlu1 %1671 }
 0x2e1   :  { %v1686_v43 = vsel %vm23124_vm0, %v1670_v18, %v1672_v53  ;;  %1953 = vmatprep.mubr.f32.mxu1 %v23277_v28 }
 0x2e2   :  { %3025 = vrot.lane.b32.xlu1 %v20704_v51, %s19480_s23  ;;  %2997 = vrot.lane.b32.xlu0 %v20579_v41, %s19490_s12  ;;  %s19508_s12 = smov 73  }
 0x2e3   :  { %1828 = vmatprep.subr.mxu0 %v1686_v43 }
 0x2e4   :  { %1829 = vmatpush1.msra.mxu0 %v1685_v35  ;;  %v1656_v59 = vpop.permute.xlu1 %1655 }
 0x2e5   :  { %v1679_v26 = vsel %vm23124_vm0, %v1654_v23, %v1656_v59 }
 0x2e6   :  { %3009 = vrot.lane.b32.xlu1 %v20697_v39, %s19480_s23  ;;  %3011 = vrot.lane.b32.xlu0 %v20713_v30, %s19480_s23 }
 0x2e8   :  { %v1658_v11 = vpop.permute.xlu0 %1657 }
 0x2e9   :  { %v1680_v14 = vsel %vm23124_vm0, %v1656_v59, %v1658_v11 }
 0x2ea   :  { %3465 = vrot.lane.b32.xlu1 %v20595_v17, %s19481_s24  ;;  %3467 = vrot.lane.b32.xlu0 %v20598_v7, %s19481_s24 }
 0x2eb   :  { %1830 = vmatprep.subr.mxu0 %v1680_v14 }
 0x2ec   :  { %1831 = vmatpush1.msra.mxu0 %v1679_v26 }
 0x2ed   :  { %16019 = vmatmul.mubr.msk.f32.vlgmr.msra.gmra.mxu0 %vm1234_vm11, %v20743_v29 }
 0x2ee   :  { %3463 = vrot.lane.b32.xlu1 %v20602_v9, %s19481_s24  ;;  %3451 = vrot.lane.b32.xlu0 %v20613_v57, %s19481_s24 }
 0x2ef   :  { %1870 = vmatprep.mubr.f32.mxu0 %v23277_v28 }
 0x2f1   :  { %16020 = vmatmul.mubr.msk.f32.gmra.mxu0 %vm1234_vm11, %v20755_v49 }
 0x2f2   :  { %3453 = vrot.lane.b32.xlu1 %v20621_v46, %s19481_s24  ;;  %3449 = vrot.lane.b32.xlu0 %v20625_v34, %s19481_s24 }
 0x2f3   :  { %1876 = vmatprep.mubr.f32.mxu0 %v23277_v28 }
 0x2f4   :  { %v1674_v20 = vpop.permute.xlu0 %1673 }
 0x2f5   :  { %16021 = vmatmul.mubr.msk.f32.gmra.mxu0 %vm1234_vm11, %v20753_v32  ;;  %v1687_v8 = vsel %vm23124_vm0, %v1672_v53, %v1674_v20 }
 0x2f6   :  { %3441 = vrot.lane.b32.xlu1 %v20575_v24, %s19491_s13  ;;  %3469 = vrot.lane.b32.xlu0 %v20652_v45, %s19481_s24 }
 0x2f7   :  { %1882 = vmatprep.mubr.f32.mxu0 %v23277_v28 }
 0x2f9   :  { %16022 = vmatmul.mubr.msk.f32.gmra.mxu0 %vm1234_vm11, %v20767_v40 }
 0x2fa   :  { %3471 = vrot.lane.b32.xlu1 %v20659_v27, %s19481_s24  ;;  %3443 = vrot.lane.b32.xlu0 %v20573_v0, %s19491_s13 }
 0x2fb   :  { %18282 = vmatprep.mubr.msk.f32.mxu0 %vm1234_vm11, %v20743_v29 }
 0x2fc   :  { %v1676_v6 = vpop.permute.xlu1 %1675 }
 0x2fd   :  { %18278 = vmatprep.subr.mxu0 %v1676_v6  ;;  %v1688_v1 = vsel %vm23124_vm0, %v1674_v20, %v1676_v6 }
 0x2fe   :  { %3455 = vrot.lane.b32.xlu1 %v20664_v31, %s19481_s24  ;;  %3457 = vrot.lane.b32.xlu0 %v20673_v50, %s19481_s24 }
 0x2ff   :  { %1917 = vmatprep.subr.mxu1 %v1688_v1  ;;  %18279 = vmatpush3.msra.mxu0 %v1676_v6 }
 0x300   :  { %1918 = vmatpush1.msra.mxu1 %v1687_v8  ;;  %v1660_v37 = vpop.permute.xlu1 %1659  ;;  %v1662_v21 = vpop.permute.xlu0 %1661 }
 0x301   :  { %18280 = vmatprep.subr.mxu0 %v1662_v21  ;;  %v1682_v33 = vsel %vm23124_vm0, %v1660_v37, %v1662_v21  ;;  %v1681_v25 = vsel %vm23124_vm0, %v1658_v11, %v1660_v37 }
 0x302   :  { %3445 = vrot.lane.b32.xlu1 %v20581_v12, %s19491_s13  ;;  %3473 = vrot.lane.b32.xlu0 %v20687_v3, %s19481_s24 }
 0x303   :  { %1919 = vmatprep.subr.mxu1 %v1682_v33  ;;  %18281 = vmatpush3.msra.mxu0 %v1662_v21 }
 0x304   :  { %1920 = vmatpush1.msra.mxu1 %v1681_v25  ;;  %v2116_v13 = vpop.permute.xlu1 %2115  ;;  %18283 = vmatmul.mubr.msk.f32.vlgmr.msra.gmra.mxu0 %vm1234_vm11, %v20755_v49  ;;  %v2118_v38 = vpop.permute.xlu0 %2117 }
 0x305   :  { %16023 = vmatmul.mubr.msk.f32.vlgmr.msra.gmra.mxu1 %vm1234_vm11, %v20743_v29  ;;  %18285 = vmatprep.mubr.msk.f32.mxu0 %vm1234_vm11, %v20753_v32  ;;  %v2134_v42 = vsel %vm23122_vm1, %v2116_v13, %v2118_v38  ;;  %v2133_v10 = vsel %vm23122_vm1, %v20799_v63, %v2116_v13 }
 0x306   :  { %3475 = vrot.lane.b32.xlu1 %v20704_v51, %s19481_s24  ;;  %3447 = vrot.lane.b32.xlu0 %v20579_v41, %s19491_s13 }
 0x307   :  { %2189 = vmatprep.subr.mxu0 %v2134_v42  ;;  %1959 = vmatprep.mubr.f32.mxu1 %v23277_v28 }
 0x308   :  { %2190 = vmatpush1.msra.mxu0 %v2133_v10  ;;  %v2120_v48 = vpop.permute.xlu1 %2119  ;;  %v2122_v29 = vpop.permute.xlu0 %2121 }
 0x309   :  { %16024 = vmatmul.mubr.msk.f32.gmra.mxu1 %vm1234_vm11, %v20755_v49  ;;  %18286 = vmatmul.mubr.msk.f32.gmra.mxu0 %vm1234_vm11, %v20767_v40  ;;  %v2136_v63 = vsel %vm23122_vm1, %v2120_v48, %v2122_v29  ;;  %v2135_v47 = vsel %vm23122_vm1, %v2118_v38, %v2120_v48 }
 0x30a   :  { %3459 = vrot.lane.b32.xlu1 %v20697_v39, %s19481_s24  ;;  %3461 = vrot.lane.b32.xlu0 %v20713_v30, %s19481_s24  ;;  %s19497_s24 = smov 50  }
 0x30b   :  { %2278 = vmatprep.subr.mxu1 %v2136_v63  ;;  %1965 = vmatprep.mubr.f32.mxu1 %v23277_v28 }
 0x30c   :  { %2279 = vmatpush1.msra.mxu1 %v2135_v47  ;;  %v2104_v55 = vpop.permute.xlu1 %2103  ;;  %v2102_v22 = vpop.permute.xlu0 %2101  ;;  %2225 = vmatprep.mubr.f32.mxu0 %v23277_v28 }
 0x30d   :  { %16025 = vmatmul.mubr.msk.f32.gmra.mxu1 %vm1234_vm11, %v20753_v32  ;;  %v2128_v49 = vsel %vm23122_vm1, %v2102_v22, %v2104_v55  ;;  %v2127_v60 = vsel %vm23122_vm1, %v20811_v16, %v2102_v22 }
 0x30e   :  { %3915 = vrot.lane.b32.xlu1 %v20595_v17, %s19482_s25  ;;  %3917 = vrot.lane.b32.xlu0 %v20598_v7, %s19482_s25 }
 0x30f   :  { %2191 = vmatprep.subr.mxu0 %v2128_v49  ;;  %1971 = vmatprep.mubr.f32.mxu1 %v23277_v28 }
 0x310   :  { %2192 = vmatpush1.msra.mxu0 %v2127_v60  ;;  %v2108_v5 = vpop.permute.xlu1 %2107  ;;  %v2106_v23 = vpop.permute.xlu0 %2105 }
 0x311   :  { %16026 = vmatmul.mubr.msk.f32.gmra.mxu1 %vm1234_vm11, %v20767_v40  ;;  %16031 = vmatmul.mubr.msk.f32.vlgmr.msra.gmra.mxu0 %vm1234_vm11, %v20761_v2  ;;  %v2130_v32 = vsel %vm23122_vm1, %v2106_v23, %v2108_v5  ;;  %v2129_v16 = vsel %vm23122_vm1, %v2104_v55, %v2106_v23 }
 0x312   :  { %3919 = vrot.lane.b32.xlu1 %v20652_v45, %s19482_s25  ;;  %3921 = vrot.lane.b32.xlu0 %v20659_v27, %s19482_s25 }
 0x313   :  { %2280 = vmatprep.subr.mxu1 %v2130_v32  ;;  %2231 = vmatprep.mubr.f32.mxu0 %v23277_v28 }
 0x314   :  { %2281 = vmatpush1.msra.mxu1 %v2129_v16  ;;  %2314 = vmatprep.mubr.f32.mxu1 %v23277_v28  ;;  %v2126_v40 = vpop.permute.xlu1 %2125  ;;  %v2124_v56 = vpop.permute.xlu0 %2123 }
 0x315   :  { %16032 = vmatmul.mubr.msk.f32.gmra.mxu0 %vm1234_vm11, %v20775_v54  ;;  %16035 = vmatmul.mubr.msk.f32.vlgmr.msra.gmra.mxu1 %vm1234_vm11, %v20761_v2  ;;  %v2138_v4 = vsel %vm23122_vm1, %v2124_v56, %v2126_v40  ;;  %v2137_v44 = vsel %vm23122_vm1, %v2122_v29, %v2124_v56 }
 0x316   :  { %18288 = vmatprep.subr.mxu1 %v2126_v40  ;;  %3913 = vrot.lane.b32.xlu1 %v20602_v9, %s19482_s25 }
 0x317   :  { %3901 = vrot.lane.b32.xlu0 %v20613_v57, %s19482_s25  ;;  %2367 = vmatprep.subr.mxu0 %v2138_v4 }
 0x318   :  { %18289 = vmatpush3.msra.mxu1 %v2126_v40  ;;  %2237 = vmatprep.mubr.f32.mxu0 %v23277_v28  ;;  %v2110_v18 = vpop.permute.xlu1 %2109  ;;  %v2112_v53 = vpop.permute.xlu0 %2111 }
 0x319   :  { %2320 = vmatprep.mubr.f32.mxu1 %v23277_v28  ;;  %2368 = vmatpush1.msra.mxu0 %v2137_v44  ;;  %v2132_v43 = vsel %vm23122_vm1, %v2110_v18, %v2112_v53  ;;  %v2131_v35 = vsel %vm23122_vm1, %v2108_v5, %v2110_v18 }
 0x31a   :  { %16033 = vmatmul.mubr.msk.f32.gmra.mxu0 %vm1234_vm11, %v20773_v61  ;;  %16036 = vmatmul.mubr.msk.f32.gmra.mxu1 %vm1234_vm11, %v20775_v54 }
 0x31b   :  { %18290 = vmatprep.subr.mxu1 %v2112_v53  ;;  %3903 = vrot.lane.b32.xlu1 %v20621_v46, %s19482_s25 }
 0x31c   :  { %3905 = vrot.lane.b32.xlu0 %v20664_v31, %s19482_s25  ;;  %2369 = vmatprep.subr.mxu0 %v2132_v43  ;;  %v2566_v59 = vpop.permute.xlu1 %2565  ;;  %v2568_v11 = vpop.permute.xlu0 %2567 }
 0x31d   :  { %18291 = vmatpush3.msra.mxu1 %v2112_v53  ;;  %2243 = vmatprep.mubr.f32.mxu0 %v23277_v28  ;;  %v2584_v14 = vsel %vm23114_vm2, %v2566_v59, %v2568_v11 }
 0x31e   :  { %2326 = vmatprep.mubr.f32.mxu1 %v23277_v28  ;;  %2370 = vmatpush1.msra.mxu0 %v2131_v35 }
 0x31f   :  { %16034 = vmatmul.mubr.msk.f32.gmra.mxu0 %vm1234_vm11, %v20787_v19  ;;  %16037 = vmatmul.mubr.msk.f32.gmra.mxu1 %vm1234_vm11, %v20773_v61 }
 0x320   :  { %3907 = vrot.lane.b32.xlu1 %v20673_v50, %s19482_s25  ;;  %3899 = vrot.lane.b32.xlu0 %v20625_v34, %s19482_s25  ;;  %v2554_v26 = vpop.permute.xlu1 %2553  ;;  %v2552_v6 = vpop.permute.xlu0 %2551 }
 0x321   :  { %2639 = vmatprep.subr.mxu1 %v2584_v14  ;;  %2332 = vmatprep.mubr.f32.mxu1 %v23277_v28  ;;  %v2578_v37 = vsel %vm23114_vm2, %v2552_v6, %v2554_v26 }
 0x322   :  { %2403 = vmatprep.mubr.f32.mxu0 %v23277_v28 }
 0x323   :  { %16038 = vmatmul.mubr.msk.f32.gmra.mxu1 %vm1234_vm11, %v20787_v19  ;;  %16039 = vmatmul.mubr.msk.f32.vlgmr.msra.gmra.mxu0 %vm1234_vm11, %v20761_v2 }
 0x324   :  { %18292 = vmatprep.mubr.msk.f32.mxu1 %vm1234_vm11, %v20761_v2  ;;  %3891 = vrot.lane.b32.xlu1 %v20575_v24, %s19492_s14  ;;  %v2572_v20 = vpop.permute.xlu1 %2571  ;;  %v2570_v1 = vpop.permute.xlu0 %2569  ;;  %v2583_v2 = vsel %vm23114_vm2, %v20809_v36, %v2566_v59 }
 0x325   :  { %3893 = vrot.lane.b32.xlu0 %v20573_v0, %s19492_s14  ;;  %2409 = vmatprep.mubr.f32.mxu0 %v23277_v28  ;;  %v2586_v8 = vsel %vm23114_vm2, %v2570_v1, %v2572_v20  ;;  %v2585_v21 = vsel %vm23114_vm2, %v2568_v11, %v2570_v1 }
 0x326   :  { %2728 = vmatprep.subr.mxu0 %v2586_v8 }
 0x327   :  { %16040 = vmatmul.mubr.msk.f32.gmra.mxu0 %vm1234_vm11, %v20775_v54  ;;  %18293 = vmatmul.mubr.msk.f32.vlgmr.msra.gmra.mxu1 %vm1234_vm11, %v20775_v54  ;;  %v2577_v54 = vsel %vm23114_vm2, %v20817_v62, %v2552_v6 }
 0x328   :  { %2640 = vmatpush1.msra.mxu1 %v2583_v2  ;;  %18295 = vmatprep.mubr.msk.f32.mxu1 %vm1234_vm11, %v20773_v61  ;;  %v2556_v33 = vpop.permute.xlu1 %2555  ;;  %v2558_v25 = vpop.permute.xlu0 %2557 }
 0x329   :  { %2641 = vmatprep.subr.mxu1 %v2578_v37  ;;  %3895 = vrot.lane.b32.xlu1 %v20581_v12, %s19492_s14  ;;  %v2580_v36 = vsel %vm23114_vm2, %v2556_v33, %v2558_v25  ;;  %v2579_v13 = vsel %vm23114_vm2, %v2554_v26, %v2556_v33 }
 0x32a   :  { %3923 = vrot.lane.b32.xlu0 %v20687_v3, %s19482_s25  ;;  %2642 = vmatpush1.msra.mxu1 %v2577_v54 }
 0x32b   :  { %2415 = vmatprep.mubr.f32.mxu0 %v23277_v28  ;;  %2729 = vmatpush1.msra.mxu0 %v2585_v21 }
 0x32c   :  { %16041 = vmatmul.mubr.msk.f32.gmra.mxu0 %vm1234_vm11, %v20773_v61  ;;  %18296 = vmatmul.mubr.msk.f32.gmra.mxu1 %vm1234_vm11, %v20787_v19  ;;  %v21030_v38 = vpop.permute.xlu1 %2545  ;;  %v2574_v62 = vpop.permute.xlu0 %2573 }
 0x32d   :  { %3925 = vrot.lane.b32.xlu1 %v20704_v51, %s19482_s25  ;;  %2730 = vmatprep.subr.mxu0 %v2580_v36  ;;  %v2587_v29 = vsel %vm23114_vm2, %v2572_v20, %v2574_v62 }
 0x32e   :  { %3897 = vrot.lane.b32.xlu0 %v20579_v41, %s19492_s14  ;;  %2421 = vmatprep.mubr.f32.mxu0 %v23277_v28  ;;  %s19509_s14 = smov 124  }
 0x32f   :  { %2675 = vmatprep.mubr.f32.mxu1 %v23277_v28  ;;  %2731 = vmatpush1.msra.mxu0 %v2579_v13 }
 0x330   :  { %16042 = vmatmul.mubr.msk.f32.gmra.mxu0 %vm1234_vm11, %v20787_v19  ;;  %16047 = vmatmul.mubr.msk.f32.vlgmr.msra.gmra.mxu1 %vm1234_vm11, %v20781_v52  ;;  %v2576_v61 = vpop.permute.xlu1 %2575  ;;  %v21042_v42 = vpop.permute.xlu0 %2547 }
 0x331   :  { %3909 = vrot.lane.b32.xlu1 %v20697_v39, %s19482_s25  ;;  %2681 = vmatprep.mubr.f32.mxu1 %v23277_v28  ;;  %v2588_v10 = vsel %vm23114_vm2, %v2574_v62, %v2576_v61 }
 0x332   :  { %3911 = vrot.lane.b32.xlu0 %v20713_v30, %s19482_s25  ;;  %2764 = vmatprep.mubr.f32.mxu0 %v23277_v28  ;;  %s19498_s25 = smov 101  }
 0x333   :  { %18298 = vmatprep.subr.mxu0 %v2576_v61  ;;  %2817 = vmatprep.subr.mxu1 %v2588_v10 }
 0x334   :  { %16048 = vmatmul.mubr.msk.f32.gmra.mxu1 %vm1234_vm11, %v20793_v58  ;;  %16051 = vmatmul.mubr.msk.f32.vlgmr.msra.gmra.mxu0 %vm1234_vm11, %v20781_v52  ;;  %v2560_v19 = vpop.permute.xlu1 %2559  ;;  %v2562_v48 = vpop.permute.xlu0 %2561 }
 0x335   :  { %4365 = vrot.lane.b32.xlu1 %v20595_v17, %s19483_s26  ;;  %18299 = vmatpush3.msra.mxu0 %v2576_v61  ;;  %v2582_v63 = vsel %vm23114_vm2, %v2560_v19, %v2562_v48  ;;  %v2581_v22 = vsel %vm23114_vm2, %v2558_v25, %v2560_v19 }
 0x336   :  { %4367 = vrot.lane.b32.xlu0 %v20598_v7, %s19483_s26  ;;  %2687 = vmatprep.mubr.f32.mxu1 %v23277_v28 }
 0x337   :  { %2770 = vmatprep.mubr.f32.mxu0 %v23277_v28  ;;  %2818 = vmatpush1.msra.mxu1 %v2587_v29  ;;  %v1193_v29 = vld [vmem:[%s23065_s5 + $0x8] sm:$0xff] }
 0x338   :  { %16049 = vmatmul.mubr.msk.f32.gmra.mxu1 %vm1234_vm11, %v21030_v38  ;;  %16052 = vmatmul.mubr.msk.f32.gmra.mxu0 %vm1234_vm11, %v20793_v58  ;;  %v3016_v47 = vpop.permute.xlu1 %3015  ;;  %v3018_v55 = vpop.permute.xlu0 %3017 }
 0x339   :  { %18300 = vmatprep.subr.mxu0 %v2562_v48  ;;  %4363 = vrot.lane.b32.xlu1 %v20602_v9, %s19483_s26  ;;  %v3034_v49 = vsel %vm23113_vm3, %v3016_v47, %v3018_v55 }
 0x33a   :  { %4351 = vrot.lane.b32.xlu0 %v20613_v57, %s19483_s26  ;;  %2819 = vmatprep.subr.mxu1 %v2582_v63 }
 0x33b   :  { %18301 = vmatpush3.msra.mxu0 %v2562_v48  ;;  %2693 = vmatprep.mubr.f32.mxu1 %v23277_v28 }
 0x33c   :  { %2776 = vmatprep.mubr.f32.mxu0 %v23277_v28  ;;  %2820 = vmatpush1.msra.mxu1 %v2581_v22  ;;  %v3020_v60 = vpop.permute.xlu1 %3019  ;;  %v21075_v5 = vpop.permute.xlu0 %3021 }
 0x33d   :  { %16050 = vmatmul.mubr.msk.f32.gmra.mxu1 %vm1234_vm11, %v21042_v42  ;;  %16053 = vmatmul.mubr.msk.f32.gmra.mxu0 %vm1234_vm11, %v21030_v38  ;;  %v3036_v23 = vsel %vm23113_vm3, %v3020_v60, %v21075_v5  ;;  %v3035_v40 = vsel %vm23113_vm3, %v3018_v55, %v3020_v60  ;;  %v1195_v55 = vld [vmem:[%s23065_s5 + $0x18] sm:$0xff] }
 0x33e   :  { %4353 = vrot.lane.b32.xlu1 %v20621_v46, %s19483_s26  ;;  %4349 = vrot.lane.b32.xlu0 %v20625_v34, %s19483_s26 }
 0x33f   :  { %3089 = vmatprep.subr.mxu0 %v3034_v49  ;;  %2782 = vmatprep.mubr.f32.mxu0 %v23277_v28 }
 0x340   :  { %2853 = vmatprep.mubr.f32.mxu1 %v23277_v28  ;;  %3178 = vmatprep.subr.mxu1 %v3036_v23  ;;  %v3014_v32 = vpop.permute.xlu1 %3013  ;;  %v3002_v16 = vpop.permute.xlu0 %3001 }
 0x341   :  { %16054 = vmatmul.mubr.msk.f32.gmra.mxu0 %vm1234_vm11, %v21042_v42  ;;  %16055 = vmatmul.mubr.msk.f32.vlgmr.msra.gmra.mxu1 %vm1234_vm11, %v20781_v52  ;;  %v3033_v56 = vsel %vm23113_vm3, %v3014_v32, %v3016_v47 }
 0x342   :  { %18302 = vmatprep.mubr.msk.f32.mxu0 %vm1234_vm11, %v20781_v52  ;;  %4341 = vrot.lane.b32.xlu1 %v20575_v24, %s19462_s19 }
 0x343   :  { %4369 = vrot.lane.b32.xlu0 %v20652_v45, %s19483_s26  ;;  %2859 = vmatprep.mubr.f32.mxu1 %v23277_v28 }
 0x344   :  { %3179 = vmatpush1.msra.mxu1 %v3035_v40  ;;  %v3004_v4 = vpop.permute.xlu1 %3003  ;;  %v3006_v44 = vpop.permute.xlu0 %3005 }
 0x345   :  { %16056 = vmatmul.mubr.msk.f32.gmra.mxu1 %vm1234_vm11, %v20793_v58  ;;  %18303 = vmatmul.mubr.msk.f32.vlgmr.msra.gmra.mxu0 %vm1234_vm11, %v20793_v58  ;;  %v3028_v52 = vsel %vm23113_vm3, %v3002_v16, %v3004_v4  ;;  %v3029_v35 = vsel %vm23113_vm3, %v3004_v4, %v3006_v44 }
 0x346   :  { %18305 = vmatprep.mubr.msk.f32.mxu0 %vm1234_vm11, %v21030_v38  ;;  %4371 = vrot.lane.b32.xlu1 %v20659_v27, %s19483_s26 }
 0x347   :  { %4343 = vrot.lane.b32.xlu0 %v20573_v0, %s19462_s19  ;;  %3090 = vmatpush1.msra.mxu0 %v3033_v56 }
 0x348   :  { %2865 = vmatprep.mubr.f32.mxu1 %v23277_v28  ;;  %3091 = vmatprep.subr.mxu0 %v3028_v52  ;;  %v3008_v24 = vpop.permute.xlu1 %3007  ;;  %v3000_v18 = vpop.permute.xlu0 %2999 }
 0x349   :  { %16057 = vmatmul.mubr.msk.f32.gmra.mxu1 %vm1234_vm11, %v21030_v38  ;;  %18306 = vmatmul.mubr.msk.f32.gmra.mxu0 %vm1234_vm11, %v21042_v42  ;;  %v3027_v58 = vsel %vm23113_vm3, %v3000_v18, %v3002_v16  ;;  %v3030_v53 = vsel %vm23113_vm3, %v3006_v44, %v3008_v24 }
 0x34a   :  { %4355 = vrot.lane.b32.xlu1 %v20664_v31, %s19483_s26  ;;  %2871 = vmatprep.mubr.f32.mxu1 %v23277_v28 }
 0x34b   :  { %4357 = vrot.lane.b32.xlu0 %v20673_v50, %s19483_s26  ;;  %3092 = vmatpush1.msra.mxu0 %v3027_v58 }
 0x34c   :  { %3180 = vmatprep.subr.mxu1 %v3030_v53  ;;  %v2992_v0 = vpop.permute.xlu1 %2991  ;;  %3125 = vmatprep.mubr.f32.mxu0 %v23277_v28  ;;  %v21126_v43 = vpop.permute.xlu0 %2993 }
 0x34d   :  { %16058 = vmatmul.mubr.msk.f32.gmra.mxu1 %vm1234_vm11, %v21042_v42  ;;  %16063 = vmatmul.mubr.msk.f32.vlgmr.msra.gmra.mxu0 %vm1234_vm11, %v2992_v0 }
 0x34e   :  { %4345 = vrot.lane.b32.xlu1 %v20581_v12, %s19462_s19  ;;  %3181 = vmatpush1.msra.mxu1 %v3029_v35  ;;  %v21303_v35 = vpop.f32.mrf.mxu0 }
 0x34f   :  { %4373 = vrot.lane.b32.xlu0 %v20687_v3, %s19483_s26  ;;  %3214 = vmatprep.mubr.f32.mxu1 %v23277_v28  ;;  %23280 = vst [vmem:[#allocation32_spill] sm:$0xff] %v21303_v35 }
 0x350   :  { %v21137_v59 = vpop.permute.xlu1 %2995  ;;  %3131 = vmatprep.mubr.f32.mxu0 %v23277_v28  ;;  %v3024_v11 = vpop.permute.xlu0 %3023 }
 0x351   :  { %16067 = vmatmul.mubr.msk.f32.vlgmr.msra.gmra.mxu1 %vm1234_vm11, %v2992_v0  ;;  %16064 = vmatmul.mubr.msk.f32.gmra.mxu0 %vm1234_vm11, %v21126_v43 }
 0x352   :  { %4375 = vrot.lane.b32.xlu1 %v20704_v51, %s19483_s26  ;;  %3220 = vmatprep.mubr.f32.mxu1 %v23277_v28 }
 0x353   :  { %4347 = vrot.lane.b32.xlu0 %v20579_v41, %s19462_s19  ;;  %3137 = vmatprep.mubr.f32.mxu0 %v23277_v28  ;;  %v3037_v41 = vsel %vm23113_vm3, %v21075_v5, %v3024_v11  ;;  %s19510_s19 = smov 47  }
 0x354   :  { %v3026_v12 = vpop.permute.xlu1 %3025  ;;  %v21149_v14 = vpop.permute.xlu0 %2997 }
 0x355   :  { %16068 = vmatmul.mubr.msk.f32.gmra.mxu1 %vm1234_vm11, %v21126_v43  ;;  %16065 = vmatmul.mubr.msk.f32.gmra.mxu0 %vm1234_vm11, %v21137_v59  ;;  %v3038_v26 = vsel %vm23113_vm3, %v3024_v11, %v3026_v12 }
 0x356   :  { %4359 = vrot.lane.b32.xlu1 %v20697_v39, %s19483_s26  ;;  %3226 = vmatprep.mubr.f32.mxu1 %v23277_v28 }
 0x357   :  { %4361 = vrot.lane.b32.xlu0 %v20713_v30, %s19483_s26  ;;  %18308 = vmatprep.subr.mxu1 %v3026_v12  ;;  %s19499_s26 = smov 24  }
 0x358   :  { %3267 = vmatprep.subr.mxu0 %v3038_v26  ;;  %18309 = vmatpush3.msra.mxu1 %v3026_v12  ;;  %v3010_v6 = vpop.permute.xlu1 %3009  ;;  %v3012_v20 = vpop.permute.xlu0 %3011 }
 0x359   :  { %16069 = vmatmul.mubr.msk.f32.gmra.mxu1 %vm1234_vm11, %v21137_v59  ;;  %3268 = vmatpush1.msra.mxu0 %v3037_v41  ;;  %v3032_v1 = vsel %vm23113_vm3, %v3010_v6, %v3012_v20  ;;  %v21312_v26 = vpop.f32.mrf.mxu0 }
 0x35a   :  { %4811 = vrot.lane.b32.xlu1 %v20595_v17, %s19484_s27  ;;  %3143 = vmatprep.mubr.f32.mxu0 %v23277_v28  ;;  %v3031_v17 = vsel %vm23113_vm3, %v3008_v24, %v3010_v6 }
 0x35b   :  { %4813 = vrot.lane.b32.xlu0 %v20598_v7, %s19484_s27  ;;  %3232 = vmatprep.mubr.f32.mxu1 %v23277_v28  ;;  %v21182_v7 = vpop.f32.mrf.mxu1 }
 0x35c   :  { %16066 = vmatmul.mubr.msk.f32.gmra.mxu0 %vm1234_vm11, %v21149_v14  ;;  %18310 = vmatprep.subr.mxu1 %v3012_v20  ;;  %v3466_v8 = vpop.permute.xlu1 %3465  ;;  %v3468_v2 = vpop.permute.xlu0 %3467 }
 0x35d   :  { %16070 = vmatmul.mubr.msk.f32.gmra.mxu1 %vm1234_vm11, %v21149_v14  ;;  %3269 = vmatprep.subr.mxu0 %v3032_v1  ;;  %v3484_v37 = vsel %vm672_vm4, %v3466_v8, %v3468_v2 }
 0x35e   :  { %4815 = vrot.lane.b32.xlu1 %v20652_v45, %s19484_s27  ;;  %18311 = vmatpush3.msra.mxu1 %v3012_v20  ;;  %v21319_v20 = vpop.f32.mrf.mxu0 }
 0x35f   :  { %4817 = vrot.lane.b32.xlu0 %v20659_v27, %s19484_s27  ;;  %18312 = vmatprep.mubr.msk.f32.mxu1 %vm1234_vm11, %v2992_v0  ;;  %v21196_v27 = vpop.f32.mrf.mxu1 }
 0x360   :  { %3270 = vmatpush1.msra.mxu0 %v3031_v17  ;;  %3303 = vmatprep.mubr.f32.mxu0 %v23277_v28  ;;  %v3464_v21 = vpop.permute.xlu1 %3463  ;;  %v3452_v33 = vpop.permute.xlu0 %3451 }
 0x361   :  { %16071 = vmatmul.mubr.msk.f32.vlgmr.msra.gmra.mxu0 %vm1234_vm11, %v2992_v0  ;;  %18313 = vmatmul.mubr.msk.f32.vlgmr.msra.gmra.mxu1 %vm1234_vm11, %v21126_v43  ;;  %v3483_v45 = vsel %vm672_vm4, %v3464_v21, %v3466_v8  ;;  %v21325_v17 = vpop.f32.mrf.mxu0 }
 0x362   :  { %4809 = vrot.lane.b32.xlu1 %v20602_v9, %s19484_s27  ;;  %18315 = vmatprep.mubr.msk.f32.mxu1 %vm1234_vm11, %v21137_v59 }
 0x363   :  { %4797 = vrot.lane.b32.xlu0 %v20613_v57, %s19484_s27  ;;  %3539 = vmatprep.subr.mxu1 %v3484_v37  ;;  %v21210_v57 = vpop.f32.mrf.mxu1 }
 0x364   :  { %3309 = vmatprep.mubr.f32.mxu0 %v23277_v28  ;;  %3540 = vmatpush1.msra.mxu1 %v3483_v45  ;;  %v3454_v25 = vpop.permute.xlu1 %3453  ;;  %v3450_v54 = vpop.permute.xlu0 %3449 }
 0x365   :  { %16072 = vmatmul.mubr.msk.f32.gmra.mxu0 %vm1234_vm11, %v21126_v43  ;;  %18316 = vmatmul.mubr.msk.f32.gmra.mxu1 %vm1234_vm11, %v21149_v14  ;;  %v3477_v9 = vsel %vm672_vm4, %v3450_v54, %v3452_v33  ;;  %v3478_v36 = vsel %vm672_vm4, %v3452_v33, %v3454_v25 }
 0x366   :  { %4799 = vrot.lane.b32.xlu1 %v20621_v46, %s19484_s27  ;;  %3315 = vmatprep.mubr.f32.mxu0 %v23277_v28  ;;  %v21225_v46 = vpop.f32.mrf.mxu1 }
 0x367   :  { %4801 = vrot.lane.b32.xlu0 %v20664_v31, %s19484_s27  ;;  %3541 = vmatprep.subr.mxu1 %v3478_v36 }
 0x368   :  { %3542 = vmatpush1.msra.mxu1 %v3477_v9  ;;  %v21212_v13 = vpop.permute.xlu1 %3441  ;;  %3575 = vmatprep.mubr.f32.mxu1 %v23277_v28  ;;  %v3470_v38 = vpop.permute.xlu0 %3469 }
 0x369   :  { %16073 = vmatmul.mubr.msk.f32.gmra.mxu0 %vm1234_vm11, %v21137_v59  ;;  %16079 = vmatmul.mubr.msk.f32.vlgmr.msra.gmra.mxu1 %vm1234_vm11, %v21212_v13  ;;  %v21239_v61 = vpop.f32.mrf.mxu1  ;;  %v21332_v9 = vpop.f32.mrf.mxu0 }
 0x36a   :  { %4803 = vrot.lane.b32.xlu1 %v20673_v50, %s19484_s27  ;;  %3321 = vmatprep.mubr.f32.mxu0 %v23277_v28  ;;  %23281 = vst [vmem:[#allocation42_spill] sm:$0xff] %v21332_v9 }
 0x36b   :  { %4795 = vrot.lane.b32.xlu0 %v20625_v34, %s19484_s27  ;;  %3581 = vmatprep.mubr.f32.mxu1 %v23277_v28  ;;  %v3485_v34 = vsel %vm672_vm4, %v3468_v2, %v3470_v38 }
 0x36c   :  { %v3472_v31 = vpop.permute.xlu1 %3471  ;;  %v21227_v62 = vpop.permute.xlu0 %3443 }
 0x36d   :  { %16074 = vmatmul.mubr.msk.f32.gmra.mxu0 %vm1234_vm11, %v21149_v14  ;;  %16080 = vmatmul.mubr.msk.f32.gmra.mxu1 %vm1234_vm11, %v21227_v62  ;;  %v3486_v50 = vsel %vm672_vm4, %v3470_v38, %v3472_v31 }
 0x36e   :  { %4819 = vrot.lane.b32.xlu1 %v20687_v3, %s19484_s27  ;;  %3628 = vmatprep.subr.mxu0 %v3486_v50  ;;  %v1192_v3 = vld [vmem:[%s23065_s5] sm:$0xff] }
 0x36f   :  { %4821 = vrot.lane.b32.xlu0 %v20704_v51, %s19484_s27  ;;  %3629 = vmatpush1.msra.mxu0 %v3485_v34  ;;  %v21252_v51 = vpop.f32.mrf.mxu1 }
 0x370   :  { %v3456_v42 = vpop.permute.xlu1 %3455  ;;  %v3458_v10 = vpop.permute.xlu0 %3457  ;;  %3664 = vmatprep.mubr.f32.mxu0 %v23277_v28  ;;  %3587 = vmatprep.mubr.f32.mxu1 %v23277_v28 }
 0x371   :  { %v3480_v19 = vsel %vm672_vm4, %v3456_v42, %v3458_v10  ;;  %v3479_v48 = vsel %vm672_vm4, %v3454_v25, %v3456_v42  ;;  %v21265_v47 = vpop.f32.mrf.mxu1 }
 0x372   :  { %4805 = vrot.lane.b32.xlu1 %v20697_v39, %s19484_s27  ;;  %3630 = vmatprep.subr.mxu0 %v3480_v19 }
 0x373   :  { %4807 = vrot.lane.b32.xlu0 %v20713_v30, %s19484_s27  ;;  %3631 = vmatpush1.msra.mxu0 %v3479_v48  ;;  %v1194_v30 = vld [vmem:[%s23065_s5 + $0x10] sm:$0xff]  ;;  %v21275_v23 = vpop.f32.mrf.mxu1  ;;  %s19493_s5 = smov 102   ;;  %s19500_s27 = smov 75  }
 0x374   :  { %v3446_v63 = vpop.permute.xlu1 %3445  ;;  %16083 = vmatmul.mubr.msk.f32.vlgmr.msra.gmra.mxu0 %vm1234_vm11, %v21212_v13  ;;  %v3474_v39 = vpop.permute.xlu0 %3473 }
 0x375   :  { %16081 = vmatmul.mubr.msk.f32.gmra.mxu1 %vm1234_vm11, %v3446_v63  ;;  %3670 = vmatprep.mubr.f32.mxu0 %v23277_v28  ;;  %v3487_v5 = vsel %vm672_vm4, %v3472_v31, %v3474_v39  ;;  %v21281_v4 = vpop.f32.mrf.mxu1  ;;  %v21340_v31 = vpop.f32.mrf.mxu0 }
 0x376   :  { %1198 = vperm.xlu1 %18454, %v1192_v3   ;;  %3593 = vmatprep.mubr.f32.mxu1 %v23277_v28  ;;  %23283 = vst [vmem:[#allocation37_spill] sm:$0xff] %v21340_v31 }
 0x377   :  { %1203 = vperm.xlu0 %18453, %v1193_v29   ;;  %v21291_v18 = vpop.f32.mrf.mxu1  ;;  %v21348_v42 = vpop.f32.mrf.mxu0 }
 0x378   :  { %v3476_v22 = vpop.permute.xlu1 %3475  ;;  %16084 = vmatmul.mubr.msk.f32.gmra.mxu0 %vm1234_vm11, %v21227_v62  ;;  %v3448_v49 = vpop.permute.xlu0 %3447  ;;  %23285 = vst [vmem:[#allocation27_spill] sm:$0xff] %v21348_v42 }
 0x379   :  { %16082 = vmatmul.mubr.msk.f32.gmra.mxu1 %vm1234_vm11, %v3448_v49  ;;  %18318 = vmatprep.subr.mxu0 %v3476_v22  ;;  %v3488_v60 = vsel %vm672_vm4, %v3474_v39, %v3476_v22  ;;  %v21306_v59 = vpop.f32.mrf.mxu1 }
 0x37a   :  { %1208 = vperm.xlu1 %18454, %v1194_v30   ;;  %3717 = vmatprep.subr.mxu1 %v3488_v60 }
 0x37b   :  { %1213 = vperm.xlu0 %18453, %v1195_v55   ;;  %18319 = vmatpush3.msra.mxu0 %v3476_v22  ;;  %v21315_v41 = vpop.f32.mrf.mxu1 }
 0x37c   :  { %3676 = vmatprep.mubr.f32.mxu0 %v23277_v28  ;;  %3718 = vmatpush1.msra.mxu1 %v3487_v5  ;;  %v3460_v32 = vpop.permute.xlu1 %3459  ;;  %v3462_v16 = vpop.permute.xlu0 %3461 }
 0x37d   :  { %16085 = vmatmul.mubr.msk.f32.gmra.mxu0 %vm1234_vm11, %v3446_v63  ;;  %18320 = vmatprep.subr.mxu0 %v3462_v16  ;;  %v3482_v40 = vsel %vm672_vm4, %v3460_v32, %v3462_v16  ;;  %v3481_v56 = vsel %vm672_vm4, %v3458_v10, %v3460_v32  ;;  %v21323_v2 = vpop.f32.mrf.mxu1 }
 0x37e   :  { %3719 = vmatprep.subr.mxu1 %v3482_v40  ;;  %18321 = vmatpush3.msra.mxu0 %v3462_v16 }
 0x37f   :  { %3682 = vmatprep.mubr.f32.mxu0 %v23277_v28  ;;  %3720 = vmatpush1.msra.mxu1 %v3481_v56  ;;  %v21327_v33 = vpop.f32.mrf.mxu1 }
 0x380   :  { %3753 = vmatprep.mubr.f32.mxu1 %v23277_v28  ;;  %v3916_v44 = vpop.permute.xlu1 %3915  ;;  %v3918_v52 = vpop.permute.xlu0 %3917 }
 0x381   :  { %16086 = vmatmul.mubr.msk.f32.gmra.mxu0 %vm1234_vm11, %v3448_v49  ;;  %16087 = vmatmul.mubr.msk.f32.vlgmr.msra.gmra.mxu1 %vm1234_vm11, %v21212_v13  ;;  %v3934_v24 = vsel %vm777_vm5, %v3916_v44, %v3918_v52 }
 0x382   :  { %18322 = vmatprep.mubr.msk.f32.mxu0 %vm1234_vm11, %v21212_v13  ;;  %3989 = vmatprep.subr.mxu0 %v3934_v24  ;;  %v21334_v13 = vpop.f32.mrf.mxu1 }
 0x383   :  { %3759 = vmatprep.mubr.f32.mxu1 %v23277_v28  ;;  %23282 = vst [vmem:[#allocation43_spill] sm:$0xff] %v21334_v13 }
 0x384   :  { %v3920_v58 = vpop.permute.xlu1 %3919  ;;  %v21294_v53 = vpop.permute.xlu0 %3921 }
 0x385   :  { %16088 = vmatmul.mubr.msk.f32.gmra.mxu1 %vm1234_vm11, %v21227_v62  ;;  %18323 = vmatmul.mubr.msk.f32.vlgmr.msra.gmra.mxu0 %vm1234_vm11, %v21227_v62  ;;  %v3936_v0 = vsel %vm777_vm5, %v3920_v58, %v21294_v53  ;;  %v3935_v43 = vsel %vm777_vm5, %v3918_v52, %v3920_v58  ;;  %v21342_v62 = vpop.f32.mrf.mxu1 }
 0x386   :  { %18325 = vmatprep.mubr.msk.f32.mxu0 %vm1234_vm11, %v3446_v63  ;;  %4078 = vmatprep.subr.mxu1 %v3936_v0  ;;  %23284 = vst [vmem:[#allocation44_spill] sm:$0xff] %v21342_v62 }
 0x387   :  { %3765 = vmatprep.mubr.f32.mxu1 %v23277_v28  ;;  %4079 = vmatpush1.msra.mxu1 %v3935_v43  ;;  %v21350_v10 = vpop.f32.mrf.mxu1 }
 0x388   :  { %v3914_v11 = vpop.permute.xlu1 %3913  ;;  %23286 = vst [vmem:[#allocation24_spill] sm:$0xff] %v21350_v10 }
 0x389   :  { %v3933_v12 = vsel %vm777_vm5, %v3914_v11, %v3916_v44  ;;  %16089 = vmatmul.mubr.msk.f32.gmra.mxu1 %vm1234_vm11, %v3446_v63  ;;  %18326 = vmatmul.mubr.msk.f32.gmra.mxu0 %vm1234_vm11, %v3448_v49  ;;  %v3902_v14 = vpop.permute.xlu0 %3901  ;;  %v21358_v63 = vpop.f32.mrf.mxu0 }
 0x38a   :  { %3990 = vmatpush1.msra.mxu0 %v3933_v12  ;;  %3771 = vmatprep.mubr.f32.mxu1 %v23277_v28  ;;  %23287 = vst [vmem:[#allocation30_spill] sm:$0xff] %v21358_v63  ;;  %v21361_v39 = vpop.f32.mrf.mxu1 }
 0x38b   :  { %4025 = vmatprep.mubr.f32.mxu0 %v23277_v28  ;;  %23288 = vst [vmem:[#allocation28_spill] sm:$0xff] %v21361_v39  ;;  %v21369_v60 = vpop.f32.mrf.mxu0 }
 0x38c   :  { %23289 = vst [vmem:[#allocation25_spill] sm:$0xff] %v21369_v60 }
 0x38d   :  { %v3904_v6 = vpop.permute.xlu1 %3903  ;;  %16090 = vmatmul.mubr.msk.f32.gmra.mxu1 %vm1234_vm11, %v3448_v49  ;;  %v21378_v56 = vpop.f32.mrf.mxu0 }
 0x38e   :  { %v3906_v1 = vpop.permute.xlu0 %3905  ;;  %v3928_v8 = vsel %vm777_vm5, %v3902_v14, %v3904_v6  ;;  %4114 = vmatprep.mubr.f32.mxu1 %v23277_v28  ;;  %23291 = vst [vmem:[#allocation31_spill] sm:$0xff] %v21378_v56 }
 0x38f   :  { %3991 = vmatprep.subr.mxu0 %v3928_v8  ;;  %v3929_v54 = vsel %vm777_vm5, %v3904_v6, %v3906_v1 }
 0x392   :  { %v3908_v37 = vpop.permute.xlu1 %3907  ;;  %v3900_v21 = vpop.permute.xlu0 %3899 }
 0x393   :  { %v3927_v45 = vsel %vm777_vm5, %v3900_v21, %v3902_v14  ;;  %v3930_v25 = vsel %vm777_vm5, %v3906_v1, %v3908_v37 }
 0x394   :  { %3992 = vmatpush1.msra.mxu0 %v3927_v45  ;;  %4080 = vmatprep.subr.mxu1 %v3930_v25  ;;  %v21371_v5 = vpop.f32.mrf.mxu1 }
 0x395   :  { %4081 = vmatpush1.msra.mxu1 %v3929_v54  ;;  %23290 = vst [vmem:[#allocation35_spill] sm:$0xff] %v21371_v5 }
 0x396   :  { %v3892_v36 = vpop.permute.xlu1 %3891  ;;  %v21380_v44 = vpop.f32.mrf.mxu1 }
 0x397   :  { %v3894_v38 = vpop.permute.xlu0 %3893  ;;  %16095 = vmatmul.mubr.msk.f32.vlgmr.msra.gmra.mxu0 %vm1234_vm11, %v3892_v36  ;;  %16099 = vmatmul.mubr.msk.f32.vlgmr.msra.gmra.mxu1 %vm1234_vm11, %v3892_v36 }
 0x398   :  { %4031 = vmatprep.mubr.f32.mxu0 %v23277_v28  ;;  %4120 = vmatprep.mubr.f32.mxu1 %v23277_v28  ;;  %v21389_v0 = vpop.f32.mrf.mxu1 }
 0x39a   :  { %v21399_v8 = vpop.f32.mrf.mxu1 }
 0x39b   :  { %v3896_v50 = vpop.permute.xlu1 %3895  ;;  %16096 = vmatmul.mubr.msk.f32.gmra.mxu0 %vm1234_vm11, %v3894_v38  ;;  %16100 = vmatmul.mubr.msk.f32.gmra.mxu1 %vm1234_vm11, %v3894_v38 }
 0x39c   :  { %v3924_v34 = vpop.permute.xlu0 %3923  ;;  %4037 = vmatprep.mubr.f32.mxu0 %v23277_v28  ;;  %4126 = vmatprep.mubr.f32.mxu1 %v23277_v28  ;;  %v21412_v54 = vpop.f32.mrf.mxu1 }
 0x39d   :  { %v3937_v29 = vsel %vm777_vm5, %v21294_v53, %v3924_v34 }
 0x39f   :  { %v3926_v19 = vpop.permute.xlu1 %3925  ;;  %16097 = vmatmul.mubr.msk.f32.gmra.mxu0 %vm1234_vm11, %v3896_v50  ;;  %16101 = vmatmul.mubr.msk.f32.gmra.mxu1 %vm1234_vm11, %v3896_v50 }
 0x3a0   :  { %v3898_v48 = vpop.permute.xlu0 %3897  ;;  %18328 = vmatprep.subr.mxu1 %v3926_v19  ;;  %v3938_v3 = vsel %vm777_vm5, %v3924_v34, %v3926_v19  ;;  %4043 = vmatprep.mubr.f32.mxu0 %v23277_v28 }
 0x3a1   :  { %4167 = vmatprep.subr.mxu0 %v3938_v3  ;;  %18329 = vmatpush3.msra.mxu1 %v3926_v19 }
 0x3a2   :  { %4168 = vmatpush1.msra.mxu0 %v3937_v29  ;;  %4132 = vmatprep.mubr.f32.mxu1 %v23277_v28 }
 0x3a3   :  { %v3910_v30 = vpop.permute.xlu1 %3909  ;;  %16098 = vmatmul.mubr.msk.f32.gmra.mxu0 %vm1234_vm11, %v3898_v48  ;;  %16102 = vmatmul.mubr.msk.f32.gmra.mxu1 %vm1234_vm11, %v3898_v48 }
 0x3a4   :  { %v3912_v55 = vpop.permute.xlu0 %3911  ;;  %18332 = vmatprep.mubr.msk.f32.mxu1 %vm1234_vm11, %v3892_v36  ;;  %v3931_v22 = vsel %vm777_vm5, %v3908_v37, %v3910_v30  ;;  %4203 = vmatprep.mubr.f32.mxu0 %v23277_v28 }
 0x3a5   :  { %18330 = vmatprep.subr.mxu1 %v3912_v55  ;;  %v3932_v49 = vsel %vm777_vm5, %v3910_v30, %v3912_v55 }
 0x3a6   :  { %4169 = vmatprep.subr.mxu0 %v3932_v49  ;;  %18331 = vmatpush3.msra.mxu1 %v3912_v55 }
 0x3a7   :  { %4170 = vmatpush1.msra.mxu0 %v3931_v22  ;;  %v4366_v32 = vpop.permute.xlu1 %4365  ;;  %18333 = vmatmul.mubr.msk.f32.vlgmr.msra.gmra.mxu1 %vm1234_vm11, %v3894_v38 }
 0x3a8   :  { %v4368_v16 = vpop.permute.xlu0 %4367  ;;  %16103 = vmatmul.mubr.msk.f32.vlgmr.msra.gmra.mxu0 %vm1234_vm11, %v3892_v36  ;;  %18335 = vmatprep.mubr.msk.f32.mxu1 %vm1234_vm11, %v3896_v50 }
 0x3a9   :  { %v4384_v40 = vsel %vm882_vm6, %v4366_v32, %v4368_v16  ;;  %4209 = vmatprep.mubr.f32.mxu0 %v23277_v28 }
 0x3aa   :  { %4439 = vmatprep.subr.mxu1 %v4384_v40 }
 0x3ab   :  { %v4364_v52 = vpop.permute.xlu1 %4363  ;;  %18336 = vmatmul.mubr.msk.f32.gmra.mxu1 %vm1234_vm11, %v3898_v48 }
 0x3ac   :  { %v4383_v24 = vsel %vm882_vm6, %v4364_v52, %v4366_v32  ;;  %v4352_v58 = vpop.permute.xlu0 %4351  ;;  %16104 = vmatmul.mubr.msk.f32.gmra.mxu0 %vm1234_vm11, %v3894_v38  ;;  %4475 = vmatprep.mubr.f32.mxu1 %v23277_v28 }
 0x3ad   :  { %4440 = vmatpush1.msra.mxu1 %v4383_v24  ;;  %4215 = vmatprep.mubr.f32.mxu0 %v23277_v28  ;;  %v21387_v53 = vpop.f32.mrf.mxu0 }
 0x3af   :  { %v21391_v43 = vpop.f32.mrf.mxu0 }
 0x3b0   :  { %v4354_v11 = vpop.permute.xlu1 %4353  ;;  %v4350_v12 = vpop.permute.xlu0 %4349  ;;  %16105 = vmatmul.mubr.msk.f32.gmra.mxu0 %vm1234_vm11, %v3896_v50 }
 0x3b1   :  { %v4377_v14 = vsel %vm882_vm6, %v4350_v12, %v4352_v58  ;;  %v4378_v6 = vsel %vm882_vm6, %v4352_v58, %v4354_v11  ;;  %4221 = vmatprep.mubr.f32.mxu0 %v23277_v28  ;;  %v21397_v1 = vpop.f32.mrf.mxu0 }
 0x3b2   :  { %4441 = vmatprep.subr.mxu1 %v4378_v6 }
 0x3b3   :  { %4442 = vmatpush1.msra.mxu1 %v4377_v14  ;;  %v21401_v37 = vpop.f32.mrf.mxu0 }
 0x3b4   :  { %v21403_v21 = vpop.permute.xlu1 %4341  ;;  %16106 = vmatmul.mubr.msk.f32.gmra.mxu0 %vm1234_vm11, %v3898_v48  ;;  %v21422_v48 = vpop.f32.mrf.mxu1 }
 0x3b5   :  { %v4370_v45 = vpop.permute.xlu0 %4369  ;;  %16111 = vmatmul.mubr.msk.f32.vlgmr.msra.gmra.mxu1 %vm1234_vm11, %v21403_v21  ;;  %4564 = vmatprep.mubr.f32.mxu0 %v23277_v28  ;;  %v21410_v25 = vpop.f32.mrf.mxu0 }
 0x3b6   :  { %4481 = vmatprep.mubr.f32.mxu1 %v23277_v28  ;;  %v4385_v34 = vsel %vm882_vm6, %v4368_v16, %v4370_v45  ;;  %v21429_v49 = vpop.f32.mrf.mxu1 }
 0x3b7   :  { %v21420_v19 = vpop.f32.mrf.mxu0 }
 0x3b8   :  { %v4372_v36 = vpop.permute.xlu1 %4371  ;;  %v21441_v52 = vpop.f32.mrf.mxu1 }
 0x3b9   :  { %v21414_v38 = vpop.permute.xlu0 %4343  ;;  %v4386_v50 = vsel %vm882_vm6, %v4370_v45, %v4372_v36  ;;  %v21427_v22 = vpop.f32.mrf.mxu0 }
 0x3ba   :  { %16112 = vmatmul.mubr.msk.f32.gmra.mxu1 %vm1234_vm11, %v21414_v38  ;;  %4528 = vmatprep.subr.mxu0 %v4386_v50 }
 0x3bb   :  { %4529 = vmatpush1.msra.mxu0 %v4385_v34  ;;  %4487 = vmatprep.mubr.f32.mxu1 %v23277_v28  ;;  %v21439_v40 = vpop.f32.mrf.mxu0 }
 0x3bc   :  { %v4356_v3 = vpop.permute.xlu1 %4355 }
 0x3bd   :  { %v4379_v29 = vsel %vm882_vm6, %v4354_v11, %v4356_v3  ;;  %v4358_v30 = vpop.permute.xlu0 %4357 }
 0x3be   :  { %v4380_v55 = vsel %vm882_vm6, %v4356_v3, %v4358_v30 }
 0x3bf   :  { %4530 = vmatprep.subr.mxu0 %v4380_v55 }
 0x3c0   :  { %4531 = vmatpush1.msra.mxu0 %v4379_v29  ;;  %v21431_v32 = vpop.permute.xlu1 %4345 }
 0x3c1   :  { %16115 = vmatmul.mubr.msk.f32.vlgmr.msra.gmra.mxu0 %vm1234_vm11, %v21403_v21  ;;  %v4374_v16 = vpop.permute.xlu0 %4373  ;;  %16113 = vmatmul.mubr.msk.f32.gmra.mxu1 %vm1234_vm11, %v21431_v32 }
 0x3c2   :  { %4570 = vmatprep.mubr.f32.mxu0 %v23277_v28  ;;  %4493 = vmatprep.mubr.f32.mxu1 %v23277_v28  ;;  %v4387_v6 = vsel %vm882_vm6, %v4372_v36, %v4374_v16 }
 0x3c4   :  { %v4376_v24 = vpop.permute.xlu1 %4375  ;;  %v21443_v58 = vpop.f32.mrf.mxu0 }
 0x3c5   :  { %23292 = vst [vmem:[#allocation40_spill] sm:$0xff] %v21443_v58  ;;  %16116 = vmatmul.mubr.msk.f32.gmra.mxu0 %vm1234_vm11, %v21414_v38  ;;  %v21447_v11 = vpop.permute.xlu0 %4347  ;;  %18338 = vmatprep.subr.mxu0 %v4376_v24  ;;  %v4388_v12 = vsel %vm882_vm6, %v4374_v16, %v4376_v24  ;;  %v21450_v14 = vpop.f32.mrf.mxu1 }
 0x3c6   :  { %16114 = vmatmul.mubr.msk.f32.gmra.mxu1 %vm1234_vm11, %v21447_v11  ;;  %4617 = vmatprep.subr.mxu1 %v4388_v12  ;;  %v21458_v34 = vpop.f32.mrf.mxu0 }
 0x3c7   :  { %18339 = vmatpush3.msra.mxu0 %v4376_v24  ;;  %4576 = vmatprep.mubr.f32.mxu0 %v23277_v28  ;;  %v21456_v45 = vpop.f32.mrf.mxu1  ;;  %23294 = vst [vmem:[#allocation47_spill] sm:$0xff] %v21458_v34 }
 0x3c8   :  { %23293 = vst [vmem:[#allocation36_spill] sm:$0xff] %v21456_v45  ;;  %4618 = vmatpush1.msra.mxu1 %v4387_v6  ;;  %v4360_v50 = vpop.permute.xlu1 %4359  ;;  %4653 = vmatprep.mubr.f32.mxu1 %v23277_v28 }
 0x3c9   :  { %v4381_v3 = vsel %vm882_vm6, %v4358_v30, %v4360_v50  ;;  %16117 = vmatmul.mubr.msk.f32.gmra.mxu0 %vm1234_vm11, %v21431_v32  ;;  %v4362_v29 = vpop.permute.xlu0 %4361  ;;  %v21464_v55 = vpop.f32.mrf.mxu1 }
 0x3ca   :  { %23295 = vst [vmem:[#allocation33_spill] sm:$0xff] %v21464_v55  ;;  %18340 = vmatprep.subr.mxu0 %v4362_v29  ;;  %v4382_v36 = vsel %vm882_vm6, %v4360_v50, %v4362_v29  ;;  %4582 = vmatprep.mubr.f32.mxu0 %v23277_v28  ;;  %v21470_v12 = vpop.f32.mrf.mxu0 }
 0x3cb   :  { %4619 = vmatprep.subr.mxu1 %v4382_v36  ;;  %18341 = vmatpush3.msra.mxu0 %v4362_v29  ;;  %v21468_v16 = vpop.f32.mrf.mxu1  ;;  %23297 = vst [vmem:[#allocation38_spill] sm:$0xff] %v21470_v12 }
 0x3cc   :  { %23296 = vst [vmem:[#allocation41_spill] sm:$0xff] %v21468_v16  ;;  %4620 = vmatpush1.msra.mxu1 %v4381_v3  ;;  %v4812_v24 = vpop.permute.xlu1 %4811  ;;  %v21484_v29 = vpop.f32.mrf.mxu0 }
 0x3cd   :  { %16118 = vmatmul.mubr.msk.f32.gmra.mxu0 %vm1234_vm11, %v21447_v11  ;;  %16119 = vmatmul.mubr.msk.f32.vlgmr.msra.gmra.mxu1 %vm1234_vm11, %v21403_v21  ;;  %v4814_v30 = vpop.permute.xlu0 %4813  ;;  %v21476_v6 = vpop.f32.mrf.mxu1  ;;  %23300 = vst [vmem:[#allocation29_spill] sm:$0xff] %v21484_v29 }
 0x3ce   :  { %23298 = vst [vmem:[#allocation48_spill] sm:$0xff] %v21476_v6  ;;  %18342 = vmatprep.mubr.msk.f32.mxu0 %vm1234_vm11, %v21403_v21  ;;  %v4830_v50 = vsel %vm987_vm7, %v4812_v24, %v4814_v30  ;;  %4659 = vmatprep.mubr.f32.mxu1 %v23277_v28  ;;  %v4791_v6 = vld [vmem:[#allocation10 + $0x8] sm:$0xff] }
 0x3cf   :  { %4889 = vmatprep.subr.mxu0 %v4830_v50  ;;  %v21482_v3 = vpop.f32.mrf.mxu1 }
 0x3d0   :  { %23299 = vst [vmem:[#allocation26_spill] sm:$0xff] %v21482_v3  ;;  %v4816_v36 = vpop.permute.xlu1 %4815 }
 0x3d1   :  { %v4831_v15 = vsel %vm987_vm7, %v4814_v30, %v4816_v36  ;;  %16120 = vmatmul.mubr.msk.f32.gmra.mxu1 %vm1234_vm11, %v21414_v38  ;;  %18343 = vmatmul.mubr.msk.f32.vlgmr.msra.gmra.mxu0 %vm1234_vm11, %v21414_v38  ;;  %v4818_v5 = vpop.permute.xlu0 %4817  ;;  %v21491_v21 = vpop.f32.mrf.mxu1 }
 0x3d2   :  { %23301 = vst [vmem:[#allocation34_spill] sm:$0xff] %v21491_v21  ;;  %18345 = vmatprep.mubr.msk.f32.mxu0 %vm1234_vm11, %v21431_v32  ;;  %v4832_v50 = vsel %vm987_vm7, %v4816_v36, %v4818_v5  ;;  %4665 = vmatprep.mubr.f32.mxu1 %v23277_v28  ;;  %v21497_v35 = vpop.f32.mrf.mxu0 }
 0x3d3   :  { %23302 = vst [vmem:[#allocation45_spill] sm:$0xff] %v21497_v35  ;;  %4978 = vmatprep.subr.mxu1 %v4832_v50  ;;  %v21499_v30 = vpop.f32.mrf.mxu1 }
 0x3d4   :  { %23303 = vst [vmem:[#allocation39_spill] sm:$0xff] %v21499_v30  ;;  %4979 = vmatpush1.msra.mxu1 %v4831_v15  ;;  %v4810_v56 = vpop.permute.xlu1 %4809  ;;  %v21501_v60 = vpop.f32.mrf.mxu0 }
 0x3d5   :  { %v4829_v38 = vsel %vm987_vm7, %v4810_v56, %v4812_v24  ;;  %16121 = vmatmul.mubr.msk.f32.gmra.mxu1 %vm1234_vm11, %v21431_v32  ;;  %18346 = vmatmul.mubr.msk.f32.gmra.mxu0 %vm1234_vm11, %v21447_v11  ;;  %v4798_v36 = vpop.permute.xlu0 %4797  ;;  %v21508_v21 = vpop.f32.mrf.mxu1 }
 0x3d6   :  { %4890 = vmatpush1.msra.mxu0 %v4829_v38  ;;  %4671 = vmatprep.mubr.f32.mxu1 %v23277_v28  ;;  %v21511_v50 = vpop.f32.mrf.mxu0 }
 0x3d7   :  { %v21513_v15 = vpop.f32.mrf.mxu1  ;;  %4925 = vmatprep.mubr.f32.mxu0 %v23277_v28 }
 0x3d8   :  { %v4800_v35 = vpop.permute.xlu1 %4799  ;;  %v21516_v56 = vpop.f32.mrf.mxu0 }
 0x3d9   :  { %16122 = vmatmul.mubr.msk.f32.gmra.mxu1 %vm1234_vm11, %v21447_v11  ;;  %v4802_v32 = vpop.permute.xlu0 %4801  ;;  %v4824_v24 = vsel %vm987_vm7, %v4798_v36, %v4800_v35 }
 0x3da   :  { %4891 = vmatprep.subr.mxu0 %v4824_v24  ;;  %v21521_v30 = vpop.f32.mrf.mxu0  ;;  %v21523_v38 = vpop.f32.mrf.mxu1  ;;  %5014 = vmatprep.mubr.f32.mxu1 %v23277_v28  ;;  %v4825_v11 = vsel %vm987_vm7, %v4800_v35, %v4802_v32  ;;  %v4792_v35 = vld [vmem:[#allocation10 + $0x18] sm:$0xff] }
 0x3dc   :  { %v4804_v29 = vpop.permute.xlu1 %4803  ;;  %v21526_v3 = vpop.f32.mrf.mxu0 }
 0x3dd   :  { %v4796_v39 = vpop.permute.xlu0 %4795  ;;  %v21528_v63 = vpop.f32.mrf.mxu1  ;;  %v4826_v12 = vsel %vm987_vm7, %v4802_v32, %v4804_v29 }
 0x3de   :  { %v4823_v34 = vsel %vm987_vm7, %v4796_v39, %v4798_v36  ;;  %4980 = vmatprep.subr.mxu1 %v4826_v12 }
 0x3df   :  { %4892 = vmatpush1.msra.mxu0 %v4823_v34  ;;  %4981 = vmatpush1.msra.mxu1 %v4825_v11  ;;  %v21533_v24 = vpop.f32.mrf.mxu0  ;;  %v21535_v16 = vpop.f32.mrf.mxu1 }
 0x3e0   :  { %16127 = vmatmul.mubr.msk.f32.vlgmr.msra.gmra.mxu0 %vm1234_vm11, %v4791_v6  ;;  %v4820_v10 = vpop.permute.xlu1 %4819  ;;  %16131 = vmatmul.mubr.msk.f32.vlgmr.msra.gmra.mxu1 %vm1234_vm11, %v4791_v6 }
 0x3e1   :  { %v4822_v42 = vpop.permute.xlu0 %4821  ;;  %v21539_v58 = vpop.f32.mrf.mxu0  ;;  %4931 = vmatprep.mubr.f32.mxu0 %v23277_v28  ;;  %5020 = vmatprep.mubr.f32.mxu1 %v23277_v28  ;;  %v4833_v39 = vsel %vm987_vm7, %v4818_v5, %v4820_v10  ;;  %v21556_v5 = vld [vmem:[#allocation10 + $0x28] sm:$0xff] }
 0x3e2   :  { %18348 = vmatprep.subr.mxu1 %v4822_v42  ;;  %v21544_v34 = vpop.f32.mrf.mxu1  ;;  %v4834_v12 = vsel %vm987_vm7, %v4820_v10, %v4822_v42 }
 0x3e3   :  { %5067 = vmatprep.subr.mxu0 %v4834_v12  ;;  %18349 = vmatpush3.msra.mxu1 %v4822_v42  ;;  %v21547_v36 = vpop.f32.mrf.mxu0 }
 0x3e4   :  { %16128 = vmatmul.mubr.msk.f32.gmra.mxu0 %vm1234_vm11, %v4792_v35  ;;  %v4806_v32 = vpop.permute.xlu1 %4805  ;;  %v21550_v11 = vpop.f32.mrf.mxu1  ;;  %16132 = vmatmul.mubr.msk.f32.gmra.mxu1 %vm1234_vm11, %v4792_v35 }
 0x3e5   :  { %5068 = vmatpush1.msra.mxu0 %v4833_v39  ;;  %v4808_v62 = vpop.permute.xlu0 %4807  ;;  %v21553_v31 = vpop.f32.mrf.mxu0  ;;  %4937 = vmatprep.mubr.f32.mxu0 %v23277_v28  ;;  %v4827_v10 = vsel %vm987_vm7, %v4804_v29, %v4806_v32 }
 0x3e6   :  { %23304 = vst [vmem:[#allocation46_spill] sm:$0xff] %v21553_v31  ;;  %18350 = vmatprep.subr.mxu1 %v4808_v62  ;;  %v21559_v42 = vpop.f32.mrf.mxu1  ;;  %v4828_v12 = vsel %vm987_vm7, %v4806_v32, %v4808_v62  ;;  %5026 = vmatprep.mubr.f32.mxu1 %v23277_v28  ;;  %v21574_v32 = vld [vmem:[#allocation10 + $0x38] sm:$0xff]  ;;  %vm23118_vm7 = vcmask 416768  }
 0x3e7   :  { %23305 = vst [vmem:[#allocation49_spill] sm:$0xff] %v21559_v42  ;;  %5069 = vmatprep.subr.mxu0 %v4828_v12  ;;  %18351 = vmatpush3.msra.mxu1 %v4808_v62  ;;  %v21563_v55 = vpop.f32.mrf.mxu0 }
 0x3e8   :  { %23306 = vst [vmem:[#allocation50_spill] sm:$0xff] %v21563_v55  ;;  %16129 = vmatmul.mubr.msk.f32.gmra.mxu0 %vm1234_vm11, %v21556_v5  ;;  %v21567_v39 = vpop.f32.mrf.mxu1  ;;  %16133 = vmatmul.mubr.msk.f32.gmra.mxu1 %vm1234_vm11, %v21556_v5 }
 0x3e9   :  { %23307 = vst [vmem:[#allocation51_spill] sm:$0xff] %v21567_v39  ;;  %5070 = vmatpush1.msra.mxu0 %v4827_v10  ;;  %v21571_v29 = vpop.f32.mrf.mxu0  ;;  %4943 = vmatprep.mubr.f32.mxu0 %v23277_v28 }
 0x3ea   :  { %23308 = vst [vmem:[#allocation52_spill] sm:$0xff] %v21571_v29  ;;  %v21576_v31 = vpop.f32.mrf.mxu1  ;;  %5032 = vmatprep.mubr.f32.mxu1 %v23277_v28 }
 0x3eb   :  { %23309 = vst [vmem:[#allocation53_spill] sm:$0xff] %v21576_v31 }
 0x3ec   :  { %16130 = vmatmul.mubr.msk.f32.gmra.mxu0 %vm1234_vm11, %v21574_v32  ;;  %v21581_v62 = vpop.f32.mrf.mxu0  ;;  %v21583_v12 = vpop.f32.mrf.mxu1  ;;  %16134 = vmatmul.mubr.msk.f32.gmra.mxu1 %vm1234_vm11, %v21574_v32 }
 0x3ed   :  { %23310 = vst [vmem:[#allocation54_spill] sm:$0xff] %v21581_v62  ;;  %23311 = vst [vmem:[#allocation55_spill] sm:$0xff] %v21583_v12  ;;  %5103 = vmatprep.mubr.f32.mxu0 %v23277_v28  ;;  %18352 = vmatprep.mubr.msk.f32.mxu1 %vm1234_vm11, %v4791_v6 }
 0x3ee   :  { %v21589_v10 = vpop.f32.mrf.mxu0  ;;  %v21591_v29 = vpop.f32.mrf.mxu1 }
 0x3ef   :  { %23312 = vst [vmem:[#allocation56_spill] sm:$0xff] %v21589_v10  ;;  %23313 = vst [vmem:[#allocation57_spill] sm:$0xff] %v21591_v29 }
 0x3f0   :  { %16135 = vmatmul.mubr.msk.f32.vlgmr.msra.gmra.mxu0 %vm1234_vm11, %v4791_v6  ;;  %v21594_v31 = vpop.f32.mrf.mxu0  ;;  %v21596_v39 = vpop.f32.mrf.mxu1  ;;  %18353 = vmatmul.mubr.msk.f32.vlgmr.msra.gmra.mxu1 %vm1234_vm11, %v4792_v35 }
 0x3f1   :  { %23314 = vst [vmem:[#allocation58_spill] sm:$0xff] %v21594_v31  ;;  %23315 = vst [vmem:[#allocation59_spill] sm:$0xff] %v21596_v39  ;;  %v21599_v12 = vpop.permute.xlu1 %1198  ;;  %5109 = vmatprep.mubr.f32.mxu0 %v23277_v28  ;;  %18355 = vmatprep.mubr.msk.f32.mxu1 %vm1234_vm11, %v21556_v5 }
 0x3f2   :  { %v21604_v62 = vpop.permute.xlu0 %1203  ;;  %v21606_v10 = vpop.f32.mrf.mxu0  ;;  %v1600_v6 = vadd.f32 %v21312_v26, %v21599_v12  ;;  %v1601_v31 = vadd.f32 %v21265_v47, %v21599_v12  ;;  %v1602_v39 = vadd.f32 %v21275_v23, %v21599_v12  ;;  %v21616_v29 = vadd.f32 %v21319_v20, %v21599_v12 }
 0x3f3   :  { %23316 = vst [vmem:[#allocation60_spill] sm:$0xff] %v21606_v10  ;;  %v2679_v55 = vpop.f32.mrf.mxu1  ;;  %v1606_v13 = vadd.f32 %v21182_v7, %v21604_v62  ;;  %v1607_v10 = vadd.f32 %v21196_v27, %v21604_v62  ;;  %v1608_v26 = vadd.f32 %v21281_v4, %v21604_v62  ;;  %v1609_v47 = vadd.f32 %v21291_v18, %v21604_v62 }
 0x3f4   :  { %v2064_v42 = vadd.f32 %v21380_v44, %v1600_v6  ;;  %16136 = vmatmul.mubr.msk.f32.gmra.mxu0 %vm1234_vm11, %v4792_v35  ;;  %v2065_v23 = vadd.f32 %v21387_v53, %v1601_v31  ;;  %v2766_v20 = vpop.f32.mrf.mxu0  ;;  %18356 = vmatmul.mubr.msk.f32.gmra.mxu1 %vm1234_vm11, %v21574_v32  ;;  %v2066_v7 = vadd.f32 %v21391_v43, %v1602_v39 }
 0x3f5   :  { %v2070_v27 = vadd.f32 %v21389_v0, %v1606_v13  ;;  %v2683_v9 = vpop.f32.mrf.mxu1  ;;  %v21633_v45 = vpop.permute.xlu1 %1208  ;;  %v2071_v4 = vadd.f32 %v21399_v8, %v1607_v10  ;;  %5115 = vmatprep.mubr.f32.mxu0 %v23277_v28  ;;  %v2072_v18 = vadd.f32 %v21397_v1, %v1608_v26  ;;  %v2073_v44 = vadd.f32 %v21401_v37, %v1609_v47 }
 0x3f6   :  { %v2514_v31 = vadd.f32 %v21501_v60, %v2064_v42  ;;  %v2515_v53 = vadd.f32 %v21508_v21, %v2065_v23  ;;  %v2516_v35 = vadd.f32 %v21513_v15, %v2066_v7  ;;  %v2768_v43 = vpop.f32.mrf.mxu0  ;;  %v1613_v13 = vadd.f32 %v21210_v57, %v21633_v45  ;;  %v21645_v39 = vpop.permute.xlu0 %1213 }
 0x3f7   :  { %v2520_v0 = vadd.f32 %v21511_v50, %v2070_v27  ;;  %v2521_v8 = vadd.f32 %v21516_v56, %v2071_v4  ;;  %v2685_v10 = vpop.f32.mrf.mxu1  ;;  %v2522_v1 = vadd.f32 %v21523_v38, %v2072_v18  ;;  %v1614_v60 = vadd.f32 %v21225_v46, %v21633_v45 }
 0x3f8   :  { %v21651_v37 = vadd.f32 %v2679_v55, %v2514_v31  ;;  %v21653_v21 = vadd.f32 %v2766_v20, %v2515_v53  ;;  %v21655_v15 = vadd.f32 %v2768_v43, %v2516_v35  ;;  %16137 = vmatmul.mubr.msk.f32.gmra.mxu0 %vm1234_vm11, %v21556_v5  ;;  %v2077_v57 = vadd.f32 %v21412_v54, %v1613_v13  ;;  %v2772_v50 = vpop.f32.mrf.mxu0  ;;  %v23317_v43 = vld [vmem:[#allocation36_spill] sm:$0xff] }
 0x3f9   :  { %v21660_v42 = vadd.f32 %v2683_v9, %v2520_v0  ;;  %v21662_v56 = vadd.f32 %v2685_v10, %v2521_v8  ;;  %v2689_v38 = vpop.f32.mrf.mxu1  ;;  %v21664_v6 = vadd.f32 %v2772_v50, %v2522_v1  ;;  %v2078_v46 = vadd.f32 %v21422_v48, %v1614_v60  ;;  %5121 = vmatprep.mubr.f32.mxu0 %v23277_v28  ;;  %v23319_v10 = vld [vmem:[#allocation49_spill] sm:$0xff] }
 0x3fa   :  { %v2527_v55 = vadd.f32 %v21521_v30, %v2077_v57  ;;  %v2523_v26 = vadd.f32 %v21528_v63, %v2073_v44  ;;  %v2774_v47 = vpop.f32.mrf.mxu0  ;;  %v1620_v54 = vadd.f32 %v21239_v61, %v21645_v39  ;;  %v1615_v9 = vadd.f32 %v21306_v59, %v21633_v45  ;;  %v23321_v57 = vld [vmem:[#allocation46_spill] sm:$0xff] }
 0x3fb   :  { %v2528_v5 = vadd.f32 %v21526_v3, %v2078_v46  ;;  %v2691_v23 = vpop.f32.mrf.mxu1  ;;  %v1621_v20 = vadd.f32 %v21252_v51, %v21645_v39  ;;  %v1616_v48 = vadd.f32 %v21315_v41, %v21633_v45  ;;  %v1622_v30 = vadd.f32 %v21323_v2, %v21645_v39  ;;  %v23322_v46 = vld [vmem:[#allocation33_spill] sm:$0xff] }
 0x3fc   :  { %v21681_v63 = vadd.f32 %v2689_v38, %v2527_v55  ;;  %v21683_v7 = vadd.f32 %v2774_v47, %v2523_v26  ;;  %16138 = vmatmul.mubr.msk.f32.gmra.mxu0 %vm1234_vm11, %v21574_v32  ;;  %v2084_v61 = vadd.f32 %v21429_v49, %v1620_v54  ;;  %v2079_v59 = vadd.f32 %v21410_v25, %v1615_v9  ;;  %v23323_v26 = vld [vmem:[#allocation37_spill] sm:$0xff]  ;;  %v23324_v54 = vld [vmem:[#allocation44_spill] sm:$0xff] }
 0x3fd   :  { %v21689_v3 = vadd.f32 %v2691_v23, %v2528_v5  ;;  %v2695_v51 = vpop.f32.mrf.mxu1  ;;  %v2778_v27 = vpop.f32.mrf.mxu0  ;;  %v2085_v41 = vadd.f32 %v21441_v52, %v1621_v20  ;;  %v2080_v4 = vadd.f32 %v21420_v19, %v1616_v48  ;;  %v2086_v2 = vadd.f32 %v21427_v22, %v1622_v30  ;;  %v23325_v23 = vld [vmem:[#allocation40_spill] sm:$0xff]  ;;  %v23326_v48 = vld [vmem:[#allocation27_spill] sm:$0xff] }
 0x3fe   :  { %v2534_v18 = vadd.f32 %v21533_v24, %v2084_v61  ;;  %v2529_v44 = vadd.f32 %v21535_v16, %v2079_v59  ;;  %v2067_v32 = vadd.f32 %v21450_v14, %v21616_v29  ;;  %v1623_v25 = vadd.f32 %v21327_v33, %v21645_v39  ;;  %v23327_v61 = vld [vmem:[#allocation24_spill] sm:$0xff] }
 0x3ff   :  { %v2535_v49 = vadd.f32 %v21539_v58, %v2085_v41  ;;  %v2697_v31 = vpop.f32.mrf.mxu1  ;;  %v2530_v53 = vadd.f32 %v21544_v34, %v2080_v4  ;;  %v2780_v52 = vpop.f32.mrf.mxu0  ;;  %v2536_v19 = vadd.f32 %v21550_v11, %v2086_v2  ;;  %v1604_v22 = vadd.f32 %v21325_v17, %v21599_v12  ;;  %v23318_v11 = vld [vmem:[#allocation42_spill] sm:$0xff] }
 0x400   :  { %v21705_v24 = vadd.f32 %v2695_v51, %v2534_v18  ;;  %v21707_v16 = vadd.f32 %v2778_v27, %v2529_v44  ;;  %v2517_v14 = vadd.f32 %v21547_v36, %v2067_v32  ;;  %v2087_v29 = vadd.f32 %v21439_v40, %v1623_v25  ;;  %v23320_v36 = vld [vmem:[#allocation43_spill] sm:$0xff]  ;;  %v23328_v27 = vld [vmem:[#allocation50_spill] sm:$0xff] }
 0x401   :  { %v21711_v33 = vadd.f32 %v2697_v31, %v2535_v49  ;;  %v21713_v58 = vadd.f32 %v2780_v52, %v2530_v53  ;;  %v2784_v35 = vpop.f32.mrf.mxu0  ;;  %v2855_v34 = vpop.f32.mrf.mxu1  ;;  %v2068_v13 = vadd.f32 %v23317_v43, %v1604_v22  ;;  %v1610_v0 = vadd.f32 %v23318_v11, %v21604_v62  ;;  %v23330_v44 = vld [vmem:[#allocation47_spill] sm:$0xff]  ;;  %v23332_v31 = vld [vmem:[#allocation48_spill] sm:$0xff]  ;;  %v23333_v52 = vld [vmem:[#allocation38_spill] sm:$0xff] }
 0x402   :  { %v21718_v17 = vadd.f32 %v2784_v35, %v2536_v19  ;;  %v21720_v8 = vadd.f32 %v2855_v34, %v2517_v14  ;;  %v2537_v1 = vadd.f32 %v23319_v10, %v2087_v29  ;;  %v1612_v40 = vadd.f32 %v23320_v36, %v21604_v62  ;;  %v23331_v25 = vld [vmem:[#allocation51_spill] sm:$0xff]  ;;  %v23334_v22 = vld [vmem:[#allocation30_spill] sm:$0xff]  ;;  %v23335_v35 = vld [vmem:[#allocation52_spill] sm:$0xff] }
 0x403   :  { %v2786_v60 = vpop.f32.mrf.mxu0  ;;  %v2518_v50 = vadd.f32 %v23321_v57, %v2068_v13  ;;  %v2857_v38 = vpop.f32.mrf.mxu1  ;;  %v2074_v55 = vadd.f32 %v23322_v46, %v1610_v0  ;;  %v1611_v47 = vadd.f32 %v23323_v26, %v21604_v62  ;;  %v1605_v9 = vadd.f32 %v23324_v54, %v21599_v12  ;;  %v23329_v62 = vld [vmem:[#allocation41_spill] sm:$0xff]  ;;  %v23337_v10 = vld [vmem:[#allocation28_spill] sm:$0xff]  ;;  %v23339_v57 = vld [vmem:[#allocation55_spill] sm:$0xff] }
 0x404   :  { %v21731_v5 = vadd.f32 %v2786_v60, %v2537_v1  ;;  %v2076_v20 = vadd.f32 %v23325_v23, %v1612_v40  ;;  %v1617_v30 = vadd.f32 %v23326_v48, %v21633_v45  ;;  %v1626_v59 = vadd.f32 %v23327_v61, %v21645_v39  ;;  %v23336_v13 = vld [vmem:[#allocation53_spill] sm:$0xff]  ;;  %v23338_v40 = vld [vmem:[#allocation54_spill] sm:$0xff]  ;;  %v23343_v61 = vld [vmem:[#allocation56_spill] sm:$0xff] }
 0x405   :  { %v21738_v51 = vadd.f32 %v2857_v38, %v2518_v50  ;;  %v2524_v41 = vadd.f32 %v23328_v27, %v2074_v55  ;;  %v2861_v4 = vpop.f32.mrf.mxu1  ;;  %v18304_v2 = vpop.f32.mrf.mxu0  ;;  %v2075_v18 = vadd.f32 %v23329_v62, %v1611_v47  ;;  %v2069_v32 = vadd.f32 %v23330_v44, %v1605_v9  ;;  %v23340_v38 = vld [vmem:[#allocation26_spill] sm:$0xff]  ;;  %v23341_v9 = vld [vmem:[#allocation29_spill] sm:$0xff]  ;;  %v23344_v27 = vld [vmem:[#allocation31_spill] sm:$0xff] }
 0x406   :  { %v2526_v49 = vadd.f32 %v23331_v25, %v2076_v20  ;;  %v2081_v53 = vadd.f32 %v23332_v31, %v1617_v30  ;;  %v2090_v19 = vadd.f32 %v23333_v52, %v1626_v59  ;;  %v1618_v14 = vadd.f32 %v23334_v22, %v21633_v45  ;;  %v23342_v20 = vld [vmem:[#allocation25_spill] sm:$0xff]  ;;  %v23346_v44 = vld [vmem:[#allocation34_spill] sm:$0xff]  ;;  %v23347_v25 = vld [vmem:[#allocation32_spill] sm:$0xff] }
 0x407   :  { %v21748_v29 = vadd.f32 %v2861_v4, %v2524_v41  ;;  %v2525_v34 = vadd.f32 %v23335_v35, %v2075_v18  ;;  %v2863_v43 = vpop.f32.mrf.mxu1  ;;  %v2519_v11 = vadd.f32 %v23336_v13, %v2069_v32  ;;  %v2944_v0 = vpop.f32.mrf.mxu0  ;;  %v1619_v1 = vadd.f32 %v23337_v10, %v21633_v45  ;;  %v23349_v22 = vld [vmem:[#allocation58_spill] sm:$0xff]  ;;  %v23351_v13 = vld [vmem:[#allocation60_spill] sm:$0xff] }
 0x408   :  { %v21754_v36 = vadd.f32 %v18304_v2, %v2526_v49  ;;  %v2531_v60 = vadd.f32 %v23338_v40, %v2081_v53  ;;  %v2540_v50 = vadd.f32 %v23339_v57, %v2090_v19  ;;  %v2082_v46 = vadd.f32 %v23340_v38, %v1618_v14  ;;  %v23345_v2 = vld [vmem:[#allocation57_spill] sm:$0xff]  ;;  %v23348_v53 = vld [vmem:[#allocation39_spill] sm:$0xff] }
 0x409   :  { %v21759_v55 = vadd.f32 %v2863_v43, %v2525_v34  ;;  %v21761_v26 = vadd.f32 %v2944_v0, %v2519_v11  ;;  %v2867_v47 = vpop.f32.mrf.mxu1  ;;  %v18307_v54 = vpop.f32.mrf.mxu0  ;;  %v2083_v23 = vadd.f32 %v23341_v9, %v1619_v1  ;;  %v1624_v48 = vadd.f32 %v23342_v20, %v21645_v39  ;;  %v23350_v34 = vld [vmem:[#allocation35_spill] sm:$0xff]  ;;  %v23352_v1 = vld [vmem:[#allocation45_spill] sm:$0xff] }
 0x40a   :  { %v21766_v45 = vadd.f32 %v2867_v47, %v2531_v60  ;;  %v21768_v30 = vadd.f32 %v18307_v54, %v2540_v50  ;;  %v2532_v59 = vadd.f32 %v23343_v61, %v2082_v46  ;;  %v1625_v41 = vadd.f32 %v23344_v27, %v21645_v39  ;;  %v23353_v50 = vld [vmem:[#allocation59_spill] sm:$0xff] }
 0x40b   :  { %v2869_v4 = vpop.f32.mrf.mxu1  ;;  %v2533_v62 = vadd.f32 %v23345_v2, %v2083_v23  ;;  %v2954_v18 = vpop.f32.mrf.mxu0  ;;  %v2088_v32 = vadd.f32 %v23346_v44, %v1624_v48  ;;  %v1599_v49 = vadd.f32 %v23347_v25, %v21599_v12 }
 0x40c   :  { %v21777_v31 = vadd.f32 %v2869_v4, %v2532_v59  ;;  %v2089_v52 = vadd.f32 %v23348_v53, %v1625_v41 }
 0x40d   :  { %v2983_v19 = vadd.f32 %v2954_v18, %v2533_v62  ;;  %v2538_v14 = vadd.f32 %v23349_v22, %v2088_v32  ;;  %v2873_v35 = vpop.f32.mrf.mxu1  ;;  %v2063_v43 = vadd.f32 %v23350_v34, %v1599_v49  ;;  %v3127_v39 = vpop.f32.mrf.mxu0 }
 0x40e   :  { %v2539_v11 = vadd.f32 %v23351_v13, %v2089_v52 }
 0x40f   :  { %v2988_v0 = vadd.f32 %v2873_v35, %v2538_v14  ;;  %v2875_v10 = vpop.f32.mrf.mxu1  ;;  %v2513_v40 = vadd.f32 %v23352_v1, %v2063_v43  ;;  %v3129_v60 = vpop.f32.mrf.mxu0 }
 0x410   :  { %v2989_v57 = vadd.f32 %v2875_v10, %v2539_v11  ;;  %v3414_v12 = vadd.f32 %v3129_v60, %v21651_v37 }
 0x411   :  { %v2963_v38 = vadd.f32 %v23353_v50, %v2513_v40  ;;  %v3216_v46 = vpop.f32.mrf.mxu1  ;;  %v3133_v47 = vpop.f32.mrf.mxu0 }
 0x412   :  { %v3415_v54 = vadd.f32 %v3216_v46, %v21653_v21  ;;  %v3420_v9 = vadd.f32 %v3133_v47, %v21660_v42 }
 0x413   :  { %v3413_v23 = vadd.f32 %v3127_v39, %v2963_v38  ;;  %v3218_v20 = vpop.f32.mrf.mxu1  ;;  %v3135_v48 = vpop.f32.mrf.mxu0 }
 0x414   :  { %v3416_v61 = vadd.f32 %v3218_v20, %v21655_v15  ;;  %v3421_v59 = vadd.f32 %v3135_v48, %v21662_v56 }
 0x415   :  { %v3222_v27 = vpop.f32.mrf.mxu1  ;;  %v3139_v41 = vpop.f32.mrf.mxu0 }
 0x416   :  { %v3422_v4 = vadd.f32 %v3222_v27, %v21664_v6  ;;  %v3427_v37 = vadd.f32 %v3139_v41, %v21681_v63 }
 0x417   :  { %v3224_v2 = vpop.f32.mrf.mxu1  ;;  %v3141_v62 = vpop.f32.mrf.mxu0 }
 0x418   :  { %v3423_v18 = vadd.f32 %v3224_v2, %v21683_v7  ;;  %v3428_v21 = vadd.f32 %v3141_v62, %v21689_v3 }
 0x419   :  { %v3228_v42 = vpop.f32.mrf.mxu1 }
 0x41a   :  { %v3429_v44 = vadd.f32 %v3228_v42, %v21707_v16 }
 0x41b   :  { %v3230_v32 = vpop.f32.mrf.mxu1 }
 0x41c   :  { %v3430_v15 = vadd.f32 %v3230_v32, %v21713_v58  ;;  %v3145_v25 = vpop.f32.mrf.mxu0 }
 0x41d   :  { %v3434_v56 = vadd.f32 %v3145_v25, %v21705_v24  ;;  %v3234_v49 = vpop.f32.mrf.mxu1 }
 0x41e   :  { %v3436_v6 = vadd.f32 %v3234_v49, %v21718_v17  ;;  %v3147_v53 = vpop.f32.mrf.mxu0 }
 0x41f   :  { %v3435_v63 = vadd.f32 %v3147_v53, %v21711_v33  ;;  %v3236_v52 = vpop.f32.mrf.mxu1 }
 0x420   :  { %v3437_v7 = vadd.f32 %v3236_v52, %v21731_v5 }
 0x421   :  { %v3305_v22 = vpop.f32.mrf.mxu0  ;;  %v18314_v3 = vpop.f32.mrf.mxu1 }
 0x422   :  { %v3417_v14 = vadd.f32 %v3305_v22, %v21720_v8  ;;  %v3426_v16 = vadd.f32 %v18314_v3, %v21754_v36 }
 0x423   :  { %v3307_v35 = vpop.f32.mrf.mxu0  ;;  %v3394_v58 = vpop.f32.mrf.mxu1 }
 0x424   :  { %v3418_v34 = vadd.f32 %v3307_v35, %v21738_v51  ;;  %v3419_v24 = vadd.f32 %v3394_v58, %v21761_v26 }
 0x425   :  { %v3311_v43 = vpop.f32.mrf.mxu0  ;;  %v18317_v17 = vpop.f32.mrf.mxu1 }
 0x426   :  { %v3424_v39 = vadd.f32 %v3311_v43, %v21748_v29  ;;  %v3440_v33 = vadd.f32 %v18317_v17, %v21768_v30 }
 0x427   :  { %v3313_v13 = vpop.f32.mrf.mxu0  ;;  %v3404_v5 = vpop.f32.mrf.mxu1 }
 0x428   :  { %v3425_v11 = vadd.f32 %v3313_v13, %v21759_v55  ;;  %v3433_v10 = vadd.f32 %v3404_v5, %v2983_v19 }
 0x429   :  { %v3317_v8 = vpop.f32.mrf.mxu0  ;;  %v3577_v1 = vpop.f32.mrf.mxu1 }
 0x42a   :  { %v3431_v36 = vadd.f32 %v3317_v8, %v21766_v45  ;;  %v21808_v40 = vadd.f32 %v3577_v1, %v3413_v23 }
 0x42b   :  { %v3319_v51 = vpop.f32.mrf.mxu0  ;;  %v3579_v60 = vpop.f32.mrf.mxu1 }
 0x42c   :  { %v3432_v26 = vadd.f32 %v3319_v51, %v21777_v31  ;;  %v21811_v50 = vadd.f32 %v3579_v60, %v3414_v12 }
 0x42d   :  { %v3323_v29 = vpop.f32.mrf.mxu0  ;;  %v3583_v38 = vpop.f32.mrf.mxu1 }
 0x42e   :  { %v3438_v30 = vadd.f32 %v3323_v29, %v2988_v0  ;;  %v21813_v46 = vadd.f32 %v3583_v38, %v3420_v9 }
 0x42f   :  { %v3325_v47 = vpop.f32.mrf.mxu0  ;;  %v3585_v55 = vpop.f32.mrf.mxu1 }
 0x430   :  { %v3439_v19 = vadd.f32 %v3325_v47, %v2989_v57  ;;  %v21815_v20 = vadd.f32 %v3585_v55, %v3421_v59 }
 0x434   :  { %v3666_v48 = vpop.f32.mrf.mxu0 }
 0x435   :  { %v21817_v45 = vadd.f32 %v3666_v48, %v3415_v54  ;;  %v3589_v23 = vpop.f32.mrf.mxu1 }
 0x436   :  { %v21819_v27 = vadd.f32 %v3589_v23, %v3427_v37  ;;  %v3668_v41 = vpop.f32.mrf.mxu0 }
 0x437   :  { %v21821_v31 = vadd.f32 %v3668_v41, %v3416_v61  ;;  %v3591_v12 = vpop.f32.mrf.mxu1 }
 0x438   :  { %v21823_v2 = vadd.f32 %v3591_v12, %v3428_v21  ;;  %v3672_v0 = vpop.f32.mrf.mxu0 }
 0x439   :  { %v21825_v9 = vadd.f32 %v3672_v0, %v3422_v4  ;;  %v3595_v62 = vpop.f32.mrf.mxu1 }
 0x43a   :  { %v21827_v42 = vadd.f32 %v3595_v62, %v3434_v56  ;;  %v3674_v57 = vpop.f32.mrf.mxu0 }
 0x43b   :  { %v21829_v59 = vadd.f32 %v3674_v57, %v3423_v18  ;;  %v3597_v54 = vpop.f32.mrf.mxu1 }
 0x43c   :  { %v21831_v32 = vadd.f32 %v3597_v54, %v3435_v63 }
 0x43d   :  { %v3678_v37 = vpop.f32.mrf.mxu0 }
 0x43e   :  { %v21833_v25 = vadd.f32 %v3678_v37, %v3429_v44 }
 0x43f   :  { %v3680_v61 = vpop.f32.mrf.mxu0 }
 0x440   :  { %v21835_v49 = vadd.f32 %v3680_v61, %v3430_v15 }
 0x441   :  { %v3684_v21 = vpop.f32.mrf.mxu0  ;;  %v3755_v53 = vpop.f32.mrf.mxu1 }
 0x442   :  { %v21837_v52 = vadd.f32 %v3684_v21, %v3436_v6  ;;  %v21839_v4 = vadd.f32 %v3755_v53, %v3417_v14 }
 0x443   :  { %v3686_v56 = vpop.f32.mrf.mxu0  ;;  %v3757_v22 = vpop.f32.mrf.mxu1 }
 0x444   :  { %v21841_v3 = vadd.f32 %v3686_v56, %v3437_v7  ;;  %v21843_v18 = vadd.f32 %v3757_v22, %v3418_v34 }
 0x445   :  { %v3761_v63 = vpop.f32.mrf.mxu1  ;;  %v18324_v35 = vpop.f32.mrf.mxu0 }
 0x446   :  { %23354 = vst [vmem:[#allocation36_spill] sm:$0xff] %v21843_v18  ;;  %v21845_v58 = vadd.f32 %v3761_v63, %v3424_v39  ;;  %v21847_v44 = vadd.f32 %v18324_v35, %v3426_v16 }
 0x447   :  { %v3763_v15 = vpop.f32.mrf.mxu1  ;;  %v3844_v43 = vpop.f32.mrf.mxu0 }
 0x448   :  { %23355 = vst [vmem:[#allocation42_spill] sm:$0xff] %v21845_v58  ;;  %v21849_v17 = vadd.f32 %v3763_v15, %v3425_v11  ;;  %v21851_v6 = vadd.f32 %v3844_v43, %v3419_v24 }
 0x449   :  { %v3767_v14 = vpop.f32.mrf.mxu1  ;;  %v18327_v13 = vpop.f32.mrf.mxu0 }
 0x44a   :  { %23356 = vst [vmem:[#allocation49_spill] sm:$0xff] %v21849_v17  ;;  %23357 = vst [vmem:[#allocation43_spill] sm:$0xff] %v21851_v6  ;;  %v21853_v5 = vadd.f32 %v3767_v14, %v3431_v36  ;;  %v21855_v7 = vadd.f32 %v18327_v13, %v3440_v33 }
 0x44b   :  { %v3769_v34 = vpop.f32.mrf.mxu1  ;;  %v3854_v8 = vpop.f32.mrf.mxu0 }
 0x44c   :  { %23358 = vst [vmem:[#allocation46_spill] sm:$0xff] %v21853_v5  ;;  %23359 = vst [vmem:[#allocation33_spill] sm:$0xff] %v21855_v7  ;;  %v21857_v1 = vadd.f32 %v3769_v34, %v3432_v26  ;;  %v21859_v39 = vadd.f32 %v3854_v8, %v3433_v10 }
 0x44d   :  { %v3773_v16 = vpop.f32.mrf.mxu1 }
 0x44e   :  { %23360 = vst [vmem:[#allocation37_spill] sm:$0xff] %v21857_v1  ;;  %23361 = vst [vmem:[#allocation44_spill] sm:$0xff] %v21859_v39  ;;  %v21861_v51 = vadd.f32 %v3773_v16, %v3438_v30 }
 0x44f   :  { %v3775_v60 = vpop.f32.mrf.mxu1 }
 0x450   :  { %23362 = vst [vmem:[#allocation40_spill] sm:$0xff] %v21861_v51  ;;  %v21863_v11 = vadd.f32 %v3775_v60, %v3439_v19 }
 0x452   :  { %23363 = vst [vmem:[#allocation27_spill] sm:$0xff] %v21863_v11 }
 0x457   :  { %v4027_v24 = vpop.f32.mrf.mxu0  ;;  %v4116_v29 = vpop.f32.mrf.mxu1 }
 0x459   :  { %v4029_v38 = vpop.f32.mrf.mxu0  ;;  %v4118_v47 = vpop.f32.mrf.mxu1 }
 0x45b   :  { %v4033_v36 = vpop.f32.mrf.mxu0  ;;  %v4122_v55 = vpop.f32.mrf.mxu1 }
 0x45d   :  { %v21865_v33 = vpop.f32.mrf.mxu0  ;;  %v21867_v48 = vpop.f32.mrf.mxu1 }
 0x45f   :  { %v21869_v26 = vpop.f32.mrf.mxu0  ;;  %v21871_v10 = vpop.f32.mrf.mxu1 }
 0x461   :  { %v21873_v23 = vpop.f32.mrf.mxu0  ;;  %v21875_v30 = vpop.f32.mrf.mxu1 }
 0x463   :  { %v21877_v19 = vpop.f32.mrf.mxu0  ;;  %v21879_v41 = vpop.f32.mrf.mxu1 }
 0x465   :  { %v21881_v12 = vpop.f32.mrf.mxu0  ;;  %v21883_v0 = vpop.f32.mrf.mxu1 }
 0x467   :  { %v21885_v62 = vpop.f32.mrf.mxu1 }
 0x468   :  { %v21887_v57 = vpop.f32.mrf.mxu0 }
 0x469   :  { %v21891_v37 = vpop.f32.mrf.mxu1 }
 0x46a   :  { %v21889_v54 = vpop.f32.mrf.mxu0  ;;  %23365 = vst [vmem:[#allocation50_spill] sm:$0xff] %v21891_v37 }
 0x46b   :  { %23364 = vst [vmem:[#allocation24_spill] sm:$0xff] %v21889_v54  ;;  %v21895_v21 = vpop.f32.mrf.mxu1 }
 0x46c   :  { %v21893_v61 = vpop.f32.mrf.mxu0  ;;  %23367 = vst [vmem:[#allocation47_spill] sm:$0xff] %v21895_v21 }
 0x46d   :  { %23366 = vst [vmem:[#allocation41_spill] sm:$0xff] %v21893_v61  ;;  %v21899_v56 = vpop.f32.mrf.mxu1 }
 0x46e   :  { %v21897_v53 = vpop.f32.mrf.mxu0  ;;  %23369 = vst [vmem:[#allocation48_spill] sm:$0xff] %v21899_v56 }
 0x46f   :  { %23368 = vst [vmem:[#allocation51_spill] sm:$0xff] %v21897_v53 }
 0x470   :  { %v21901_v22 = vpop.f32.mrf.mxu0 }
 0x471   :  { %23370 = vst [vmem:[#allocation38_spill] sm:$0xff] %v21901_v22 }
 0x472   :  { %v21903_v35 = vpop.f32.mrf.mxu0 }
 0x473   :  { %23371 = vst [vmem:[#allocation30_spill] sm:$0xff] %v21903_v35 }
 0x474   :  { %v21905_v43 = vpop.f32.mrf.mxu0 }
 0x475   :  { %v4477_v63 = vpop.f32.mrf.mxu1  ;;  %23372 = vst [vmem:[#allocation52_spill] sm:$0xff] %v21905_v43 }
 0x476   :  { %v21907_v13 = vpop.f32.mrf.mxu0 }
 0x477   :  { %v4479_v15 = vpop.f32.mrf.mxu1  ;;  %23373 = vst [vmem:[#allocation53_spill] sm:$0xff] %v21907_v13 }
 0x47a   :  { %v4483_v14 = vpop.f32.mrf.mxu1 }
 0x47c   :  { %v4485_v34 = vpop.f32.mrf.mxu1 }
 0x481   :  { %v4566_v8 = vpop.f32.mrf.mxu0  ;;  %v4489_v16 = vpop.f32.mrf.mxu1 }
 0x483   :  { %v4568_v60 = vpop.f32.mrf.mxu0  ;;  %v21909_v28 = vpop.f32.mrf.mxu1 }
 0x485   :  { %v4572_v11 = vpop.f32.mrf.mxu0 }
 0x486   :  { %v21911_v51 = vpop.f32.mrf.mxu1 }
 0x487   :  { %v4574_v1 = vpop.f32.mrf.mxu0 }
 0x488   :  { %v21913_v5 = vpop.f32.mrf.mxu1 }
 0x489   :  { %v4578_v22 = vpop.f32.mrf.mxu0 }
 0x48b   :  { %v21915_v35 = vpop.f32.mrf.mxu0 }
 0x48d   :  { %v21917_v56 = vpop.f32.mrf.mxu0  ;;  %v21919_v43 = vpop.f32.mrf.mxu1 }
 0x48e   :  { %23374 = vst [vmem:[#allocation28_spill] sm:$0xff] %v21919_v43  ;;  %v4313_v43 = vadd.f32 %v4027_v24, %v21808_v40 }
 0x48f   :  { %v21921_v13 = vpop.f32.mrf.mxu0  ;;  %v21923_v39 = vpop.f32.mrf.mxu1 }
 0x490   :  { %23375 = vst [vmem:[#allocation54_spill] sm:$0xff] %v21921_v13  ;;  %23376 = vst [vmem:[#allocation55_spill] sm:$0xff] %v21923_v39  ;;  %v4315_v39 = vadd.f32 %v4116_v29, %v21817_v45  ;;  %v4321_v29 = vadd.f32 %v21865_v33, %v21815_v20 }
 0x491   :  { %v21925_v53 = vpop.f32.mrf.mxu1  ;;  %v21927_v17 = vpop.f32.mrf.mxu0 }
 0x492   :  { %23377 = vst [vmem:[#allocation26_spill] sm:$0xff] %v21925_v53  ;;  %23378 = vst [vmem:[#allocation29_spill] sm:$0xff] %v21927_v17  ;;  %v4763_v17 = vadd.f32 %v4477_v63, %v4313_v43  ;;  %v4334_v43 = vadd.f32 %v21877_v19, %v21827_v42  ;;  %v4337_v42 = vadd.f32 %v21883_v0, %v21841_v3 }
 0x493   :  { %v21929_v21 = vpop.f32.mrf.mxu1  ;;  %v21933_v61 = vpop.f32.mrf.mxu0 }
 0x494   :  { %23379 = vst [vmem:[#allocation25_spill] sm:$0xff] %v21929_v21  ;;  %23381 = vst [vmem:[#allocation31_spill] sm:$0xff] %v21933_v61  ;;  %v4314_v21 = vadd.f32 %v4029_v38, %v21811_v50  ;;  %v4765_v61 = vadd.f32 %v4566_v8, %v4315_v39  ;;  %v4323_v50 = vadd.f32 %v21867_v48, %v21829_v59 }
 0x495   :  { %v21931_v7 = vpop.f32.mrf.mxu1  ;;  %v21937_v37 = vpop.f32.mrf.mxu0  ;;  %v4328_v48 = vadd.f32 %v21873_v23, %v21823_v2 }
 0x496   :  { %23380 = vst [vmem:[#allocation56_spill] sm:$0xff] %v21931_v7  ;;  %23383 = vst [vmem:[#allocation34_spill] sm:$0xff] %v21937_v37  ;;  %v4316_v7 = vadd.f32 %v4118_v47, %v21821_v31  ;;  %v4322_v37 = vadd.f32 %v4122_v55, %v21825_v9  ;;  %v4764_v13 = vadd.f32 %v4479_v15, %v4314_v21 }
 0x497   :  { %v21935_v58 = vpop.f32.mrf.mxu1  ;;  %v21943_v54 = vpop.f32.mrf.mxu0  ;;  %v4327_v55 = vadd.f32 %v21869_v26, %v21819_v27  ;;  %v4778_v2 = vadd.f32 %v21909_v28, %v4328_v48  ;;  %v23394_v48 = vld [vmem:[#allocation33_spill] sm:$0xff] }
 0x498   :  { %23382 = vst [vmem:[#allocation57_spill] sm:$0xff] %v21935_v58  ;;  %v4320_v58 = vadd.f32 %v4033_v36, %v21813_v46  ;;  %v4766_v40 = vadd.f32 %v4568_v60, %v4316_v7  ;;  %v4772_v31 = vadd.f32 %v4572_v11, %v4322_v37  ;;  %v4330_v37 = vadd.f32 %v21875_v30, %v21835_v49 }
 0x499   :  { %v21939_v6 = vpop.f32.mrf.mxu1  ;;  %v4777_v27 = vadd.f32 %v4489_v16, %v4327_v55  ;;  %v4335_v16 = vadd.f32 %v21881_v12, %v21831_v32  ;;  %v4326_v32 = vadd.f32 %v21885_v62, %v21847_v44  ;;  %v23391_v62 = vld [vmem:[#allocation29_spill] sm:$0xff] }
 0x49a   :  { %23384 = vst [vmem:[#allocation32_spill] sm:$0xff] %v21939_v6  ;;  %v4770_v38 = vadd.f32 %v4483_v14, %v4320_v58  ;;  %v4336_v14 = vadd.f32 %v21879_v41, %v21837_v52  ;;  %v4780_v49 = vadd.f32 %v21915_v35, %v4330_v37  ;;  %v4784_v52 = vadd.f32 %v21911_v51, %v4334_v43  ;;  %v23385_v51 = vld [vmem:[#allocation54_spill] sm:$0xff]  ;;  %v23395_v37 = vld [vmem:[#allocation47_spill] sm:$0xff] }
 0x49b   :  { %v21945_v53 = vpop.f32.mrf.mxu1  ;;  %v4785_v3 = vadd.f32 %v21913_v5, %v4335_v16  ;;  %v4787_v12 = vadd.f32 %v23385_v51, %v4337_v42  ;;  %v4776_v5 = vadd.f32 %v23391_v62, %v4326_v32  ;;  %v23405_v32 = vld [vmem:[#allocation38_spill] sm:$0xff]  ;;  %v23406_v51 = vld [vmem:[#allocation25_spill] sm:$0xff] }
 0x49c   :  { %v4786_v28 = vadd.f32 %v21917_v56, %v4336_v14 }
 0x49d   :  { %v23403_v42 = vld [vmem:[#allocation34_spill] sm:$0xff] }
 0x4a0   :  { %v4927_v18 = vpop.f32.mrf.mxu0  ;;  %v5016_v6 = vpop.f32.mrf.mxu1 }
 0x4a1   :  { %v5213_v24 = vadd.f32 %v4927_v18, %v4763_v17  ;;  %v5215_v45 = vadd.f32 %v5016_v6, %v4765_v61  ;;  %v4329_v18 = vadd.f32 %v21871_v10, %v21833_v25  ;;  %v4771_v17 = vadd.f32 %v4485_v34, %v4321_v29 }
 0x4a2   :  { %v4929_v47 = vpop.f32.mrf.mxu0  ;;  %v5018_v39 = vpop.f32.mrf.mxu1  ;;  %v4773_v6 = vadd.f32 %v4574_v1, %v4323_v50 }
 0x4a3   :  { %v5241_v63 = vmax.f32 %v5213_v24, 0.0  ;;  %v5243_v46 = vmax.f32 %v5215_v45, 0.0  ;;  %v5214_v36 = vadd.f32 %v4929_v47, %v4764_v13  ;;  %v5216_v9 = vadd.f32 %v5018_v39, %v4766_v40  ;;  %v23386_v47 = vld [vmem:[#allocation36_spill] sm:$0xff] }
 0x4a4   :  { %v4933_v20 = vpop.f32.mrf.mxu0  ;;  %v5022_v7 = vpop.f32.mrf.mxu1  ;;  %v4779_v26 = vadd.f32 %v4578_v22, %v4329_v18  ;;  %v4317_v45 = vadd.f32 %v21887_v57, %v21839_v4  ;;  %v23387_v39 = vld [vmem:[#allocation24_spill] sm:$0xff]  ;;  %v23389_v4 = vld [vmem:[#allocation50_spill] sm:$0xff] }
 0x4a5   :  { %5269 = vst [vmem:[#allocation3] sm:$0xff] %v5241_v63  ;;  %5271 = vst [vmem:[#allocation3 + $0x10] sm:$0xff] %v5243_v46  ;;  %v5242_v59 = vmax.f32 %v5214_v36, 0.0  ;;  %v5244_v58 = vmax.f32 %v5216_v9, 0.0  ;;  %v5220_v11 = vadd.f32 %v4933_v20, %v4770_v38  ;;  %v5222_v33 = vadd.f32 %v5022_v7, %v4772_v31  ;;  %v23388_v46 = vld [vmem:[#allocation43_spill] sm:$0xff]  ;;  %v23390_v36 = vld [vmem:[#allocation28_spill] sm:$0xff] }
 0x4a6   :  { %v4935_v61 = vpop.f32.mrf.mxu0  ;;  %v5024_v25 = vpop.f32.mrf.mxu1  ;;  %v4318_v63 = vadd.f32 %v23387_v39, %v23386_v47  ;;  %v4319_v57 = vadd.f32 %v23389_v4, %v23388_v46  ;;  %v4767_v44 = vadd.f32 %v23390_v36, %v4317_v45  ;;  %v23404_v45 = vld [vmem:[#allocation46_spill] sm:$0xff]  ;;  %v23407_v39 = vld [vmem:[#allocation37_spill] sm:$0xff]  ;;  %v23409_v4 = vld [vmem:[#allocation56_spill] sm:$0xff] }
 0x4a7   :  { %5270 = vst [vmem:[#allocation3 + $0x8] sm:$0xff] %v5242_v59  ;;  %5272 = vst [vmem:[#allocation3 + $0x18] sm:$0xff] %v5244_v58  ;;  %v5248_v1 = vmax.f32 %v5220_v11, 0.0  ;;  %v5250_v10 = vmax.f32 %v5222_v33, 0.0  ;;  %v5221_v21 = vadd.f32 %v4935_v61, %v4771_v17  ;;  %v5223_v15 = vadd.f32 %v5024_v25, %v4773_v6  ;;  %v23392_v58 = vld [vmem:[#allocation42_spill] sm:$0xff]  ;;  %v23393_v11 = vld [vmem:[#allocation41_spill] sm:$0xff] }
 0x4a8   :  { %v4939_v23 = vpop.f32.mrf.mxu0  ;;  %v5028_v30 = vpop.f32.mrf.mxu1  ;;  %v4324_v33 = vadd.f32 %v23393_v11, %v23392_v58  ;;  %v23397_v25 = vld [vmem:[#allocation31_spill] sm:$0xff] }
 0x4a9   :  { %5277 = vst [vmem:[#allocation3 + $0x38] sm:$0xff] %v5248_v1  ;;  %5279 = vst [vmem:[#allocation3 + $0x48] sm:$0xff] %v5250_v10  ;;  %v5249_v22 = vmax.f32 %v5221_v21, 0.0  ;;  %v5251_v13 = vmax.f32 %v5223_v15, 0.0  ;;  %v5227_v34 = vadd.f32 %v4939_v23, %v4777_v27  ;;  %v5229_v8 = vadd.f32 %v5028_v30, %v4779_v26  ;;  %v23396_v26 = vld [vmem:[#allocation55_spill] sm:$0xff] }
 0x4aa   :  { %v4941_v19 = vpop.f32.mrf.mxu0  ;;  %v5030_v41 = vpop.f32.mrf.mxu1  ;;  %v4340_v27 = vadd.f32 %v23395_v37, %v23394_v48  ;;  %v4768_v61 = vadd.f32 %v23396_v26, %v4318_v63  ;;  %v4769_v1 = vadd.f32 %v23397_v25, %v4319_v57  ;;  %v23399_v23 = vld [vmem:[#allocation51_spill] sm:$0xff]  ;;  %v23408_v63 = vld [vmem:[#allocation30_spill] sm:$0xff]  ;;  %v23414_v26 = vld [vmem:[#allocation53_spill] sm:$0xff] }
 0x4ab   :  { %5278 = vst [vmem:[#allocation3 + $0x40] sm:$0xff] %v5249_v22  ;;  %5280 = vst [vmem:[#allocation3 + $0x50] sm:$0xff] %v5251_v13  ;;  %v5255_v35 = vmax.f32 %v5227_v34, 0.0  ;;  %v5257_v60 = vmax.f32 %v5229_v8, 0.0  ;;  %v5228_v40 = vadd.f32 %v4941_v19, %v4778_v2  ;;  %v5230_v24 = vadd.f32 %v5030_v41, %v4780_v49  ;;  %v23398_v49 = vld [vmem:[#allocation49_spill] sm:$0xff]  ;;  %v23400_v22 = vld [vmem:[#allocation44_spill] sm:$0xff] }
 0x4ac   :  { %v4945_v0 = vpop.f32.mrf.mxu0  ;;  %v5034_v56 = vpop.f32.mrf.mxu1  ;;  %v4325_v30 = vadd.f32 %v23399_v23, %v23398_v49  ;;  %v23401_v13 = vld [vmem:[#allocation48_spill] sm:$0xff]  ;;  %v23402_v8 = vld [vmem:[#allocation26_spill] sm:$0xff]  ;;  %v4332_v46 = vadd.f32 %v23408_v63, %v23407_v39 }
 0x4ad   :  { %5284 = vst [vmem:[#allocation3 + $0x70] sm:$0xff] %v5255_v35  ;;  %5286 = vst [vmem:[#allocation3 + $0x80] sm:$0xff] %v5257_v60  ;;  %v5256_v29 = vmax.f32 %v5228_v40, 0.0  ;;  %v5258_v50 = vmax.f32 %v5230_v24, 0.0  ;;  %v5234_v38 = vadd.f32 %v4945_v0, %v4784_v52  ;;  %v5236_v31 = vadd.f32 %v5034_v56, %v4786_v28  ;;  %v23415_v25 = vld [vmem:[#allocation32_spill] sm:$0xff] }
 0x4ae   :  { %v4947_v9 = vpop.f32.mrf.mxu0  ;;  %v5036_v55 = vpop.f32.mrf.mxu1  ;;  %v5334_v18 = vld [vmem:[#allocation3 + $0x2] ss:$8 sm:$0xf]  ;;  %v5316_v17 = vld [vmem:[#allocation3 + $0x1] ss:$8 sm:$0xf]  ;;  %v4333_v34 = vadd.f32 %v23401_v13, %v23400_v22  ;;  %v4774_v16 = vadd.f32 %v23402_v8, %v4324_v33  ;;  %v4790_v52 = vadd.f32 %v23403_v42, %v4340_v27 }
 0x4af   :  { %5285 = vst [vmem:[#allocation3 + $0x78] sm:$0xff] %v5256_v29  ;;  %5287 = vst [vmem:[#allocation3 + $0x88] sm:$0xff] %v5258_v50  ;;  %v5262_v6 = vmax.f32 %v5234_v38, 0.0  ;;  %v5264_v20 = vmax.f32 %v5236_v31, 0.0  ;;  %v5235_v7 = vadd.f32 %v4947_v9, %v4785_v3  ;;  %v5237_v59 = vadd.f32 %v5036_v55, %v4787_v12  ;;  %5336 = vrot.lane.b32.xlu1 %v5334_v18, %s19493_s5  ;;  %v23410_v18 = vld [vmem:[#allocation40_spill] sm:$0xff]  ;;  %v23413_v27 = vld [vmem:[#allocation27_spill] sm:$0xff] }
 0x4b0   :  { %5318 = vrot.lane.b32.xlu0 %v5316_v17, %s19494_s20  ;;  %v5105_v10 = vpop.f32.mrf.mxu0  ;;  %v18354_v21 = vpop.f32.mrf.mxu1  ;;  %v5357_v41 = vld [vmem:[#allocation3 + $0x3] ss:$8 sm:$0xf]  ;;  %v4331_v3 = vadd.f32 %v23405_v32, %v23404_v45  ;;  %v4775_v12 = vadd.f32 %v23406_v51, %v4325_v30  ;;  %v4783_v0 = vadd.f32 %v21943_v54, %v4333_v34  ;;  %v5381_v62 = vld [vmem:[#allocation3 + $0x4] ss:$8 sm:$0xf] }
 0x4b1   :  { %5291 = vst [vmem:[#allocation3 + $0xa8] sm:$0xff] %v5262_v6  ;;  %5293 = vst [vmem:[#allocation3 + $0xb8] sm:$0xff] %v5264_v20  ;;  %v5263_v15 = vmax.f32 %v5235_v7, 0.0  ;;  %v5265_v43 = vmax.f32 %v5237_v59, 0.0  ;;  %v5217_v14 = vadd.f32 %v5105_v10, %v4767_v44  ;;  %v5226_v2 = vadd.f32 %v18354_v21, %v4776_v5  ;;  %v23411_v17 = vld [vmem:[#allocation52_spill] sm:$0xff]  ;;  %v23412_v7 = vld [vmem:[#allocation57_spill] sm:$0xff] }
 0x4b2   :  { %v5107_v28 = vpop.f32.mrf.mxu0  ;;  %v5194_v19 = vpop.f32.mrf.mxu1  ;;  %v4781_v57 = vadd.f32 %v23409_v4, %v4331_v3  ;;  %v4338_v6 = vadd.f32 %v23411_v17, %v23410_v18  ;;  %v4782_v59 = vadd.f32 %v23412_v7, %v4332_v46  ;;  %v5405_v37 = vld [vmem:[#allocation3 + $0x5] ss:$8 sm:$0xf]  ;;  %v5428_v23 = vld [vmem:[#allocation3 + $0x6] ss:$8 sm:$0xf] }
 0x4b3   :  { %5292 = vst [vmem:[#allocation3 + $0xb0] sm:$0xff] %v5263_v15  ;;  %5294 = vst [vmem:[#allocation3 + $0xc0] sm:$0xff] %v5265_v43  ;;  %v5245_v35 = vmax.f32 %v5217_v14, 0.0  ;;  %v5254_v60 = vmax.f32 %v5226_v2, 0.0  ;;  %v5218_v40 = vadd.f32 %v5107_v28, %v4768_v61  ;;  %v5219_v24 = vadd.f32 %v5194_v19, %v4769_v1  ;;  %5359 = vrot.lane.b32.xlu1 %v5357_v41, %s19495_s21 }
 0x4b4   :  { %v5111_v56 = vpop.f32.mrf.mxu0  ;;  %v18357_v29 = vpop.f32.mrf.mxu1  ;;  %v4339_v61 = vadd.f32 %v23414_v26, %v23413_v27  ;;  %v4788_v1 = vadd.f32 %v23415_v25, %v4338_v6  ;;  %v5452_v8 = vld [vmem:[#allocation3 + $0x7] ss:$8 sm:$0xf]  ;;  %v23416_v28 = vlaneseq  ;;  %v5524_v41 = vld [vmem:[#allocation3 + $0x3a] ss:$8 sm:$0xf] }
 0x4b5   :  { %5273 = vst [vmem:[#allocation3 + $0x20] sm:$0xff] %v5245_v35  ;;  %5283 = vst.msk [vmem:[#allocation3 + $0x68] sm:$0xff] %vm23115_vm13, %v5254_v60  ;;  %v5246_v50 = vmax.f32 %v5218_v40, 0.0  ;;  %v5247_v38 = vmax.f32 %v5219_v24, 0.0  ;;  %v5224_v31 = vadd.f32 %v5111_v56, %v4774_v16  ;;  %v5240_v47 = vadd.f32 %v18357_v29, %v4790_v52 }
 0x4b6   :  { %v5113_v36 = vpop.f32.mrf.mxu0  ;;  %v5204_v44 = vpop.f32.mrf.mxu1  ;;  %v4789_v43 = vadd.f32 %v21945_v53, %v4339_v61  ;;  %v5476_v16 = vld [vmem:[#allocation3 + $0x38] ss:$8 sm:$0xf]  ;;  %v5500_v52 = vld [vmem:[#allocation3 + $0x39] ss:$8 sm:$0xf] }
 0x4b7   :  { %5274 = vst [vmem:[#allocation3 + $0x28] sm:$0xff] %v5246_v50  ;;  %5276 = vst.msk [vmem:[#allocation3 + $0x30] sm:$0xff] %vm23115_vm13, %v5247_v38  ;;  %v5252_v54 = vmax.f32 %v5224_v31, 0.0  ;;  %v5268_v5 = vmax.f32 %v5240_v47, 0.0  ;;  %v5225_v9 = vadd.f32 %v5113_v36, %v4775_v12  ;;  %v5233_v55 = vadd.f32 %v5204_v44, %v4783_v0  ;;  %5383 = vrot.lane.b32.xlu1 %v5381_v62, %s19496_s9 }
 0x4b8   :  { %v5117_v20 = vpop.f32.mrf.mxu0  ;;  %vm22024_vm14 = vcmp.lt.s32.totalorder %v23416_v28, 435  ;;  %v5298_v60 = vld [vmem:[#allocation3] ss:$8 sm:$0xf]  ;;  %vm22046_vm15 = vcmp.ge.s32.totalorder %v23416_v28, 51  ;;  %vm22051_vm4 = vcmp.lt.s32.totalorder %v23416_v28, 486 }
 0x4b9   :  { %5281 = vst [vmem:[#allocation3 + $0x58] sm:$0xff] %v5252_v54  ;;  %5297 = vst.msk [vmem:[#allocation3 + $0xd8] sm:$0xff] %vm23115_vm13, %v5268_v5  ;;  %v5253_v58 = vmax.f32 %v5225_v9, 0.0  ;;  %v5261_v11 = vmax.f32 %v5233_v55, 0.0  ;;  %v5231_v33 = vadd.f32 %v5117_v20, %v4781_v57  ;;  %vm22056_vm5 = vcmp.ge.s32.totalorder %v23416_v28, 102 }
 0x4ba   :  { %v5119_v48 = vpop.f32.mrf.mxu0  ;;  %5303 = vst.msk [vmem:[#allocation4] ss:$2 sm:$0xf] %vm22024_vm14, %v5298_v60  ;;  %v5547_v24 = vld [vmem:[#allocation3 + $0x3b] ss:$8 sm:$0xf]  ;;  %vm23117_vm8 = vmand %vm22046_vm15, %vm22051_vm4 }
 0x4bb   :  { %5282 = vst [vmem:[#allocation3 + $0x60] sm:$0xff] %v5253_v58  ;;  %5290 = vst.msk [vmem:[#allocation3 + $0xa0] sm:$0xff] %vm23115_vm13, %v5261_v11  ;;  %v5259_v10 = vmax.f32 %v5231_v33, 0.0  ;;  %v5232_v21 = vadd.f32 %v5119_v48, %v4782_v59  ;;  %5407 = vrot.lane.b32.xlu1 %v5405_v37, %s19477_s0  ;;  %v5571_v32 = vld [vmem:[#allocation3 + $0x3c] ss:$8 sm:$0xf] }
 0x4bc   :  { %v5123_v15 = vpop.f32.mrf.mxu0  ;;  %v5595_v51 = vld [vmem:[#allocation3 + $0x3d] ss:$8 sm:$0xf]  ;;  %v5619_v0 = vld [vmem:[#allocation3 + $0x3e] ss:$8 sm:$0xf] }
 0x4bd   :  { %5288 = vst [vmem:[#allocation3 + $0x90] sm:$0xff] %v5259_v10  ;;  %v5260_v14 = vmax.f32 %v5232_v21, 0.0  ;;  %v5238_v2 = vadd.f32 %v5123_v15, %v4788_v1  ;;  %v5643_v29 = vld [vmem:[#allocation3 + $0x3f] ss:$8 sm:$0xf]  ;;  %vm22061_vm6 = vcmp.lt.s32.totalorder %v23416_v28, 537 }
 0x4be   :  { %v5125_v49 = vpop.f32.mrf.mxu0  ;;  %v5347_v56 = vld [vmem:[#allocation3 + $0x1a] ss:$8 sm:$0xf]  ;;  %v5371_v50 = vld [vmem:[#allocation3 + $0x1b] ss:$8 sm:$0xf]  ;;  %vm23116_vm9 = vmand %vm22056_vm5, %vm22061_vm6 }
 0x4bf   :  { %5289 = vst [vmem:[#allocation3 + $0x98] sm:$0xff] %v5260_v14  ;;  %v5266_v30 = vmax.f32 %v5238_v2, 0.0  ;;  %v5239_v22 = vadd.f32 %v5125_v49, %v4789_v43  ;;  %5430 = vrot.lane.b32.xlu1 %v5428_v23, %s19497_s24  ;;  %v5667_v38 = vld [vmem:[#allocation3 + $0x70] ss:$8 sm:$0xf]  ;;  %vm22076_vm10 = vcmp.ge.s32.totalorder %v23416_v28, 25 }
 0x4c0   :  { %v5395_v31 = vld [vmem:[#allocation3 + $0x1c] ss:$8 sm:$0xf]  ;;  %v5691_v47 = vld [vmem:[#allocation3 + $0x71] ss:$8 sm:$0xf] }
 0x4c1   :  { %5295 = vst [vmem:[#allocation3 + $0xc8] sm:$0xff] %v5266_v30  ;;  %v5267_v13 = vmax.f32 %v5239_v22, 0.0  ;;  %v5418_v39 = vld [vmem:[#allocation3 + $0x1d] ss:$8 sm:$0xf]  ;;  %vm22081_vm11 = vcmp.lt.s32.totalorder %v23416_v28, 460 }
 0x4c2   :  { %v5490_v34 = vld [vmem:[#allocation3 + $0x50] ss:$8 sm:$0xf]  ;;  %v5514_v53 = vld [vmem:[#allocation3 + $0x51] ss:$8 sm:$0xf]  ;;  %vm23120_vm3 = vmand %vm22076_vm10, %vm22081_vm11 }
 0x4c3   :  { %5296 = vst [vmem:[#allocation3 + $0xd0] sm:$0xff] %v5267_v13  ;;  %5492 = vrot.lane.b32.xlu0 %v5490_v34, %s19498_s25  ;;  %5454 = vrot.lane.b32.xlu1 %v5452_v8, %s19498_s25  ;;  %v5537_v42 = vld [vmem:[#allocation3 + $0x52] ss:$8 sm:$0xf]  ;;  %vm22103_vm2 = vcmp.ge.s32.totalorder %v23416_v28, 76  ;;  %vm22150_vm1 = vcmp.lt.s32.totalorder %v23416_v28, 485 }
 0x4c4   :  { %v5561_v35 = vld [vmem:[#allocation3 + $0x53] ss:$8 sm:$0xf]  ;;  %v5585_v40 = vld [vmem:[#allocation3 + $0x54] ss:$8 sm:$0xf] }
 0x4c5   :  { %v5609_v45 = vld [vmem:[#allocation3 + $0x55] ss:$8 sm:$0xf]  ;;  %v5633_v3 = vld [vmem:[#allocation3 + $0x56] ss:$8 sm:$0xf] }
 0x4c6   :  { %v5657_v12 = vld [vmem:[#allocation3 + $0x57] ss:$8 sm:$0xf]  ;;  %v5715_v63 = vld [vmem:[#allocation3 + $0x72] ss:$8 sm:$0xf] }
 0x4c7   :  { %5516 = vrot.lane.b32.xlu0 %v5514_v53, %s19499_s26  ;;  %5478 = vrot.lane.b32.xlu1 %v5476_v16, %s19499_s26  ;;  %v5442_v46 = vld [vmem:[#allocation3 + $0x1e] ss:$8 sm:$0xf]  ;;  %v5739_v4 = vld [vmem:[#allocation3 + $0x73] ss:$8 sm:$0xf] }
 0x4c8   :  { %v5466_v57 = vld [vmem:[#allocation3 + $0x1f] ss:$8 sm:$0xf]  ;;  %v5763_v36 = vld [vmem:[#allocation3 + $0x74] ss:$8 sm:$0xf] }
 0x4c9   :  { %v5681_v44 = vld [vmem:[#allocation3 + $0x88] ss:$8 sm:$0xf]  ;;  %v5787_v62 = vld [vmem:[#allocation3 + $0x75] ss:$8 sm:$0xf] }
 0x4ca   :  { %v5705_v54 = vld [vmem:[#allocation3 + $0x89] ss:$8 sm:$0xf]  ;;  %v5811_v5 = vld [vmem:[#allocation3 + $0x76] ss:$8 sm:$0xf] }
 0x4cb   :  { %5539 = vrot.lane.b32.xlu0 %v5537_v42, %s19500_s27  ;;  %5502 = vrot.lane.b32.xlu1 %v5500_v52, %s19500_s27  ;;  %v5729_v9 = vld [vmem:[#allocation3 + $0x8a] ss:$8 sm:$0xf]  ;;  %v5835_v55 = vld [vmem:[#allocation3 + $0x77] ss:$8 sm:$0xf] }
 0x4cc   :  { %v5753_v18 = vld [vmem:[#allocation3 + $0x8b] ss:$8 sm:$0xf]  ;;  %v5305_v17 = vld [vmem:[#allocation3 + $0x18] ss:$8 sm:$0xf] }
 0x4cd   :  { %v5777_v6 = vld [vmem:[#allocation3 + $0x8c] ss:$8 sm:$0xf]  ;;  %v5859_v20 = vld [vmem:[#allocation3 + $0xa8] ss:$8 sm:$0xf] }
 0x4ce   :  { %v5801_v7 = vld [vmem:[#allocation3 + $0x8d] ss:$8 sm:$0xf]  ;;  %v5883_v59 = vld [vmem:[#allocation3 + $0xa9] ss:$8 sm:$0xf] }
 0x4cf   :  { %5563 = vrot.lane.b32.xlu0 %v5561_v35, %s19478_s3  ;;  %5526 = vrot.lane.b32.xlu1 %v5524_v41, %s19478_s3  ;;  %s19504_s3 = smov 74   ;;  %v5825_v58 = vld [vmem:[#allocation3 + $0x8e] ss:$8 sm:$0xf]  ;;  %v23431_v52 = vmov 0  ;;  %v23433_v41 = vmov 0 }
 0x4d0   :  { %v5906_v11 = vld [vmem:[#allocation3 + $0xaa] ss:$8 sm:$0xf]  ;;  %v5849_v33 = vld [vmem:[#allocation3 + $0x8f] ss:$8 sm:$0xf] }
 0x4d1   :  { %v5930_v48 = vld [vmem:[#allocation3 + $0xab] ss:$8 sm:$0xf]  ;;  %v5873_v37 = vld [vmem:[#allocation3 + $0xc0] ss:$8 sm:$0xf] }
 0x4d2   :  { %v5954_v27 = vld [vmem:[#allocation3 + $0xac] ss:$8 sm:$0xf]  ;;  %v5896_v26 = vld [vmem:[#allocation3 + $0xc1] ss:$8 sm:$0xf] }
 0x4d3   :  { %5587 = vrot.lane.b32.xlu0 %v5585_v40, %s19501_s28  ;;  %5549 = vrot.lane.b32.xlu1 %v5547_v24, %s19501_s28  ;;  %v5978_v61 = vld [vmem:[#allocation3 + $0xad] ss:$8 sm:$0xf]  ;;  %v5920_v14 = vld [vmem:[#allocation3 + $0xc2] ss:$8 sm:$0xf] }
 0x4d4   :  { %v6002_v23 = vld [vmem:[#allocation3 + $0xae] ss:$8 sm:$0xf]  ;;  %v5944_v53 = vld [vmem:[#allocation3 + $0xc3] ss:$8 sm:$0xf] }
 0x4d5   :  { %v6025_v42 = vld [vmem:[#allocation3 + $0xaf] ss:$8 sm:$0xf]  ;;  %v23432_v52 = vsel %vm22103_vm2, 4294967295, %v23431_v52 }
 0x4d6   :  { %v5968_v24 = vld [vmem:[#allocation3 + $0xc4] ss:$8 sm:$0xf] }
 0x4d7   :  { %5611 = vrot.lane.b32.xlu0 %v5609_v45, %s19502_s29  ;;  %5573 = vrot.lane.b32.xlu1 %v5571_v32, %s19502_s29  ;;  %v23435_v45 = vmov 0  ;;  %v23437_v32 = vmov 0 }
 0x4db   :  { %5635 = vrot.lane.b32.xlu0 %v5633_v3, %s19503_s1  ;;  %5597 = vrot.lane.b32.xlu1 %v5595_v51, %s19503_s1 }
 0x4df   :  { %5659 = vrot.lane.b32.xlu0 %v5657_v12, %s19504_s3  ;;  %5621 = vrot.lane.b32.xlu1 %v5619_v0, %s19504_s3  ;;  %v5992_v0 = vld [vmem:[#allocation3 + $0xc5] ss:$8 sm:$0xf] }
 0x4e3   :  { %5349 = vrot.lane.b32.xlu0 %v5347_v56, %s19494_s20  ;;  %5645 = vrot.lane.b32.xlu1 %v5643_v29, %s19505_s30  ;;  %v23439_v56 = vmov 0  ;;  %v23441_v29 = vmov 0 }
 0x4e4   :  { %v23442_v29 = vsel %vm22150_vm1, 4294967295, %v23441_v29 }
 0x4e7   :  { %5373 = vrot.lane.b32.xlu0 %v5371_v50, %s19493_s5  ;;  %5669 = vrot.lane.b32.xlu1 %v5667_v38, %s19491_s13  ;;  %s94_s5 = sshll.u32 %s19520_s18, 4  ;;  %s95_s5 = int_to_ptr.vmem [resolvable:$true] %s94_s5 }
 0x4e8   :  { %s19440_s20 = scalar_lea.vmem %s95_s5, 111360  ;;  %p19445_p7 = scmp.lt.s32.totalorder %s95_s5, %s95_s5 }
 0x4e9   :  { %p19441_p6 = scmp.ne.s32.totalorder %s95_s5, %s19440_s20  ;;  %p19446_p8 = scmp.lt.s32.totalorder %s19440_s20, %s19440_s20 }
 0x4eb   :  { %5397 = vrot.lane.b32.xlu0 %v5395_v31, %s19495_s21  ;;  %5693 = vrot.lane.b32.xlu1 %v5691_v47, %s19506_s4  ;;  %p19447_p9 = por %p19446_p8, %p19445_p7 }
 0x4ed   :  { %p19448_p10 = pnand %p19447_p9, %p19441_p6 }
 0x4ef   :  { %5420 = vrot.lane.b32.xlu0 %v5418_v39, %s19496_s9  ;;  %5717 = vrot.lane.b32.xlu1 %v5715_v63, %s19507_s11 }
 0x4f3   :  { %5444 = vrot.lane.b32.xlu0 %v5442_v46, %s19477_s0  ;;  %5741 = vrot.lane.b32.xlu1 %v5739_v4, %s19508_s12  ;;  %s19512_s0 = smov 21  }
 0x4f7   :  { %5468 = vrot.lane.b32.xlu0 %v5466_v57, %s19497_s24  ;;  %5765 = vrot.lane.b32.xlu1 %v5763_v36, %s19509_s14 }
 0x4fb   :  { %5683 = vrot.lane.b32.xlu0 %v5681_v44, %s19505_s30  ;;  %5789 = vrot.lane.b32.xlu1 %v5787_v62, %s19510_s19 }
 0x4ff   :  { %5707 = vrot.lane.b32.xlu0 %v5705_v54, %s19491_s13  ;;  %5813 = vrot.lane.b32.xlu1 %v5811_v5, %s19511_s15  ;;  %s19515_s13 = smov 46  }
 0x503   :  { %5731 = vrot.lane.b32.xlu0 %v5729_v9, %s19506_s4  ;;  %5837 = vrot.lane.b32.xlu1 %v5835_v55, %s19512_s0 }
 0x507   :  { %5755 = vrot.lane.b32.xlu0 %v5753_v18, %s19507_s11  ;;  %5307 = vrot.lane.b32.xlu1 %v5305_v17, %s19513_s2 }
 0x50b   :  { %5779 = vrot.lane.b32.xlu0 %v5777_v6, %s19508_s12  ;;  %5861 = vrot.lane.b32.xlu1 %v5859_v20, %s19514_s16 }
 0x50f   :  { %5803 = vrot.lane.b32.xlu0 %v5801_v7, %s19509_s14  ;;  %5885 = vrot.lane.b32.xlu1 %v5883_v59, %s19479_s22 }
 0x513   :  { %5827 = vrot.lane.b32.xlu0 %v5825_v58, %s19510_s19  ;;  %5908 = vrot.lane.b32.xlu1 %v5906_v11, %s19515_s13 }
 0x517   :  { %5851 = vrot.lane.b32.xlu0 %v5849_v33, %s19511_s15  ;;  %5932 = vrot.lane.b32.xlu1 %v5930_v48, %s19516_s17 }
 0x51b   :  { %5875 = vrot.lane.b32.xlu0 %v5873_v37, %s19512_s0  ;;  %5956 = vrot.lane.b32.xlu1 %v5954_v27, %s19517_s7 }
 0x51f   :  { %5898 = vrot.lane.b32.xlu0 %v5896_v26, %s19514_s16  ;;  %5980 = vrot.lane.b32.xlu1 %v5978_v61, %s19518_s8 }
 0x521   :  { %v5337_v15 = vpop.permute.xlu1 %5336 }
 0x522   :  { %v5319_v43 = vpop.permute.xlu0 %5318  ;;  %v5338_v2 = vrot.slane %v5337_v15, 7 }
 0x523   :  { %v5320_v49 = vrot.slane %v5319_v43, 7  ;;  %5922 = vrot.lane.b32.xlu0 %v5920_v14, %s19479_s22  ;;  %6004 = vrot.lane.b32.xlu1 %v6002_v23, %s19480_s23  ;;  %s19519_s22 = smov 45  }
 0x524   :  { %v5339_v13 = vsel %vm23115_vm13, %v5338_v2, %v5337_v15  ;;  %vm22108_vm13 = vcmp.lt.s32.totalorder %v23416_v28, 511 }
 0x525   :  { %v5322_v34 = vsel %vm23118_vm7, %v5320_v49, %v5319_v43  ;;  %v5360_v8 = vpop.permute.xlu1 %5359  ;;  %v23434_v41 = vsel %vm22108_vm13, 4294967295, %v23433_v41  ;;  %vm22124_vm7 = vcmp.ge.s32.totalorder %v23416_v28, 127 }
 0x526   :  { %5328 = vst.msk [vmem:[#allocation4 + $0x6] ss:$2 sm:$0xf] %vm23117_vm8, %v5322_v34  ;;  %v5361_v16 = vrot.slane %v5360_v8, 7  ;;  %vm23123_vm8 = vmand %vm22103_vm2, %vm22108_vm13  ;;  %v23436_v45 = vsel %vm22124_vm7, 4294967295, %v23435_v45 }
 0x527   :  { %5345 = vst.msk [vmem:[#allocation4 + $0xc] ss:$2 sm:$0x1f] %vm23116_vm9, %v5339_v13  ;;  %5946 = vrot.lane.b32.xlu0 %v5944_v53, %s19515_s13  ;;  %6027 = vrot.lane.b32.xlu1 %v6025_v42, %s19519_s22  ;;  %vm23121_vm9 = vcmask 621568  }
 0x528   :  { %v5363_v35 = vsel %vm23119_vm12, %v5361_v16, %v5360_v8  ;;  %vm22129_vm12 = vcmp.lt.s32.totalorder %v23416_v28, 562 }
 0x529   :  { %5369 = vst.msk [vmem:[#allocation4 + $0x14] ss:$2 sm:$0xf] %vm23120_vm3, %v5363_v35  ;;  %v5384_v60 = vpop.permute.xlu1 %5383  ;;  %v23438_v32 = vsel %vm22129_vm12, 4294967295, %v23437_v32  ;;  %vm23127_vm3 = vmand %vm22124_vm7, %vm22129_vm12 }
 0x52a   :  { %v5385_v40 = vrot.slane %v5384_v60, 7 }
 0x52b   :  { %5970 = vrot.lane.b32.xlu0 %v5968_v24, %s19516_s17 }
 0x52c   :  { %v5387_v3 = vsel %vm23121_vm9, %v5385_v40, %v5384_v60  ;;  %vm22145_vm9 = vcmp.ge.s32.totalorder %v23416_v28, 50 }
 0x52d   :  { %5393 = vst.msk [vmem:[#allocation4 + $0x1a] ss:$2 sm:$0xf] %vm23123_vm8, %v5387_v3  ;;  %v5408_v51 = vpop.permute.xlu1 %5407  ;;  %v23440_v56 = vsel %vm22145_vm9, 4294967295, %v23439_v56 }
 0x52e   :  { %v5409_v12 = vrot.slane %v5408_v51, 7 }
 0x52f   :  { %5994 = vrot.lane.b32.xlu0 %v5992_v0, %s19517_s7 }
 0x530   :  { %v5410_v50 = vsel %vm23124_vm0, %v5409_v12, %v5408_v51 }
 0x531   :  { %19451 = shalt.err (!%p19448_p10)  }
 0x532   :  { %97 = dma.hbm_to_vmem [thread:$0]  %s23066_s6, 111360, %s95_s5, [#allocation6]  ;;  %5416 = vst.msk [vmem:[#allocation4 + $0x20] ss:$2 sm:$0x1f] %vm23127_vm3, %v5410_v50  ;;  %vm23129_vm8 = vcmask 408576   ;;  %v5431_v38 = vpop.permute.xlu1 %5430  ;;  %vm23130_vm0 = vmand %vm22145_vm9, %vm22150_vm1 }
 0x533   :  { %v5432_v31 = vrot.slane %v5431_v38, 7  ;;  %v6015_v47 = vld [vmem:[#allocation3 + $0xc6] ss:$8 sm:$0xf]  ;;  %vm22169_vm13 = vcmp.ge.s32.totalorder %v23416_v28, 101  ;;  %v23443_v39 = vmov 0 }
 0x534   :  { %6017 = vrot.lane.b32.xlu0 %v6015_v47, %s19518_s8  ;;  %v23444_v39 = vsel %vm22169_vm13, 4294967295, %v23443_v39  ;;  %vm22174_vm2 = vcmp.lt.s32.totalorder %v23416_v28, 536  ;;  %v23445_v63 = vmov 0  ;;  %vm5457_vm3 = vcmask 826368  }
 0x535   :  { %v23446_v63 = vsel %vm22174_vm2, 4294967295, %v23445_v63  ;;  %v5434_v46 = vsel %vm23129_vm8, %v5432_v31, %v5431_v38  ;;  %v5493_v4 = vpop.permute.xlu0 %5492  ;;  %vm23134_vm12 = vmand %vm22169_vm13, %vm22174_vm2  ;;  %v6039_v62 = vld [vmem:[#allocation3 + $0xc7] ss:$8 sm:$0xf]  ;;  %vm22190_vm8 = vcmp.ge.s32.totalorder %v23416_v28, 24  ;;  %v23447_v54 = vmov 0 }
 0x536   :  { %5440 = vst.msk [vmem:[#allocation4 + $0x28] ss:$2 sm:$0xf] %vm23130_vm0, %v5434_v46  ;;  %v5455_v57 = vpop.permute.xlu1 %5454  ;;  %v5494_v36 = vrot.slane %v5493_v4, 1  ;;  %v23448_v54 = vsel %vm22190_vm8, 4294967295, %v23447_v54  ;;  %vm22195_vm0 = vcmp.lt.s32.totalorder %v23416_v28, 459 }
 0x537   :  { %v5456_v44 = vrot.slane %v5455_v57, 7  ;;  %v23449_v5 = vmov 0  ;;  %vm5481_vm1 = vcmask 195584   ;;  %vm23137_vm9 = vmand %vm22190_vm8, %vm22195_vm0  ;;  %vm22211_vm7 = vcmp.ge.s32.totalorder %v23416_v28, 75 }
 0x538   :  { %6041 = vrot.lane.b32.xlu0 %v6039_v62, %s19480_s23  ;;  %v23450_v5 = vsel %vm22195_vm0, 4294967295, %v23449_v5  ;;  %v22199_v9 = vsel %vm5457_vm3, %v5493_v4, %v5494_v36  ;;  %v23451_v7 = vmov 0  ;;  %v23453_v59 = vmov 0 }
 0x539   :  { %v5458_v55 = vsel %vm5457_vm3, %v5456_v44, %v5455_v57  ;;  %v5517_v18 = vpop.permute.xlu0 %5516  ;;  %v23452_v7 = vsel %vm22211_vm7, 4294967295, %v23451_v7  ;;  %vm22216_vm3 = vcmp.lt.s32.totalorder %v23416_v28, 510  ;;  %vm22232_vm13 = vcmp.ge.s32.totalorder %v23416_v28, 126 }
 0x53a   :  { %5464 = vst.msk [vmem:[#allocation4 + $0x2e] ss:$2 sm:$0x1f] %vm23134_vm12, %v5458_v55  ;;  %v5479_v17 = vpop.permute.xlu1 %5478  ;;  %v5518_v6 = vrot.slane %v5517_v18, 7  ;;  %v23454_v59 = vsel %vm22216_vm3, 4294967295, %v23453_v59  ;;  %vm5505_vm12 = vcmask 613376   ;;  %vm23139_vm2 = vmand %vm22211_vm7, %vm22216_vm3 }
 0x53b   :  { %v5480_v20 = vrot.slane %v5479_v17, 7  ;;  %v23455_v26 = vmov 0  ;;  %v23457_v61 = vmov 0  ;;  %vm22255_vm0 = vcmp.ge.s32.totalorder %v23416_v28, 49 }
 0x53c   :  { %v22220_v58 = vsel %vm5481_vm1, %v5518_v6, %v5517_v18  ;;  %v23456_v26 = vsel %vm22232_vm13, 4294967295, %v23455_v26  ;;  %v23459_v23 = vmov 0  ;;  %v23461_v13 = vmov 0 }
 0x53d   :  { %v5482_v11 = vsel %vm5481_vm1, %v5480_v20, %v5479_v17  ;;  %v5540_v33 = vpop.permute.xlu0 %5539  ;;  %vm22237_vm1 = vcmp.lt.s32.totalorder %v23416_v28, 561  ;;  %v23460_v23 = vsel %vm22255_vm0, 4294967295, %v23459_v23  ;;  %vm5552_vm3 = vcmask 400384  }
 0x53e   :  { %5488 = vst.msk [vmem:[#allocation4 + $0x36] ss:$2 sm:$0xf] %vm23137_vm9, %v5482_v11  ;;  %v5503_v48 = vpop.permute.xlu1 %5502  ;;  %v5541_v37 = vrot.slane %v5540_v33, 7  ;;  %v23458_v61 = vsel %vm22237_vm1, 4294967295, %v23457_v61  ;;  %vm23143_vm9 = vmand %vm22232_vm13, %vm22237_vm1  ;;  %vm22275_vm8 = vcmp.ge.s32.totalorder %v23416_v28, 100 }
 0x53f   :  { %v5504_v27 = vrot.slane %v5503_v48, 7  ;;  %v23464_v35 = vmov 0  ;;  %v23466_v60 = vmov 0  ;;  %vm22298_vm13 = vcmp.ge.s32.totalorder %v23416_v28, 23 }
 0x540   :  { %v22241_v15 = vsel %vm5505_vm12, %v5541_v37, %v5540_v33  ;;  %v23465_v35 = vsel %vm22275_vm8, 4294967295, %v23464_v35  ;;  %v23468_v0 = vmov 0  ;;  %v23470_v50 = vmov 0 }
 0x541   :  { %v5506_v43 = vsel %vm5505_vm12, %v5504_v27, %v5503_v48  ;;  %v22248_v14 = vpop.permute.xlu0 %5563  ;;  %vm22260_vm12 = vcmp.lt.s32.totalorder %v23416_v28, 484  ;;  %v23469_v0 = vsel %vm22298_vm13, 4294967295, %v23468_v0  ;;  %v23472_v4 = vmov 0 }
 0x542   :  { %5512 = vst.msk [vmem:[#allocation4 + $0x3c] ss:$2 sm:$0xf] %vm23139_vm2, %v5506_v43  ;;  %v5527_v2 = vpop.permute.xlu1 %5526  ;;  %v23462_v13 = vsel %vm22260_vm12, 4294967295, %v23461_v13  ;;  %vm23463_vm2 = vcmask 1031168   ;;  %vm23146_vm7 = vmand %vm22255_vm0, %vm22260_vm12  ;;  %vm22320_vm0 = vcmp.ge.s32.totalorder %v23416_v28, 74 }
 0x543   :  { %v5528_v49 = vrot.slane %v5527_v2, 7  ;;  %v23473_v4 = vsel %vm22320_vm0, 4294967295, %v23472_v4  ;;  %v23474_v57 = vmov 0  ;;  %v23476_v18 = vmov 0 }
 0x544   :  { %v23478_v17 = vmov 0  ;;  %v23480_v48 = vmov 0  ;;  %v23483_v37 = vmov 0  ;;  %v23536_v25 = vmov 0 }
 0x545   :  { %v5529_v34 = vsel %vm23463_vm2, %v5528_v49, %v5527_v2  ;;  %v5588_v8 = vpop.permute.xlu0 %5587  ;;  %vm22280_vm2 = vcmp.lt.s32.totalorder %v23416_v28, 535  ;;  %v23538_v1 = vmov 0 }
 0x546   :  { %5535 = vst.msk [vmem:[#allocation4 + $0x42] ss:$2 sm:$0x1f] %vm23143_vm9, %v5529_v34  ;;  %v5550_v53 = vpop.permute.xlu1 %5549  ;;  %v5589_v16 = vrot.slane %v5588_v8, 7  ;;  %v23467_v60 = vsel %vm22280_vm2, 4294967295, %v23466_v60  ;;  %vm23149_vm9 = vcmask 818176   ;;  %vm23150_vm1 = vmand %vm22275_vm8, %vm22280_vm2 }
 0x547   :  { %v5551_v42 = vrot.slane %v5550_v53, 7  ;;  %vm22342_vm8 = vcmp.ge.s32.totalorder %v23416_v28, 125  ;;  %v23486_v34 = vmov 0 }
 0x548   :  { %v22284_v40 = vsel %vm5552_vm3, %v5589_v16, %v5588_v8  ;;  %v23477_v18 = vsel %vm22342_vm8, 4294967295, %v23476_v18  ;;  %v23489_v8 = vmov 0 }
 0x549   :  { %v5553_v24 = vsel %vm5552_vm3, %v5551_v42, %v5550_v53  ;;  %v22291_v3 = vpop.permute.xlu0 %5611  ;;  %vm22303_vm3 = vcmp.lt.s32.totalorder %v23416_v28, 458 }
 0x54a   :  { %5559 = vst.msk [vmem:[#allocation4 + $0x4a] ss:$2 sm:$0xf] %vm23146_vm7, %v5553_v24  ;;  %v5574_v51 = vpop.permute.xlu1 %5573  ;;  %v23471_v50 = vsel %vm22303_vm3, 4294967295, %v23470_v50  ;;  %vm23153_vm7 = vcmask 187392   ;;  %vm23154_vm12 = vmand %vm22298_vm13, %vm22303_vm3  ;;  %vm22364_vm13 = vcmp.ge.s32.totalorder %v23416_v28, 48 }
 0x54b   :  { %v5575_v12 = vrot.slane %v5574_v51, 7  ;;  %v23481_v48 = vsel %vm22364_vm13, 4294967295, %v23480_v48 }
 0x54c   :  { %23482 = vst [vmem:[#allocation39_spill] sm:$0xff] %v23481_v48 }
 0x54d   :  { %v5577_v38 = vsel %vm23149_vm9, %v5575_v12, %v5574_v51  ;;  %v22313_v31 = vpop.permute.xlu0 %5635  ;;  %vm22325_vm9 = vcmp.lt.s32.totalorder %v23416_v28, 509  ;;  %v23492_v51 = vmov 0  ;;  %v23495_v12 = vmov 0 }
 0x54e   :  { %5583 = vst.msk [vmem:[#allocation4 + $0x50] ss:$2 sm:$0x1f] %vm23150_vm1, %v5577_v38  ;;  %v5598_v47 = vpop.permute.xlu1 %5597  ;;  %v23475_v57 = vsel %vm22325_vm9, 4294967295, %v23474_v57  ;;  %vm23157_vm1 = vcmask 605184   ;;  %vm23158_vm2 = vmand %vm22320_vm0, %vm22325_vm9  ;;  %vm22386_vm0 = vcmp.ge.s32.totalorder %v23416_v28, 99 }
 0x54f   :  { %v5599_v46 = vrot.slane %v5598_v47, 7  ;;  %v23487_v34 = vsel %vm22386_vm0, 4294967295, %v23486_v34 }
 0x550   :  { %23488 = vst [vmem:[#allocation35_spill] sm:$0xff] %v23487_v34 }
 0x551   :  { %v5601_v36 = vsel %vm23153_vm7, %v5599_v46, %v5598_v47  ;;  %v22335_v44 = vpop.permute.xlu0 %5659  ;;  %vm22347_vm7 = vcmp.lt.s32.totalorder %v23416_v28, 560 }
 0x552   :  { %5607 = vst.msk [vmem:[#allocation4 + $0x58] ss:$2 sm:$0xf] %vm23154_vm12, %v5601_v36  ;;  %v5622_v62 = vpop.permute.xlu1 %5621  ;;  %v23479_v17 = vsel %vm22347_vm7, 4294967295, %v23478_v17  ;;  %vm23161_vm12 = vcmask 1022976   ;;  %vm23162_vm3 = vmand %vm22342_vm8, %vm22347_vm7  ;;  %vm22408_vm8 = vcmp.ge.s32.totalorder %v23416_v28, 22 }
 0x553   :  { %v5623_v55 = vrot.slane %v5622_v62, 7  ;;  %v23493_v51 = vsel %vm22408_vm8, 4294967295, %v23492_v51 }
 0x554   :  { %23494 = vst [vmem:[#allocation45_spill] sm:$0xff] %v23493_v51  ;;  %v23528_v51 = vmov 0 }
 0x555   :  { %v5625_v6 = vsel %vm23157_vm1, %v5623_v55, %v5622_v62  ;;  %v22357_v20 = vpop.permute.xlu0 %5349  ;;  %vm22369_vm1 = vcmp.lt.s32.totalorder %v23416_v28, 483  ;;  %v23498_v62 = vmov 0  ;;  %v23501_v55 = vmov 0 }
 0x556   :  { %5631 = vst.msk [vmem:[#allocation4 + $0x5e] ss:$2 sm:$0xf] %vm23158_vm2, %v5625_v6  ;;  %v5646_v11 = vpop.permute.xlu1 %5645  ;;  %v23484_v37 = vsel %vm22369_vm1, 4294967295, %v23483_v37  ;;  %vm23165_vm2 = vcmask 392192   ;;  %vm23166_vm9 = vmand %vm22364_vm13, %vm22369_vm1  ;;  %vm22430_vm13 = vcmp.ge.s32.totalorder %v23416_v28, 73 }
 0x557   :  { %v5647_v33 = vrot.slane %v5646_v11, 7  ;;  %23485 = vst [vmem:[#allocation58_spill] sm:$0xff] %v23484_v37  ;;  %v23499_v62 = vsel %vm22430_vm13, 4294967295, %v23498_v62 }
 0x558   :  { %23500 = vst [vmem:[#allocation54_spill] sm:$0xff] %v23499_v62  ;;  %v23522_v62 = vmov 0 }
 0x559   :  { %v5649_v27 = vsel %vm23161_vm12, %v5647_v33, %v5646_v11  ;;  %v22379_v43 = vpop.permute.xlu0 %5373  ;;  %vm22391_vm12 = vcmp.lt.s32.totalorder %v23416_v28, 534 }
 0x55a   :  { %5655 = vst.msk [vmem:[#allocation4 + $0x64] ss:$2 sm:$0x1f] %vm23162_vm3, %v5649_v27  ;;  %v5670_v2 = vpop.permute.xlu1 %5669  ;;  %v23490_v8 = vsel %vm22391_vm12, 4294967295, %v23489_v8  ;;  %vm23169_vm3 = vcmask 809984   ;;  %vm23170_vm7 = vmand %vm22386_vm0, %vm22391_vm12  ;;  %vm22452_vm0 = vcmp.ge.s32.totalorder %v23416_v28, 124 }
 0x55b   :  { %v5671_v49 = vrot.slane %v5670_v2, 7  ;;  %23491 = vst [vmem:[#allocation60_spill] sm:$0xff] %v23490_v8 }
 0x55d   :  { %v5673_v53 = vsel %vm23165_vm2, %v5671_v49, %v5670_v2  ;;  %v22401_v16 = vpop.permute.xlu0 %5397  ;;  %vm22413_vm2 = vcmp.lt.s32.totalorder %v23416_v28, 457  ;;  %v23504_v2 = vmov 0  ;;  %v23507_v49 = vmov 0 }
 0x55e   :  { %5679 = vst.msk [vmem:[#allocation4 + $0x6c] ss:$2 sm:$0xf] %vm23166_vm9, %v5673_v53  ;;  %v5694_v42 = vpop.permute.xlu1 %5693  ;;  %v23496_v12 = vsel %vm22413_vm2, 4294967295, %v23495_v12  ;;  %vm23173_vm9 = vcmask 179200   ;;  %vm23174_vm1 = vmand %vm22408_vm8, %vm22413_vm2  ;;  %v23505_v2 = vsel %vm22452_vm0, 4294967295, %v23504_v2 }
 0x55f   :  { %v5695_v24 = vrot.slane %v5694_v42, 7  ;;  %23497 = vst [vmem:[#allocation59_spill] sm:$0xff] %v23496_v12  ;;  %23506 = vst [vmem:[#allocation24_spill] sm:$0xff] %v23505_v2  ;;  %vm22474_vm8 = vcmp.ge.s32.totalorder %v23416_v28, 47 }
 0x561   :  { %v5697_v38 = vsel %vm23169_vm3, %v5695_v24, %v5694_v42  ;;  %v22423_v47 = vpop.permute.xlu0 %5420  ;;  %vm22435_vm3 = vcmp.lt.s32.totalorder %v23416_v28, 508 }
 0x562   :  { %5703 = vst.msk [vmem:[#allocation4 + $0x72] ss:$2 sm:$0x1f] %vm23170_vm7, %v5697_v38  ;;  %v5718_v46 = vpop.permute.xlu1 %5717  ;;  %v23502_v55 = vsel %vm22435_vm3, 4294967295, %v23501_v55  ;;  %vm23177_vm7 = vcmask 596992   ;;  %vm23178_vm12 = vmand %vm22430_vm13, %vm22435_vm3  ;;  %vm22496_vm13 = vcmp.ge.s32.totalorder %v23416_v28, 98 }
 0x563   :  { %v5719_v36 = vrot.slane %v5718_v46, 7  ;;  %23503 = vst [vmem:[#allocation36_spill] sm:$0xff] %v23502_v55  ;;  %v23516_v55 = vmov 0 }
 0x564   :  { %v23517_v55 = vsel %vm22496_vm13, 4294967295, %v23516_v55 }
 0x565   :  { %v5721_v6 = vsel %vm23173_vm9, %v5719_v36, %v5718_v46  ;;  %v22445_v11 = vpop.permute.xlu0 %5444  ;;  %vm22457_vm9 = vcmp.lt.s32.totalorder %v23416_v28, 559  ;;  %v23510_v46 = vmov 0  ;;  %v23513_v36 = vmov 0  ;;  %23518 = vst [vmem:[#allocation29_spill] sm:$0xff] %v23517_v55 }
 0x566   :  { %5727 = vst.msk [vmem:[#allocation4 + $0x7a] ss:$2 sm:$0xf] %vm23174_vm1, %v5721_v6  ;;  %v5742_v33 = vpop.permute.xlu1 %5741  ;;  %v23508_v49 = vsel %vm22457_vm9, 4294967295, %v23507_v49  ;;  %vm23182_vm1 = vcmask 1014784   ;;  %vm23183_vm2 = vmand %vm22452_vm0, %vm22457_vm9  ;;  %v23511_v46 = vsel %vm22474_vm8, 4294967295, %v23510_v46 }
 0x567   :  { %v5743_v27 = vrot.slane %v5742_v33, 7  ;;  %23509 = vst [vmem:[#allocation43_spill] sm:$0xff] %v23508_v49  ;;  %23512 = vst [vmem:[#allocation50_spill] sm:$0xff] %v23511_v46  ;;  %vm22518_vm0 = vcmp.ge.s32.totalorder %v23416_v28, 21  ;;  %v5375_v55 = vrot.slane %v22379_v43, 1  ;;  %v5446_v48 = vrot.slane %v22445_v11, 1 }
 0x568   :  { %v23523_v62 = vsel %vm22518_vm0, 4294967295, %v23522_v62 }
 0x569   :  { %v5745_v53 = vsel %vm23177_vm7, %v5743_v27, %v5742_v33  ;;  %v22467_v42 = vpop.permute.xlu0 %5468  ;;  %vm22479_vm7 = vcmp.lt.s32.totalorder %v23416_v28, 482  ;;  %23524 = vst [vmem:[#allocation41_spill] sm:$0xff] %v23523_v62  ;;  %v5330_v62 = vld [vmem:[#allocation3 + $0x19] ss:$8 sm:$0xf] }
 0x56a   :  { %5751 = vst.msk [vmem:[#allocation4 + $0x80] ss:$2 sm:$0xf] %vm23178_vm12, %v5745_v53  ;;  %v5766_v24 = vpop.permute.xlu1 %5765  ;;  %v23514_v36 = vsel %vm22479_vm7, 4294967295, %v23513_v36  ;;  %vm23189_vm12 = vcmask 384000   ;;  %vm23190_vm3 = vmand %vm22474_vm8, %vm22479_vm7 }
 0x56b   :  { %v5767_v38 = vrot.slane %v5766_v24, 7  ;;  %23515 = vst [vmem:[#allocation28_spill] sm:$0xff] %v23514_v36 }
 0x56d   :  { %v5769_v6 = vsel %vm23182_vm1, %v5767_v38, %v5766_v24  ;;  %v22489_v33 = vpop.permute.xlu0 %5683  ;;  %vm22501_vm1 = vcmp.lt.s32.totalorder %v23416_v28, 533  ;;  %v23519_v24 = vmov 0 }
 0x56e   :  { %5775 = vst.msk [vmem:[#allocation4 + $0x86] ss:$2 sm:$0x1f] %vm23183_vm2, %v5769_v6  ;;  %v5790_v27 = vpop.permute.xlu1 %5789  ;;  %v23520_v24 = vsel %vm22501_vm1, 4294967295, %v23519_v24  ;;  %vm23195_vm2 = vcmask 801792   ;;  %vm23198_vm9 = vmand %vm22496_vm13, %vm22501_vm1 }
 0x56f   :  { %v5791_v53 = vrot.slane %v5790_v27, 7  ;;  %23521 = vst [vmem:[#allocation42_spill] sm:$0xff] %v23520_v24 }
 0x571   :  { %v5793_v38 = vsel %vm23189_vm12, %v5791_v53, %v5790_v27  ;;  %v22511_v6 = vpop.permute.xlu0 %5707  ;;  %vm22523_vm12 = vcmp.lt.s32.totalorder %v23416_v28, 456  ;;  %v23525_v27 = vmov 0 }
 0x572   :  { %5799 = vst.msk [vmem:[#allocation4 + $0x8e] ss:$2 sm:$0xf] %vm23190_vm3, %v5793_v38  ;;  %v5814_v49 = vpop.permute.xlu1 %5813  ;;  %v23526_v27 = vsel %vm22523_vm12, 4294967295, %v23525_v27  ;;  %vm23200_vm3 = vcmask 171008   ;;  %vm23204_vm7 = vmand %vm22518_vm0, %vm22523_vm12  ;;  %vm23532_vm12 = vcmask 416768  }
 0x573   :  { %v5815_v2 = vrot.slane %v5814_v49, 7  ;;  %23527 = vst [vmem:[#allocation33_spill] sm:$0xff] %v23526_v27  ;;  %v5422_v27 = vrot.slane %v22423_v47, 7 }
 0x575   :  { %v5817_v53 = vsel %vm23195_vm2, %v5815_v2, %v5814_v49  ;;  %v22533_v38 = vpop.permute.xlu0 %5731  ;;  %vm5310_vm2 = vcmask 629760  }
 0x576   :  { %5823 = vst.msk [vmem:[#allocation4 + $0x94] ss:$2 sm:$0x1f] %vm23198_vm9, %v5817_v53  ;;  %v5838_v36 = vpop.permute.xlu1 %5837  ;;  %v5351_v53 = vrot.slane %v22357_v20, 7  ;;  %vm22550_vm9 = vcmp.ge.s32.totalorder %v23416_v28, 72 }
 0x577   :  { %v5839_v46 = vrot.slane %v5838_v36, 7  ;;  %v23529_v51 = vsel %vm22550_vm9, 4294967295, %v23528_v51 }
 0x578   :  { %v5352_v37 = vsel %vm23532_vm12, %v5351_v53, %v22357_v20  ;;  %vm23535_vm12 = vmand %vm22056_vm5, %vm22061_vm6  ;;  %vm23542_vm5 = vcmask 588800   ;;  %vm23543_vm6 = vcmask 621568  }
 0x579   :  { %v5841_v12 = vsel %vm23200_vm3, %v5839_v46, %v5838_v36  ;;  %v22545_v2 = vpop.permute.xlu0 %5755  ;;  %vm22555_vm3 = vcmp.lt.s32.totalorder %v23416_v28, 507  ;;  %v23530_v46 = vmov 0  ;;  %v5423_v21 = vsel %vm23543_vm6, %v5422_v27, %v22423_v47  ;;  %v23619_v27 = vld [vmem:[#allocation45_spill] sm:$0xff] }
 0x57a   :  { %5847 = vst.msk [vmem:[#allocation4 + $0x9c] ss:$2 sm:$0xf] %vm23204_vm7, %v5841_v12  ;;  %v5308_v49 = vpop.permute.xlu1 %5307  ;;  %v23531_v46 = vsel %vm22555_vm3, 4294967295, %v23530_v46  ;;  %v5399_v12 = vrot.slane %v22401_v16, 7  ;;  %vm23534_vm7 = vcmask 834560   ;;  %vm23553_vm6 = vnez %v23440_v56 }
 0x57b   :  { %v5309_v24 = vrot.slane %v5308_v49, 1 }
 0x57d   :  { %v5311_v36 = vsel %vm5310_vm2, %v5308_v49, %v5309_v24  ;;  %v22563_v8 = vpop.permute.xlu0 %5779  ;;  %vm23533_vm2 = vmand %vm22046_vm15, %vm22051_vm4  ;;  %v5376_v24 = vsel %vm23534_vm7, %v22379_v43, %v5375_v55  ;;  %v5470_v49 = vrot.slane %v22467_v42, 7  ;;  %vm22586_vm15 = vcmp.ge.s32.totalorder %v23416_v28, 123  ;;  %v23613_v55 = vld [vmem:[#allocation35_spill] sm:$0xff] }
 0x57e   :  { %5314 = vst.msk [vmem:[#allocation4 + $0x1] ss:$2 sm:$0xf] %vm22024_vm14, %v5311_v36  ;;  %v5862_v34 = vpop.permute.xlu1 %5861  ;;  %v23537_v25 = vsel %vm22586_vm15, 4294967295, %v23536_v25  ;;  %vm22591_vm4 = vcmp.lt.s32.totalorder %v23416_v28, 558  ;;  %vm23540_vm7 = vcmask 203776   ;;  %vm23545_vm14 = vnez %v23434_v41 }
 0x57f   :  { %5332 = vst.msk [vmem:[#allocation4 + $0x7] ss:$2 sm:$0xf] %vm23533_vm2, %v5330_v62  ;;  %v5863_v19 = vrot.slane %v5862_v34, 7  ;;  %v23539_v1 = vsel %vm22591_vm4, 4294967295, %v23538_v1  ;;  %v5400_v20 = vsel %vm23540_vm7, %v5399_v12, %v22401_v16  ;;  %vm23541_vm2 = vmand %vm22076_vm10, %vm22081_vm11  ;;  %vm23548_vm10 = vcmask 1039360  }
 0x580   :  { %5355 = vst.msk [vmem:[#allocation4 + $0xd] ss:$2 sm:$0x1f] %vm23535_vm12, %v5352_v37  ;;  %vm23544_vm12 = vnez %v23432_v52  ;;  %vm23547_vm7 = vmand %vm22550_vm9, %vm22555_vm3  ;;  %v5447_v37 = vsel %vm23548_vm10, %v22445_v11, %v5446_v48  ;;  %vm23549_vm11 = vnez %v23436_v45  ;;  %v5565_v41 = vrot.slane %v22248_v14, 1  ;;  %v23608_v16 = vld [vmem:[#allocation58_spill] sm:$0xff]  ;;  %v23615_v11 = vld [vmem:[#allocation60_spill] sm:$0xff] }
 0x581   :  { %5379 = vst.msk [vmem:[#allocation4 + $0x15] ss:$2 sm:$0xf] %vm23541_vm2, %v5376_v24  ;;  %v5865_v10 = vsel %vm23542_vm5, %v5863_v19, %v5862_v34  ;;  %vm23546_vm0 = vmand %vm23544_vm12, %vm23545_vm14  ;;  %v22615_v30 = vpop.permute.xlu0 %5803  ;;  %vm23550_vm2 = vnez %v23438_v32  ;;  %vm23552_vm14 = vcmask 408576   ;;  %vm23554_vm12 = vnez %v23442_v29  ;;  %v23606_v34 = vld [vmem:[#allocation39_spill] sm:$0xff]  ;;  %v23628_v19 = vld [vmem:[#allocation54_spill] sm:$0xff] }
 0x582   :  { %5403 = vst.msk [vmem:[#allocation4 + $0x1b] ss:$2 sm:$0xf] %vm23546_vm0, %v5400_v20  ;;  %v5886_v22 = vpop.permute.xlu1 %5885  ;;  %vm23551_vm5 = vmand %vm23549_vm11, %vm23550_vm2  ;;  %v5471_v43 = vsel %vm23552_vm14, %v5470_v49, %v22467_v42  ;;  %vm22637_vm10 = vcmp.ge.s32.totalorder %v23416_v28, 46  ;;  %v23556_v45 = vmov 0  ;;  %vm22642_vm11 = vcmp.lt.s32.totalorder %v23416_v28, 481 }
 0x583   :  { %5871 = vst.msk [vmem:[#allocation4 + $0xa2] ss:$2 sm:$0xf] %vm23547_vm7, %v5865_v10  ;;  %v5887_v52 = vrot.slane %v5886_v22, 7  ;;  %vm23555_vm7 = vmand %vm23553_vm6, %vm23554_vm12  ;;  %v23557_v45 = vsel %vm22637_vm10, 4294967295, %v23556_v45  ;;  %v23558_v32 = vmov 0  ;;  %vm23560_vm2 = vnez %v23444_v39 }
 0x584   :  { %5426 = vst.msk [vmem:[#allocation4 + $0x21] ss:$2 sm:$0x1f] %vm23551_vm5, %v5423_v21  ;;  %v23559_v32 = vsel %vm22642_vm11, 4294967295, %v23558_v32  ;;  %vm23561_vm5 = vnez %v23446_v63  ;;  %vm23563_vm0 = vcmask 1006592   ;;  %v5613_v29 = vrot.slane %v22291_v3, 1  ;;  %vm23567_vm3 = vmand %vm22586_vm15, %vm22591_vm4 }
 0x585   :  { %5450 = vst.msk [vmem:[#allocation4 + $0x29] ss:$2 sm:$0xf] %vm23555_vm7, %v5447_v37  ;;  %vm23562_vm14 = vmand %vm23560_vm2, %vm23561_vm5  ;;  %v5888_v56 = vsel %vm23563_vm0, %v5887_v52, %v5886_v22  ;;  %vm23564_vm6 = vnez %v23448_v54  ;;  %vm23565_vm12 = vnez %v23450_v5  ;;  %v22664_v39 = vpop.permute.xlu0 %5827  ;;  %v5637_v48 = vrot.slane %v22313_v31, 7  ;;  %v23634_v10 = vld [vmem:[#allocation24_spill] sm:$0xff]  ;;  %v23636_v21 = vld [vmem:[#allocation43_spill] sm:$0xff] }
 0x586   :  { %5474 = vst.msk [vmem:[#allocation4 + $0x2f] ss:$2 sm:$0x1f] %vm23562_vm14, %v5471_v43  ;;  %vm23566_vm7 = vmand %vm23564_vm6, %vm23565_vm12  ;;  %v5909_v63 = vpop.permute.xlu1 %5908  ;;  %vm23568_vm0 = vnez %v23452_v7  ;;  %vm23569_vm5 = vnez %v23454_v59  ;;  %vm23572_vm12 = vnez %v23456_v26  ;;  %v23575_v7 = vmov 0 }
 0x587   :  { %5498 = vst.msk [vmem:[#allocation4 + $0x37] ss:$2 sm:$0xf] %vm23566_vm7, %v22199_v9  ;;  %vm23570_vm14 = vmand %vm23568_vm0, %vm23569_vm5  ;;  %v5910_v54 = vrot.slane %v5909_v63, 7  ;;  %v5661_v9 = vrot.slane %v22335_v44, 7  ;;  %vm23573_vm7 = vnez %v23458_v61  ;;  %vm22687_vm0 = vcmp.ge.s32.totalorder %v23416_v28, 97 }
 0x588   :  { %5894 = vst.msk [vmem:[#allocation4 + $0xa8] ss:$2 sm:$0x1f] %vm23567_vm3, %v5888_v56  ;;  %vm23571_vm3 = vcmask 1031168   ;;  %vm23574_vm2 = vmand %vm23572_vm12, %vm23573_vm7  ;;  %v23576_v7 = vsel %vm22687_vm0, 4294967295, %v23575_v7  ;;  %vm22692_vm5 = vcmp.lt.s32.totalorder %v23416_v28, 532  ;;  %vm23584_vm7 = vnez %v23465_v35 }
 0x589   :  { %5522 = vst.msk [vmem:[#allocation4 + $0x3d] ss:$2 sm:$0xf] %vm23570_vm14, %v22220_v58  ;;  %v5566_v5 = vsel %vm23571_vm3, %v22248_v14, %v5565_v41  ;;  %v23577_v59 = vmov 0  ;;  %v5685_v58 = vrot.slane %v22489_v33, 1  ;;  %vm23579_vm14 = vnez %v23460_v23  ;;  %v5852_v14 = vpop.permute.xlu0 %5851  ;;  %v23642_v41 = vld [vmem:[#allocation28_spill] sm:$0xff] }
 0x58a   :  { %5545 = vst.msk [vmem:[#allocation4 + $0x43] ss:$2 sm:$0x1f] %vm23574_vm2, %v22241_v15  ;;  %v23578_v59 = vsel %vm22692_vm5, 4294967295, %v23577_v59  ;;  %vm23580_vm3 = vnez %v23462_v13  ;;  %vm23582_vm12 = vcmask 375808   ;;  %vm23583_vm2 = vcmask 818176   ;;  %v5933_v23 = vpop.permute.xlu1 %5932 }
 0x58b   :  { %vm23581_vm6 = vmand %vm23579_vm14, %vm23580_vm3  ;;  %v5912_v26 = vsel %vm23582_vm12, %v5910_v54, %v5909_v63  ;;  %v5614_v61 = vsel %vm23583_vm2, %v22291_v3, %v5613_v29  ;;  %v5709_v15 = vrot.slane %v22511_v6, 7  ;;  %vm23585_vm4 = vnez %v23467_v60 }
 0x58c   :  { %5569 = vst.msk [vmem:[#allocation4 + $0x4b] ss:$2 sm:$0xf] %vm23581_vm6, %v5566_v5  ;;  %vm23586_vm15 = vmand %vm23584_vm7, %vm23585_vm4  ;;  %vm23588_vm3 = vcmask 187392   ;;  %v5733_v3 = vrot.slane %v22533_v38, 1  ;;  %vm23589_vm12 = vnez %v23469_v0  ;;  %vm23590_vm2 = vnez %v23471_v50  ;;  %v23654_v5 = vld [vmem:[#allocation41_spill] sm:$0xff] }
 0x58d   :  { %5593 = vst.msk [vmem:[#allocation4 + $0x51] ss:$2 sm:$0x1f] %vm23586_vm15, %v22284_v40  ;;  %vm23587_vm14 = vmand %vm22637_vm10, %vm22642_vm11  ;;  %v5638_v13 = vsel %vm23588_vm3, %v5637_v48, %v22313_v31  ;;  %v5934_v35 = vrot.slane %v5933_v23, 7  ;;  %vm23592_vm7 = vcmask 605184   ;;  %v5757_v40 = vrot.slane %v22545_v2, 7 }
 0x58e   :  { %5918 = vst.msk [vmem:[#allocation4 + $0xb0] ss:$2 sm:$0xf] %vm23587_vm14, %v5912_v26  ;;  %vm23591_vm4 = vmand %vm23589_vm12, %vm23590_vm2  ;;  %v5662_v60 = vsel %vm23592_vm7, %v5661_v9, %v22335_v44  ;;  %vm23593_vm14 = vnez %v23473_v4  ;;  %vm23594_vm3 = vnez %v23475_v57  ;;  %vm22738_vm12 = vcmp.ge.s32.totalorder %v23416_v28, 20  ;;  %v23656_v9 = vld [vmem:[#allocation33_spill] sm:$0xff] }
 0x58f   :  { %5617 = vst.msk [vmem:[#allocation4 + $0x59] ss:$2 sm:$0xf] %vm23591_vm4, %v5614_v61  ;;  %vm23595_vm6 = vmand %vm23593_vm14, %vm23594_vm3  ;;  %vm22743_vm2 = vcmp.lt.s32.totalorder %v23416_v28, 455  ;;  %vm23600_vm4 = vcmask 1022976   ;;  %vm23601_vm7 = vnez %v23477_v18  ;;  %vm23602_vm15 = vnez %v23479_v17  ;;  %v5876_v18 = vpop.permute.xlu0 %5875  ;;  %v5957_v17 = vpop.permute.xlu1 %5956 }
 0x590   :  { %5641 = vst.msk [vmem:[#allocation4 + $0x5f] ss:$2 sm:$0xf] %vm23595_vm6, %v5638_v13  ;;  %v5686_v31 = vsel %vm23600_vm4, %v22489_v33, %v5685_v58  ;;  %vm23603_vm11 = vmand %vm23601_vm7, %vm23602_vm15  ;;  %v5781_v4 = vrot.slane %v22563_v8, 7  ;;  %vm23604_vm6 = vcmask 793600   ;;  %vm23605_vm14 = vcmask 392192  }
 0x591   :  { %5665 = vst.msk [vmem:[#allocation4 + $0x65] ss:$2 sm:$0x1f] %vm23603_vm11, %v5662_v60  ;;  %v5936_v57 = vsel %vm23604_vm6, %v5934_v35, %v5933_v23  ;;  %v5710_v44 = vsel %vm23605_vm14, %v5709_v15, %v22511_v6  ;;  %vm23607_vm3 = vnez %v23606_v34  ;;  %vm23609_vm10 = vnez %v23608_v16  ;;  %vm23611_vm11 = vmand %vm22687_vm0, %vm22692_vm5 }
 0x592   :  { %vm23610_vm9 = vmand %vm23607_vm3, %vm23609_vm10  ;;  %v5805_v47 = vrot.slane %v22615_v30, 1  ;;  %5942 = vst.msk [vmem:[#allocation4 + $0xb6] ss:$2 sm:$0x1f] %vm23611_vm11, %v5936_v57  ;;  %vm23218_vm15 = vcmask 162816   ;;  %vm23612_vm4 = vcmask 809984   ;;  %vm23614_vm7 = vnez %v23613_v55 }
 0x593   :  { %5689 = vst.msk [vmem:[#allocation4 + $0x6d] ss:$2 sm:$0xf] %vm23610_vm9, %v5686_v31  ;;  %v5734_v62 = vsel %vm23612_vm4, %v22533_v38, %v5733_v3  ;;  %vm23616_vm6 = vnez %v23615_v11  ;;  %v5829_v42 = vrot.slane %v22664_v39, 7  ;;  %v5958_v33 = vrot.slane %v5957_v17, 7  ;;  %v23621_v38 = vld [vmem:[#allocation59_spill] sm:$0xff]  ;;  %v5899_v37 = vpop.permute.xlu0 %5898 }
 0x594   :  { %vm23617_vm10 = vmand %vm23614_vm7, %vm23616_vm6  ;;  %vm23618_vm14 = vcmask 179200   ;;  %vm23620_vm3 = vnez %v23619_v27  ;;  %vm23622_vm11 = vnez %v23621_v38  ;;  %v5853_v53 = vrot.slane %v5852_v14, 1 }
 0x595   :  { %5713 = vst.msk [vmem:[#allocation4 + $0x73] ss:$2 sm:$0x1f] %vm23617_vm10, %v5710_v44  ;;  %v5758_v6 = vsel %vm23618_vm14, %v5757_v40, %v22545_v2  ;;  %vm23623_vm4 = vmand %vm23620_vm3, %vm23622_vm11  ;;  %vm22789_vm7 = vcmp.ge.s32.totalorder %v23416_v28, 71  ;;  %vm22794_vm6 = vcmp.lt.s32.totalorder %v23416_v28, 506  ;;  %vm23629_vm10 = vnez %v23628_v19  ;;  %v23630_v2 = vld [vmem:[#allocation36_spill] sm:$0xff] }
 0x596   :  { %5737 = vst.msk [vmem:[#allocation4 + $0x7b] ss:$2 sm:$0xf] %vm23623_vm4, %v5734_v62  ;;  %vm23631_vm14 = vnez %v23630_v2  ;;  %vm23633_vm3 = vcmask 596992   ;;  %v5877_v49 = vrot.slane %v5876_v18, 7  ;;  %v5960_v20 = vsel %vm23218_vm15, %v5958_v33, %v5957_v17 }
 0x597   :  { %vm23632_vm9 = vmand %vm23629_vm10, %vm23631_vm14  ;;  %v5782_v24 = vsel %vm23633_vm3, %v5781_v4, %v22563_v8  ;;  %vm23635_vm11 = vnez %v23634_v10  ;;  %vm23637_vm4 = vnez %v23636_v21  ;;  %vm23639_vm0 = vcmask 1014784   ;;  %v5981_v8 = vpop.permute.xlu1 %5980  ;;  %v5923_v15 = vpop.permute.xlu0 %5922 }
 0x598   :  { %5761 = vst.msk [vmem:[#allocation4 + $0x81] ss:$2 sm:$0xf] %vm23632_vm9, %v5758_v6  ;;  %vm23638_vm5 = vmand %vm23635_vm11, %vm23637_vm4  ;;  %v5806_v22 = vsel %vm23639_vm0, %v22615_v30, %v5805_v47  ;;  %vm23219_vm10 = vcmask 580608   ;;  %vm23643_vm14 = vnez %v23642_v41  ;;  %v5900_v56 = vrot.slane %v5899_v37, 7 }
 0x599   :  { %5785 = vst.msk [vmem:[#allocation4 + $0x87] ss:$2 sm:$0x1f] %vm23638_vm5, %v5782_v24  ;;  %vm23640_vm9 = vmand %vm22738_vm12, %vm22743_vm2  ;;  %vm23645_vm5 = vcmask 384000   ;;  %v5982_v30 = vrot.slane %v5981_v8, 7  ;;  %vm23649_vm4 = vcmask 801792  }
 0x59a   :  { %5966 = vst.msk [vmem:[#allocation4 + $0xbe] ss:$2 sm:$0xf] %vm23640_vm9, %v5960_v20  ;;  %vm23644_vm3 = vmand %vm22474_vm8, %vm23643_vm14  ;;  %v5830_v43 = vsel %vm23645_vm5, %v5829_v42, %v22664_v39  ;;  %v5854_v48 = vsel %vm23649_vm4, %v5852_v14, %v5853_v53  ;;  %vm22836_vm8 = vcmp.ge.s32.totalorder %v23416_v28, 122  ;;  %vm22841_vm9 = vcmp.lt.s32.totalorder %v23416_v28, 557 }
 0x59b   :  { %5809 = vst.msk [vmem:[#allocation4 + $0x8f] ss:$2 sm:$0xf] %vm23644_vm3, %v5806_v22  ;;  %vm5988_vm0 = vmand %vm22789_vm7, %vm22794_vm6  ;;  %vm23655_vm14 = vnez %v23654_v5  ;;  %vm23657_vm3 = vnez %v23656_v9  ;;  %v5984_v26 = vsel %vm23219_vm10, %v5982_v30, %v5981_v8  ;;  %vm23663_vm15 = vcmask 588800   ;;  %v6005_v14 = vpop.permute.xlu1 %6004 }
 0x59c   :  { %vm23648_vm11 = vmand %vm22496_vm13, %vm22501_vm1  ;;  %vm23659_vm13 = vcmask 171008   ;;  %vm23660_vm1 = vnez %v23529_v51  ;;  %v5901_v61 = vsel %vm23663_vm15, %v5900_v56, %v5899_v37  ;;  %5990 = vst.msk [vmem:[#allocation4 + $0xc4] ss:$2 sm:$0xf] %vm5988_vm0, %v5984_v26  ;;  %v5924_v51 = vrot.slane %v5923_v15, 1 }
 0x59d   :  { %5833 = vst.msk [vmem:[#allocation4 + $0x95] ss:$2 sm:$0x1f] %vm23648_vm11, %v5830_v43  ;;  %vm23658_vm5 = vmand %vm23655_vm14, %vm23657_vm3  ;;  %v5878_v58 = vsel %vm23659_vm13, %v5877_v49, %v5876_v18  ;;  %vm23661_vm11 = vnez %v23531_v46  ;;  %vm23664_vm14 = vnez %v23537_v25  ;;  %vm23665_vm3 = vnez %v23539_v1 }
 0x59e   :  { %5857 = vst.msk [vmem:[#allocation4 + $0x9d] ss:$2 sm:$0xf] %vm23658_vm5, %v5854_v48  ;;  %vm23662_vm4 = vmand %vm23660_vm1, %vm23661_vm11  ;;  %v6006_v46 = vrot.slane %v6005_v14, 7  ;;  %vm22873_vm13 = vcmp.ge.s32.totalorder %v23416_v28, 45  ;;  %vm22878_vm1 = vcmp.lt.s32.totalorder %v23416_v28, 480  ;;  %v5947_v28 = vpop.permute.xlu0 %5946 }
 0x59f   :  { %5881 = vst.msk [vmem:[#allocation4 + $0xa3] ss:$2 sm:$0xf] %vm23662_vm4, %v5878_v58  ;;  %vm23666_vm5 = vmand %vm23664_vm14, %vm23665_vm3  ;;  %vm23671_vm11 = vcmask 1006592   ;;  %vm23672_vm4 = vcmask 998400   ;;  %vm23673_vm14 = vnez %v23557_v45  ;;  %vm23674_vm3 = vnez %v23559_v32  ;;  %v6028_v3 = vpop.permute.xlu1 %6027 }
 0x5a0   :  { %5904 = vst.msk [vmem:[#allocation4 + $0xa9] ss:$2 sm:$0x1f] %vm23666_vm5, %v5901_v61  ;;  %vm23220_vm15 = vmand %vm22836_vm8, %vm22841_vm9  ;;  %v5925_v25 = vsel %vm23671_vm11, %v5923_v15, %v5924_v51  ;;  %v6007_v1 = vsel %vm23672_vm4, %v6006_v46, %v6005_v14  ;;  %vm6030_vm10 = vcmask 367616   ;;  %v5948_v35 = vrot.slane %v5947_v28, 7 }
 0x5a1   :  { %vm23675_vm5 = vmand %vm23673_vm14, %vm23674_vm3  ;;  %6013 = vst.msk [vmem:[#allocation4 + $0xca] ss:$2 sm:$0x1f] %vm23220_vm15, %v6007_v1  ;;  %v6029_v45 = vrot.slane %v6028_v3, 7  ;;  %vm23676_vm4 = vcmask 375808   ;;  %vm23677_vm14 = vnez %v23576_v7  ;;  %vm23678_vm3 = vnez %v23578_v59 }
 0x5a2   :  { %5928 = vst.msk [vmem:[#allocation4 + $0xb1] ss:$2 sm:$0xf] %vm23675_vm5, %v5925_v25  ;;  %vm6035_vm11 = vmand %vm22873_vm13, %vm22878_vm1  ;;  %v5949_v32 = vsel %vm23676_vm4, %v5948_v35, %v5947_v28  ;;  %v5971_v40 = vpop.permute.xlu0 %5970  ;;  %vm23680_vm15 = vcmask 793600   ;;  %vm23682_vm4 = vcmask 162816  }
 0x5a3   :  { %v6031_v60 = vsel %vm6030_vm10, %v6029_v45, %v6028_v3  ;;  %vm23679_vm5 = vmand %vm23677_vm14, %vm23678_vm3  ;;  %v5972_v31 = vrot.slane %v5971_v40, 1  ;;  %vm23683_vm14 = vcmask 580608  }
 0x5a4   :  { %5952 = vst.msk [vmem:[#allocation4 + $0xb7] ss:$2 sm:$0x1f] %vm23679_vm5, %v5949_v32  ;;  %vm23681_vm10 = vmand %vm22738_vm12, %vm22743_vm2  ;;  %vm23685_vm2 = vcmask 998400  }
 0x5a5   :  { %6037 = vst.msk [vmem:[#allocation4 + $0xd2] ss:$2 sm:$0xf] %vm6035_vm11, %v6031_v60  ;;  %v5973_v4 = vsel %vm23680_vm15, %v5971_v40, %v5972_v31  ;;  %vm23684_vm12 = vmand %vm22836_vm8, %vm22841_vm9 }
 0x5a6   :  { %5976 = vst.msk [vmem:[#allocation4 + $0xbf] ss:$2 sm:$0xf] %vm23681_vm10, %v5973_v4  ;;  %v5995_v7 = vpop.permute.xlu0 %5994 }
 0x5a7   :  { %v5996_v59 = vrot.slane %v5995_v7, 7 }
 0x5a9   :  { %v5997_v57 = vsel %vm23682_vm4, %v5996_v59, %v5995_v7 }
 0x5aa   :  { %6000 = vst.msk [vmem:[#allocation4 + $0xc5] ss:$2 sm:$0xf] %vm5988_vm0, %v5997_v57  ;;  %v6018_v44 = vpop.permute.xlu0 %6017 }
 0x5ab   :  { %v6019_v34 = vrot.slane %v6018_v44, 7 }
 0x5ad   :  { %v6020_v16 = vsel %vm23683_vm14, %v6019_v34, %v6018_v44 }
 0x5ae   :  { %6023 = vst.msk [vmem:[#allocation4 + $0xcb] ss:$2 sm:$0x1f] %vm23684_vm12, %v6020_v16  ;;  %v6042_v0 = vpop.permute.xlu0 %6041 }
 0x5af   :  { %v6043_v50 = vrot.slane %v6042_v0, 1 }
 0x5b1   :  { %v6044_v47 = vsel %vm23685_vm2, %v6042_v0, %v6043_v50 }
 0x5b2   :  { %6047 = vst.msk [vmem:[#allocation4 + $0xd3] ss:$2 sm:$0xf] %vm6035_vm11, %v6044_v47 }
 0x5b3   :  { %19458 = dma.done.wait [#allocation6], 111360 }
 0x5b4   :  { %19459 = vsyncadd [#allocation6], 4294855936  ;;  %v18455_v18 = vld [vmem:[#allocation5 + $0x78] sm:$0xff]   ;;  %v18459_v11 = vld [vmem:[#allocation5 + $0x70] sm:$0xff]   ;;  %v19521_v37 = vmov 1983009808  }
 0x5b5   :  { %v18456_v17 = vld [vmem:[#allocation5 + $0x38] sm:$0xff]   ;;  %17073 = vmatprep.subr.bf16.mxu0 %v18455_v18  ;;  %v18460_v42 = vld [vmem:[#allocation5 + $0x30] sm:$0xff]   ;;  %v18463_v27 = vld [vmem:[#allocation5 + $0x68] sm:$0xff]   ;;  %v6110_v8 = vunpack.c.l.s4 %v19521_v37  ;;  %vm19522_vm7 = vmmov 0   ;;  %vm13759_vm6 = vcmask 785408   ;;  %vm15972_vm0 = vcmask 1041408  }
 0x5b6   :  { %v18457_v62 = vld [vmem:[#allocation5 + $0xf8] sm:$0xff]   ;;  %17074 = vmatpush3.bf16.msra.mxu0 %v18456_v17  ;;  %v18461_v33 = vld [vmem:[#allocation5 + $0xf0] sm:$0xff]   ;;  %v18464_v38 = vld [vmem:[#allocation5 + $0x28] sm:$0xff]   ;;  %vm15984_vm8 = vcmask 1024  }
 0x5b7   :  { %v18458_v55 = vld [vmem:[#allocation5 + $0xb8] sm:$0xff]   ;;  %17095 = vmatprep.subr.bf16.mxu1 %v18457_v62  ;;  %17075 = vmatprep.subr.bf16.mxu0 %v18459_v11  ;;  %v18462_v6 = vld [vmem:[#allocation5 + $0xb0] sm:$0xff]   ;;  %v18465_v53 = vld [vmem:[#allocation5 + $0xe8] sm:$0xff]   ;;  %v6111_v30 = vunpack.c.0.s8 %v6110_v8 }
 0x5b8   :  { %17096 = vmatpush3.bf16.msra.mxu1 %v18458_v55  ;;  %v18466_v12 = vld [vmem:[#allocation5 + $0xa8] sm:$0xff]   ;;  %v18467_v36 = vld [vmem:[#allocation5 + $0x60] sm:$0xff]   ;;  %v18471_v49 = vld [vmem:[#allocation5 + $0x58] sm:$0xff]  }
 0x5b9   :  { %17097 = vmatprep.subr.bf16.mxu1 %v18461_v33  ;;  %v18468_v19 = vld [vmem:[#allocation5 + $0x20] sm:$0xff]   ;;  %v18472_v20 = vld [vmem:[#allocation5 + $0x18] sm:$0xff]   ;;  %v18475_v22 = vld [vmem:[#allocation5 + $0x50] sm:$0xff]  }
 0x5ba   :  { %17076 = vmatpush3.bf16.msra.mxu0 %v18460_v42  ;;  %v18469_v2 = vld [vmem:[#allocation5 + $0xe0] sm:$0xff]   ;;  %v18473_v10 = vld [vmem:[#allocation5 + $0xd8] sm:$0xff]   ;;  %v18476_v52 = vld [vmem:[#allocation5 + $0x10] sm:$0xff]  }
 0x5bb   :  { %17077 = vmatprep.subr.bf16.mxu0 %v18463_v27  ;;  %v18470_v24 = vld [vmem:[#allocation5 + $0xa0] sm:$0xff]   ;;  %v18474_v21 = vld [vmem:[#allocation5 + $0x98] sm:$0xff]   ;;  %v18477_v41 = vld [vmem:[#allocation5 + $0xd0] sm:$0xff]  }
 0x5bc   :  { %17098 = vmatpush3.bf16.msra.mxu1 %v18462_v6  ;;  %v18478_v43 = vld [vmem:[#allocation5 + $0x90] sm:$0xff]   ;;  %v18479_v56 = vld [vmem:[#allocation5 + $0x48] sm:$0xff]   ;;  %v18483_v54 = vld [vmem:[#allocation5 + $0x40] sm:$0xff]  }
 0x5bd   :  { %17099 = vmatprep.subr.bf16.mxu1 %v18465_v53  ;;  %v18480_v29 = vld [vmem:[#allocation5 + $0x8] sm:$0xff]   ;;  %v18484_v9 = vld [vmem:[#allocation5] sm:$0xff]   ;;  %v18487_v51 = vld [vmem:[#allocation5 + $0x178] sm:$0xff]  }
 0x5be   :  { %17078 = vmatpush3.bf16.msra.mxu0 %v18464_v38  ;;  %v18481_v63 = vld [vmem:[#allocation5 + $0xc8] sm:$0xff]   ;;  %v18485_v58 = vld [vmem:[#allocation5 + $0xc0] sm:$0xff]   ;;  %v18489_v13 = vld [vmem:[#allocation5 + $0x138] sm:$0xff]  }
 0x5bf   :  { %17079 = vmatprep.subr.bf16.mxu0 %v18467_v36  ;;  %v18482_v48 = vld [vmem:[#allocation5 + $0x88] sm:$0xff]   ;;  %v18486_v15 = vld [vmem:[#allocation5 + $0x80] sm:$0xff]   ;;  %v18490_v1 = vld [vmem:[#allocation5 + $0x1f8] sm:$0xff]  }
 0x5c0   :  { %17100 = vmatpush3.bf16.msra.mxu1 %v18466_v12  ;;  %v23686_v39 = vld [vmem:[#allocation23_spill] sm:$0xff]  ;;  %v18491_v35 = vld [vmem:[#allocation5 + $0x1b8] sm:$0xff]   ;;  %v18492_v32 = vld [vmem:[#allocation5 + $0x170] sm:$0xff]  }
 0x5c1   :  { %17101 = vmatprep.subr.bf16.mxu1 %v18469_v2  ;;  %v22934_v5 = vsub.s32 %v6111_v30, %v23686_v39  ;;  %v6052_v26 = vld [vmem:[#allocation4] sm:$0xff]  ;;  %v18493_v40 = vld [vmem:[#allocation5 + $0x130] sm:$0xff]   ;;  %v18504_v47 = vld [vmem:[#allocation5 + $0x158] sm:$0xff]  }
 0x5c2   :  { %17080 = vmatpush3.bf16.msra.mxu0 %v18468_v19  ;;  %v6108_v14 = vcombine.high %v6052_v26, %v6052_v26  ;;  %v18494_v31 = vld [vmem:[#allocation5 + $0x1f0] sm:$0xff]   ;;  %v18496_v7 = vld [vmem:[#allocation5 + $0x168] sm:$0xff]   ;;  %v18500_v34 = vld [vmem:[#allocation5 + $0x160] sm:$0xff]  }
 0x5c3   :  { %17081 = vmatprep.subr.bf16.mxu0 %v18471_v49  ;;  %v6115_v61 = vrot.slane %v6052_v26, %v22934_v5  ;;  %v18495_v4 = vld [vmem:[#allocation5 + $0x1b0] sm:$0xff]   ;;  %v18497_v59 = vld [vmem:[#allocation5 + $0x128] sm:$0xff]   ;;  %v18501_v16 = vld [vmem:[#allocation5 + $0x120] sm:$0xff]  }
 0x5c4   :  { %17102 = vmatpush3.bf16.msra.mxu1 %v18470_v24  ;;  %v6122_v23 = vrot.slane %v6108_v14, %v22934_v5  ;;  %v18498_v57 = vld [vmem:[#allocation5 + $0x1e8] sm:$0xff]   ;;  %v18502_v0 = vld [vmem:[#allocation5 + $0x1e0] sm:$0xff]   ;;  %v18505_v18 = vld [vmem:[#allocation5 + $0x118] sm:$0xff]  }
 0x5c5   :  { %17103 = vmatprep.subr.bf16.mxu1 %v18473_v10  ;;  %v6123_v46 = vcombine.high %v6115_v61, %v6115_v61  ;;  %v6683_v25 = vpack.c.bf16 %v6115_v61, %v6115_v61  ;;  %v18499_v44 = vld [vmem:[#allocation5 + $0x1a8] sm:$0xff]   ;;  %v18503_v50 = vld [vmem:[#allocation5 + $0x1a0] sm:$0xff]   ;;  %v18506_v17 = vld [vmem:[#allocation5 + $0x1d8] sm:$0xff]  }
 0x5c6   :  { %17082 = vmatpush3.bf16.msra.mxu0 %v18472_v20  ;;  %v6124_v3 = vcombine.high %v6122_v23, %v6122_v23  ;;  %v6685_v45 = vpack.c.bf16 %v6122_v23, %v6122_v23  ;;  %v18507_v62 = vld [vmem:[#allocation5 + $0x198] sm:$0xff]   ;;  %v18508_v55 = vld [vmem:[#allocation5 + $0x150] sm:$0xff]   ;;  %v18512_v6 = vld [vmem:[#allocation5 + $0x148] sm:$0xff]  }
 0x5c7   :  { %17083 = vmatprep.subr.bf16.mxu0 %v18475_v22  ;;  %v6684_v28 = vpack.c.bf16 %v6123_v46, %v6123_v46  ;;  %v18509_v11 = vld [vmem:[#allocation5 + $0x110] sm:$0xff]   ;;  %v18513_v27 = vld [vmem:[#allocation5 + $0x108] sm:$0xff]   ;;  %v18516_v12 = vld [vmem:[#allocation5 + $0x140] sm:$0xff]  }
 0x5c8   :  { %17104 = vmatpush3.bf16.msra.mxu1 %v18474_v21  ;;  %v6686_v60 = vpack.c.bf16 %v6124_v3, %v6124_v3  ;;  %v18510_v42 = vld [vmem:[#allocation5 + $0x1d0] sm:$0xff]   ;;  %v18514_v38 = vld [vmem:[#allocation5 + $0x1c8] sm:$0xff]   ;;  %v18517_v36 = vld [vmem:[#allocation5 + $0x100] sm:$0xff]  }
 0x5c9   :  { %17105 = vmatprep.subr.bf16.mxu1 %v18477_v41  ;;  %13795 = vmatprep.mubr.bf16.mxu0 %v6684_v28  ;;  %v18511_v33 = vld [vmem:[#allocation5 + $0x190] sm:$0xff]   ;;  %v18515_v53 = vld [vmem:[#allocation5 + $0x188] sm:$0xff]   ;;  %v18518_v19 = vld [vmem:[#allocation5 + $0x1c0] sm:$0xff]  }
 0x5ca   :  { %17084 = vmatpush3.bf16.msra.mxu0 %v18476_v52  ;;  %13835 = vmatprep.mubr.bf16.mxu1 %v6686_v60  ;;  %v6053_v2 = vld [vmem:[#allocation4 + $0x8] sm:$0xff]  ;;  %v18519_v49 = vld [vmem:[#allocation5 + $0x180] sm:$0xff]   ;;  %v18520_v10 = vld [vmem:[#allocation5 + $0x278] sm:$0xff]  }
 0x5cb   :  { %17085 = vmatprep.subr.bf16.mxu0 %v18479_v56  ;;  %v6132_v24 = vrot.slane %v6053_v2, %v22934_v5  ;;  %v6125_v20 = vcombine.high %v6053_v2, %v6053_v2  ;;  %v18522_v37 = vld [vmem:[#allocation5 + $0x238] sm:$0xff]   ;;  %v18528_v39 = vld [vmem:[#allocation5 + $0x2b0] sm:$0xff]   ;;  %v18531_v26 = vld [vmem:[#allocation5 + $0x2e8] sm:$0xff]  }
 0x5cc   :  { %17106 = vmatpush3.bf16.msra.mxu1 %v18478_v43  ;;  %v18523_v52 = vld [vmem:[#allocation5 + $0x2f8] sm:$0xff]   ;;  %v18532_v61 = vld [vmem:[#allocation5 + $0x2a8] sm:$0xff]   ;;  %v18534_v14 = vld [vmem:[#allocation5 + $0x220] sm:$0xff]  }
 0x5cd   :  { %17107 = vmatprep.subr.bf16.mxu1 %v18481_v63  ;;  %v6140_v21 = vcombine.high %v6132_v24, %v6132_v24  ;;  %v6139_v22 = vrot.slane %v6125_v20, %v22934_v5  ;;  %v6687_v8 = vpack.c.bf16 %v6132_v24, %v6132_v24  ;;  %v18524_v56 = vld [vmem:[#allocation5 + $0x2b8] sm:$0xff]   ;;  %v18536_v46 = vld [vmem:[#allocation5 + $0x2a0] sm:$0xff]   ;;  %v18541_v28 = vld [vmem:[#allocation5 + $0x250] sm:$0xff]  }
 0x5ce   :  { %17086 = vmatpush3.bf16.msra.mxu0 %v18480_v29  ;;  %v18525_v29 = vld [vmem:[#allocation5 + $0x270] sm:$0xff]   ;;  %v18537_v23 = vld [vmem:[#allocation5 + $0x258] sm:$0xff]   ;;  %v18546_v60 = vld [vmem:[#allocation5 + $0x208] sm:$0xff]  }
 0x5cf   :  { %17087 = vmatprep.subr.bf16.mxu0 %v18483_v54  ;;  %v6688_v41 = vpack.c.bf16 %v6140_v21, %v6140_v21  ;;  %v6141_v43 = vcombine.high %v6139_v22, %v6139_v22  ;;  %v6689_v30 = vpack.c.bf16 %v6139_v22, %v6139_v22  ;;  %v18527_v54 = vld [vmem:[#allocation5 + $0x2f0] sm:$0xff]   ;;  %v18564_v2 = vld [vmem:[#allocation5 + $0x3e8] sm:$0xff]   ;;  %v18567_v20 = vld [vmem:[#allocation5 + $0x320] sm:$0xff]  }
 0x5d0   :  { %17108 = vmatpush3.bf16.msra.mxu1 %v18482_v48  ;;  %v18526_v48 = vld [vmem:[#allocation5 + $0x230] sm:$0xff]   ;;  %v18565_v24 = vld [vmem:[#allocation5 + $0x3a8] sm:$0xff]   ;;  %v18569_v21 = vld [vmem:[#allocation5 + $0x3a0] sm:$0xff]  }
 0x5d1   :  { %17109 = vmatprep.subr.bf16.mxu1 %v18485_v58  ;;  %v6690_v63 = vpack.c.bf16 %v6141_v43, %v6141_v43  ;;  %v18530_v58 = vld [vmem:[#allocation5 + $0x228] sm:$0xff]   ;;  %v18542_v3 = vld [vmem:[#allocation5 + $0x210] sm:$0xff]   ;;  %v18570_v22 = vld [vmem:[#allocation5 + $0x358] sm:$0xff]  }
 0x5d2   :  { %17088 = vmatpush3.bf16.msra.mxu0 %v18484_v9  ;;  %v18529_v9 = vld [vmem:[#allocation5 + $0x268] sm:$0xff]   ;;  %v18575_v43 = vld [vmem:[#allocation5 + $0x310] sm:$0xff]  }
 0x5d3   :  { %17117 = vmatprep.subr.bf16.mxu0 %v18487_v51  ;;  %v18535_v51 = vld [vmem:[#allocation5 + $0x2e0] sm:$0xff]  }
 0x5d4   :  { %17110 = vmatpush3.bf16.msra.mxu1 %v18486_v15  ;;  %v18533_v15 = vld [vmem:[#allocation5 + $0x260] sm:$0xff]  }
 0x5d5   :  { %17139 = vmatprep.subr.bf16.mxu1 %v18490_v1  ;;  %13796 = vmatmul.mubr.bf16.vlgmr.msra.gmra.mxu0 %v6683_v25  ;;  %v18539_v25 = vld [vmem:[#allocation5 + $0x2d8] sm:$0xff]  }
 0x5d6   :  { %17118 = vmatpush3.bf16.msra.mxu0 %v18489_v13  ;;  %13875 = vmatprep.mubr.bf16.mxu0 %v6688_v41  ;;  %v18538_v13 = vld [vmem:[#allocation5 + $0x218] sm:$0xff]   ;;  %v18574_v41 = vld [vmem:[#allocation5 + $0x350] sm:$0xff]  }
 0x5d7   :  { %13836 = vmatmul.mubr.bf16.vlgmr.msra.gmra.mxu1 %v6685_v45  ;;  %17119 = vmatprep.subr.bf16.mxu0 %v18492_v32  ;;  %v18540_v1 = vld [vmem:[#allocation5 + $0x298] sm:$0xff]   ;;  %v18544_v45 = vld [vmem:[#allocation5 + $0x290] sm:$0xff]   ;;  %v18545_v32 = vld [vmem:[#allocation5 + $0x248] sm:$0xff]  }
 0x5d8   :  { %17140 = vmatpush3.bf16.msra.mxu1 %v18491_v35  ;;  %13915 = vmatprep.mubr.bf16.mxu1 %v6690_v63  ;;  %v18543_v35 = vld [vmem:[#allocation5 + $0x2d0] sm:$0xff]   ;;  %v18579_v63 = vld [vmem:[#allocation5 + $0x308] sm:$0xff]  }
 0x5d9   :  { %17141 = vmatprep.subr.bf16.mxu1 %v18494_v31  ;;  %v18548_v31 = vld [vmem:[#allocation5 + $0x288] sm:$0xff]  }
 0x5da   :  { %17120 = vmatpush3.bf16.msra.mxu0 %v18493_v40  ;;  %v18547_v40 = vld [vmem:[#allocation5 + $0x2c8] sm:$0xff]  }
 0x5db   :  { %17121 = vmatprep.subr.bf16.mxu0 %v18496_v7  ;;  %v18550_v7 = vld [vmem:[#allocation5 + $0x200] sm:$0xff]  }
 0x5dc   :  { %17142 = vmatpush3.bf16.msra.mxu1 %v18495_v4  ;;  %v18549_v4 = vld [vmem:[#allocation5 + $0x240] sm:$0xff]  }
 0x5dd   :  { %17143 = vmatprep.subr.bf16.mxu1 %v18498_v57  ;;  %v6054_v57 = vld [vmem:[#allocation4 + $0x10] sm:$0xff] }
 0x5de   :  { %17122 = vmatpush3.bf16.msra.mxu0 %v18497_v59  ;;  %v18551_v59 = vld [vmem:[#allocation5 + $0x2c0] sm:$0xff]  }
 0x5df   :  { %17123 = vmatprep.subr.bf16.mxu0 %v18500_v34  ;;  %v18552_v34 = vld [vmem:[#allocation5 + $0x280] sm:$0xff]  }
 0x5e0   :  { %17144 = vmatpush3.bf16.msra.mxu1 %v18499_v44  ;;  %v6149_v44 = vrot.slane %v6054_v57, %v22934_v5 }
 0x5e1   :  { %17145 = vmatprep.subr.bf16.mxu1 %v18502_v0  ;;  %v18553_v0 = vld [vmem:[#allocation5 + $0x378] sm:$0xff]  }
 0x5e2   :  { %17124 = vmatpush3.bf16.msra.mxu0 %v18501_v16  ;;  %v6142_v16 = vcombine.high %v6054_v57, %v6054_v57  ;;  %v18597_v57 = vld [vmem:[#allocation5 + $0x4e8] sm:$0xff]  }
 0x5e3   :  { %17125 = vmatprep.subr.bf16.mxu0 %v18504_v47 }
 0x5e4   :  { %17146 = vmatpush3.bf16.msra.mxu1 %v18503_v50  ;;  %v6157_v50 = vcombine.high %v6149_v44, %v6149_v44  ;;  %v6156_v47 = vrot.slane %v6142_v16, %v22934_v5  ;;  %v18600_v16 = vld [vmem:[#allocation5 + $0x420] sm:$0xff]  }
 0x5e5   :  { %17147 = vmatprep.subr.bf16.mxu1 %v18506_v17  ;;  %v6691_v17 = vpack.c.bf16 %v6149_v44, %v6149_v44  ;;  %v18598_v44 = vld [vmem:[#allocation5 + $0x4a8] sm:$0xff]  }
 0x5e6   :  { %17126 = vmatpush3.bf16.msra.mxu0 %v18505_v18  ;;  %v18555_v18 = vld [vmem:[#allocation5 + $0x338] sm:$0xff]  }
 0x5e7   :  { %17127 = vmatprep.subr.bf16.mxu0 %v18508_v55  ;;  %v6692_v55 = vpack.c.bf16 %v6157_v50, %v6157_v50  ;;  %v18602_v50 = vld [vmem:[#allocation5 + $0x4a0] sm:$0xff]  }
 0x5e8   :  { %17148 = vmatpush3.bf16.msra.mxu1 %v18507_v62  ;;  %v18556_v62 = vld [vmem:[#allocation5 + $0x3f8] sm:$0xff]  }
 0x5e9   :  { %17149 = vmatprep.subr.bf16.mxu1 %v18510_v42  ;;  %v18557_v42 = vld [vmem:[#allocation5 + $0x3b8] sm:$0xff]  }
 0x5ea   :  { %17128 = vmatpush3.bf16.msra.mxu0 %v18509_v11  ;;  %v6158_v11 = vcombine.high %v6156_v47, %v6156_v47 }
 0x5eb   :  { %17129 = vmatprep.subr.bf16.mxu0 %v18512_v6  ;;  %v18558_v6 = vld [vmem:[#allocation5 + $0x370] sm:$0xff]  }
 0x5ec   :  { %17150 = vmatpush3.bf16.msra.mxu1 %v18511_v33  ;;  %v6693_v33 = vpack.c.bf16 %v6156_v47, %v6156_v47  ;;  %v18603_v47 = vld [vmem:[#allocation5 + $0x458] sm:$0xff]  }
 0x5ed   :  { %17151 = vmatprep.subr.bf16.mxu1 %v18514_v38  ;;  %v18559_v38 = vld [vmem:[#allocation5 + $0x330] sm:$0xff]  }
 0x5ee   :  { %17130 = vmatpush3.bf16.msra.mxu0 %v18513_v27  ;;  %v6694_v27 = vpack.c.bf16 %v6158_v11, %v6158_v11  ;;  %v18608_v11 = vld [vmem:[#allocation5 + $0x410] sm:$0xff]  }
 0x5ef   :  { %17131 = vmatprep.subr.bf16.mxu0 %v18516_v12  ;;  %v18561_v12 = vld [vmem:[#allocation5 + $0x3b0] sm:$0xff]  }
 0x5f0   :  { %17152 = vmatpush3.bf16.msra.mxu1 %v18515_v53  ;;  %v18560_v53 = vld [vmem:[#allocation5 + $0x3f0] sm:$0xff]  }
 0x5f1   :  { %17153 = vmatprep.subr.bf16.mxu1 %v18518_v19  ;;  %v18563_v19 = vld [vmem:[#allocation5 + $0x328] sm:$0xff]  }
 0x5f2   :  { %17132 = vmatpush3.bf16.msra.mxu0 %v18517_v36  ;;  %v18562_v36 = vld [vmem:[#allocation5 + $0x368] sm:$0xff]  }
 0x5f3   :  { %17161 = vmatprep.subr.bf16.mxu0 %v18520_v10  ;;  %v18568_v10 = vld [vmem:[#allocation5 + $0x3e0] sm:$0xff]  }
 0x5f4   :  { %17154 = vmatpush3.bf16.msra.mxu1 %v18519_v49  ;;  %v18566_v49 = vld [vmem:[#allocation5 + $0x360] sm:$0xff]  }
 0x5f5   :  { %13876 = vmatmul.mubr.bf16.vlgmr.msra.gmra.mxu0 %v6687_v8  ;;  %17183 = vmatprep.subr.bf16.mxu1 %v18523_v52  ;;  %v18572_v8 = vld [vmem:[#allocation5 + $0x3d8] sm:$0xff]  }
 0x5f6   :  { %17162 = vmatpush3.bf16.msra.mxu0 %v18522_v37  ;;  %13955 = vmatprep.mubr.bf16.mxu0 %v6692_v55  ;;  %v18571_v37 = vld [vmem:[#allocation5 + $0x318] sm:$0xff]   ;;  %v18607_v55 = vld [vmem:[#allocation5 + $0x450] sm:$0xff]  }
 0x5f7   :  { %13916 = vmatmul.mubr.bf16.vlgmr.msra.gmra.mxu1 %v6689_v30  ;;  %17163 = vmatprep.subr.bf16.mxu0 %v18525_v29  ;;  %v18573_v52 = vld [vmem:[#allocation5 + $0x398] sm:$0xff]   ;;  %v18577_v30 = vld [vmem:[#allocation5 + $0x390] sm:$0xff]   ;;  %v18578_v29 = vld [vmem:[#allocation5 + $0x348] sm:$0xff]  }
 0x5f8   :  { %17184 = vmatpush3.bf16.msra.mxu1 %v18524_v56  ;;  %13995 = vmatprep.mubr.bf16.mxu1 %v6694_v27  ;;  %v18576_v56 = vld [vmem:[#allocation5 + $0x3d0] sm:$0xff]   ;;  %v18612_v27 = vld [vmem:[#allocation5 + $0x408] sm:$0xff]  }
 0x5f9   :  { %17185 = vmatprep.subr.bf16.mxu1 %v18527_v54  ;;  %v18581_v54 = vld [vmem:[#allocation5 + $0x388] sm:$0xff]  }
 0x5fa   :  { %17164 = vmatpush3.bf16.msra.mxu0 %v18526_v48  ;;  %v18580_v48 = vld [vmem:[#allocation5 + $0x3c8] sm:$0xff]  }
 0x5fb   :  { %17165 = vmatprep.subr.bf16.mxu0 %v18529_v9  ;;  %v18583_v9 = vld [vmem:[#allocation5 + $0x300] sm:$0xff]  }
 0x5fc   :  { %17186 = vmatpush3.bf16.msra.mxu1 %v18528_v39  ;;  %v18582_v39 = vld [vmem:[#allocation5 + $0x340] sm:$0xff]  }
 0x5fd   :  { %17187 = vmatprep.subr.bf16.mxu1 %v18531_v26  ;;  %v6055_v26 = vld [vmem:[#allocation4 + $0x18] sm:$0xff] }
 0x5fe   :  { %17166 = vmatpush3.bf16.msra.mxu0 %v18530_v58  ;;  %v18584_v58 = vld [vmem:[#allocation5 + $0x3c0] sm:$0xff]  }
 0x5ff   :  { %17167 = vmatprep.subr.bf16.mxu0 %v18533_v15  ;;  %v18585_v15 = vld [vmem:[#allocation5 + $0x380] sm:$0xff]  }
 0x600   :  { %17188 = vmatpush3.bf16.msra.mxu1 %v18532_v61  ;;  %v6166_v61 = vrot.slane %v6055_v26, %v22934_v5 }
 0x601   :  { %17189 = vmatprep.subr.bf16.mxu1 %v18535_v51  ;;  %v18586_v51 = vld [vmem:[#allocation5 + $0x478] sm:$0xff]  }
 0x602   :  { %17168 = vmatpush3.bf16.msra.mxu0 %v18534_v14  ;;  %v6159_v14 = vcombine.high %v6055_v26, %v6055_v26  ;;  %v18630_v26 = vld [vmem:[#allocation5 + $0x5e8] sm:$0xff]  }
 0x603   :  { %17169 = vmatprep.subr.bf16.mxu0 %v18537_v23 }
 0x604   :  { %17190 = vmatpush3.bf16.msra.mxu1 %v18536_v46  ;;  %v6174_v46 = vcombine.high %v6166_v61, %v6166_v61  ;;  %v6173_v23 = vrot.slane %v6159_v14, %v22934_v5  ;;  %v18633_v14 = vld [vmem:[#allocation5 + $0x520] sm:$0xff]  }
 0x605   :  { %17191 = vmatprep.subr.bf16.mxu1 %v18539_v25  ;;  %v6695_v25 = vpack.c.bf16 %v6166_v61, %v6166_v61  ;;  %v18631_v61 = vld [vmem:[#allocation5 + $0x5a8] sm:$0xff]  }
 0x606   :  { %17170 = vmatpush3.bf16.msra.mxu0 %v18538_v13  ;;  %v18588_v13 = vld [vmem:[#allocation5 + $0x438] sm:$0xff]  }
 0x607   :  { %17171 = vmatprep.subr.bf16.mxu0 %v18541_v28  ;;  %v6696_v28 = vpack.c.bf16 %v6174_v46, %v6174_v46  ;;  %v18635_v46 = vld [vmem:[#allocation5 + $0x5a0] sm:$0xff]  }
 0x608   :  { %17192 = vmatpush3.bf16.msra.mxu1 %v18540_v1  ;;  %v18589_v1 = vld [vmem:[#allocation5 + $0x4f8] sm:$0xff]  }
 0x609   :  { %17193 = vmatprep.subr.bf16.mxu1 %v18543_v35  ;;  %v18590_v35 = vld [vmem:[#allocation5 + $0x4b8] sm:$0xff]  }
 0x60a   :  { %17172 = vmatpush3.bf16.msra.mxu0 %v18542_v3  ;;  %v6175_v3 = vcombine.high %v6173_v23, %v6173_v23 }
 0x60b   :  { %17173 = vmatprep.subr.bf16.mxu0 %v18545_v32  ;;  %v18591_v32 = vld [vmem:[#allocation5 + $0x470] sm:$0xff]  }
 0x60c   :  { %17194 = vmatpush3.bf16.msra.mxu1 %v18544_v45  ;;  %v6697_v45 = vpack.c.bf16 %v6173_v23, %v6173_v23  ;;  %v18636_v23 = vld [vmem:[#allocation5 + $0x558] sm:$0xff]  }
 0x60d   :  { %17195 = vmatprep.subr.bf16.mxu1 %v18547_v40  ;;  %v18592_v40 = vld [vmem:[#allocation5 + $0x430] sm:$0xff]  }
 0x60e   :  { %17174 = vmatpush3.bf16.msra.mxu0 %v18546_v60  ;;  %v6698_v60 = vpack.c.bf16 %v6175_v3, %v6175_v3  ;;  %v18641_v3 = vld [vmem:[#allocation5 + $0x510] sm:$0xff]  }
 0x60f   :  { %17175 = vmatprep.subr.bf16.mxu0 %v18549_v4  ;;  %v18594_v4 = vld [vmem:[#allocation5 + $0x4b0] sm:$0xff]  }
 0x610   :  { %17196 = vmatpush3.bf16.msra.mxu1 %v18548_v31  ;;  %v18593_v31 = vld [vmem:[#allocation5 + $0x4f0] sm:$0xff]  }
 0x611   :  { %17197 = vmatprep.subr.bf16.mxu1 %v18551_v59  ;;  %v18596_v59 = vld [vmem:[#allocation5 + $0x428] sm:$0xff]  }
 0x612   :  { %17176 = vmatpush3.bf16.msra.mxu0 %v18550_v7  ;;  %v18595_v7 = vld [vmem:[#allocation5 + $0x468] sm:$0xff]  }
 0x613   :  { %17205 = vmatprep.subr.bf16.mxu0 %v18553_v0  ;;  %v18601_v0 = vld [vmem:[#allocation5 + $0x4e0] sm:$0xff]  }
 0x614   :  { %17198 = vmatpush3.bf16.msra.mxu1 %v18552_v34  ;;  %v18599_v34 = vld [vmem:[#allocation5 + $0x460] sm:$0xff]  }
 0x615   :  { %13956 = vmatmul.mubr.bf16.vlgmr.msra.gmra.mxu0 %v6691_v17  ;;  %17227 = vmatprep.subr.bf16.mxu1 %v18556_v62  ;;  %v18605_v17 = vld [vmem:[#allocation5 + $0x4d8] sm:$0xff]  }
 0x616   :  { %17206 = vmatpush3.bf16.msra.mxu0 %v18555_v18  ;;  %14035 = vmatprep.mubr.bf16.mxu0 %v6696_v28  ;;  %v18604_v18 = vld [vmem:[#allocation5 + $0x418] sm:$0xff]   ;;  %v18640_v28 = vld [vmem:[#allocation5 + $0x550] sm:$0xff]  }
 0x617   :  { %13996 = vmatmul.mubr.bf16.vlgmr.msra.gmra.mxu1 %v6693_v33  ;;  %17207 = vmatprep.subr.bf16.mxu0 %v18558_v6  ;;  %v18606_v62 = vld [vmem:[#allocation5 + $0x498] sm:$0xff]   ;;  %v18610_v33 = vld [vmem:[#allocation5 + $0x490] sm:$0xff]   ;;  %v18611_v6 = vld [vmem:[#allocation5 + $0x448] sm:$0xff]  }
 0x618   :  { %17228 = vmatpush3.bf16.msra.mxu1 %v18557_v42  ;;  %14075 = vmatprep.mubr.bf16.mxu1 %v6698_v60  ;;  %v18609_v42 = vld [vmem:[#allocation5 + $0x4d0] sm:$0xff]   ;;  %v18645_v60 = vld [vmem:[#allocation5 + $0x508] sm:$0xff]  }
 0x619   :  { %17229 = vmatprep.subr.bf16.mxu1 %v18560_v53  ;;  %v18614_v53 = vld [vmem:[#allocation5 + $0x488] sm:$0xff]  }
 0x61a   :  { %17208 = vmatpush3.bf16.msra.mxu0 %v18559_v38  ;;  %v18613_v38 = vld [vmem:[#allocation5 + $0x4c8] sm:$0xff]  }
 0x61b   :  { %17209 = vmatprep.subr.bf16.mxu0 %v18562_v36  ;;  %v18616_v36 = vld [vmem:[#allocation5 + $0x400] sm:$0xff]  }
 0x61c   :  { %17230 = vmatpush3.bf16.msra.mxu1 %v18561_v12  ;;  %v18615_v12 = vld [vmem:[#allocation5 + $0x440] sm:$0xff]  }
 0x61d   :  { %17231 = vmatprep.subr.bf16.mxu1 %v18564_v2  ;;  %v6056_v2 = vld [vmem:[#allocation4 + $0x20] sm:$0xff] }
 0x61e   :  { %17210 = vmatpush3.bf16.msra.mxu0 %v18563_v19  ;;  %v18617_v19 = vld [vmem:[#allocation5 + $0x4c0] sm:$0xff]  }
 0x61f   :  { %17211 = vmatprep.subr.bf16.mxu0 %v18566_v49  ;;  %v18618_v49 = vld [vmem:[#allocation5 + $0x480] sm:$0xff]  }
 0x620   :  { %17232 = vmatpush3.bf16.msra.mxu1 %v18565_v24  ;;  %v6183_v24 = vrot.slane %v6056_v2, %v22934_v5 }
 0x621   :  { %17233 = vmatprep.subr.bf16.mxu1 %v18568_v10  ;;  %v18619_v10 = vld [vmem:[#allocation5 + $0x578] sm:$0xff]  }
 0x622   :  { %17212 = vmatpush3.bf16.msra.mxu0 %v18567_v20  ;;  %v6176_v20 = vcombine.high %v6056_v2, %v6056_v2  ;;  %v18663_v2 = vld [vmem:[#allocation5 + $0x6e8] sm:$0xff]  }
 0x623   :  { %17213 = vmatprep.subr.bf16.mxu0 %v18570_v22 }
 0x624   :  { %17234 = vmatpush3.bf16.msra.mxu1 %v18569_v21  ;;  %v6191_v21 = vcombine.high %v6183_v24, %v6183_v24  ;;  %v6190_v22 = vrot.slane %v6176_v20, %v22934_v5  ;;  %v18666_v20 = vld [vmem:[#allocation5 + $0x620] sm:$0xff]  }
 0x625   :  { %17235 = vmatprep.subr.bf16.mxu1 %v18572_v8  ;;  %v6699_v8 = vpack.c.bf16 %v6183_v24, %v6183_v24  ;;  %v18664_v24 = vld [vmem:[#allocation5 + $0x6a8] sm:$0xff]  }
 0x626   :  { %17214 = vmatpush3.bf16.msra.mxu0 %v18571_v37  ;;  %v18621_v37 = vld [vmem:[#allocation5 + $0x538] sm:$0xff]  }
 0x627   :  { %17215 = vmatprep.subr.bf16.mxu0 %v18574_v41  ;;  %v6700_v41 = vpack.c.bf16 %v6191_v21, %v6191_v21  ;;  %v18668_v21 = vld [vmem:[#allocation5 + $0x6a0] sm:$0xff]  }
 0x628   :  { %17236 = vmatpush3.bf16.msra.mxu1 %v18573_v52  ;;  %v18622_v52 = vld [vmem:[#allocation5 + $0x5f8] sm:$0xff]  }
 0x629   :  { %17237 = vmatprep.subr.bf16.mxu1 %v18576_v56  ;;  %v18623_v56 = vld [vmem:[#allocation5 + $0x5b8] sm:$0xff]  }
 0x62a   :  { %17216 = vmatpush3.bf16.msra.mxu0 %v18575_v43  ;;  %v6192_v43 = vcombine.high %v6190_v22, %v6190_v22 }
 0x62b   :  { %17217 = vmatprep.subr.bf16.mxu0 %v18578_v29  ;;  %v18624_v29 = vld [vmem:[#allocation5 + $0x570] sm:$0xff]  }
 0x62c   :  { %17238 = vmatpush3.bf16.msra.mxu1 %v18577_v30  ;;  %v6701_v30 = vpack.c.bf16 %v6190_v22, %v6190_v22  ;;  %v18669_v22 = vld [vmem:[#allocation5 + $0x658] sm:$0xff]  }
 0x62d   :  { %17239 = vmatprep.subr.bf16.mxu1 %v18580_v48  ;;  %v18625_v48 = vld [vmem:[#allocation5 + $0x530] sm:$0xff]  }
 0x62e   :  { %17218 = vmatpush3.bf16.msra.mxu0 %v18579_v63  ;;  %v6702_v63 = vpack.c.bf16 %v6192_v43, %v6192_v43  ;;  %v18674_v43 = vld [vmem:[#allocation5 + $0x610] sm:$0xff]  }
 0x62f   :  { %17219 = vmatprep.subr.bf16.mxu0 %v18582_v39  ;;  %v18627_v39 = vld [vmem:[#allocation5 + $0x5b0] sm:$0xff]  }
 0x630   :  { %17240 = vmatpush3.bf16.msra.mxu1 %v18581_v54  ;;  %v18626_v54 = vld [vmem:[#allocation5 + $0x5f0] sm:$0xff]  }
 0x631   :  { %17241 = vmatprep.subr.bf16.mxu1 %v18584_v58  ;;  %v18629_v58 = vld [vmem:[#allocation5 + $0x528] sm:$0xff]  }
 0x632   :  { %17220 = vmatpush3.bf16.msra.mxu0 %v18583_v9  ;;  %v18628_v9 = vld [vmem:[#allocation5 + $0x568] sm:$0xff]  }
 0x633   :  { %17249 = vmatprep.subr.bf16.mxu0 %v18586_v51  ;;  %v18634_v51 = vld [vmem:[#allocation5 + $0x5e0] sm:$0xff]  }
 0x634   :  { %17242 = vmatpush3.bf16.msra.mxu1 %v18585_v15  ;;  %v18632_v15 = vld [vmem:[#allocation5 + $0x560] sm:$0xff]  }
 0x635   :  { %17271 = vmatprep.subr.bf16.mxu1 %v18589_v1  ;;  %14036 = vmatmul.mubr.bf16.vlgmr.msra.gmra.mxu0 %v6695_v25  ;;  %v18638_v25 = vld [vmem:[#allocation5 + $0x5d8] sm:$0xff]  }
 0x636   :  { %17250 = vmatpush3.bf16.msra.mxu0 %v18588_v13  ;;  %14115 = vmatprep.mubr.bf16.mxu0 %v6700_v41  ;;  %v18637_v13 = vld [vmem:[#allocation5 + $0x518] sm:$0xff]   ;;  %v18673_v41 = vld [vmem:[#allocation5 + $0x650] sm:$0xff]  }
 0x637   :  { %14076 = vmatmul.mubr.bf16.vlgmr.msra.gmra.mxu1 %v6697_v45  ;;  %17251 = vmatprep.subr.bf16.mxu0 %v18591_v32  ;;  %v18639_v1 = vld [vmem:[#allocation5 + $0x598] sm:$0xff]   ;;  %v18643_v45 = vld [vmem:[#allocation5 + $0x590] sm:$0xff]   ;;  %v18644_v32 = vld [vmem:[#allocation5 + $0x548] sm:$0xff]  }
 0x638   :  { %17272 = vmatpush3.bf16.msra.mxu1 %v18590_v35  ;;  %14155 = vmatprep.mubr.bf16.mxu1 %v6702_v63  ;;  %v18642_v35 = vld [vmem:[#allocation5 + $0x5d0] sm:$0xff]   ;;  %v18678_v63 = vld [vmem:[#allocation5 + $0x608] sm:$0xff]  }
 0x639   :  { %17273 = vmatprep.subr.bf16.mxu1 %v18593_v31  ;;  %v18647_v31 = vld [vmem:[#allocation5 + $0x588] sm:$0xff]  }
 0x63a   :  { %17252 = vmatpush3.bf16.msra.mxu0 %v18592_v40  ;;  %v18646_v40 = vld [vmem:[#allocation5 + $0x5c8] sm:$0xff]  }
 0x63b   :  { %17253 = vmatprep.subr.bf16.mxu0 %v18595_v7  ;;  %v18649_v7 = vld [vmem:[#allocation5 + $0x500] sm:$0xff]  }
 0x63c   :  { %17274 = vmatpush3.bf16.msra.mxu1 %v18594_v4  ;;  %v18648_v4 = vld [vmem:[#allocation5 + $0x540] sm:$0xff]  }
 0x63d   :  { %17275 = vmatprep.subr.bf16.mxu1 %v18597_v57  ;;  %v6057_v57 = vld [vmem:[#allocation4 + $0x28] sm:$0xff] }
 0x63e   :  { %17254 = vmatpush3.bf16.msra.mxu0 %v18596_v59  ;;  %v18650_v59 = vld [vmem:[#allocation5 + $0x5c0] sm:$0xff]  }
 0x63f   :  { %17255 = vmatprep.subr.bf16.mxu0 %v18599_v34  ;;  %v18651_v34 = vld [vmem:[#allocation5 + $0x580] sm:$0xff]  }
 0x640   :  { %17276 = vmatpush3.bf16.msra.mxu1 %v18598_v44  ;;  %v6200_v44 = vrot.slane %v6057_v57, %v22934_v5 }
 0x641   :  { %17277 = vmatprep.subr.bf16.mxu1 %v18601_v0  ;;  %v18652_v0 = vld [vmem:[#allocation5 + $0x678] sm:$0xff]  }
 0x642   :  { %17256 = vmatpush3.bf16.msra.mxu0 %v18600_v16  ;;  %v6193_v16 = vcombine.high %v6057_v57, %v6057_v57  ;;  %v18692_v57 = vld [vmem:[#allocation5 + $0x7f0] sm:$0xff]  }
 0x643   :  { %17257 = vmatprep.subr.bf16.mxu0 %v18603_v47 }
 0x644   :  { %17278 = vmatpush3.bf16.msra.mxu1 %v18602_v50  ;;  %v6208_v50 = vcombine.high %v6200_v44, %v6200_v44  ;;  %v6207_v47 = vrot.slane %v6193_v16, %v22934_v5 }
 0x645   :  { %17279 = vmatprep.subr.bf16.mxu1 %v18605_v17  ;;  %v6703_v17 = vpack.c.bf16 %v6200_v44, %v6200_v44 }
 0x646   :  { %17258 = vmatpush3.bf16.msra.mxu0 %v18604_v18  ;;  %v18654_v18 = vld [vmem:[#allocation5 + $0x638] sm:$0xff]  }
 0x647   :  { %17259 = vmatprep.subr.bf16.mxu0 %v18607_v55  ;;  %v6704_v55 = vpack.c.bf16 %v6208_v50, %v6208_v50  ;;  %v18694_v50 = vld [vmem:[#allocation5 + $0x768] sm:$0xff]  }
 0x648   :  { %17280 = vmatpush3.bf16.msra.mxu1 %v18606_v62  ;;  %v18655_v62 = vld [vmem:[#allocation5 + $0x6f8] sm:$0xff]  }
 0x649   :  { %17281 = vmatprep.subr.bf16.mxu1 %v18609_v42  ;;  %v18656_v42 = vld [vmem:[#allocation5 + $0x6b8] sm:$0xff]  }
 0x64a   :  { %17260 = vmatpush3.bf16.msra.mxu0 %v18608_v11  ;;  %v6209_v11 = vcombine.high %v6207_v47, %v6207_v47 }
 0x64b   :  { %17261 = vmatprep.subr.bf16.mxu0 %v18611_v6  ;;  %v18657_v6 = vld [vmem:[#allocation5 + $0x670] sm:$0xff]  }
 0x64c   :  { %17282 = vmatpush3.bf16.msra.mxu1 %v18610_v33  ;;  %v6705_v33 = vpack.c.bf16 %v6207_v47, %v6207_v47 }
 0x64d   :  { %17283 = vmatprep.subr.bf16.mxu1 %v18613_v38  ;;  %v18658_v38 = vld [vmem:[#allocation5 + $0x630] sm:$0xff]  }
 0x64e   :  { %17262 = vmatpush3.bf16.msra.mxu0 %v18612_v27  ;;  %v6706_v27 = vpack.c.bf16 %v6209_v11, %v6209_v11 }
 0x64f   :  { %17263 = vmatprep.subr.bf16.mxu0 %v18615_v12  ;;  %v18660_v12 = vld [vmem:[#allocation5 + $0x6b0] sm:$0xff]  }
 0x650   :  { %17284 = vmatpush3.bf16.msra.mxu1 %v18614_v53  ;;  %v18659_v53 = vld [vmem:[#allocation5 + $0x6f0] sm:$0xff]  }
 0x651   :  { %17285 = vmatprep.subr.bf16.mxu1 %v18617_v19  ;;  %v18662_v19 = vld [vmem:[#allocation5 + $0x628] sm:$0xff]  }
 0x652   :  { %17264 = vmatpush3.bf16.msra.mxu0 %v18616_v36  ;;  %v18661_v36 = vld [vmem:[#allocation5 + $0x668] sm:$0xff]  }
 0x653   :  { %17293 = vmatprep.subr.bf16.mxu0 %v18619_v10  ;;  %v18667_v10 = vld [vmem:[#allocation5 + $0x6e0] sm:$0xff]  }
 0x654   :  { %17286 = vmatpush3.bf16.msra.mxu1 %v18618_v49  ;;  %v18665_v49 = vld [vmem:[#allocation5 + $0x660] sm:$0xff]  }
 0x655   :  { %14116 = vmatmul.mubr.bf16.vlgmr.msra.gmra.mxu0 %v6699_v8  ;;  %17315 = vmatprep.subr.bf16.mxu1 %v18622_v52  ;;  %v18671_v8 = vld [vmem:[#allocation5 + $0x6d8] sm:$0xff]  }
 0x656   :  { %17294 = vmatpush3.bf16.msra.mxu0 %v18621_v37  ;;  %14195 = vmatprep.mubr.bf16.mxu0 %v6704_v55  ;;  %v18670_v37 = vld [vmem:[#allocation5 + $0x618] sm:$0xff]   ;;  %v18696_v55 = vld [vmem:[#allocation5 + $0x7e8] sm:$0xff]  }
 0x657   :  { %14156 = vmatmul.mubr.bf16.vlgmr.msra.gmra.mxu1 %v6701_v30  ;;  %17295 = vmatprep.subr.bf16.mxu0 %v18624_v29  ;;  %v18672_v52 = vld [vmem:[#allocation5 + $0x698] sm:$0xff]   ;;  %v18676_v30 = vld [vmem:[#allocation5 + $0x690] sm:$0xff]   ;;  %v18677_v29 = vld [vmem:[#allocation5 + $0x648] sm:$0xff]  }
 0x658   :  { %17316 = vmatpush3.bf16.msra.mxu1 %v18623_v56  ;;  %14235 = vmatprep.mubr.bf16.mxu1 %v6706_v27  ;;  %v18675_v56 = vld [vmem:[#allocation5 + $0x6d0] sm:$0xff]  }
 0x659   :  { %17317 = vmatprep.subr.bf16.mxu1 %v18626_v54  ;;  %v18680_v54 = vld [vmem:[#allocation5 + $0x688] sm:$0xff]  }
 0x65a   :  { %17296 = vmatpush3.bf16.msra.mxu0 %v18625_v48  ;;  %v18679_v48 = vld [vmem:[#allocation5 + $0x6c8] sm:$0xff]  }
 0x65b   :  { %17297 = vmatprep.subr.bf16.mxu0 %v18628_v9  ;;  %v18682_v9 = vld [vmem:[#allocation5 + $0x600] sm:$0xff]  }
 0x65c   :  { %17318 = vmatpush3.bf16.msra.mxu1 %v18627_v39  ;;  %v18681_v39 = vld [vmem:[#allocation5 + $0x640] sm:$0xff]  }
 0x65d   :  { %17319 = vmatprep.subr.bf16.mxu1 %v18630_v26  ;;  %v6058_v26 = vld [vmem:[#allocation4 + $0x30] sm:$0xff] }
 0x65e   :  { %17298 = vmatpush3.bf16.msra.mxu0 %v18629_v58  ;;  %v18683_v58 = vld [vmem:[#allocation5 + $0x6c0] sm:$0xff]  }
 0x65f   :  { %17299 = vmatprep.subr.bf16.mxu0 %v18632_v15  ;;  %v18684_v15 = vld [vmem:[#allocation5 + $0x680] sm:$0xff]  }
 0x660   :  { %17320 = vmatpush3.bf16.msra.mxu1 %v18631_v61  ;;  %v6217_v61 = vrot.slane %v6058_v26, %v22934_v5 }
 0x661   :  { %17321 = vmatprep.subr.bf16.mxu1 %v18634_v51  ;;  %v18685_v51 = vld [vmem:[#allocation5 + $0x778] sm:$0xff]  }
 0x662   :  { %17300 = vmatpush3.bf16.msra.mxu0 %v18633_v14  ;;  %v6210_v14 = vcombine.high %v6058_v26, %v6058_v26 }
 0x663   :  { %17301 = vmatprep.subr.bf16.mxu0 %v18636_v23 }
 0x664   :  { %17322 = vmatpush3.bf16.msra.mxu1 %v18635_v46  ;;  %v6225_v46 = vcombine.high %v6217_v61, %v6217_v61  ;;  %v6224_v23 = vrot.slane %v6210_v14, %v22934_v5 }
 0x665   :  { %17323 = vmatprep.subr.bf16.mxu1 %v18638_v25  ;;  %v6707_v25 = vpack.c.bf16 %v6217_v61, %v6217_v61  ;;  %v18721_v61 = vld [vmem:[#allocation5 + $0x8f8] sm:$0xff]  }
 0x666   :  { %17302 = vmatpush3.bf16.msra.mxu0 %v18637_v13  ;;  %v18687_v13 = vld [vmem:[#allocation5 + $0x738] sm:$0xff]  }
 0x667   :  { %17303 = vmatprep.subr.bf16.mxu0 %v18640_v28  ;;  %v6708_v28 = vpack.c.bf16 %v6225_v46, %v6225_v46 }
 0x668   :  { %17324 = vmatpush3.bf16.msra.mxu1 %v18639_v1  ;;  %v18688_v1 = vld [vmem:[#allocation5 + $0x7f8] sm:$0xff]  }
 0x669   :  { %17325 = vmatprep.subr.bf16.mxu1 %v18642_v35  ;;  %v18689_v35 = vld [vmem:[#allocation5 + $0x7b8] sm:$0xff]  }
 0x66a   :  { %17304 = vmatpush3.bf16.msra.mxu0 %v18641_v3  ;;  %v6226_v3 = vcombine.high %v6224_v23, %v6224_v23 }
 0x66b   :  { %17305 = vmatprep.subr.bf16.mxu0 %v18644_v32  ;;  %v16144_v32 = vld [vmem:[#allocation12] ss:$0 sm:$0xff] }
 0x66c   :  { %17326 = vmatpush3.bf16.msra.mxu1 %v18643_v45 }
 0x66d   :  { %17327 = vmatprep.subr.bf16.mxu1 %v18646_v40  ;;  %v18690_v40 = vld [vmem:[#allocation5 + $0x770] sm:$0xff]  }
 0x66e   :  { %17306 = vmatpush3.bf16.msra.mxu0 %v18645_v60  ;;  %v6709_v60 = vpack.c.bf16 %v6224_v23, %v6224_v23 }
 0x66f   :  { %17307 = vmatprep.subr.bf16.mxu0 %v18648_v4  ;;  %v18691_v4 = vld [vmem:[#allocation5 + $0x730] sm:$0xff]  }
 0x670   :  { %17328 = vmatpush3.bf16.msra.mxu1 %v18647_v31  ;;  %v6710_v31 = vpack.c.bf16 %v6226_v3, %v6226_v3 }
 0x671   :  { %17329 = vmatprep.subr.bf16.mxu1 %v18650_v59 }
 0x672   :  { %17308 = vmatpush3.bf16.msra.mxu0 %v18649_v7 }
 0x673   :  { %17337 = vmatprep.subr.bf16.mxu0 %v18652_v0 }
 0x674   :  { %17330 = vmatpush3.bf16.msra.mxu1 %v18651_v34  ;;  %v18693_v34 = vld [vmem:[#allocation5 + $0x7b0] sm:$0xff]  }
 0x675   :  { %14196 = vmatmul.mubr.bf16.vlgmr.msra.gmra.mxu0 %v6703_v17  ;;  %17359 = vmatprep.subr.bf16.mxu1 %v18655_v62  ;;  %v18695_v17 = vld [vmem:[#allocation5 + $0x728] sm:$0xff]  }
 0x676   :  { %17338 = vmatpush3.bf16.msra.mxu0 %v18654_v18  ;;  %14275 = vmatprep.mubr.bf16.mxu0 %v6708_v28 }
 0x677   :  { %14236 = vmatmul.mubr.bf16.vlgmr.msra.gmra.mxu1 %v6705_v33  ;;  %17339 = vmatprep.subr.bf16.mxu0 %v18657_v6  ;;  %v18697_v33 = vld [vmem:[#allocation5 + $0x7a8] sm:$0xff]   ;;  %v18698_v6 = vld [vmem:[#allocation5 + $0x760] sm:$0xff]  }
 0x678   :  { %17360 = vmatpush3.bf16.msra.mxu1 %v18656_v42  ;;  %14315 = vmatprep.mubr.bf16.mxu1 %v6710_v31  ;;  %v18727_v31 = vld [vmem:[#allocation5 + $0x868] sm:$0xff]  }
 0x679   :  { %17361 = vmatprep.subr.bf16.mxu1 %v18659_v53  ;;  %v18700_v53 = vld [vmem:[#allocation5 + $0x7e0] sm:$0xff]  }
 0x67a   :  { %17340 = vmatpush3.bf16.msra.mxu0 %v18658_v38  ;;  %v18699_v38 = vld [vmem:[#allocation5 + $0x720] sm:$0xff]  }
 0x67b   :  { %17341 = vmatprep.subr.bf16.mxu0 %v18661_v36  ;;  %v18702_v36 = vld [vmem:[#allocation5 + $0x758] sm:$0xff]  }
 0x67c   :  { %17362 = vmatpush3.bf16.msra.mxu1 %v18660_v12  ;;  %v18701_v12 = vld [vmem:[#allocation5 + $0x7a0] sm:$0xff]  }
 0x67d   :  { %17363 = vmatprep.subr.bf16.mxu1 %v18663_v2  ;;  %v18704_v2 = vld [vmem:[#allocation5 + $0x7d8] sm:$0xff]  }
 0x67e   :  { %17342 = vmatpush3.bf16.msra.mxu0 %v18662_v19  ;;  %v18703_v19 = vld [vmem:[#allocation5 + $0x718] sm:$0xff]  }
 0x67f   :  { %17343 = vmatprep.subr.bf16.mxu0 %v18665_v49  ;;  %v18706_v49 = vld [vmem:[#allocation5 + $0x750] sm:$0xff]  }
 0x680   :  { %17364 = vmatpush3.bf16.msra.mxu1 %v18664_v24  ;;  %v18705_v24 = vld [vmem:[#allocation5 + $0x798] sm:$0xff]  }
 0x681   :  { %17365 = vmatprep.subr.bf16.mxu1 %v18667_v10  ;;  %v18708_v10 = vld [vmem:[#allocation5 + $0x7d0] sm:$0xff]  }
 0x682   :  { %17344 = vmatpush3.bf16.msra.mxu0 %v18666_v20  ;;  %v18707_v20 = vld [vmem:[#allocation5 + $0x710] sm:$0xff]  }
 0x683   :  { %17345 = vmatprep.subr.bf16.mxu0 %v18669_v22  ;;  %v18710_v22 = vld [vmem:[#allocation5 + $0x748] sm:$0xff]  }
 0x684   :  { %17366 = vmatpush3.bf16.msra.mxu1 %v18668_v21  ;;  %v18709_v21 = vld [vmem:[#allocation5 + $0x790] sm:$0xff]  }
 0x685   :  { %17367 = vmatprep.subr.bf16.mxu1 %v18671_v8  ;;  %v18712_v8 = vld [vmem:[#allocation5 + $0x7c8] sm:$0xff]  }
 0x686   :  { %17346 = vmatpush3.bf16.msra.mxu0 %v18670_v37  ;;  %v18711_v37 = vld [vmem:[#allocation5 + $0x708] sm:$0xff]  }
 0x687   :  { %17347 = vmatprep.subr.bf16.mxu0 %v18673_v41  ;;  %v18714_v41 = vld [vmem:[#allocation5 + $0x740] sm:$0xff]  }
 0x688   :  { %17368 = vmatpush3.bf16.msra.mxu1 %v18672_v52  ;;  %v18713_v52 = vld [vmem:[#allocation5 + $0x788] sm:$0xff]  }
 0x689   :  { %17369 = vmatprep.subr.bf16.mxu1 %v18675_v56  ;;  %v18716_v56 = vld [vmem:[#allocation5 + $0x7c0] sm:$0xff]  }
 0x68a   :  { %17348 = vmatpush3.bf16.msra.mxu0 %v18674_v43  ;;  %v18715_v43 = vld [vmem:[#allocation5 + $0x700] sm:$0xff]  }
 0x68b   :  { %17349 = vmatprep.subr.bf16.mxu0 %v18677_v29 }
 0x68c   :  { %17370 = vmatpush3.bf16.msra.mxu1 %v18676_v30  ;;  %v6059_v30 = vld [vmem:[#allocation4 + $0x38] sm:$0xff] }
 0x68d   :  { %17371 = vmatprep.subr.bf16.mxu1 %v18679_v48  ;;  %v6234_v29 = vrot.slane %v6059_v30, %v22934_v5  ;;  %v6227_v48 = vcombine.high %v6059_v30, %v6059_v30  ;;  %v18754_v30 = vld [vmem:[#allocation5 + $0x9f8] sm:$0xff]  }
 0x68e   :  { %17350 = vmatpush3.bf16.msra.mxu0 %v18678_v63  ;;  %v18717_v63 = vld [vmem:[#allocation5 + $0x780] sm:$0xff]  }
 0x68f   :  { %17351 = vmatprep.subr.bf16.mxu0 %v18681_v39  ;;  %v6242_v39 = vcombine.high %v6234_v29, %v6234_v29  ;;  %v6711_v26 = vpack.c.bf16 %v6234_v29, %v6234_v29 }
 0x690   :  { %17372 = vmatpush3.bf16.msra.mxu1 %v18680_v54  ;;  %v18718_v54 = vld [vmem:[#allocation5 + $0x878] sm:$0xff]  }
 0x691   :  { %17373 = vmatprep.subr.bf16.mxu1 %v18683_v58  ;;  %v18720_v58 = vld [vmem:[#allocation5 + $0x838] sm:$0xff]  }
 0x692   :  { %17352 = vmatpush3.bf16.msra.mxu0 %v18682_v9  ;;  %v6241_v9 = vrot.slane %v6227_v48, %v22934_v5 }
 0x693   :  { %17381 = vmatprep.subr.bf16.mxu0 %v18685_v51  ;;  %v18722_v51 = vld [vmem:[#allocation5 + $0x8b8] sm:$0xff]  }
 0x694   :  { %17374 = vmatpush3.bf16.msra.mxu1 %v18684_v15  ;;  %v6712_v15 = vpack.c.bf16 %v6242_v39, %v6242_v39  ;;  %v6243_v14 = vcombine.high %v6241_v9, %v6241_v9  ;;  %v6713_v23 = vpack.c.bf16 %v6241_v9, %v6241_v9  ;;  %v18756_v9 = vld [vmem:[#allocation5 + $0x970] sm:$0xff]  }
 0x695   :  { %v17089_v45 = vpop.f32.mrf.mxu0  ;;  %17403 = vmatprep.subr.bf16.mxu1 %v18688_v1  ;;  %14276 = vmatmul.mubr.bf16.vlgmr.msra.gmra.mxu0 %v6707_v25  ;;  %v18724_v1 = vld [vmem:[#allocation5 + $0x830] sm:$0xff]  }
 0x696   :  { %17382 = vmatpush3.bf16.msra.mxu0 %v18687_v13  ;;  %v18723_v13 = vld [vmem:[#allocation5 + $0x870] sm:$0xff]   ;;  %14355 = vmatprep.mubr.bf16.mxu0 %v6712_v15  ;;  %v6714_v25 = vpack.c.bf16 %v6243_v14, %v6243_v14 }
 0x697   :  { %v17090_v7 = vpop.f32.mrf.mxu0  ;;  %v17111_v59 = vpop.f32.mrf.mxu1  ;;  %14316 = vmatmul.mubr.bf16.vlgmr.msra.gmra.mxu1 %v6709_v60  ;;  %17383 = vmatprep.subr.bf16.mxu0 %v18690_v40  ;;  %v18757_v15 = vld [vmem:[#allocation5 + $0x930] sm:$0xff]  }
 0x698   :  { %v17091_v44 = vadd.f32 %v17090_v7, %v17089_v45  ;;  %17404 = vmatpush3.bf16.msra.mxu1 %v18689_v35  ;;  %v18725_v35 = vld [vmem:[#allocation5 + $0x8f0] sm:$0xff]   ;;  %14395 = vmatprep.mubr.bf16.mxu1 %v6714_v25 }
 0x699   :  { %v17092_v16 = vpop.f32.mrf.mxu0  ;;  %v17112_v0 = vpop.f32.mrf.mxu1  ;;  %17405 = vmatprep.subr.bf16.mxu1 %v18692_v57 }
 0x69a   :  { %v13798_v47 = vadd.f32 %v17091_v44, %v16144_v32  ;;  %v17113_v18 = vadd.f32 %v17112_v0, %v17111_v59  ;;  %17384 = vmatpush3.bf16.msra.mxu0 %v18691_v4  ;;  %v18726_v32 = vld [vmem:[#allocation5 + $0x8b0] sm:$0xff]   ;;  %v18728_v59 = vld [vmem:[#allocation5 + $0x828] sm:$0xff]  }
 0x69b   :  { %v17093_v62 = vpop.f32.mrf.mxu0  ;;  %v17114_v11 = vpop.f32.mrf.mxu1  ;;  %17385 = vmatprep.subr.bf16.mxu0 %v18694_v50  ;;  %v18729_v44 = vld [vmem:[#allocation5 + $0x8e8] sm:$0xff]   ;;  %v18731_v50 = vld [vmem:[#allocation5 + $0x860] sm:$0xff]  }
 0x69c   :  { %v22950_v42 = vadd.f32 %v17113_v18, %v13798_v47  ;;  %17406 = vmatpush3.bf16.msra.mxu1 %v18693_v34  ;;  %v18730_v0 = vld [vmem:[#allocation5 + $0x8a8] sm:$0xff]   ;;  %v18732_v18 = vld [vmem:[#allocation5 + $0x820] sm:$0xff]   ;;  %v18736_v11 = vld [vmem:[#allocation5 + $0x818] sm:$0xff]  }
 0x69d   :  { %v17115_v27 = vpop.f32.mrf.mxu1  ;;  %17407 = vmatprep.subr.bf16.mxu1 %v18696_v55  ;;  %v18734_v62 = vld [vmem:[#allocation5 + $0x8a0] sm:$0xff]   ;;  %v18735_v55 = vld [vmem:[#allocation5 + $0x858] sm:$0xff]  }
 0x69e   :  { %17386 = vmatpush3.bf16.msra.mxu0 %v18695_v17  ;;  %v18733_v17 = vld [vmem:[#allocation5 + $0x8e0] sm:$0xff]   ;;  %v18740_v27 = vld [vmem:[#allocation5 + $0x810] sm:$0xff]  }
 0x69f   :  { %17387 = vmatprep.subr.bf16.mxu0 %v18698_v6  ;;  %v18739_v6 = vld [vmem:[#allocation5 + $0x850] sm:$0xff]  }
 0x6a0   :  { %17408 = vmatpush3.bf16.msra.mxu1 %v18697_v33  ;;  %v18738_v33 = vld [vmem:[#allocation5 + $0x898] sm:$0xff]  }
 0x6a1   :  { %17409 = vmatprep.subr.bf16.mxu1 %v18700_v53  ;;  %v18742_v53 = vld [vmem:[#allocation5 + $0x890] sm:$0xff]  }
 0x6a2   :  { %17388 = vmatpush3.bf16.msra.mxu0 %v18699_v38  ;;  %v18741_v38 = vld [vmem:[#allocation5 + $0x8d0] sm:$0xff]  }
 0x6a3   :  { %17389 = vmatprep.subr.bf16.mxu0 %v18702_v36  ;;  %v18744_v36 = vld [vmem:[#allocation5 + $0x808] sm:$0xff]  }
 0x6a4   :  { %17410 = vmatpush3.bf16.msra.mxu1 %v18701_v12  ;;  %v18743_v12 = vld [vmem:[#allocation5 + $0x848] sm:$0xff]  }
 0x6a5   :  { %17411 = vmatprep.subr.bf16.mxu1 %v18704_v2  ;;  %v18746_v2 = vld [vmem:[#allocation5 + $0x888] sm:$0xff]  }
 0x6a6   :  { %17390 = vmatpush3.bf16.msra.mxu0 %v18703_v19  ;;  %v18745_v19 = vld [vmem:[#allocation5 + $0x8c8] sm:$0xff]  }
 0x6a7   :  { %17391 = vmatprep.subr.bf16.mxu0 %v18706_v49  ;;  %v18748_v49 = vld [vmem:[#allocation5 + $0x800] sm:$0xff]  }
 0x6a8   :  { %17412 = vmatpush3.bf16.msra.mxu1 %v18705_v24  ;;  %v18747_v24 = vld [vmem:[#allocation5 + $0x840] sm:$0xff]  }
 0x6a9   :  { %17413 = vmatprep.subr.bf16.mxu1 %v18708_v10  ;;  %v6060_v10 = vld [vmem:[#allocation4 + $0x40] sm:$0xff] }
 0x6aa   :  { %17392 = vmatpush3.bf16.msra.mxu0 %v18707_v20  ;;  %v18749_v20 = vld [vmem:[#allocation5 + $0x8c0] sm:$0xff]  }
 0x6ab   :  { %17393 = vmatprep.subr.bf16.mxu0 %v18710_v22  ;;  %v18750_v22 = vld [vmem:[#allocation5 + $0x880] sm:$0xff]  }
 0x6ac   :  { %17414 = vmatpush3.bf16.msra.mxu1 %v18709_v21  ;;  %v6251_v21 = vrot.slane %v6060_v10, %v22934_v5 }
 0x6ad   :  { %17415 = vmatprep.subr.bf16.mxu1 %v18712_v8  ;;  %v18751_v8 = vld [vmem:[#allocation5 + $0x978] sm:$0xff]  }
 0x6ae   :  { %17394 = vmatpush3.bf16.msra.mxu0 %v18711_v37  ;;  %v6244_v37 = vcombine.high %v6060_v10, %v6060_v10  ;;  %v18787_v10 = vld [vmem:[#allocation5 + $0xaf8] sm:$0xff]  }
 0x6af   :  { %17395 = vmatprep.subr.bf16.mxu0 %v18714_v41 }
 0x6b0   :  { %17416 = vmatpush3.bf16.msra.mxu1 %v18713_v52  ;;  %v6259_v52 = vcombine.high %v6251_v21, %v6251_v21  ;;  %v6258_v41 = vrot.slane %v6244_v37, %v22934_v5  ;;  %v18788_v37 = vld [vmem:[#allocation5 + $0xab8] sm:$0xff]  }
 0x6b1   :  { %17417 = vmatprep.subr.bf16.mxu1 %v18716_v56  ;;  %v6715_v56 = vpack.c.bf16 %v6251_v21, %v6251_v21 }
 0x6b2   :  { %17396 = vmatpush3.bf16.msra.mxu0 %v18715_v43  ;;  %v18753_v43 = vld [vmem:[#allocation5 + $0x938] sm:$0xff]   ;;  %v6716_v29 = vpack.c.bf16 %v6259_v52, %v6259_v52  ;;  %v6260_v48 = vcombine.high %v6258_v41, %v6258_v41  ;;  %v6717_v39 = vpack.c.bf16 %v6258_v41, %v6258_v41  ;;  %v18789_v41 = vld [vmem:[#allocation5 + $0xa70] sm:$0xff]  }
 0x6b3   :  { %17425 = vmatprep.subr.bf16.mxu0 %v18718_v54  ;;  %v18755_v54 = vld [vmem:[#allocation5 + $0x9b8] sm:$0xff]  }
 0x6b4   :  { %17418 = vmatpush3.bf16.msra.mxu1 %v18717_v63 }
 0x6b5   :  { %v17133_v46 = vpop.f32.mrf.mxu0  ;;  %14356 = vmatmul.mubr.bf16.vlgmr.msra.gmra.mxu0 %v6711_v26  ;;  %17447 = vmatprep.subr.bf16.mxu1 %v18721_v61 }
 0x6b6   :  { %17426 = vmatpush3.bf16.msra.mxu0 %v18720_v58  ;;  %14435 = vmatprep.mubr.bf16.mxu0 %v6716_v29  ;;  %v6718_v58 = vpack.c.bf16 %v6260_v48, %v6260_v48 }
 0x6b7   :  { %v17134_v28 = vpop.f32.mrf.mxu0  ;;  %v17155_v3 = vpop.f32.mrf.mxu1  ;;  %14396 = vmatmul.mubr.bf16.vlgmr.msra.gmra.mxu1 %v6713_v23  ;;  %17427 = vmatprep.subr.bf16.mxu0 %v18723_v13  ;;  %v18759_v13 = vld [vmem:[#allocation5 + $0x9b0] sm:$0xff]  }
 0x6b8   :  { %v17135_v45 = vadd.f32 %v17134_v28, %v17133_v46  ;;  %17448 = vmatpush3.bf16.msra.mxu1 %v18722_v51  ;;  %v18758_v51 = vld [vmem:[#allocation5 + $0x9f0] sm:$0xff]   ;;  %14475 = vmatprep.mubr.bf16.mxu1 %v6718_v58  ;;  %v18760_v28 = vld [vmem:[#allocation5 + $0x968] sm:$0xff]  }
 0x6b9   :  { %v17136_v60 = vpop.f32.mrf.mxu0  ;;  %v17156_v40 = vpop.f32.mrf.mxu1  ;;  %17449 = vmatprep.subr.bf16.mxu1 %v18725_v35  ;;  %v18761_v35 = vld [vmem:[#allocation5 + $0x928] sm:$0xff]  }
 0x6ba   :  { %v13878_v4 = vadd.f32 %v17135_v45, %v22950_v42  ;;  %v17157_v7 = vadd.f32 %v17156_v40, %v17155_v3  ;;  %17428 = vmatpush3.bf16.msra.mxu0 %v18724_v1  ;;  %v18737_v42 = vld [vmem:[#allocation5 + $0x8d8] sm:$0xff]   ;;  %v18762_v60 = vld [vmem:[#allocation5 + $0x9e8] sm:$0xff]  }
 0x6bb   :  { %v17137_v57 = vpop.f32.mrf.mxu0  ;;  %v17158_v34 = vpop.f32.mrf.mxu1  ;;  %17429 = vmatprep.subr.bf16.mxu0 %v18727_v31  ;;  %v18763_v40 = vld [vmem:[#allocation5 + $0x9a8] sm:$0xff]  }
 0x6bc   :  { %v22955_v16 = vadd.f32 %v17157_v7, %v13878_v4  ;;  %17450 = vmatpush3.bf16.msra.mxu1 %v18726_v32  ;;  %v18764_v4 = vld [vmem:[#allocation5 + $0x960] sm:$0xff]   ;;  %v18769_v34 = vld [vmem:[#allocation5 + $0x918] sm:$0xff]   ;;  %v18793_v58 = vld [vmem:[#allocation5 + $0xa68] sm:$0xff]  }
 0x6bd   :  { %v17159_v47 = vpop.f32.mrf.mxu1  ;;  %17451 = vmatprep.subr.bf16.mxu1 %v18729_v44  ;;  %v18765_v7 = vld [vmem:[#allocation5 + $0x920] sm:$0xff]   ;;  %v18768_v44 = vld [vmem:[#allocation5 + $0x958] sm:$0xff]  }
 0x6be   :  { %17430 = vmatpush3.bf16.msra.mxu0 %v18728_v59  ;;  %v18766_v59 = vld [vmem:[#allocation5 + $0x9e0] sm:$0xff]   ;;  %v18773_v47 = vld [vmem:[#allocation5 + $0x910] sm:$0xff]  }
 0x6bf   :  { %17431 = vmatprep.subr.bf16.mxu0 %v18731_v50  ;;  %v18767_v57 = vld [vmem:[#allocation5 + $0x9a0] sm:$0xff]   ;;  %v18772_v50 = vld [vmem:[#allocation5 + $0x950] sm:$0xff]  }
 0x6c0   :  { %17452 = vmatpush3.bf16.msra.mxu1 %v18730_v0  ;;  %v18771_v0 = vld [vmem:[#allocation5 + $0x998] sm:$0xff]  }
 0x6c1   :  { %17453 = vmatprep.subr.bf16.mxu1 %v18733_v17  ;;  %v18775_v17 = vld [vmem:[#allocation5 + $0x990] sm:$0xff]  }
 0x6c2   :  { %17432 = vmatpush3.bf16.msra.mxu0 %v18732_v18  ;;  %v18774_v18 = vld [vmem:[#allocation5 + $0x9d0] sm:$0xff]  }
 0x6c3   :  { %17433 = vmatprep.subr.bf16.mxu0 %v18735_v55  ;;  %v18777_v55 = vld [vmem:[#allocation5 + $0x908] sm:$0xff]  }
 0x6c4   :  { %17454 = vmatpush3.bf16.msra.mxu1 %v18734_v62  ;;  %v18776_v62 = vld [vmem:[#allocation5 + $0x948] sm:$0xff]  }
 0x6c5   :  { %17455 = vmatprep.subr.bf16.mxu1 %v18737_v42  ;;  %v18779_v42 = vld [vmem:[#allocation5 + $0x988] sm:$0xff]  }
 0x6c6   :  { %17434 = vmatpush3.bf16.msra.mxu0 %v18736_v11  ;;  %v18778_v11 = vld [vmem:[#allocation5 + $0x9c8] sm:$0xff]  }
 0x6c7   :  { %17435 = vmatprep.subr.bf16.mxu0 %v18739_v6  ;;  %v18781_v6 = vld [vmem:[#allocation5 + $0x900] sm:$0xff]  }
 0x6c8   :  { %17456 = vmatpush3.bf16.msra.mxu1 %v18738_v33  ;;  %v18780_v33 = vld [vmem:[#allocation5 + $0x940] sm:$0xff]  }
 0x6c9   :  { %17457 = vmatprep.subr.bf16.mxu1 %v18741_v38  ;;  %v6061_v38 = vld [vmem:[#allocation4 + $0x48] sm:$0xff] }
 0x6ca   :  { %17436 = vmatpush3.bf16.msra.mxu0 %v18740_v27  ;;  %v18782_v27 = vld [vmem:[#allocation5 + $0x9c0] sm:$0xff]  }
 0x6cb   :  { %17437 = vmatprep.subr.bf16.mxu0 %v18743_v12  ;;  %v18783_v12 = vld [vmem:[#allocation5 + $0x980] sm:$0xff]  }
 0x6cc   :  { %17458 = vmatpush3.bf16.msra.mxu1 %v18742_v53  ;;  %v6268_v53 = vrot.slane %v6061_v38, %v22934_v5 }
 0x6cd   :  { %17459 = vmatprep.subr.bf16.mxu1 %v18745_v19  ;;  %v18784_v19 = vld [vmem:[#allocation5 + $0xa78] sm:$0xff]  }
 0x6ce   :  { %17438 = vmatpush3.bf16.msra.mxu0 %v18744_v36  ;;  %v6261_v36 = vcombine.high %v6061_v38, %v6061_v38  ;;  %v18820_v38 = vld [vmem:[#allocation5 + $0xbf8] sm:$0xff]  }
 0x6cf   :  { %17439 = vmatprep.subr.bf16.mxu0 %v18747_v24 }
 0x6d0   :  { %17460 = vmatpush3.bf16.msra.mxu1 %v18746_v2  ;;  %v6276_v2 = vcombine.high %v6268_v53, %v6268_v53  ;;  %v6275_v24 = vrot.slane %v6261_v36, %v22934_v5  ;;  %v18821_v36 = vld [vmem:[#allocation5 + $0xbb8] sm:$0xff]  }
 0x6d1   :  { %17461 = vmatprep.subr.bf16.mxu1 %v18749_v20  ;;  %v6719_v20 = vpack.c.bf16 %v6268_v53, %v6268_v53 }
 0x6d2   :  { %17440 = vmatpush3.bf16.msra.mxu0 %v18748_v49  ;;  %v18786_v49 = vld [vmem:[#allocation5 + $0xa38] sm:$0xff]   ;;  %v6720_v21 = vpack.c.bf16 %v6276_v2, %v6276_v2  ;;  %v6721_v52 = vpack.c.bf16 %v6275_v24, %v6275_v24 }
 0x6d3   :  { %17469 = vmatprep.subr.bf16.mxu0 %v18751_v8 }
 0x6d4   :  { %17462 = vmatpush3.bf16.msra.mxu1 %v18750_v22  ;;  %v6277_v22 = vcombine.high %v6275_v24, %v6275_v24  ;;  %v18822_v24 = vld [vmem:[#allocation5 + $0xb70] sm:$0xff]  }
 0x6d5   :  { %v17177_v63 = vpop.f32.mrf.mxu0  ;;  %17491 = vmatprep.subr.bf16.mxu1 %v18754_v30  ;;  %14436 = vmatmul.mubr.bf16.vlgmr.msra.gmra.mxu0 %v6715_v56  ;;  %v18790_v56 = vld [vmem:[#allocation5 + $0xa30] sm:$0xff]  }
 0x6d6   :  { %17470 = vmatpush3.bf16.msra.mxu0 %v18753_v43  ;;  %14515 = vmatprep.mubr.bf16.mxu0 %v6720_v21  ;;  %v6722_v43 = vpack.c.bf16 %v6277_v22, %v6277_v22  ;;  %v18824_v22 = vld [vmem:[#allocation5 + $0xbf0] sm:$0xff]  }
 0x6d7   :  { %v17178_v26 = vpop.f32.mrf.mxu0  ;;  %v17199_v61 = vpop.f32.mrf.mxu1  ;;  %14476 = vmatmul.mubr.bf16.vlgmr.msra.gmra.mxu1 %v6717_v39  ;;  %17471 = vmatprep.subr.bf16.mxu0 %v18756_v9 }
 0x6d8   :  { %v17179_v14 = vadd.f32 %v17178_v26, %v17177_v63  ;;  %17492 = vmatpush3.bf16.msra.mxu1 %v18755_v54  ;;  %v18791_v63 = vld [vmem:[#allocation5 + $0xaf0] sm:$0xff]   ;;  %14555 = vmatprep.mubr.bf16.mxu1 %v6722_v43  ;;  %v18826_v43 = vld [vmem:[#allocation5 + $0xb68] sm:$0xff]  }
 0x6d9   :  { %v17180_v46 = vpop.f32.mrf.mxu0  ;;  %v17200_v23 = vpop.f32.mrf.mxu1  ;;  %17493 = vmatprep.subr.bf16.mxu1 %v18758_v51  ;;  %v18792_v54 = vld [vmem:[#allocation5 + $0xab0] sm:$0xff]   ;;  %v18795_v51 = vld [vmem:[#allocation5 + $0xae8] sm:$0xff]  }
 0x6da   :  { %v13958_v25 = vadd.f32 %v17179_v14, %v22955_v16  ;;  %v17201_v1 = vadd.f32 %v17200_v23, %v17199_v61  ;;  %17472 = vmatpush3.bf16.msra.mxu0 %v18757_v15  ;;  %v18770_v16 = vld [vmem:[#allocation5 + $0x9d8] sm:$0xff]   ;;  %v18794_v15 = vld [vmem:[#allocation5 + $0xa28] sm:$0xff]  }
 0x6db   :  { %v17181_v3 = vpop.f32.mrf.mxu0  ;;  %v17202_v45 = vpop.f32.mrf.mxu1  ;;  %17473 = vmatprep.subr.bf16.mxu0 %v18760_v28  ;;  %v18798_v28 = vld [vmem:[#allocation5 + $0xa20] sm:$0xff]  }
 0x6dc   :  { %v22960_v32 = vadd.f32 %v17201_v1, %v13958_v25  ;;  %17494 = vmatpush3.bf16.msra.mxu1 %v18759_v13  ;;  %v18796_v13 = vld [vmem:[#allocation5 + $0xaa8] sm:$0xff]   ;;  %v18797_v25 = vld [vmem:[#allocation5 + $0xa60] sm:$0xff]   ;;  %v18801_v45 = vld [vmem:[#allocation5 + $0xa58] sm:$0xff]  }
 0x6dd   :  { %v17203_v31 = vpop.f32.mrf.mxu1  ;;  %17495 = vmatprep.subr.bf16.mxu1 %v18762_v60  ;;  %v18799_v3 = vld [vmem:[#allocation5 + $0xae0] sm:$0xff]   ;;  %v18803_v60 = vld [vmem:[#allocation5 + $0xad8] sm:$0xff]  }
 0x6de   :  { %17474 = vmatpush3.bf16.msra.mxu0 %v18761_v35  ;;  %v18800_v35 = vld [vmem:[#allocation5 + $0xaa0] sm:$0xff]   ;;  %v18805_v31 = vld [vmem:[#allocation5 + $0xa50] sm:$0xff]  }
 0x6df   :  { %17475 = vmatprep.subr.bf16.mxu0 %v18764_v4  ;;  %v18806_v4 = vld [vmem:[#allocation5 + $0xa10] sm:$0xff]  }
 0x6e0   :  { %17496 = vmatpush3.bf16.msra.mxu1 %v18763_v40  ;;  %v18804_v40 = vld [vmem:[#allocation5 + $0xa98] sm:$0xff]  }
 0x6e1   :  { %17497 = vmatprep.subr.bf16.mxu1 %v18766_v59  ;;  %v18808_v59 = vld [vmem:[#allocation5 + $0xa90] sm:$0xff]  }
 0x6e2   :  { %17476 = vmatpush3.bf16.msra.mxu0 %v18765_v7  ;;  %v18807_v7 = vld [vmem:[#allocation5 + $0xad0] sm:$0xff]  }
 0x6e3   :  { %17477 = vmatprep.subr.bf16.mxu0 %v18768_v44  ;;  %v18810_v44 = vld [vmem:[#allocation5 + $0xa08] sm:$0xff]  }
 0x6e4   :  { %17498 = vmatpush3.bf16.msra.mxu1 %v18767_v57  ;;  %v18809_v57 = vld [vmem:[#allocation5 + $0xa48] sm:$0xff]  }
 0x6e5   :  { %17499 = vmatprep.subr.bf16.mxu1 %v18770_v16  ;;  %v18812_v16 = vld [vmem:[#allocation5 + $0xa88] sm:$0xff]  }
 0x6e6   :  { %17478 = vmatpush3.bf16.msra.mxu0 %v18769_v34  ;;  %v18811_v34 = vld [vmem:[#allocation5 + $0xac8] sm:$0xff]  }
 0x6e7   :  { %17479 = vmatprep.subr.bf16.mxu0 %v18772_v50  ;;  %v18814_v50 = vld [vmem:[#allocation5 + $0xa00] sm:$0xff]  }
 0x6e8   :  { %17500 = vmatpush3.bf16.msra.mxu1 %v18771_v0  ;;  %v18813_v0 = vld [vmem:[#allocation5 + $0xa40] sm:$0xff]  }
 0x6e9   :  { %17501 = vmatprep.subr.bf16.mxu1 %v18774_v18  ;;  %v6062_v18 = vld [vmem:[#allocation4 + $0x50] sm:$0xff] }
 0x6ea   :  { %17480 = vmatpush3.bf16.msra.mxu0 %v18773_v47  ;;  %v18815_v47 = vld [vmem:[#allocation5 + $0xac0] sm:$0xff]  }
 0x6eb   :  { %17481 = vmatprep.subr.bf16.mxu0 %v18776_v62  ;;  %v18816_v62 = vld [vmem:[#allocation5 + $0xa80] sm:$0xff]  }
 0x6ec   :  { %17502 = vmatpush3.bf16.msra.mxu1 %v18775_v17  ;;  %v6285_v17 = vrot.slane %v6062_v18, %v22934_v5 }
 0x6ed   :  { %17503 = vmatprep.subr.bf16.mxu1 %v18778_v11  ;;  %v18817_v11 = vld [vmem:[#allocation5 + $0xb78] sm:$0xff]  }
 0x6ee   :  { %17482 = vmatpush3.bf16.msra.mxu0 %v18777_v55  ;;  %v6278_v55 = vcombine.high %v6062_v18, %v6062_v18  ;;  %v18853_v18 = vld [vmem:[#allocation5 + $0xcf8] sm:$0xff]  }
 0x6ef   :  { %17483 = vmatprep.subr.bf16.mxu0 %v18780_v33 }
 0x6f0   :  { %17504 = vmatpush3.bf16.msra.mxu1 %v18779_v42  ;;  %v6293_v42 = vcombine.high %v6285_v17, %v6285_v17  ;;  %v6292_v33 = vrot.slane %v6278_v55, %v22934_v5 }
 0x6f1   :  { %17505 = vmatprep.subr.bf16.mxu1 %v18782_v27  ;;  %v6723_v27 = vpack.c.bf16 %v6285_v17, %v6285_v17 }
 0x6f2   :  { %17484 = vmatpush3.bf16.msra.mxu0 %v18781_v6  ;;  %v18819_v6 = vld [vmem:[#allocation5 + $0xb38] sm:$0xff]   ;;  %v6724_v53 = vpack.c.bf16 %v6293_v42, %v6293_v42  ;;  %v6725_v2 = vpack.c.bf16 %v6292_v33, %v6292_v33 }
 0x6f3   :  { %17513 = vmatprep.subr.bf16.mxu0 %v18784_v19 }
 0x6f4   :  { %17506 = vmatpush3.bf16.msra.mxu1 %v18783_v12  ;;  %v6294_v12 = vcombine.high %v6292_v33, %v6292_v33  ;;  %v18855_v33 = vld [vmem:[#allocation5 + $0xc70] sm:$0xff]  }
 0x6f5   :  { %v17221_v8 = vpop.f32.mrf.mxu0  ;;  %14516 = vmatmul.mubr.bf16.vlgmr.msra.gmra.mxu0 %v6719_v20  ;;  %17535 = vmatprep.subr.bf16.mxu1 %v18787_v10  ;;  %v18823_v20 = vld [vmem:[#allocation5 + $0xb30] sm:$0xff]  }
 0x6f6   :  { %17514 = vmatpush3.bf16.msra.mxu0 %v18786_v49  ;;  %14595 = vmatprep.mubr.bf16.mxu0 %v6724_v53  ;;  %v6726_v49 = vpack.c.bf16 %v6294_v12, %v6294_v12  ;;  %v18856_v53 = vld [vmem:[#allocation5 + $0xc30] sm:$0xff]  }
 0x6f7   :  { %v17222_v30 = vpop.f32.mrf.mxu0  ;;  %v17243_v29 = vpop.f32.mrf.mxu1  ;;  %14556 = vmatmul.mubr.bf16.vlgmr.msra.gmra.mxu1 %v6721_v52  ;;  %17515 = vmatprep.subr.bf16.mxu0 %v18789_v41 }
 0x6f8   :  { %v17223_v48 = vadd.f32 %v17222_v30, %v17221_v8  ;;  %17536 = vmatpush3.bf16.msra.mxu1 %v18788_v37  ;;  %14635 = vmatprep.mubr.bf16.mxu1 %v6726_v49  ;;  %v18825_v8 = vld [vmem:[#allocation5 + $0xbb0] sm:$0xff]  }
 0x6f9   :  { %v17224_v39 = vpop.f32.mrf.mxu0  ;;  %v17244_v9 = vpop.f32.mrf.mxu1  ;;  %17537 = vmatprep.subr.bf16.mxu1 %v18791_v63 }
 0x6fa   :  { %v14038_v26 = vadd.f32 %v17223_v48, %v22960_v32  ;;  %v17245_v61 = vadd.f32 %v17244_v9, %v17243_v29  ;;  %17516 = vmatpush3.bf16.msra.mxu0 %v18790_v56  ;;  %v18802_v32 = vld [vmem:[#allocation5 + $0xa18] sm:$0xff]   ;;  %v18827_v29 = vld [vmem:[#allocation5 + $0xb28] sm:$0xff]  }
 0x6fb   :  { %v17225_v14 = vpop.f32.mrf.mxu0  ;;  %v17246_v46 = vpop.f32.mrf.mxu1  ;;  %17517 = vmatprep.subr.bf16.mxu0 %v18793_v58  ;;  %v18828_v48 = vld [vmem:[#allocation5 + $0xbe8] sm:$0xff]   ;;  %v18830_v58 = vld [vmem:[#allocation5 + $0xb60] sm:$0xff]  }
 0x6fc   :  { %v22965_v23 = vadd.f32 %v17245_v61, %v14038_v26  ;;  %17538 = vmatpush3.bf16.msra.mxu1 %v18792_v54  ;;  %v18829_v9 = vld [vmem:[#allocation5 + $0xba8] sm:$0xff]   ;;  %v18831_v61 = vld [vmem:[#allocation5 + $0xb20] sm:$0xff]   ;;  %v18835_v46 = vld [vmem:[#allocation5 + $0xb18] sm:$0xff]  }
 0x6fd   :  { %v17247_v1 = vpop.f32.mrf.mxu1  ;;  %17539 = vmatprep.subr.bf16.mxu1 %v18795_v51  ;;  %v18833_v14 = vld [vmem:[#allocation5 + $0xba0] sm:$0xff]   ;;  %v18834_v51 = vld [vmem:[#allocation5 + $0xb58] sm:$0xff]  }
 0x6fe   :  { %17518 = vmatpush3.bf16.msra.mxu0 %v18794_v15  ;;  %v18832_v15 = vld [vmem:[#allocation5 + $0xbe0] sm:$0xff]   ;;  %v18839_v1 = vld [vmem:[#allocation5 + $0xb10] sm:$0xff]  }
 0x6ff   :  { %17519 = vmatprep.subr.bf16.mxu0 %v18797_v25  ;;  %v18838_v25 = vld [vmem:[#allocation5 + $0xb50] sm:$0xff]  }
 0x700   :  { %17540 = vmatpush3.bf16.msra.mxu1 %v18796_v13  ;;  %v18837_v13 = vld [vmem:[#allocation5 + $0xb98] sm:$0xff]  }
 0x701   :  { %17541 = vmatprep.subr.bf16.mxu1 %v18799_v3  ;;  %v18841_v3 = vld [vmem:[#allocation5 + $0xb90] sm:$0xff]  }
 0x702   :  { %17520 = vmatpush3.bf16.msra.mxu0 %v18798_v28  ;;  %v18840_v28 = vld [vmem:[#allocation5 + $0xbd0] sm:$0xff]  }
 0x703   :  { %17521 = vmatprep.subr.bf16.mxu0 %v18801_v45  ;;  %v18843_v45 = vld [vmem:[#allocation5 + $0xb08] sm:$0xff]  }
 0x704   :  { %17542 = vmatpush3.bf16.msra.mxu1 %v18800_v35  ;;  %v18842_v35 = vld [vmem:[#allocation5 + $0xb48] sm:$0xff]  }
 0x705   :  { %17543 = vmatprep.subr.bf16.mxu1 %v18803_v60  ;;  %v18845_v60 = vld [vmem:[#allocation5 + $0xb88] sm:$0xff]  }
 0x706   :  { %17522 = vmatpush3.bf16.msra.mxu0 %v18802_v32  ;;  %v18844_v32 = vld [vmem:[#allocation5 + $0xbc8] sm:$0xff]  }
 0x707   :  { %17523 = vmatprep.subr.bf16.mxu0 %v18805_v31  ;;  %v18847_v31 = vld [vmem:[#allocation5 + $0xb00] sm:$0xff]  }
 0x708   :  { %17544 = vmatpush3.bf16.msra.mxu1 %v18804_v40  ;;  %v18846_v40 = vld [vmem:[#allocation5 + $0xb40] sm:$0xff]  }
 0x709   :  { %17545 = vmatprep.subr.bf16.mxu1 %v18807_v7  ;;  %v6063_v7 = vld [vmem:[#allocation4 + $0x58] sm:$0xff] }
 0x70a   :  { %17524 = vmatpush3.bf16.msra.mxu0 %v18806_v4  ;;  %v18848_v4 = vld [vmem:[#allocation5 + $0xbc0] sm:$0xff]  }
 0x70b   :  { %17525 = vmatprep.subr.bf16.mxu0 %v18809_v57  ;;  %v18849_v57 = vld [vmem:[#allocation5 + $0xb80] sm:$0xff]  }
 0x70c   :  { %17546 = vmatpush3.bf16.msra.mxu1 %v18808_v59  ;;  %v6302_v59 = vrot.slane %v6063_v7, %v22934_v5 }
 0x70d   :  { %17547 = vmatprep.subr.bf16.mxu1 %v18811_v34  ;;  %v18850_v34 = vld [vmem:[#allocation5 + $0xc78] sm:$0xff]  }
 0x70e   :  { %17526 = vmatpush3.bf16.msra.mxu0 %v18810_v44  ;;  %v6295_v44 = vcombine.high %v6063_v7, %v6063_v7  ;;  %v18886_v7 = vld [vmem:[#allocation5 + $0xdf8] sm:$0xff]  }
 0x70f   :  { %17527 = vmatprep.subr.bf16.mxu0 %v18813_v0 }
 0x710   :  { %17548 = vmatpush3.bf16.msra.mxu1 %v18812_v16  ;;  %v6310_v16 = vcombine.high %v6302_v59, %v6302_v59  ;;  %v6309_v0 = vrot.slane %v6295_v44, %v22934_v5  ;;  %v18887_v44 = vld [vmem:[#allocation5 + $0xdb8] sm:$0xff]  }
 0x711   :  { %17549 = vmatprep.subr.bf16.mxu1 %v18815_v47  ;;  %v6727_v47 = vpack.c.bf16 %v6302_v59, %v6302_v59 }
 0x712   :  { %17528 = vmatpush3.bf16.msra.mxu0 %v18814_v50  ;;  %v18852_v50 = vld [vmem:[#allocation5 + $0xc38] sm:$0xff]   ;;  %v6728_v17 = vpack.c.bf16 %v6310_v16, %v6310_v16  ;;  %v6311_v55 = vcombine.high %v6309_v0, %v6309_v0  ;;  %v6729_v42 = vpack.c.bf16 %v6309_v0, %v6309_v0  ;;  %v18888_v0 = vld [vmem:[#allocation5 + $0xd70] sm:$0xff]  }
 0x713   :  { %17557 = vmatprep.subr.bf16.mxu0 %v18817_v11  ;;  %v18854_v11 = vld [vmem:[#allocation5 + $0xcb8] sm:$0xff]  }
 0x714   :  { %17550 = vmatpush3.bf16.msra.mxu1 %v18816_v62 }
 0x715   :  { %v17265_v19 = vpop.f32.mrf.mxu0  ;;  %14596 = vmatmul.mubr.bf16.vlgmr.msra.gmra.mxu0 %v6723_v27  ;;  %17579 = vmatprep.subr.bf16.mxu1 %v18820_v38 }
 0x716   :  { %17558 = vmatpush3.bf16.msra.mxu0 %v18819_v6  ;;  %14675 = vmatprep.mubr.bf16.mxu0 %v6728_v17  ;;  %v6730_v6 = vpack.c.bf16 %v6311_v55, %v6311_v55 }
 0x717   :  { %v17266_v10 = vpop.f32.mrf.mxu0  ;;  %v17287_v21 = vpop.f32.mrf.mxu1  ;;  %14636 = vmatmul.mubr.bf16.vlgmr.msra.gmra.mxu1 %v6725_v2  ;;  %17559 = vmatprep.subr.bf16.mxu0 %v18822_v24  ;;  %v18858_v24 = vld [vmem:[#allocation5 + $0xcb0] sm:$0xff]  }
 0x718   :  { %v17267_v37 = vadd.f32 %v17266_v10, %v17265_v19  ;;  %17580 = vmatpush3.bf16.msra.mxu1 %v18821_v36  ;;  %v18857_v36 = vld [vmem:[#allocation5 + $0xcf0] sm:$0xff]   ;;  %14715 = vmatprep.mubr.bf16.mxu1 %v6730_v6  ;;  %v18859_v10 = vld [vmem:[#allocation5 + $0xc68] sm:$0xff]  }
 0x719   :  { %v17268_v52 = vpop.f32.mrf.mxu0  ;;  %v17288_v41 = vpop.f32.mrf.mxu1  ;;  %17581 = vmatprep.subr.bf16.mxu1 %v18824_v22  ;;  %v18860_v22 = vld [vmem:[#allocation5 + $0xc28] sm:$0xff]  }
 0x71a   :  { %v14118_v56 = vadd.f32 %v17267_v37, %v22965_v23  ;;  %v17289_v30 = vadd.f32 %v17288_v41, %v17287_v21  ;;  %17560 = vmatpush3.bf16.msra.mxu0 %v18823_v20  ;;  %v18836_v23 = vld [vmem:[#allocation5 + $0xbd8] sm:$0xff]   ;;  %v18861_v52 = vld [vmem:[#allocation5 + $0xce8] sm:$0xff]  }
 0x71b   :  { %v17269_v63 = vpop.f32.mrf.mxu0  ;;  %v17290_v54 = vpop.f32.mrf.mxu1  ;;  %17561 = vmatprep.subr.bf16.mxu0 %v18826_v43  ;;  %v18862_v41 = vld [vmem:[#allocation5 + $0xca8] sm:$0xff]  }
 0x71c   :  { %v22970_v39 = vadd.f32 %v17289_v30, %v14118_v56  ;;  %17582 = vmatpush3.bf16.msra.mxu1 %v18825_v8  ;;  %v18863_v56 = vld [vmem:[#allocation5 + $0xc60] sm:$0xff]   ;;  %v18868_v54 = vld [vmem:[#allocation5 + $0xc18] sm:$0xff]   ;;  %v18892_v6 = vld [vmem:[#allocation5 + $0xd68] sm:$0xff]  }
 0x71d   :  { %v17291_v26 = vpop.f32.mrf.mxu1  ;;  %17583 = vmatprep.subr.bf16.mxu1 %v18828_v48  ;;  %v18864_v30 = vld [vmem:[#allocation5 + $0xc20] sm:$0xff]   ;;  %v18867_v48 = vld [vmem:[#allocation5 + $0xc58] sm:$0xff]  }
 0x71e   :  { %17562 = vmatpush3.bf16.msra.mxu0 %v18827_v29  ;;  %v18865_v29 = vld [vmem:[#allocation5 + $0xce0] sm:$0xff]   ;;  %v18872_v26 = vld [vmem:[#allocation5 + $0xc10] sm:$0xff]  }
 0x71f   :  { %17563 = vmatprep.subr.bf16.mxu0 %v18830_v58  ;;  %v18866_v63 = vld [vmem:[#allocation5 + $0xca0] sm:$0xff]   ;;  %v18871_v58 = vld [vmem:[#allocation5 + $0xc50] sm:$0xff]  }
 0x720   :  { %17584 = vmatpush3.bf16.msra.mxu1 %v18829_v9  ;;  %v18870_v9 = vld [vmem:[#allocation5 + $0xc98] sm:$0xff]  }
 0x721   :  { %17585 = vmatprep.subr.bf16.mxu1 %v18832_v15  ;;  %v18874_v15 = vld [vmem:[#allocation5 + $0xc90] sm:$0xff]  }
 0x722   :  { %17564 = vmatpush3.bf16.msra.mxu0 %v18831_v61  ;;  %v18873_v61 = vld [vmem:[#allocation5 + $0xcd0] sm:$0xff]  }
 0x723   :  { %17565 = vmatprep.subr.bf16.mxu0 %v18834_v51  ;;  %v18876_v51 = vld [vmem:[#allocation5 + $0xc08] sm:$0xff]  }
 0x724   :  { %17586 = vmatpush3.bf16.msra.mxu1 %v18833_v14  ;;  %v18875_v14 = vld [vmem:[#allocation5 + $0xc48] sm:$0xff]  }
 0x725   :  { %17587 = vmatprep.subr.bf16.mxu1 %v18836_v23  ;;  %v18878_v23 = vld [vmem:[#allocation5 + $0xc88] sm:$0xff]  }
 0x726   :  { %17566 = vmatpush3.bf16.msra.mxu0 %v18835_v46  ;;  %v18877_v46 = vld [vmem:[#allocation5 + $0xcc8] sm:$0xff]  }
 0x727   :  { %17567 = vmatprep.subr.bf16.mxu0 %v18838_v25  ;;  %v18880_v25 = vld [vmem:[#allocation5 + $0xc00] sm:$0xff]  }
 0x728   :  { %17588 = vmatpush3.bf16.msra.mxu1 %v18837_v13  ;;  %v18879_v13 = vld [vmem:[#allocation5 + $0xc40] sm:$0xff]  }
 0x729   :  { %17589 = vmatprep.subr.bf16.mxu1 %v18840_v28  ;;  %v6064_v28 = vld [vmem:[#allocation4 + $0x60] sm:$0xff] }
 0x72a   :  { %17568 = vmatpush3.bf16.msra.mxu0 %v18839_v1  ;;  %v18881_v1 = vld [vmem:[#allocation5 + $0xcc0] sm:$0xff]  }
 0x72b   :  { %17569 = vmatprep.subr.bf16.mxu0 %v18842_v35  ;;  %v18882_v35 = vld [vmem:[#allocation5 + $0xc80] sm:$0xff]  }
 0x72c   :  { %17590 = vmatpush3.bf16.msra.mxu1 %v18841_v3  ;;  %v6319_v3 = vrot.slane %v6064_v28, %v22934_v5 }
 0x72d   :  { %17591 = vmatprep.subr.bf16.mxu1 %v18844_v32  ;;  %v18883_v32 = vld [vmem:[#allocation5 + $0xd78] sm:$0xff]  }
 0x72e   :  { %17570 = vmatpush3.bf16.msra.mxu0 %v18843_v45  ;;  %v6312_v45 = vcombine.high %v6064_v28, %v6064_v28  ;;  %v18919_v28 = vld [vmem:[#allocation5 + $0xef8] sm:$0xff]  }
 0x72f   :  { %17571 = vmatprep.subr.bf16.mxu0 %v18846_v40 }
 0x730   :  { %17592 = vmatpush3.bf16.msra.mxu1 %v18845_v60  ;;  %v6327_v60 = vcombine.high %v6319_v3, %v6319_v3  ;;  %v6326_v40 = vrot.slane %v6312_v45, %v22934_v5  ;;  %v18920_v45 = vld [vmem:[#allocation5 + $0xeb8] sm:$0xff]  }
 0x731   :  { %17593 = vmatprep.subr.bf16.mxu1 %v18848_v4  ;;  %v6731_v4 = vpack.c.bf16 %v6319_v3, %v6319_v3 }
 0x732   :  { %17572 = vmatpush3.bf16.msra.mxu0 %v18847_v31  ;;  %v18885_v31 = vld [vmem:[#allocation5 + $0xd38] sm:$0xff]   ;;  %v6732_v59 = vpack.c.bf16 %v6327_v60, %v6327_v60  ;;  %v6733_v16 = vpack.c.bf16 %v6326_v40, %v6326_v40 }
 0x733   :  { %17601 = vmatprep.subr.bf16.mxu0 %v18850_v34 }
 0x734   :  { %17594 = vmatpush3.bf16.msra.mxu1 %v18849_v57  ;;  %v6328_v57 = vcombine.high %v6326_v40, %v6326_v40  ;;  %v18921_v40 = vld [vmem:[#allocation5 + $0xe70] sm:$0xff]  }
 0x735   :  { %v17309_v62 = vpop.f32.mrf.mxu0  ;;  %17623 = vmatprep.subr.bf16.mxu1 %v18853_v18  ;;  %14676 = vmatmul.mubr.bf16.vlgmr.msra.gmra.mxu0 %v6727_v47  ;;  %v18889_v47 = vld [vmem:[#allocation5 + $0xd30] sm:$0xff]  }
 0x736   :  { %17602 = vmatpush3.bf16.msra.mxu0 %v18852_v50  ;;  %14755 = vmatprep.mubr.bf16.mxu0 %v6732_v59  ;;  %v6734_v50 = vpack.c.bf16 %v6328_v57, %v6328_v57  ;;  %v18923_v57 = vld [vmem:[#allocation5 + $0xef0] sm:$0xff]  }
 0x737   :  { %v17310_v27 = vpop.f32.mrf.mxu0  ;;  %v17331_v38 = vpop.f32.mrf.mxu1  ;;  %14716 = vmatmul.mubr.bf16.vlgmr.msra.gmra.mxu1 %v6729_v42  ;;  %17603 = vmatprep.subr.bf16.mxu0 %v18855_v33 }
 0x738   :  { %v17311_v12 = vadd.f32 %v17310_v27, %v17309_v62  ;;  %17624 = vmatpush3.bf16.msra.mxu1 %v18854_v11  ;;  %v18890_v62 = vld [vmem:[#allocation5 + $0xdf0] sm:$0xff]   ;;  %14795 = vmatprep.mubr.bf16.mxu1 %v6734_v50  ;;  %v18925_v50 = vld [vmem:[#allocation5 + $0xe68] sm:$0xff]  }
 0x739   :  { %v17312_v19 = vpop.f32.mrf.mxu0  ;;  %v17332_v2 = vpop.f32.mrf.mxu1  ;;  %17625 = vmatprep.subr.bf16.mxu1 %v18857_v36  ;;  %v18891_v11 = vld [vmem:[#allocation5 + $0xdb0] sm:$0xff]   ;;  %v18894_v36 = vld [vmem:[#allocation5 + $0xde8] sm:$0xff]  }
 0x73a   :  { %v14198_v49 = vadd.f32 %v17311_v12, %v22970_v39  ;;  %v17333_v20 = vadd.f32 %v17332_v2, %v17331_v38  ;;  %17604 = vmatpush3.bf16.msra.mxu0 %v18856_v53  ;;  %v18869_v39 = vld [vmem:[#allocation5 + $0xcd8] sm:$0xff]   ;;  %v18893_v53 = vld [vmem:[#allocation5 + $0xd28] sm:$0xff]  }
 0x73b   :  { %v17313_v21 = vpop.f32.mrf.mxu0  ;;  %v17334_v37 = vpop.f32.mrf.mxu1  ;;  %17605 = vmatprep.subr.bf16.mxu0 %v18859_v10  ;;  %v18897_v10 = vld [vmem:[#allocation5 + $0xd20] sm:$0xff]  }
 0x73c   :  { %v22975_v8 = vadd.f32 %v17333_v20, %v14198_v49  ;;  %17626 = vmatpush3.bf16.msra.mxu1 %v18858_v24  ;;  %v18895_v24 = vld [vmem:[#allocation5 + $0xda8] sm:$0xff]   ;;  %v18896_v49 = vld [vmem:[#allocation5 + $0xd60] sm:$0xff]   ;;  %v18900_v37 = vld [vmem:[#allocation5 + $0xd58] sm:$0xff]  }
 0x73d   :  { %v17335_v43 = vpop.f32.mrf.mxu1  ;;  %17627 = vmatprep.subr.bf16.mxu1 %v18861_v52  ;;  %v18898_v21 = vld [vmem:[#allocation5 + $0xde0] sm:$0xff]   ;;  %v18902_v52 = vld [vmem:[#allocation5 + $0xdd8] sm:$0xff]  }
 0x73e   :  { %17606 = vmatpush3.bf16.msra.mxu0 %v18860_v22  ;;  %v18899_v22 = vld [vmem:[#allocation5 + $0xda0] sm:$0xff]   ;;  %v18904_v43 = vld [vmem:[#allocation5 + $0xd50] sm:$0xff]  }
 0x73f   :  { %17607 = vmatprep.subr.bf16.mxu0 %v18863_v56  ;;  %v18905_v56 = vld [vmem:[#allocation5 + $0xd10] sm:$0xff]  }
 0x740   :  { %17628 = vmatpush3.bf16.msra.mxu1 %v18862_v41  ;;  %v18903_v41 = vld [vmem:[#allocation5 + $0xd98] sm:$0xff]  }
 0x741   :  { %17629 = vmatprep.subr.bf16.mxu1 %v18865_v29  ;;  %v18907_v29 = vld [vmem:[#allocation5 + $0xd90] sm:$0xff]  }
 0x742   :  { %17608 = vmatpush3.bf16.msra.mxu0 %v18864_v30  ;;  %v18906_v30 = vld [vmem:[#allocation5 + $0xdd0] sm:$0xff]  }
 0x743   :  { %17609 = vmatprep.subr.bf16.mxu0 %v18867_v48  ;;  %v18909_v48 = vld [vmem:[#allocation5 + $0xd08] sm:$0xff]  }
 0x744   :  { %17630 = vmatpush3.bf16.msra.mxu1 %v18866_v63  ;;  %v18908_v63 = vld [vmem:[#allocation5 + $0xd48] sm:$0xff]  }
 0x745   :  { %17631 = vmatprep.subr.bf16.mxu1 %v18869_v39  ;;  %v18911_v39 = vld [vmem:[#allocation5 + $0xd88] sm:$0xff]  }
 0x746   :  { %17610 = vmatpush3.bf16.msra.mxu0 %v18868_v54  ;;  %v18910_v54 = vld [vmem:[#allocation5 + $0xdc8] sm:$0xff]  }
 0x747   :  { %17611 = vmatprep.subr.bf16.mxu0 %v18871_v58  ;;  %v18913_v58 = vld [vmem:[#allocation5 + $0xd00] sm:$0xff]  }
 0x748   :  { %17632 = vmatpush3.bf16.msra.mxu1 %v18870_v9  ;;  %v18912_v9 = vld [vmem:[#allocation5 + $0xd40] sm:$0xff]  }
 0x749   :  { %17633 = vmatprep.subr.bf16.mxu1 %v18873_v61  ;;  %v6065_v61 = vld [vmem:[#allocation4 + $0x68] sm:$0xff] }
 0x74a   :  { %17612 = vmatpush3.bf16.msra.mxu0 %v18872_v26  ;;  %v18914_v26 = vld [vmem:[#allocation5 + $0xdc0] sm:$0xff]  }
 0x74b   :  { %17613 = vmatprep.subr.bf16.mxu0 %v18875_v14  ;;  %v18915_v14 = vld [vmem:[#allocation5 + $0xd80] sm:$0xff]  }
 0x74c   :  { %17634 = vmatpush3.bf16.msra.mxu1 %v18874_v15  ;;  %v6336_v15 = vrot.slane %v6065_v61, %v22934_v5 }
 0x74d   :  { %17635 = vmatprep.subr.bf16.mxu1 %v18877_v46  ;;  %v18916_v46 = vld [vmem:[#allocation5 + $0xe78] sm:$0xff]  }
 0x74e   :  { %17614 = vmatpush3.bf16.msra.mxu0 %v18876_v51  ;;  %v6329_v51 = vcombine.high %v6065_v61, %v6065_v61  ;;  %v18952_v61 = vld [vmem:[#allocation5 + $0xff8] sm:$0xff]  }
 0x74f   :  { %17615 = vmatprep.subr.bf16.mxu0 %v18879_v13 }
 0x750   :  { %17636 = vmatpush3.bf16.msra.mxu1 %v18878_v23  ;;  %v6344_v23 = vcombine.high %v6336_v15, %v6336_v15  ;;  %v6343_v13 = vrot.slane %v6329_v51, %v22934_v5  ;;  %v18953_v51 = vld [vmem:[#allocation5 + $0xfb8] sm:$0xff]  }
 0x751   :  { %17637 = vmatprep.subr.bf16.mxu1 %v18881_v1  ;;  %v6735_v1 = vpack.c.bf16 %v6336_v15, %v6336_v15 }
 0x752   :  { %17616 = vmatpush3.bf16.msra.mxu0 %v18880_v25  ;;  %v18918_v25 = vld [vmem:[#allocation5 + $0xe38] sm:$0xff]   ;;  %v6736_v3 = vpack.c.bf16 %v6344_v23, %v6344_v23  ;;  %v6737_v60 = vpack.c.bf16 %v6343_v13, %v6343_v13 }
 0x753   :  { %17645 = vmatprep.subr.bf16.mxu0 %v18883_v32 }
 0x754   :  { %17638 = vmatpush3.bf16.msra.mxu1 %v18882_v35  ;;  %v6345_v35 = vcombine.high %v6343_v13, %v6343_v13  ;;  %v18954_v13 = vld [vmem:[#allocation5 + $0xf70] sm:$0xff]  }
 0x755   :  { %v17353_v34 = vpop.f32.mrf.mxu0  ;;  %14756 = vmatmul.mubr.bf16.vlgmr.msra.gmra.mxu0 %v6731_v4  ;;  %17667 = vmatprep.subr.bf16.mxu1 %v18886_v7  ;;  %v18922_v4 = vld [vmem:[#allocation5 + $0xe30] sm:$0xff]  }
 0x756   :  { %17646 = vmatpush3.bf16.msra.mxu0 %v18885_v31  ;;  %14835 = vmatprep.mubr.bf16.mxu0 %v6736_v3  ;;  %v6738_v31 = vpack.c.bf16 %v6345_v35, %v6345_v35  ;;  %v18956_v35 = vld [vmem:[#allocation5 + $0xff0] sm:$0xff]  }
 0x757   :  { %v17354_v18 = vpop.f32.mrf.mxu0  ;;  %v17375_v17 = vpop.f32.mrf.mxu1  ;;  %14796 = vmatmul.mubr.bf16.vlgmr.msra.gmra.mxu1 %v6733_v16  ;;  %17647 = vmatprep.subr.bf16.mxu0 %v18888_v0 }
 0x758   :  { %v17355_v55 = vadd.f32 %v17354_v18, %v17353_v34  ;;  %17668 = vmatpush3.bf16.msra.mxu1 %v18887_v44  ;;  %14875 = vmatprep.mubr.bf16.mxu1 %v6738_v31  ;;  %v18924_v34 = vld [vmem:[#allocation5 + $0xeb0] sm:$0xff]   ;;  %v18958_v31 = vld [vmem:[#allocation5 + $0xf68] sm:$0xff]  }
 0x759   :  { %v17356_v42 = vpop.f32.mrf.mxu0  ;;  %v17376_v33 = vpop.f32.mrf.mxu1  ;;  %17669 = vmatprep.subr.bf16.mxu1 %v18890_v62 }
 0x75a   :  { %v14278_v27 = vadd.f32 %v17355_v55, %v22975_v8  ;;  %v17377_v38 = vadd.f32 %v17376_v33, %v17375_v17  ;;  %17648 = vmatpush3.bf16.msra.mxu0 %v18889_v47  ;;  %v18901_v8 = vld [vmem:[#allocation5 + $0xd18] sm:$0xff]   ;;  %v18926_v17 = vld [vmem:[#allocation5 + $0xe28] sm:$0xff]  }
 0x75b   :  { %v17357_v12 = vpop.f32.mrf.mxu0  ;;  %v17378_v19 = vpop.f32.mrf.mxu1  ;;  %17649 = vmatprep.subr.bf16.mxu0 %v18892_v6  ;;  %v18927_v55 = vld [vmem:[#allocation5 + $0xee8] sm:$0xff]   ;;  %v18929_v6 = vld [vmem:[#allocation5 + $0xe60] sm:$0xff]  }
 0x75c   :  { %v22980_v2 = vadd.f32 %v17377_v38, %v14278_v27  ;;  %17670 = vmatpush3.bf16.msra.mxu1 %v18891_v11  ;;  %v18928_v33 = vld [vmem:[#allocation5 + $0xea8] sm:$0xff]   ;;  %v18930_v38 = vld [vmem:[#allocation5 + $0xe20] sm:$0xff]   ;;  %v18934_v19 = vld [vmem:[#allocation5 + $0xe18] sm:$0xff]  }
 0x75d   :  { %v17379_v20 = vpop.f32.mrf.mxu1  ;;  %17671 = vmatprep.subr.bf16.mxu1 %v18894_v36  ;;  %v18932_v12 = vld [vmem:[#allocation5 + $0xea0] sm:$0xff]   ;;  %v18933_v36 = vld [vmem:[#allocation5 + $0xe58] sm:$0xff]  }
 0x75e   :  { %17650 = vmatpush3.bf16.msra.mxu0 %v18893_v53  ;;  %v18931_v53 = vld [vmem:[#allocation5 + $0xee0] sm:$0xff]   ;;  %v18938_v20 = vld [vmem:[#allocation5 + $0xe10] sm:$0xff]  }
 0x75f   :  { %17651 = vmatprep.subr.bf16.mxu0 %v18896_v49  ;;  %v18937_v49 = vld [vmem:[#allocation5 + $0xe50] sm:$0xff]  }
 0x760   :  { %17672 = vmatpush3.bf16.msra.mxu1 %v18895_v24  ;;  %v18936_v24 = vld [vmem:[#allocation5 + $0xe98] sm:$0xff]  }
 0x761   :  { %17673 = vmatprep.subr.bf16.mxu1 %v18898_v21  ;;  %v18940_v21 = vld [vmem:[#allocation5 + $0xe90] sm:$0xff]  }
 0x762   :  { %17652 = vmatpush3.bf16.msra.mxu0 %v18897_v10  ;;  %v18939_v10 = vld [vmem:[#allocation5 + $0xed0] sm:$0xff]  }
 0x763   :  { %17653 = vmatprep.subr.bf16.mxu0 %v18900_v37  ;;  %v18942_v37 = vld [vmem:[#allocation5 + $0xe08] sm:$0xff]  }
 0x764   :  { %17674 = vmatpush3.bf16.msra.mxu1 %v18899_v22  ;;  %v18941_v22 = vld [vmem:[#allocation5 + $0xe48] sm:$0xff]  }
 0x765   :  { %17675 = vmatprep.subr.bf16.mxu1 %v18902_v52  ;;  %v18944_v52 = vld [vmem:[#allocation5 + $0xe88] sm:$0xff]  }
 0x766   :  { %17654 = vmatpush3.bf16.msra.mxu0 %v18901_v8  ;;  %v18943_v8 = vld [vmem:[#allocation5 + $0xec8] sm:$0xff]  }
 0x767   :  { %17655 = vmatprep.subr.bf16.mxu0 %v18904_v43  ;;  %v18946_v43 = vld [vmem:[#allocation5 + $0xe00] sm:$0xff]  }
 0x768   :  { %17676 = vmatpush3.bf16.msra.mxu1 %v18903_v41  ;;  %v18945_v41 = vld [vmem:[#allocation5 + $0xe40] sm:$0xff]  }
 0x769   :  { %17677 = vmatprep.subr.bf16.mxu1 %v18906_v30  ;;  %v6066_v30 = vld [vmem:[#allocation4 + $0x70] sm:$0xff] }
 0x76a   :  { %17656 = vmatpush3.bf16.msra.mxu0 %v18905_v56  ;;  %v18947_v56 = vld [vmem:[#allocation5 + $0xec0] sm:$0xff]  }
 0x76b   :  { %17657 = vmatprep.subr.bf16.mxu0 %v18908_v63  ;;  %v18948_v63 = vld [vmem:[#allocation5 + $0xe80] sm:$0xff]  }
 0x76c   :  { %17678 = vmatpush3.bf16.msra.mxu1 %v18907_v29  ;;  %v6353_v29 = vrot.slane %v6066_v30, %v22934_v5 }
 0x76d   :  { %17679 = vmatprep.subr.bf16.mxu1 %v18910_v54  ;;  %v18949_v54 = vld [vmem:[#allocation5 + $0xf78] sm:$0xff]  }
 0x76e   :  { %17658 = vmatpush3.bf16.msra.mxu0 %v18909_v48  ;;  %v6346_v48 = vcombine.high %v6066_v30, %v6066_v30  ;;  %v18985_v30 = vld [vmem:[#allocation5 + $0x10f8] sm:$0xff]  }
 0x76f   :  { %17659 = vmatprep.subr.bf16.mxu0 %v18912_v9 }
 0x770   :  { %17680 = vmatpush3.bf16.msra.mxu1 %v18911_v39  ;;  %v6361_v39 = vcombine.high %v6353_v29, %v6353_v29  ;;  %v6360_v9 = vrot.slane %v6346_v48, %v22934_v5  ;;  %v18986_v48 = vld [vmem:[#allocation5 + $0x10b8] sm:$0xff]  }
 0x771   :  { %17681 = vmatprep.subr.bf16.mxu1 %v18914_v26  ;;  %v6739_v26 = vpack.c.bf16 %v6353_v29, %v6353_v29 }
 0x772   :  { %17660 = vmatpush3.bf16.msra.mxu0 %v18913_v58  ;;  %v18951_v58 = vld [vmem:[#allocation5 + $0xf38] sm:$0xff]   ;;  %v6740_v15 = vpack.c.bf16 %v6361_v39, %v6361_v39  ;;  %v6741_v23 = vpack.c.bf16 %v6360_v9, %v6360_v9 }
 0x773   :  { %17689 = vmatprep.subr.bf16.mxu0 %v18916_v46 }
 0x774   :  { %17682 = vmatpush3.bf16.msra.mxu1 %v18915_v14  ;;  %v6362_v14 = vcombine.high %v6360_v9, %v6360_v9  ;;  %v18987_v9 = vld [vmem:[#allocation5 + $0x1070] sm:$0xff]  }
 0x775   :  { %v17397_v32 = vpop.f32.mrf.mxu0  ;;  %14836 = vmatmul.mubr.bf16.vlgmr.msra.gmra.mxu0 %v6735_v1  ;;  %17711 = vmatprep.subr.bf16.mxu1 %v18919_v28  ;;  %v18955_v1 = vld [vmem:[#allocation5 + $0xf30] sm:$0xff]  }
 0x776   :  { %17690 = vmatpush3.bf16.msra.mxu0 %v18918_v25  ;;  %14915 = vmatprep.mubr.bf16.mxu0 %v6740_v15  ;;  %v6742_v25 = vpack.c.bf16 %v6362_v14, %v6362_v14  ;;  %v18989_v14 = vld [vmem:[#allocation5 + $0x10f0] sm:$0xff]  }
 0x777   :  { %v17398_v7 = vpop.f32.mrf.mxu0  ;;  %v17419_v59 = vpop.f32.mrf.mxu1  ;;  %14876 = vmatmul.mubr.bf16.vlgmr.msra.gmra.mxu1 %v6737_v60  ;;  %17691 = vmatprep.subr.bf16.mxu0 %v18921_v40 }
 0x778   :  { %v17399_v44 = vadd.f32 %v17398_v7, %v17397_v32  ;;  %17712 = vmatpush3.bf16.msra.mxu1 %v18920_v45  ;;  %14955 = vmatprep.mubr.bf16.mxu1 %v6742_v25  ;;  %v18957_v32 = vld [vmem:[#allocation5 + $0xfb0] sm:$0xff]   ;;  %v18991_v25 = vld [vmem:[#allocation5 + $0x1068] sm:$0xff]  }
 0x779   :  { %v17400_v16 = vpop.f32.mrf.mxu0  ;;  %v17420_v0 = vpop.f32.mrf.mxu1  ;;  %17713 = vmatprep.subr.bf16.mxu1 %v18923_v57 }
 0x77a   :  { %v14358_v47 = vadd.f32 %v17399_v44, %v22980_v2  ;;  %v17421_v18 = vadd.f32 %v17420_v0, %v17419_v59  ;;  %17692 = vmatpush3.bf16.msra.mxu0 %v18922_v4  ;;  %v18935_v2 = vld [vmem:[#allocation5 + $0xed8] sm:$0xff]   ;;  %v18959_v59 = vld [vmem:[#allocation5 + $0xf28] sm:$0xff]  }
 0x77b   :  { %v17401_v62 = vpop.f32.mrf.mxu0  ;;  %v17422_v11 = vpop.f32.mrf.mxu1  ;;  %17693 = vmatprep.subr.bf16.mxu0 %v18925_v50  ;;  %v18960_v44 = vld [vmem:[#allocation5 + $0xfe8] sm:$0xff]   ;;  %v18962_v50 = vld [vmem:[#allocation5 + $0xf60] sm:$0xff]  }
 0x77c   :  { %v22985_v42 = vadd.f32 %v17421_v18, %v14358_v47  ;;  %17714 = vmatpush3.bf16.msra.mxu1 %v18924_v34  ;;  %v18961_v0 = vld [vmem:[#allocation5 + $0xfa8] sm:$0xff]   ;;  %v18963_v18 = vld [vmem:[#allocation5 + $0xf20] sm:$0xff]   ;;  %v18967_v11 = vld [vmem:[#allocation5 + $0xf18] sm:$0xff]  }
 0x77d   :  { %v17423_v27 = vpop.f32.mrf.mxu1  ;;  %17715 = vmatprep.subr.bf16.mxu1 %v18927_v55  ;;  %v18965_v62 = vld [vmem:[#allocation5 + $0xfa0] sm:$0xff]   ;;  %v18966_v55 = vld [vmem:[#allocation5 + $0xf58] sm:$0xff]  }
 0x77e   :  { %17694 = vmatpush3.bf16.msra.mxu0 %v18926_v17  ;;  %v18964_v17 = vld [vmem:[#allocation5 + $0xfe0] sm:$0xff]   ;;  %v18971_v27 = vld [vmem:[#allocation5 + $0xf10] sm:$0xff]  }
 0x77f   :  { %17695 = vmatprep.subr.bf16.mxu0 %v18929_v6  ;;  %v18970_v6 = vld [vmem:[#allocation5 + $0xf50] sm:$0xff]  }
 0x780   :  { %17716 = vmatpush3.bf16.msra.mxu1 %v18928_v33  ;;  %v18969_v33 = vld [vmem:[#allocation5 + $0xf98] sm:$0xff]  }
 0x781   :  { %17717 = vmatprep.subr.bf16.mxu1 %v18931_v53  ;;  %v18973_v53 = vld [vmem:[#allocation5 + $0xf90] sm:$0xff]  }
 0x782   :  { %17696 = vmatpush3.bf16.msra.mxu0 %v18930_v38  ;;  %v18972_v38 = vld [vmem:[#allocation5 + $0xfd0] sm:$0xff]  }
 0x783   :  { %17697 = vmatprep.subr.bf16.mxu0 %v18933_v36  ;;  %v18975_v36 = vld [vmem:[#allocation5 + $0xf08] sm:$0xff]  }
 0x784   :  { %17718 = vmatpush3.bf16.msra.mxu1 %v18932_v12  ;;  %v18974_v12 = vld [vmem:[#allocation5 + $0xf48] sm:$0xff]  }
 0x785   :  { %17719 = vmatprep.subr.bf16.mxu1 %v18935_v2  ;;  %v18977_v2 = vld [vmem:[#allocation5 + $0xf88] sm:$0xff]  }
 0x786   :  { %17698 = vmatpush3.bf16.msra.mxu0 %v18934_v19  ;;  %v18976_v19 = vld [vmem:[#allocation5 + $0xfc8] sm:$0xff]  }
 0x787   :  { %17699 = vmatprep.subr.bf16.mxu0 %v18937_v49  ;;  %v18979_v49 = vld [vmem:[#allocation5 + $0xf00] sm:$0xff]  }
 0x788   :  { %17720 = vmatpush3.bf16.msra.mxu1 %v18936_v24  ;;  %v18978_v24 = vld [vmem:[#allocation5 + $0xf40] sm:$0xff]  }
 0x789   :  { %17721 = vmatprep.subr.bf16.mxu1 %v18939_v10  ;;  %v6067_v10 = vld [vmem:[#allocation4 + $0x78] sm:$0xff] }
 0x78a   :  { %17700 = vmatpush3.bf16.msra.mxu0 %v18938_v20  ;;  %v18980_v20 = vld [vmem:[#allocation5 + $0xfc0] sm:$0xff]  }
 0x78b   :  { %17701 = vmatprep.subr.bf16.mxu0 %v18941_v22  ;;  %v18981_v22 = vld [vmem:[#allocation5 + $0xf80] sm:$0xff]  }
 0x78c   :  { %17722 = vmatpush3.bf16.msra.mxu1 %v18940_v21  ;;  %v6370_v21 = vrot.slane %v6067_v10, %v22934_v5 }
 0x78d   :  { %17723 = vmatprep.subr.bf16.mxu1 %v18943_v8  ;;  %v18982_v8 = vld [vmem:[#allocation5 + $0x1078] sm:$0xff]  }
 0x78e   :  { %17702 = vmatpush3.bf16.msra.mxu0 %v18942_v37  ;;  %v6363_v37 = vcombine.high %v6067_v10, %v6067_v10  ;;  %v19018_v10 = vld [vmem:[#allocation5 + $0x11f8] sm:$0xff]  }
 0x78f   :  { %17703 = vmatprep.subr.bf16.mxu0 %v18945_v41 }
 0x790   :  { %17724 = vmatpush3.bf16.msra.mxu1 %v18944_v52  ;;  %v6378_v52 = vcombine.high %v6370_v21, %v6370_v21  ;;  %v6377_v41 = vrot.slane %v6363_v37, %v22934_v5  ;;  %v19019_v37 = vld [vmem:[#allocation5 + $0x11b8] sm:$0xff]  }
 0x791   :  { %17725 = vmatprep.subr.bf16.mxu1 %v18947_v56  ;;  %v6743_v56 = vpack.c.bf16 %v6370_v21, %v6370_v21 }
 0x792   :  { %17704 = vmatpush3.bf16.msra.mxu0 %v18946_v43  ;;  %v18984_v43 = vld [vmem:[#allocation5 + $0x1038] sm:$0xff]   ;;  %v6744_v29 = vpack.c.bf16 %v6378_v52, %v6378_v52  ;;  %v6745_v39 = vpack.c.bf16 %v6377_v41, %v6377_v41 }
 0x793   :  { %17733 = vmatprep.subr.bf16.mxu0 %v18949_v54 }
 0x794   :  { %17726 = vmatpush3.bf16.msra.mxu1 %v18948_v63  ;;  %v6379_v63 = vcombine.high %v6377_v41, %v6377_v41  ;;  %v19020_v41 = vld [vmem:[#allocation5 + $0x1170] sm:$0xff]  }
 0x795   :  { %v17441_v46 = vpop.f32.mrf.mxu0  ;;  %17755 = vmatprep.subr.bf16.mxu1 %v18952_v61  ;;  %14916 = vmatmul.mubr.bf16.vlgmr.msra.gmra.mxu0 %v6739_v26  ;;  %v18988_v26 = vld [vmem:[#allocation5 + $0x1030] sm:$0xff]  }
 0x796   :  { %17734 = vmatpush3.bf16.msra.mxu0 %v18951_v58  ;;  %14995 = vmatprep.mubr.bf16.mxu0 %v6744_v29  ;;  %v6746_v58 = vpack.c.bf16 %v6379_v63, %v6379_v63  ;;  %v19022_v63 = vld [vmem:[#allocation5 + $0x11f0] sm:$0xff]  }
 0x797   :  { %v17442_v28 = vpop.f32.mrf.mxu0  ;;  %v17463_v3 = vpop.f32.mrf.mxu1  ;;  %14956 = vmatmul.mubr.bf16.vlgmr.msra.gmra.mxu1 %v6741_v23  ;;  %17735 = vmatprep.subr.bf16.mxu0 %v18954_v13 }
 0x798   :  { %v17443_v45 = vadd.f32 %v17442_v28, %v17441_v46  ;;  %17756 = vmatpush3.bf16.msra.mxu1 %v18953_v51  ;;  %15035 = vmatprep.mubr.bf16.mxu1 %v6746_v58  ;;  %v18990_v46 = vld [vmem:[#allocation5 + $0x10b0] sm:$0xff]   ;;  %v19024_v58 = vld [vmem:[#allocation5 + $0x1168] sm:$0xff]  }
 0x799   :  { %v17444_v60 = vpop.f32.mrf.mxu0  ;;  %v17464_v40 = vpop.f32.mrf.mxu1  ;;  %17757 = vmatprep.subr.bf16.mxu1 %v18956_v35 }
 0x79a   :  { %v14438_v4 = vadd.f32 %v17443_v45, %v22985_v42  ;;  %v17465_v7 = vadd.f32 %v17464_v40, %v17463_v3  ;;  %17736 = vmatpush3.bf16.msra.mxu0 %v18955_v1  ;;  %v18968_v42 = vld [vmem:[#allocation5 + $0xfd8] sm:$0xff]   ;;  %v18992_v3 = vld [vmem:[#allocation5 + $0x1028] sm:$0xff]  }
 0x79b   :  { %v17445_v57 = vpop.f32.mrf.mxu0  ;;  %v17466_v34 = vpop.f32.mrf.mxu1  ;;  %17737 = vmatprep.subr.bf16.mxu0 %v18958_v31  ;;  %v18993_v45 = vld [vmem:[#allocation5 + $0x10e8] sm:$0xff]   ;;  %v18995_v31 = vld [vmem:[#allocation5 + $0x1060] sm:$0xff]  }
 0x79c   :  { %v22990_v16 = vadd.f32 %v17465_v7, %v14438_v4  ;;  %17758 = vmatpush3.bf16.msra.mxu1 %v18957_v32  ;;  %v18994_v40 = vld [vmem:[#allocation5 + $0x10a8] sm:$0xff]   ;;  %v18996_v7 = vld [vmem:[#allocation5 + $0x1020] sm:$0xff]   ;;  %v19000_v34 = vld [vmem:[#allocation5 + $0x1018] sm:$0xff]  }
 0x79d   :  { %v17467_v47 = vpop.f32.mrf.mxu1  ;;  %17759 = vmatprep.subr.bf16.mxu1 %v18960_v44  ;;  %v18998_v57 = vld [vmem:[#allocation5 + $0x10a0] sm:$0xff]   ;;  %v18999_v44 = vld [vmem:[#allocation5 + $0x1058] sm:$0xff]  }
 0x79e   :  { %17738 = vmatpush3.bf16.msra.mxu0 %v18959_v59  ;;  %v18997_v59 = vld [vmem:[#allocation5 + $0x10e0] sm:$0xff]   ;;  %v19004_v47 = vld [vmem:[#allocation5 + $0x1010] sm:$0xff]  }
 0x79f   :  { %17739 = vmatprep.subr.bf16.mxu0 %v18962_v50  ;;  %v19003_v50 = vld [vmem:[#allocation5 + $0x1050] sm:$0xff]  }
 0x7a0   :  { %17760 = vmatpush3.bf16.msra.mxu1 %v18961_v0  ;;  %v19002_v0 = vld [vmem:[#allocation5 + $0x1098] sm:$0xff]  }
 0x7a1   :  { %17761 = vmatprep.subr.bf16.mxu1 %v18964_v17  ;;  %v19006_v17 = vld [vmem:[#allocation5 + $0x1090] sm:$0xff]  }
 0x7a2   :  { %17740 = vmatpush3.bf16.msra.mxu0 %v18963_v18  ;;  %v19005_v18 = vld [vmem:[#allocation5 + $0x10d0] sm:$0xff]  }
 0x7a3   :  { %17741 = vmatprep.subr.bf16.mxu0 %v18966_v55  ;;  %v19008_v55 = vld [vmem:[#allocation5 + $0x1008] sm:$0xff]  }
 0x7a4   :  { %17762 = vmatpush3.bf16.msra.mxu1 %v18965_v62  ;;  %v19007_v62 = vld [vmem:[#allocation5 + $0x1048] sm:$0xff]  }
 0x7a5   :  { %17763 = vmatprep.subr.bf16.mxu1 %v18968_v42  ;;  %v19010_v42 = vld [vmem:[#allocation5 + $0x1088] sm:$0xff]  }
 0x7a6   :  { %17742 = vmatpush3.bf16.msra.mxu0 %v18967_v11  ;;  %v19009_v11 = vld [vmem:[#allocation5 + $0x10c8] sm:$0xff]  }
 0x7a7   :  { %17743 = vmatprep.subr.bf16.mxu0 %v18970_v6  ;;  %v19012_v6 = vld [vmem:[#allocation5 + $0x1000] sm:$0xff]  }
 0x7a8   :  { %17764 = vmatpush3.bf16.msra.mxu1 %v18969_v33  ;;  %v19011_v33 = vld [vmem:[#allocation5 + $0x1040] sm:$0xff]  }
 0x7a9   :  { %17765 = vmatprep.subr.bf16.mxu1 %v18972_v38  ;;  %v6068_v38 = vld [vmem:[#allocation4 + $0x80] sm:$0xff] }
 0x7aa   :  { %17744 = vmatpush3.bf16.msra.mxu0 %v18971_v27  ;;  %v19013_v27 = vld [vmem:[#allocation5 + $0x10c0] sm:$0xff]  }
 0x7ab   :  { %17745 = vmatprep.subr.bf16.mxu0 %v18974_v12  ;;  %v19014_v12 = vld [vmem:[#allocation5 + $0x1080] sm:$0xff]  }
 0x7ac   :  { %17766 = vmatpush3.bf16.msra.mxu1 %v18973_v53  ;;  %v6387_v53 = vrot.slane %v6068_v38, %v22934_v5 }
 0x7ad   :  { %17767 = vmatprep.subr.bf16.mxu1 %v18976_v19  ;;  %v19015_v19 = vld [vmem:[#allocation5 + $0x1178] sm:$0xff]  }
 0x7ae   :  { %17746 = vmatpush3.bf16.msra.mxu0 %v18975_v36  ;;  %v6380_v36 = vcombine.high %v6068_v38, %v6068_v38  ;;  %v19051_v38 = vld [vmem:[#allocation5 + $0x12f8] sm:$0xff]  }
 0x7af   :  { %17747 = vmatprep.subr.bf16.mxu0 %v18978_v24 }
 0x7b0   :  { %17768 = vmatpush3.bf16.msra.mxu1 %v18977_v2  ;;  %v6395_v2 = vcombine.high %v6387_v53, %v6387_v53  ;;  %v6394_v24 = vrot.slane %v6380_v36, %v22934_v5  ;;  %v19052_v36 = vld [vmem:[#allocation5 + $0x12b8] sm:$0xff]  }
 0x7b1   :  { %17769 = vmatprep.subr.bf16.mxu1 %v18980_v20  ;;  %v6747_v20 = vpack.c.bf16 %v6387_v53, %v6387_v53 }
 0x7b2   :  { %17748 = vmatpush3.bf16.msra.mxu0 %v18979_v49  ;;  %v19017_v49 = vld [vmem:[#allocation5 + $0x1138] sm:$0xff]   ;;  %v6748_v21 = vpack.c.bf16 %v6395_v2, %v6395_v2  ;;  %v6749_v52 = vpack.c.bf16 %v6394_v24, %v6394_v24 }
 0x7b3   :  { %17777 = vmatprep.subr.bf16.mxu0 %v18982_v8 }
 0x7b4   :  { %17770 = vmatpush3.bf16.msra.mxu1 %v18981_v22  ;;  %v6396_v22 = vcombine.high %v6394_v24, %v6394_v24  ;;  %v19053_v24 = vld [vmem:[#allocation5 + $0x1270] sm:$0xff]  }
 0x7b5   :  { %v17485_v54 = vpop.f32.mrf.mxu0  ;;  %14996 = vmatmul.mubr.bf16.vlgmr.msra.gmra.mxu0 %v6743_v56  ;;  %17799 = vmatprep.subr.bf16.mxu1 %v18985_v30  ;;  %v19021_v56 = vld [vmem:[#allocation5 + $0x1130] sm:$0xff]  }
 0x7b6   :  { %17778 = vmatpush3.bf16.msra.mxu0 %v18984_v43  ;;  %15075 = vmatprep.mubr.bf16.mxu0 %v6748_v21  ;;  %v6750_v43 = vpack.c.bf16 %v6396_v22, %v6396_v22  ;;  %v19055_v22 = vld [vmem:[#allocation5 + $0x12f0] sm:$0xff]  }
 0x7b7   :  { %v17486_v61 = vpop.f32.mrf.mxu0  ;;  %v17507_v15 = vpop.f32.mrf.mxu1  ;;  %15036 = vmatmul.mubr.bf16.vlgmr.msra.gmra.mxu1 %v6745_v39  ;;  %17779 = vmatprep.subr.bf16.mxu0 %v18987_v9 }
 0x7b8   :  { %v17487_v51 = vadd.f32 %v17486_v61, %v17485_v54  ;;  %17800 = vmatpush3.bf16.msra.mxu1 %v18986_v48  ;;  %15115 = vmatprep.mubr.bf16.mxu1 %v6750_v43  ;;  %v19023_v54 = vld [vmem:[#allocation5 + $0x11b0] sm:$0xff]   ;;  %v19057_v43 = vld [vmem:[#allocation5 + $0x1268] sm:$0xff]  }
 0x7b9   :  { %v17488_v23 = vpop.f32.mrf.mxu0  ;;  %v17508_v13 = vpop.f32.mrf.mxu1  ;;  %17801 = vmatprep.subr.bf16.mxu1 %v18989_v14 }
 0x7ba   :  { %v14518_v1 = vadd.f32 %v17487_v51, %v22990_v16  ;;  %v17509_v28 = vadd.f32 %v17508_v13, %v17507_v15  ;;  %17780 = vmatpush3.bf16.msra.mxu0 %v18988_v26  ;;  %v19001_v16 = vld [vmem:[#allocation5 + $0x10d8] sm:$0xff]   ;;  %v19025_v15 = vld [vmem:[#allocation5 + $0x1128] sm:$0xff]  }
 0x7bb   :  { %v17489_v35 = vpop.f32.mrf.mxu0  ;;  %v17510_v32 = vpop.f32.mrf.mxu1  ;;  %17781 = vmatprep.subr.bf16.mxu0 %v18991_v25  ;;  %v19026_v51 = vld [vmem:[#allocation5 + $0x11e8] sm:$0xff]   ;;  %v19028_v25 = vld [vmem:[#allocation5 + $0x1160] sm:$0xff]  }
 0x7bc   :  { %v22995_v60 = vadd.f32 %v17509_v28, %v14518_v1  ;;  %17802 = vmatpush3.bf16.msra.mxu1 %v18990_v46  ;;  %v19027_v13 = vld [vmem:[#allocation5 + $0x11a8] sm:$0xff]   ;;  %v19029_v28 = vld [vmem:[#allocation5 + $0x1120] sm:$0xff]   ;;  %v19033_v32 = vld [vmem:[#allocation5 + $0x1118] sm:$0xff]  }
 0x7bd   :  { %v17511_v4 = vpop.f32.mrf.mxu1  ;;  %17803 = vmatprep.subr.bf16.mxu1 %v18993_v45  ;;  %v19031_v35 = vld [vmem:[#allocation5 + $0x11a0] sm:$0xff]   ;;  %v19032_v45 = vld [vmem:[#allocation5 + $0x1158] sm:$0xff]  }
 0x7be   :  { %17782 = vmatpush3.bf16.msra.mxu0 %v18992_v3  ;;  %v19030_v3 = vld [vmem:[#allocation5 + $0x11e0] sm:$0xff]   ;;  %v19037_v4 = vld [vmem:[#allocation5 + $0x1110] sm:$0xff]  }
 0x7bf   :  { %17783 = vmatprep.subr.bf16.mxu0 %v18995_v31  ;;  %v19036_v31 = vld [vmem:[#allocation5 + $0x1150] sm:$0xff]  }
 0x7c0   :  { %17804 = vmatpush3.bf16.msra.mxu1 %v18994_v40  ;;  %v19035_v40 = vld [vmem:[#allocation5 + $0x1198] sm:$0xff]  }
 0x7c1   :  { %17805 = vmatprep.subr.bf16.mxu1 %v18997_v59  ;;  %v19039_v59 = vld [vmem:[#allocation5 + $0x1190] sm:$0xff]  }
 0x7c2   :  { %17784 = vmatpush3.bf16.msra.mxu0 %v18996_v7  ;;  %v19038_v7 = vld [vmem:[#allocation5 + $0x11d0] sm:$0xff]  }
 0x7c3   :  { %17785 = vmatprep.subr.bf16.mxu0 %v18999_v44  ;;  %v19041_v44 = vld [vmem:[#allocation5 + $0x1108] sm:$0xff]  }
 0x7c4   :  { %17806 = vmatpush3.bf16.msra.mxu1 %v18998_v57  ;;  %v19040_v57 = vld [vmem:[#allocation5 + $0x1148] sm:$0xff]  }
 0x7c5   :  { %17807 = vmatprep.subr.bf16.mxu1 %v19001_v16  ;;  %v19043_v16 = vld [vmem:[#allocation5 + $0x1188] sm:$0xff]  }
 0x7c6   :  { %17786 = vmatpush3.bf16.msra.mxu0 %v19000_v34  ;;  %v19042_v34 = vld [vmem:[#allocation5 + $0x11c8] sm:$0xff]  }
 0x7c7   :  { %17787 = vmatprep.subr.bf16.mxu0 %v19003_v50  ;;  %v19045_v50 = vld [vmem:[#allocation5 + $0x1100] sm:$0xff]  }
 0x7c8   :  { %17808 = vmatpush3.bf16.msra.mxu1 %v19002_v0  ;;  %v19044_v0 = vld [vmem:[#allocation5 + $0x1140] sm:$0xff]  }
 0x7c9   :  { %17809 = vmatprep.subr.bf16.mxu1 %v19005_v18  ;;  %v6069_v18 = vld [vmem:[#allocation4 + $0x88] sm:$0xff] }
 0x7ca   :  { %17788 = vmatpush3.bf16.msra.mxu0 %v19004_v47  ;;  %v19046_v47 = vld [vmem:[#allocation5 + $0x11c0] sm:$0xff]  }
 0x7cb   :  { %17789 = vmatprep.subr.bf16.mxu0 %v19007_v62  ;;  %v19047_v62 = vld [vmem:[#allocation5 + $0x1180] sm:$0xff]  }
 0x7cc   :  { %17810 = vmatpush3.bf16.msra.mxu1 %v19006_v17  ;;  %v6404_v17 = vrot.slane %v6069_v18, %v22934_v5 }
 0x7cd   :  { %17811 = vmatprep.subr.bf16.mxu1 %v19009_v11  ;;  %v19048_v11 = vld [vmem:[#allocation5 + $0x1278] sm:$0xff]  }
 0x7ce   :  { %17790 = vmatpush3.bf16.msra.mxu0 %v19008_v55  ;;  %v6397_v55 = vcombine.high %v6069_v18, %v6069_v18  ;;  %v19084_v18 = vld [vmem:[#allocation5 + $0x13f8] sm:$0xff]  }
 0x7cf   :  { %17791 = vmatprep.subr.bf16.mxu0 %v19011_v33 }
 0x7d0   :  { %17812 = vmatpush3.bf16.msra.mxu1 %v19010_v42  ;;  %v6412_v42 = vcombine.high %v6404_v17, %v6404_v17  ;;  %v6411_v33 = vrot.slane %v6397_v55, %v22934_v5  ;;  %v19085_v55 = vld [vmem:[#allocation5 + $0x13b8] sm:$0xff]  }
 0x7d1   :  { %17813 = vmatprep.subr.bf16.mxu1 %v19013_v27  ;;  %v6751_v27 = vpack.c.bf16 %v6404_v17, %v6404_v17 }
 0x7d2   :  { %17792 = vmatpush3.bf16.msra.mxu0 %v19012_v6  ;;  %v19050_v6 = vld [vmem:[#allocation5 + $0x1238] sm:$0xff]   ;;  %v6752_v53 = vpack.c.bf16 %v6412_v42, %v6412_v42  ;;  %v6753_v2 = vpack.c.bf16 %v6411_v33, %v6411_v33 }
 0x7d3   :  { %17821 = vmatprep.subr.bf16.mxu0 %v19015_v19 }
 0x7d4   :  { %17814 = vmatpush3.bf16.msra.mxu1 %v19014_v12  ;;  %v6413_v12 = vcombine.high %v6411_v33, %v6411_v33  ;;  %v19086_v33 = vld [vmem:[#allocation5 + $0x1370] sm:$0xff]  }
 0x7d5   :  { %v17529_v8 = vpop.f32.mrf.mxu0  ;;  %15076 = vmatmul.mubr.bf16.vlgmr.msra.gmra.mxu0 %v6747_v20  ;;  %17843 = vmatprep.subr.bf16.mxu1 %v19018_v10  ;;  %v19054_v20 = vld [vmem:[#allocation5 + $0x1230] sm:$0xff]  }
 0x7d6   :  { %17822 = vmatpush3.bf16.msra.mxu0 %v19017_v49  ;;  %15155 = vmatprep.mubr.bf16.mxu0 %v6752_v53  ;;  %v6754_v49 = vpack.c.bf16 %v6413_v12, %v6413_v12  ;;  %v19088_v12 = vld [vmem:[#allocation5 + $0x13f0] sm:$0xff]  }
 0x7d7   :  { %v17530_v30 = vpop.f32.mrf.mxu0  ;;  %v17551_v29 = vpop.f32.mrf.mxu1  ;;  %15116 = vmatmul.mubr.bf16.vlgmr.msra.gmra.mxu1 %v6749_v52  ;;  %17823 = vmatprep.subr.bf16.mxu0 %v19020_v41 }
 0x7d8   :  { %v17531_v48 = vadd.f32 %v17530_v30, %v17529_v8  ;;  %17844 = vmatpush3.bf16.msra.mxu1 %v19019_v37  ;;  %15195 = vmatprep.mubr.bf16.mxu1 %v6754_v49  ;;  %v19056_v8 = vld [vmem:[#allocation5 + $0x12b0] sm:$0xff]   ;;  %v19090_v49 = vld [vmem:[#allocation5 + $0x1368] sm:$0xff]  }
 0x7d9   :  { %v17532_v39 = vpop.f32.mrf.mxu0  ;;  %v17552_v9 = vpop.f32.mrf.mxu1  ;;  %17845 = vmatprep.subr.bf16.mxu1 %v19022_v63 }
 0x7da   :  { %v14598_v26 = vadd.f32 %v17531_v48, %v22995_v60  ;;  %v17553_v61 = vadd.f32 %v17552_v9, %v17551_v29  ;;  %17824 = vmatpush3.bf16.msra.mxu0 %v19021_v56  ;;  %v19034_v60 = vld [vmem:[#allocation5 + $0x11d8] sm:$0xff]   ;;  %v19058_v29 = vld [vmem:[#allocation5 + $0x1228] sm:$0xff]  }
 0x7db   :  { %v17533_v14 = vpop.f32.mrf.mxu0  ;;  %v17554_v46 = vpop.f32.mrf.mxu1  ;;  %17825 = vmatprep.subr.bf16.mxu0 %v19024_v58  ;;  %v19059_v48 = vld [vmem:[#allocation5 + $0x12e8] sm:$0xff]   ;;  %v19061_v58 = vld [vmem:[#allocation5 + $0x1260] sm:$0xff]  }
 0x7dc   :  { %v23000_v23 = vadd.f32 %v17553_v61, %v14598_v26  ;;  %17846 = vmatpush3.bf16.msra.mxu1 %v19023_v54  ;;  %v19060_v9 = vld [vmem:[#allocation5 + $0x12a8] sm:$0xff]   ;;  %v19062_v61 = vld [vmem:[#allocation5 + $0x1220] sm:$0xff]   ;;  %v19066_v46 = vld [vmem:[#allocation5 + $0x1218] sm:$0xff]  }
 0x7dd   :  { %v17555_v1 = vpop.f32.mrf.mxu1  ;;  %17847 = vmatprep.subr.bf16.mxu1 %v19026_v51  ;;  %v19064_v14 = vld [vmem:[#allocation5 + $0x12a0] sm:$0xff]   ;;  %v19065_v51 = vld [vmem:[#allocation5 + $0x1258] sm:$0xff]  }
 0x7de   :  { %17826 = vmatpush3.bf16.msra.mxu0 %v19025_v15  ;;  %v19063_v15 = vld [vmem:[#allocation5 + $0x12e0] sm:$0xff]   ;;  %v19070_v1 = vld [vmem:[#allocation5 + $0x1210] sm:$0xff]  }
 0x7df   :  { %17827 = vmatprep.subr.bf16.mxu0 %v19028_v25  ;;  %v19069_v25 = vld [vmem:[#allocation5 + $0x1250] sm:$0xff]  }
 0x7e0   :  { %17848 = vmatpush3.bf16.msra.mxu1 %v19027_v13  ;;  %v19068_v13 = vld [vmem:[#allocation5 + $0x1298] sm:$0xff]  }
 0x7e1   :  { %17849 = vmatprep.subr.bf16.mxu1 %v19030_v3  ;;  %v19072_v3 = vld [vmem:[#allocation5 + $0x1290] sm:$0xff]  }
 0x7e2   :  { %17828 = vmatpush3.bf16.msra.mxu0 %v19029_v28  ;;  %v19071_v28 = vld [vmem:[#allocation5 + $0x12d0] sm:$0xff]  }
 0x7e3   :  { %17829 = vmatprep.subr.bf16.mxu0 %v19032_v45  ;;  %v19074_v45 = vld [vmem:[#allocation5 + $0x1208] sm:$0xff]  }
 0x7e4   :  { %17850 = vmatpush3.bf16.msra.mxu1 %v19031_v35  ;;  %v19073_v35 = vld [vmem:[#allocation5 + $0x1248] sm:$0xff]  }
 0x7e5   :  { %17851 = vmatprep.subr.bf16.mxu1 %v19034_v60  ;;  %v19076_v60 = vld [vmem:[#allocation5 + $0x1288] sm:$0xff]  }
 0x7e6   :  { %17830 = vmatpush3.bf16.msra.mxu0 %v19033_v32  ;;  %v19075_v32 = vld [vmem:[#allocation5 + $0x12c8] sm:$0xff]  }
 0x7e7   :  { %17831 = vmatprep.subr.bf16.mxu0 %v19036_v31  ;;  %v19078_v31 = vld [vmem:[#allocation5 + $0x1200] sm:$0xff]  }
 0x7e8   :  { %17852 = vmatpush3.bf16.msra.mxu1 %v19035_v40  ;;  %v19077_v40 = vld [vmem:[#allocation5 + $0x1240] sm:$0xff]  }
 0x7e9   :  { %17853 = vmatprep.subr.bf16.mxu1 %v19038_v7  ;;  %v6070_v7 = vld [vmem:[#allocation4 + $0x90] sm:$0xff] }
 0x7ea   :  { %17832 = vmatpush3.bf16.msra.mxu0 %v19037_v4  ;;  %v19079_v4 = vld [vmem:[#allocation5 + $0x12c0] sm:$0xff]  }
 0x7eb   :  { %17833 = vmatprep.subr.bf16.mxu0 %v19040_v57  ;;  %v19080_v57 = vld [vmem:[#allocation5 + $0x1280] sm:$0xff]  }
 0x7ec   :  { %17854 = vmatpush3.bf16.msra.mxu1 %v19039_v59  ;;  %v6421_v59 = vrot.slane %v6070_v7, %v22934_v5 }
 0x7ed   :  { %17855 = vmatprep.subr.bf16.mxu1 %v19042_v34  ;;  %v19081_v34 = vld [vmem:[#allocation5 + $0x1378] sm:$0xff]  }
 0x7ee   :  { %17834 = vmatpush3.bf16.msra.mxu0 %v19041_v44  ;;  %v6414_v44 = vcombine.high %v6070_v7, %v6070_v7  ;;  %v19117_v7 = vld [vmem:[#allocation5 + $0x14f8] sm:$0xff]  }
 0x7ef   :  { %17835 = vmatprep.subr.bf16.mxu0 %v19044_v0 }
 0x7f0   :  { %17856 = vmatpush3.bf16.msra.mxu1 %v19043_v16  ;;  %v6429_v16 = vcombine.high %v6421_v59, %v6421_v59  ;;  %v6428_v0 = vrot.slane %v6414_v44, %v22934_v5  ;;  %v19118_v44 = vld [vmem:[#allocation5 + $0x14b8] sm:$0xff]  }
 0x7f1   :  { %17857 = vmatprep.subr.bf16.mxu1 %v19046_v47  ;;  %v6755_v47 = vpack.c.bf16 %v6421_v59, %v6421_v59 }
 0x7f2   :  { %17836 = vmatpush3.bf16.msra.mxu0 %v19045_v50  ;;  %v19083_v50 = vld [vmem:[#allocation5 + $0x1338] sm:$0xff]   ;;  %v6756_v17 = vpack.c.bf16 %v6429_v16, %v6429_v16  ;;  %v6757_v42 = vpack.c.bf16 %v6428_v0, %v6428_v0 }
 0x7f3   :  { %17865 = vmatprep.subr.bf16.mxu0 %v19048_v11 }
 0x7f4   :  { %17858 = vmatpush3.bf16.msra.mxu1 %v19047_v62  ;;  %v6430_v62 = vcombine.high %v6428_v0, %v6428_v0  ;;  %v19119_v0 = vld [vmem:[#allocation5 + $0x1470] sm:$0xff]  }
 0x7f5   :  { %v17573_v19 = vpop.f32.mrf.mxu0  ;;  %17887 = vmatprep.subr.bf16.mxu1 %v19051_v38  ;;  %15156 = vmatmul.mubr.bf16.vlgmr.msra.gmra.mxu0 %v6751_v27  ;;  %v19087_v27 = vld [vmem:[#allocation5 + $0x1330] sm:$0xff]  }
 0x7f6   :  { %17866 = vmatpush3.bf16.msra.mxu0 %v19050_v6  ;;  %15235 = vmatprep.mubr.bf16.mxu0 %v6756_v17  ;;  %v6758_v6 = vpack.c.bf16 %v6430_v62, %v6430_v62  ;;  %v19121_v62 = vld [vmem:[#allocation5 + $0x14f0] sm:$0xff]  }
 0x7f7   :  { %v17574_v10 = vpop.f32.mrf.mxu0  ;;  %v17595_v21 = vpop.f32.mrf.mxu1  ;;  %15196 = vmatmul.mubr.bf16.vlgmr.msra.gmra.mxu1 %v6753_v2  ;;  %17867 = vmatprep.subr.bf16.mxu0 %v19053_v24 }
 0x7f8   :  { %v17575_v37 = vadd.f32 %v17574_v10, %v17573_v19  ;;  %17888 = vmatpush3.bf16.msra.mxu1 %v19052_v36  ;;  %15275 = vmatprep.mubr.bf16.mxu1 %v6758_v6  ;;  %v19089_v19 = vld [vmem:[#allocation5 + $0x13b0] sm:$0xff]   ;;  %v19123_v6 = vld [vmem:[#allocation5 + $0x1468] sm:$0xff]  }
 0x7f9   :  { %v17576_v52 = vpop.f32.mrf.mxu0  ;;  %v17596_v41 = vpop.f32.mrf.mxu1  ;;  %17889 = vmatprep.subr.bf16.mxu1 %v19055_v22 }
 0x7fa   :  { %v14678_v56 = vadd.f32 %v17575_v37, %v23000_v23  ;;  %v17597_v30 = vadd.f32 %v17596_v41, %v17595_v21  ;;  %17868 = vmatpush3.bf16.msra.mxu0 %v19054_v20  ;;  %v19067_v23 = vld [vmem:[#allocation5 + $0x12d8] sm:$0xff]   ;;  %v19091_v21 = vld [vmem:[#allocation5 + $0x1328] sm:$0xff]  }
 0x7fb   :  { %v17577_v63 = vpop.f32.mrf.mxu0  ;;  %v17598_v54 = vpop.f32.mrf.mxu1  ;;  %17869 = vmatprep.subr.bf16.mxu0 %v19057_v43  ;;  %v19092_v37 = vld [vmem:[#allocation5 + $0x13e8] sm:$0xff]   ;;  %v19094_v43 = vld [vmem:[#allocation5 + $0x1360] sm:$0xff]  }
 0x7fc   :  { %v23005_v39 = vadd.f32 %v17597_v30, %v14678_v56  ;;  %17890 = vmatpush3.bf16.msra.mxu1 %v19056_v8  ;;  %v19093_v41 = vld [vmem:[#allocation5 + $0x13a8] sm:$0xff]   ;;  %v19095_v30 = vld [vmem:[#allocation5 + $0x1320] sm:$0xff]   ;;  %v19099_v54 = vld [vmem:[#allocation5 + $0x1318] sm:$0xff]  }
 0x7fd   :  { %v17599_v26 = vpop.f32.mrf.mxu1  ;;  %17891 = vmatprep.subr.bf16.mxu1 %v19059_v48  ;;  %v19097_v63 = vld [vmem:[#allocation5 + $0x13a0] sm:$0xff]   ;;  %v19098_v48 = vld [vmem:[#allocation5 + $0x1358] sm:$0xff]  }
 0x7fe   :  { %17870 = vmatpush3.bf16.msra.mxu0 %v19058_v29  ;;  %v19096_v29 = vld [vmem:[#allocation5 + $0x13e0] sm:$0xff]   ;;  %v19103_v26 = vld [vmem:[#allocation5 + $0x1310] sm:$0xff]  }
 0x7ff   :  { %17871 = vmatprep.subr.bf16.mxu0 %v19061_v58  ;;  %v19102_v58 = vld [vmem:[#allocation5 + $0x1350] sm:$0xff]  }
 0x800   :  { %17892 = vmatpush3.bf16.msra.mxu1 %v19060_v9  ;;  %v19101_v9 = vld [vmem:[#allocation5 + $0x1398] sm:$0xff]  }
 0x801   :  { %17893 = vmatprep.subr.bf16.mxu1 %v19063_v15  ;;  %v19105_v15 = vld [vmem:[#allocation5 + $0x1390] sm:$0xff]  }
 0x802   :  { %17872 = vmatpush3.bf16.msra.mxu0 %v19062_v61  ;;  %v19104_v61 = vld [vmem:[#allocation5 + $0x13d0] sm:$0xff]  }
 0x803   :  { %17873 = vmatprep.subr.bf16.mxu0 %v19065_v51  ;;  %v19107_v51 = vld [vmem:[#allocation5 + $0x1308] sm:$0xff]  }
 0x804   :  { %17894 = vmatpush3.bf16.msra.mxu1 %v19064_v14  ;;  %v19106_v14 = vld [vmem:[#allocation5 + $0x1348] sm:$0xff]  }
 0x805   :  { %17895 = vmatprep.subr.bf16.mxu1 %v19067_v23  ;;  %v19109_v23 = vld [vmem:[#allocation5 + $0x1388] sm:$0xff]  }
 0x806   :  { %17874 = vmatpush3.bf16.msra.mxu0 %v19066_v46  ;;  %v19108_v46 = vld [vmem:[#allocation5 + $0x13c8] sm:$0xff]  }
 0x807   :  { %17875 = vmatprep.subr.bf16.mxu0 %v19069_v25  ;;  %v19111_v25 = vld [vmem:[#allocation5 + $0x1300] sm:$0xff]  }
 0x808   :  { %17896 = vmatpush3.bf16.msra.mxu1 %v19068_v13  ;;  %v19110_v13 = vld [vmem:[#allocation5 + $0x1340] sm:$0xff]  }
 0x809   :  { %17897 = vmatprep.subr.bf16.mxu1 %v19071_v28  ;;  %v6071_v28 = vld [vmem:[#allocation4 + $0x98] sm:$0xff] }
 0x80a   :  { %17876 = vmatpush3.bf16.msra.mxu0 %v19070_v1  ;;  %v19112_v1 = vld [vmem:[#allocation5 + $0x13c0] sm:$0xff]  }
 0x80b   :  { %17877 = vmatprep.subr.bf16.mxu0 %v19073_v35  ;;  %v19113_v35 = vld [vmem:[#allocation5 + $0x1380] sm:$0xff]  }
 0x80c   :  { %17898 = vmatpush3.bf16.msra.mxu1 %v19072_v3  ;;  %v6438_v3 = vrot.slane %v6071_v28, %v22934_v5 }
 0x80d   :  { %17899 = vmatprep.subr.bf16.mxu1 %v19075_v32  ;;  %v19114_v32 = vld [vmem:[#allocation5 + $0x1478] sm:$0xff]  }
 0x80e   :  { %17878 = vmatpush3.bf16.msra.mxu0 %v19074_v45  ;;  %v6431_v45 = vcombine.high %v6071_v28, %v6071_v28  ;;  %v19150_v28 = vld [vmem:[#allocation5 + $0x15f8] sm:$0xff]  }
 0x80f   :  { %17879 = vmatprep.subr.bf16.mxu0 %v19077_v40 }
 0x810   :  { %17900 = vmatpush3.bf16.msra.mxu1 %v19076_v60  ;;  %v6446_v60 = vcombine.high %v6438_v3, %v6438_v3  ;;  %v6445_v40 = vrot.slane %v6431_v45, %v22934_v5  ;;  %v19151_v45 = vld [vmem:[#allocation5 + $0x15b8] sm:$0xff]  }
 0x811   :  { %17901 = vmatprep.subr.bf16.mxu1 %v19079_v4  ;;  %v6759_v4 = vpack.c.bf16 %v6438_v3, %v6438_v3 }
 0x812   :  { %17880 = vmatpush3.bf16.msra.mxu0 %v19078_v31  ;;  %v19116_v31 = vld [vmem:[#allocation5 + $0x1438] sm:$0xff]   ;;  %v6760_v59 = vpack.c.bf16 %v6446_v60, %v6446_v60  ;;  %v6761_v16 = vpack.c.bf16 %v6445_v40, %v6445_v40 }
 0x813   :  { %17909 = vmatprep.subr.bf16.mxu0 %v19081_v34 }
 0x814   :  { %17902 = vmatpush3.bf16.msra.mxu1 %v19080_v57  ;;  %v6447_v57 = vcombine.high %v6445_v40, %v6445_v40  ;;  %v19152_v40 = vld [vmem:[#allocation5 + $0x1570] sm:$0xff]  }
 0x815   :  { %v17617_v11 = vpop.f32.mrf.mxu0  ;;  %15236 = vmatmul.mubr.bf16.vlgmr.msra.gmra.mxu0 %v6755_v47  ;;  %17931 = vmatprep.subr.bf16.mxu1 %v19084_v18  ;;  %v19120_v47 = vld [vmem:[#allocation5 + $0x1430] sm:$0xff]  }
 0x816   :  { %17910 = vmatpush3.bf16.msra.mxu0 %v19083_v50  ;;  %15315 = vmatprep.mubr.bf16.mxu0 %v6760_v59  ;;  %v6762_v50 = vpack.c.bf16 %v6447_v57, %v6447_v57  ;;  %v19154_v57 = vld [vmem:[#allocation5 + $0x15f0] sm:$0xff]  }
 0x817   :  { %v17618_v38 = vpop.f32.mrf.mxu0  ;;  %v17639_v53 = vpop.f32.mrf.mxu1  ;;  %15276 = vmatmul.mubr.bf16.vlgmr.msra.gmra.mxu1 %v6757_v42  ;;  %17911 = vmatprep.subr.bf16.mxu0 %v19086_v33 }
 0x818   :  { %v17619_v36 = vadd.f32 %v17618_v38, %v17617_v11  ;;  %17932 = vmatpush3.bf16.msra.mxu1 %v19085_v55  ;;  %15355 = vmatprep.mubr.bf16.mxu1 %v6762_v50  ;;  %v19122_v11 = vld [vmem:[#allocation5 + $0x14b0] sm:$0xff]   ;;  %v19156_v50 = vld [vmem:[#allocation5 + $0x1568] sm:$0xff]  }
 0x819   :  { %v17620_v2 = vpop.f32.mrf.mxu0  ;;  %v17640_v24 = vpop.f32.mrf.mxu1  ;;  %17933 = vmatprep.subr.bf16.mxu1 %v19088_v12 }
 0x81a   :  { %v14758_v20 = vadd.f32 %v17619_v36, %v23005_v39  ;;  %v17641_v10 = vadd.f32 %v17640_v24, %v17639_v53  ;;  %17912 = vmatpush3.bf16.msra.mxu0 %v19087_v27  ;;  %v19100_v39 = vld [vmem:[#allocation5 + $0x13d8] sm:$0xff]   ;;  %v19124_v53 = vld [vmem:[#allocation5 + $0x1428] sm:$0xff]  }
 0x81b   :  { %v17621_v22 = vpop.f32.mrf.mxu0  ;;  %v17642_v8 = vpop.f32.mrf.mxu1  ;;  %17913 = vmatprep.subr.bf16.mxu0 %v19090_v49  ;;  %v19125_v36 = vld [vmem:[#allocation5 + $0x14e8] sm:$0xff]   ;;  %v19127_v49 = vld [vmem:[#allocation5 + $0x1460] sm:$0xff]  }
 0x81c   :  { %v23010_v52 = vadd.f32 %v17641_v10, %v14758_v20  ;;  %17934 = vmatpush3.bf16.msra.mxu1 %v19089_v19  ;;  %v19126_v24 = vld [vmem:[#allocation5 + $0x14a8] sm:$0xff]   ;;  %v19128_v10 = vld [vmem:[#allocation5 + $0x1420] sm:$0xff]   ;;  %v19132_v8 = vld [vmem:[#allocation5 + $0x1418] sm:$0xff]  }
 0x81d   :  { %v17643_v56 = vpop.f32.mrf.mxu1  ;;  %17935 = vmatprep.subr.bf16.mxu1 %v19092_v37  ;;  %v19130_v22 = vld [vmem:[#allocation5 + $0x14a0] sm:$0xff]   ;;  %v19131_v37 = vld [vmem:[#allocation5 + $0x1458] sm:$0xff]  }
 0x81e   :  { %17914 = vmatpush3.bf16.msra.mxu0 %v19091_v21  ;;  %v19129_v21 = vld [vmem:[#allocation5 + $0x14e0] sm:$0xff]   ;;  %v19136_v56 = vld [vmem:[#allocation5 + $0x1410] sm:$0xff]  }
 0x81f   :  { %17915 = vmatprep.subr.bf16.mxu0 %v19094_v43  ;;  %v19135_v43 = vld [vmem:[#allocation5 + $0x1450] sm:$0xff]  }
 0x820   :  { %17936 = vmatpush3.bf16.msra.mxu1 %v19093_v41  ;;  %v19134_v41 = vld [vmem:[#allocation5 + $0x1498] sm:$0xff]  }
 0x821   :  { %17937 = vmatprep.subr.bf16.mxu1 %v19096_v29  ;;  %v19138_v29 = vld [vmem:[#allocation5 + $0x1490] sm:$0xff]  }
 0x822   :  { %17916 = vmatpush3.bf16.msra.mxu0 %v19095_v30  ;;  %v19137_v30 = vld [vmem:[#allocation5 + $0x14d0] sm:$0xff]  }
 0x823   :  { %17917 = vmatprep.subr.bf16.mxu0 %v19098_v48  ;;  %v19140_v48 = vld [vmem:[#allocation5 + $0x1408] sm:$0xff]  }
 0x824   :  { %17938 = vmatpush3.bf16.msra.mxu1 %v19097_v63  ;;  %v19139_v63 = vld [vmem:[#allocation5 + $0x1448] sm:$0xff]  }
 0x825   :  { %17939 = vmatprep.subr.bf16.mxu1 %v19100_v39  ;;  %v19142_v39 = vld [vmem:[#allocation5 + $0x1488] sm:$0xff]  }
 0x826   :  { %17918 = vmatpush3.bf16.msra.mxu0 %v19099_v54  ;;  %v19141_v54 = vld [vmem:[#allocation5 + $0x14c8] sm:$0xff]  }
 0x827   :  { %17919 = vmatprep.subr.bf16.mxu0 %v19102_v58  ;;  %v19144_v58 = vld [vmem:[#allocation5 + $0x1400] sm:$0xff]  }
 0x828   :  { %17940 = vmatpush3.bf16.msra.mxu1 %v19101_v9  ;;  %v19143_v9 = vld [vmem:[#allocation5 + $0x1440] sm:$0xff]  }
 0x829   :  { %17941 = vmatprep.subr.bf16.mxu1 %v19104_v61  ;;  %v6072_v61 = vld [vmem:[#allocation4 + $0xa0] sm:$0xff] }
 0x82a   :  { %17920 = vmatpush3.bf16.msra.mxu0 %v19103_v26  ;;  %v19145_v26 = vld [vmem:[#allocation5 + $0x14c0] sm:$0xff]  }
 0x82b   :  { %17921 = vmatprep.subr.bf16.mxu0 %v19106_v14  ;;  %v19146_v14 = vld [vmem:[#allocation5 + $0x1480] sm:$0xff]  }
 0x82c   :  { %17942 = vmatpush3.bf16.msra.mxu1 %v19105_v15  ;;  %v6455_v15 = vrot.slane %v6072_v61, %v22934_v5 }
 0x82d   :  { %17943 = vmatprep.subr.bf16.mxu1 %v19108_v46  ;;  %v19147_v46 = vld [vmem:[#allocation5 + $0x1578] sm:$0xff]  }
 0x82e   :  { %17922 = vmatpush3.bf16.msra.mxu0 %v19107_v51  ;;  %v6448_v51 = vcombine.high %v6072_v61, %v6072_v61  ;;  %v19183_v61 = vld [vmem:[#allocation5 + $0x16f8] sm:$0xff]  }
 0x82f   :  { %17923 = vmatprep.subr.bf16.mxu0 %v19110_v13 }
 0x830   :  { %17944 = vmatpush3.bf16.msra.mxu1 %v19109_v23  ;;  %v6463_v23 = vcombine.high %v6455_v15, %v6455_v15  ;;  %v6462_v13 = vrot.slane %v6448_v51, %v22934_v5  ;;  %v19184_v51 = vld [vmem:[#allocation5 + $0x16b8] sm:$0xff]  }
 0x831   :  { %17945 = vmatprep.subr.bf16.mxu1 %v19112_v1  ;;  %v6763_v1 = vpack.c.bf16 %v6455_v15, %v6455_v15 }
 0x832   :  { %17924 = vmatpush3.bf16.msra.mxu0 %v19111_v25  ;;  %v19149_v25 = vld [vmem:[#allocation5 + $0x1538] sm:$0xff]   ;;  %v6764_v3 = vpack.c.bf16 %v6463_v23, %v6463_v23  ;;  %v6765_v60 = vpack.c.bf16 %v6462_v13, %v6462_v13 }
 0x833   :  { %17953 = vmatprep.subr.bf16.mxu0 %v19114_v32 }
 0x834   :  { %17946 = vmatpush3.bf16.msra.mxu1 %v19113_v35  ;;  %v6464_v35 = vcombine.high %v6462_v13, %v6462_v13  ;;  %v19185_v13 = vld [vmem:[#allocation5 + $0x1670] sm:$0xff]  }
 0x835   :  { %v17661_v34 = vpop.f32.mrf.mxu0  ;;  %15316 = vmatmul.mubr.bf16.vlgmr.msra.gmra.mxu0 %v6759_v4  ;;  %17975 = vmatprep.subr.bf16.mxu1 %v19117_v7  ;;  %v19153_v4 = vld [vmem:[#allocation5 + $0x1530] sm:$0xff]  }
 0x836   :  { %17954 = vmatpush3.bf16.msra.mxu0 %v19116_v31  ;;  %15395 = vmatprep.mubr.bf16.mxu0 %v6764_v3  ;;  %v6766_v31 = vpack.c.bf16 %v6464_v35, %v6464_v35  ;;  %v19187_v35 = vld [vmem:[#allocation5 + $0x16f0] sm:$0xff]  }
 0x837   :  { %v17662_v18 = vpop.f32.mrf.mxu0  ;;  %v17683_v17 = vpop.f32.mrf.mxu1  ;;  %15356 = vmatmul.mubr.bf16.vlgmr.msra.gmra.mxu1 %v6761_v16  ;;  %17955 = vmatprep.subr.bf16.mxu0 %v19119_v0 }
 0x838   :  { %v17663_v55 = vadd.f32 %v17662_v18, %v17661_v34  ;;  %17976 = vmatpush3.bf16.msra.mxu1 %v19118_v44  ;;  %15435 = vmatprep.mubr.bf16.mxu1 %v6766_v31  ;;  %v19155_v34 = vld [vmem:[#allocation5 + $0x15b0] sm:$0xff]   ;;  %v19189_v31 = vld [vmem:[#allocation5 + $0x1668] sm:$0xff]  }
 0x839   :  { %v17664_v42 = vpop.f32.mrf.mxu0  ;;  %v17684_v33 = vpop.f32.mrf.mxu1  ;;  %17977 = vmatprep.subr.bf16.mxu1 %v19121_v62 }
 0x83a   :  { %v14838_v27 = vadd.f32 %v17663_v55, %v23010_v52  ;;  %v17685_v38 = vadd.f32 %v17684_v33, %v17683_v17  ;;  %17956 = vmatpush3.bf16.msra.mxu0 %v19120_v47  ;;  %v19133_v52 = vld [vmem:[#allocation5 + $0x14d8] sm:$0xff]   ;;  %v19157_v17 = vld [vmem:[#allocation5 + $0x1528] sm:$0xff]  }
 0x83b   :  { %v17665_v12 = vpop.f32.mrf.mxu0  ;;  %v17686_v19 = vpop.f32.mrf.mxu1  ;;  %17957 = vmatprep.subr.bf16.mxu0 %v19123_v6  ;;  %v19158_v55 = vld [vmem:[#allocation5 + $0x15e8] sm:$0xff]   ;;  %v19160_v6 = vld [vmem:[#allocation5 + $0x1560] sm:$0xff]  }
 0x83c   :  { %v23015_v2 = vadd.f32 %v17685_v38, %v14838_v27  ;;  %17978 = vmatpush3.bf16.msra.mxu1 %v19122_v11  ;;  %v19159_v33 = vld [vmem:[#allocation5 + $0x15a8] sm:$0xff]   ;;  %v19161_v38 = vld [vmem:[#allocation5 + $0x1520] sm:$0xff]   ;;  %v19165_v19 = vld [vmem:[#allocation5 + $0x1518] sm:$0xff]  }
 0x83d   :  { %v17687_v20 = vpop.f32.mrf.mxu1  ;;  %17979 = vmatprep.subr.bf16.mxu1 %v19125_v36  ;;  %v19163_v12 = vld [vmem:[#allocation5 + $0x15a0] sm:$0xff]   ;;  %v19164_v36 = vld [vmem:[#allocation5 + $0x1558] sm:$0xff]  }
 0x83e   :  { %17958 = vmatpush3.bf16.msra.mxu0 %v19124_v53  ;;  %v19162_v53 = vld [vmem:[#allocation5 + $0x15e0] sm:$0xff]   ;;  %v19169_v20 = vld [vmem:[#allocation5 + $0x1510] sm:$0xff]  }
 0x83f   :  { %17959 = vmatprep.subr.bf16.mxu0 %v19127_v49  ;;  %v19168_v49 = vld [vmem:[#allocation5 + $0x1550] sm:$0xff]  }
 0x840   :  { %17980 = vmatpush3.bf16.msra.mxu1 %v19126_v24  ;;  %v19167_v24 = vld [vmem:[#allocation5 + $0x1598] sm:$0xff]  }
 0x841   :  { %17981 = vmatprep.subr.bf16.mxu1 %v19129_v21  ;;  %v19171_v21 = vld [vmem:[#allocation5 + $0x1590] sm:$0xff]  }
 0x842   :  { %17960 = vmatpush3.bf16.msra.mxu0 %v19128_v10  ;;  %v19170_v10 = vld [vmem:[#allocation5 + $0x15d0] sm:$0xff]  }
 0x843   :  { %17961 = vmatprep.subr.bf16.mxu0 %v19131_v37  ;;  %v19173_v37 = vld [vmem:[#allocation5 + $0x1508] sm:$0xff]  }
 0x844   :  { %17982 = vmatpush3.bf16.msra.mxu1 %v19130_v22  ;;  %v19172_v22 = vld [vmem:[#allocation5 + $0x1548] sm:$0xff]  }
 0x845   :  { %17983 = vmatprep.subr.bf16.mxu1 %v19133_v52  ;;  %v19175_v52 = vld [vmem:[#allocation5 + $0x1588] sm:$0xff]  }
 0x846   :  { %17962 = vmatpush3.bf16.msra.mxu0 %v19132_v8  ;;  %v19174_v8 = vld [vmem:[#allocation5 + $0x15c8] sm:$0xff]  }
 0x847   :  { %17963 = vmatprep.subr.bf16.mxu0 %v19135_v43  ;;  %v19177_v43 = vld [vmem:[#allocation5 + $0x1500] sm:$0xff]  }
 0x848   :  { %17984 = vmatpush3.bf16.msra.mxu1 %v19134_v41  ;;  %v19176_v41 = vld [vmem:[#allocation5 + $0x1540] sm:$0xff]  }
 0x849   :  { %17985 = vmatprep.subr.bf16.mxu1 %v19137_v30  ;;  %v6073_v30 = vld [vmem:[#allocation4 + $0xa8] sm:$0xff] }
 0x84a   :  { %17964 = vmatpush3.bf16.msra.mxu0 %v19136_v56  ;;  %v19178_v56 = vld [vmem:[#allocation5 + $0x15c0] sm:$0xff]  }
 0x84b   :  { %17965 = vmatprep.subr.bf16.mxu0 %v19139_v63  ;;  %v19179_v63 = vld [vmem:[#allocation5 + $0x1580] sm:$0xff]  }
 0x84c   :  { %17986 = vmatpush3.bf16.msra.mxu1 %v19138_v29  ;;  %v6472_v29 = vrot.slane %v6073_v30, %v22934_v5 }
 0x84d   :  { %17987 = vmatprep.subr.bf16.mxu1 %v19141_v54  ;;  %v19180_v54 = vld [vmem:[#allocation5 + $0x1678] sm:$0xff]  }
 0x84e   :  { %17966 = vmatpush3.bf16.msra.mxu0 %v19140_v48  ;;  %v6465_v48 = vcombine.high %v6073_v30, %v6073_v30  ;;  %v19216_v30 = vld [vmem:[#allocation5 + $0x17f8] sm:$0xff]  }
 0x84f   :  { %17967 = vmatprep.subr.bf16.mxu0 %v19143_v9 }
 0x850   :  { %17988 = vmatpush3.bf16.msra.mxu1 %v19142_v39  ;;  %v6480_v39 = vcombine.high %v6472_v29, %v6472_v29  ;;  %v6479_v9 = vrot.slane %v6465_v48, %v22934_v5  ;;  %v19217_v48 = vld [vmem:[#allocation5 + $0x17b8] sm:$0xff]  }
 0x851   :  { %17989 = vmatprep.subr.bf16.mxu1 %v19145_v26  ;;  %v6767_v26 = vpack.c.bf16 %v6472_v29, %v6472_v29 }
 0x852   :  { %17968 = vmatpush3.bf16.msra.mxu0 %v19144_v58  ;;  %v19182_v58 = vld [vmem:[#allocation5 + $0x1638] sm:$0xff]   ;;  %v6768_v15 = vpack.c.bf16 %v6480_v39, %v6480_v39  ;;  %v6769_v23 = vpack.c.bf16 %v6479_v9, %v6479_v9 }
 0x853   :  { %17997 = vmatprep.subr.bf16.mxu0 %v19147_v46 }
 0x854   :  { %17990 = vmatpush3.bf16.msra.mxu1 %v19146_v14  ;;  %v6481_v14 = vcombine.high %v6479_v9, %v6479_v9  ;;  %v19218_v9 = vld [vmem:[#allocation5 + $0x1770] sm:$0xff]  }
 0x855   :  { %v17705_v32 = vpop.f32.mrf.mxu0  ;;  %18019 = vmatprep.subr.bf16.mxu1 %v19150_v28  ;;  %15396 = vmatmul.mubr.bf16.vlgmr.msra.gmra.mxu0 %v6763_v1  ;;  %v19186_v1 = vld [vmem:[#allocation5 + $0x1630] sm:$0xff]  }
 0x856   :  { %17998 = vmatpush3.bf16.msra.mxu0 %v19149_v25  ;;  %15475 = vmatprep.mubr.bf16.mxu0 %v6768_v15  ;;  %v6770_v25 = vpack.c.bf16 %v6481_v14, %v6481_v14  ;;  %v19220_v14 = vld [vmem:[#allocation5 + $0x17f0] sm:$0xff]  }
 0x857   :  { %v17706_v7 = vpop.f32.mrf.mxu0  ;;  %v17727_v59 = vpop.f32.mrf.mxu1  ;;  %15436 = vmatmul.mubr.bf16.vlgmr.msra.gmra.mxu1 %v6765_v60  ;;  %17999 = vmatprep.subr.bf16.mxu0 %v19152_v40 }
 0x858   :  { %v17707_v44 = vadd.f32 %v17706_v7, %v17705_v32  ;;  %18020 = vmatpush3.bf16.msra.mxu1 %v19151_v45  ;;  %15515 = vmatprep.mubr.bf16.mxu1 %v6770_v25  ;;  %v19188_v32 = vld [vmem:[#allocation5 + $0x16b0] sm:$0xff]   ;;  %v19222_v25 = vld [vmem:[#allocation5 + $0x1768] sm:$0xff]  }
 0x859   :  { %v17708_v16 = vpop.f32.mrf.mxu0  ;;  %v17728_v0 = vpop.f32.mrf.mxu1  ;;  %18021 = vmatprep.subr.bf16.mxu1 %v19154_v57 }
 0x85a   :  { %v14918_v47 = vadd.f32 %v17707_v44, %v23015_v2  ;;  %v17729_v18 = vadd.f32 %v17728_v0, %v17727_v59  ;;  %18000 = vmatpush3.bf16.msra.mxu0 %v19153_v4  ;;  %v19166_v2 = vld [vmem:[#allocation5 + $0x15d8] sm:$0xff]   ;;  %v19190_v59 = vld [vmem:[#allocation5 + $0x1628] sm:$0xff]  }
 0x85b   :  { %v17709_v62 = vpop.f32.mrf.mxu0  ;;  %v17730_v11 = vpop.f32.mrf.mxu1  ;;  %18001 = vmatprep.subr.bf16.mxu0 %v19156_v50  ;;  %v19191_v44 = vld [vmem:[#allocation5 + $0x16e8] sm:$0xff]   ;;  %v19193_v50 = vld [vmem:[#allocation5 + $0x1660] sm:$0xff]  }
 0x85c   :  { %v23020_v42 = vadd.f32 %v17729_v18, %v14918_v47  ;;  %18022 = vmatpush3.bf16.msra.mxu1 %v19155_v34  ;;  %v19192_v0 = vld [vmem:[#allocation5 + $0x16a8] sm:$0xff]   ;;  %v19194_v18 = vld [vmem:[#allocation5 + $0x1620] sm:$0xff]   ;;  %v19198_v11 = vld [vmem:[#allocation5 + $0x1618] sm:$0xff]  }
 0x85d   :  { %v17731_v27 = vpop.f32.mrf.mxu1  ;;  %18023 = vmatprep.subr.bf16.mxu1 %v19158_v55  ;;  %v19196_v62 = vld [vmem:[#allocation5 + $0x16a0] sm:$0xff]   ;;  %v19197_v55 = vld [vmem:[#allocation5 + $0x1658] sm:$0xff]  }
 0x85e   :  { %18002 = vmatpush3.bf16.msra.mxu0 %v19157_v17  ;;  %v19195_v17 = vld [vmem:[#allocation5 + $0x16e0] sm:$0xff]   ;;  %v19202_v27 = vld [vmem:[#allocation5 + $0x1610] sm:$0xff]  }
 0x85f   :  { %18003 = vmatprep.subr.bf16.mxu0 %v19160_v6  ;;  %v19201_v6 = vld [vmem:[#allocation5 + $0x1650] sm:$0xff]  }
 0x860   :  { %18024 = vmatpush3.bf16.msra.mxu1 %v19159_v33  ;;  %v19200_v33 = vld [vmem:[#allocation5 + $0x1698] sm:$0xff]  }
 0x861   :  { %18025 = vmatprep.subr.bf16.mxu1 %v19162_v53  ;;  %v19204_v53 = vld [vmem:[#allocation5 + $0x1690] sm:$0xff]  }
 0x862   :  { %18004 = vmatpush3.bf16.msra.mxu0 %v19161_v38  ;;  %v19203_v38 = vld [vmem:[#allocation5 + $0x16d0] sm:$0xff]  }
 0x863   :  { %18005 = vmatprep.subr.bf16.mxu0 %v19164_v36  ;;  %v19206_v36 = vld [vmem:[#allocation5 + $0x1608] sm:$0xff]  }
 0x864   :  { %18026 = vmatpush3.bf16.msra.mxu1 %v19163_v12  ;;  %v19205_v12 = vld [vmem:[#allocation5 + $0x1648] sm:$0xff]  }
 0x865   :  { %18027 = vmatprep.subr.bf16.mxu1 %v19166_v2  ;;  %v19208_v2 = vld [vmem:[#allocation5 + $0x1688] sm:$0xff]  }
 0x866   :  { %18006 = vmatpush3.bf16.msra.mxu0 %v19165_v19  ;;  %v19207_v19 = vld [vmem:[#allocation5 + $0x16c8] sm:$0xff]  }
 0x867   :  { %18007 = vmatprep.subr.bf16.mxu0 %v19168_v49  ;;  %v19210_v49 = vld [vmem:[#allocation5 + $0x1600] sm:$0xff]  }
 0x868   :  { %18028 = vmatpush3.bf16.msra.mxu1 %v19167_v24  ;;  %v19209_v24 = vld [vmem:[#allocation5 + $0x1640] sm:$0xff]  }
 0x869   :  { %18029 = vmatprep.subr.bf16.mxu1 %v19170_v10  ;;  %v6074_v10 = vld [vmem:[#allocation4 + $0xb0] sm:$0xff] }
 0x86a   :  { %18008 = vmatpush3.bf16.msra.mxu0 %v19169_v20  ;;  %v19211_v20 = vld [vmem:[#allocation5 + $0x16c0] sm:$0xff]  }
 0x86b   :  { %18009 = vmatprep.subr.bf16.mxu0 %v19172_v22  ;;  %v19212_v22 = vld [vmem:[#allocation5 + $0x1680] sm:$0xff]  }
 0x86c   :  { %18030 = vmatpush3.bf16.msra.mxu1 %v19171_v21  ;;  %v6489_v21 = vrot.slane %v6074_v10, %v22934_v5 }
 0x86d   :  { %18031 = vmatprep.subr.bf16.mxu1 %v19174_v8  ;;  %v19213_v8 = vld [vmem:[#allocation5 + $0x1778] sm:$0xff]  }
 0x86e   :  { %18010 = vmatpush3.bf16.msra.mxu0 %v19173_v37  ;;  %v6482_v37 = vcombine.high %v6074_v10, %v6074_v10  ;;  %v19249_v10 = vld [vmem:[#allocation5 + $0x18f8] sm:$0xff]  }
 0x86f   :  { %18011 = vmatprep.subr.bf16.mxu0 %v19176_v41 }
 0x870   :  { %18032 = vmatpush3.bf16.msra.mxu1 %v19175_v52  ;;  %v6497_v52 = vcombine.high %v6489_v21, %v6489_v21  ;;  %v6496_v41 = vrot.slane %v6482_v37, %v22934_v5  ;;  %v19250_v37 = vld [vmem:[#allocation5 + $0x18b8] sm:$0xff]  }
 0x871   :  { %18033 = vmatprep.subr.bf16.mxu1 %v19178_v56  ;;  %v6771_v56 = vpack.c.bf16 %v6489_v21, %v6489_v21 }
 0x872   :  { %18012 = vmatpush3.bf16.msra.mxu0 %v19177_v43  ;;  %v19215_v43 = vld [vmem:[#allocation5 + $0x1738] sm:$0xff]   ;;  %v6772_v29 = vpack.c.bf16 %v6497_v52, %v6497_v52  ;;  %v6773_v39 = vpack.c.bf16 %v6496_v41, %v6496_v41 }
 0x873   :  { %18041 = vmatprep.subr.bf16.mxu0 %v19180_v54 }
 0x874   :  { %18034 = vmatpush3.bf16.msra.mxu1 %v19179_v63  ;;  %v6498_v63 = vcombine.high %v6496_v41, %v6496_v41  ;;  %v19251_v41 = vld [vmem:[#allocation5 + $0x1870] sm:$0xff]  }
 0x875   :  { %v17749_v46 = vpop.f32.mrf.mxu0  ;;  %15476 = vmatmul.mubr.bf16.vlgmr.msra.gmra.mxu0 %v6767_v26  ;;  %18063 = vmatprep.subr.bf16.mxu1 %v19183_v61  ;;  %v19219_v26 = vld [vmem:[#allocation5 + $0x1730] sm:$0xff]  }
 0x876   :  { %18042 = vmatpush3.bf16.msra.mxu0 %v19182_v58  ;;  %15555 = vmatprep.mubr.bf16.mxu0 %v6772_v29  ;;  %v6774_v58 = vpack.c.bf16 %v6498_v63, %v6498_v63  ;;  %v19253_v63 = vld [vmem:[#allocation5 + $0x18f0] sm:$0xff]  }
 0x877   :  { %v17750_v28 = vpop.f32.mrf.mxu0  ;;  %v17771_v3 = vpop.f32.mrf.mxu1  ;;  %15516 = vmatmul.mubr.bf16.vlgmr.msra.gmra.mxu1 %v6769_v23  ;;  %18043 = vmatprep.subr.bf16.mxu0 %v19185_v13 }
 0x878   :  { %v17751_v45 = vadd.f32 %v17750_v28, %v17749_v46  ;;  %18064 = vmatpush3.bf16.msra.mxu1 %v19184_v51  ;;  %15595 = vmatprep.mubr.bf16.mxu1 %v6774_v58  ;;  %v19221_v46 = vld [vmem:[#allocation5 + $0x17b0] sm:$0xff]   ;;  %v19255_v58 = vld [vmem:[#allocation5 + $0x1868] sm:$0xff]  }
 0x879   :  { %v17752_v60 = vpop.f32.mrf.mxu0  ;;  %v17772_v40 = vpop.f32.mrf.mxu1  ;;  %18065 = vmatprep.subr.bf16.mxu1 %v19187_v35 }
 0x87a   :  { %v14998_v4 = vadd.f32 %v17751_v45, %v23020_v42  ;;  %v17773_v7 = vadd.f32 %v17772_v40, %v17771_v3  ;;  %18044 = vmatpush3.bf16.msra.mxu0 %v19186_v1  ;;  %v19199_v42 = vld [vmem:[#allocation5 + $0x16d8] sm:$0xff]   ;;  %v19223_v3 = vld [vmem:[#allocation5 + $0x1728] sm:$0xff]  }
 0x87b   :  { %v17753_v57 = vpop.f32.mrf.mxu0  ;;  %v17774_v34 = vpop.f32.mrf.mxu1  ;;  %18045 = vmatprep.subr.bf16.mxu0 %v19189_v31  ;;  %v19224_v45 = vld [vmem:[#allocation5 + $0x17e8] sm:$0xff]   ;;  %v19226_v31 = vld [vmem:[#allocation5 + $0x1760] sm:$0xff]  }
 0x87c   :  { %v23025_v16 = vadd.f32 %v17773_v7, %v14998_v4  ;;  %18066 = vmatpush3.bf16.msra.mxu1 %v19188_v32  ;;  %v19225_v40 = vld [vmem:[#allocation5 + $0x17a8] sm:$0xff]   ;;  %v19227_v7 = vld [vmem:[#allocation5 + $0x1720] sm:$0xff]   ;;  %v19231_v34 = vld [vmem:[#allocation5 + $0x1718] sm:$0xff]  }
 0x87d   :  { %v17775_v47 = vpop.f32.mrf.mxu1  ;;  %18067 = vmatprep.subr.bf16.mxu1 %v19191_v44  ;;  %v19229_v57 = vld [vmem:[#allocation5 + $0x17a0] sm:$0xff]   ;;  %v19230_v44 = vld [vmem:[#allocation5 + $0x1758] sm:$0xff]  }
 0x87e   :  { %18046 = vmatpush3.bf16.msra.mxu0 %v19190_v59  ;;  %v19228_v59 = vld [vmem:[#allocation5 + $0x17e0] sm:$0xff]   ;;  %v19235_v47 = vld [vmem:[#allocation5 + $0x1710] sm:$0xff]  }
 0x87f   :  { %18047 = vmatprep.subr.bf16.mxu0 %v19193_v50  ;;  %v19234_v50 = vld [vmem:[#allocation5 + $0x1750] sm:$0xff]  }
 0x880   :  { %18068 = vmatpush3.bf16.msra.mxu1 %v19192_v0  ;;  %v19233_v0 = vld [vmem:[#allocation5 + $0x1798] sm:$0xff]  }
 0x881   :  { %18069 = vmatprep.subr.bf16.mxu1 %v19195_v17  ;;  %v19237_v17 = vld [vmem:[#allocation5 + $0x1790] sm:$0xff]  }
 0x882   :  { %18048 = vmatpush3.bf16.msra.mxu0 %v19194_v18  ;;  %v19236_v18 = vld [vmem:[#allocation5 + $0x17d0] sm:$0xff]  }
 0x883   :  { %18049 = vmatprep.subr.bf16.mxu0 %v19197_v55  ;;  %v19239_v55 = vld [vmem:[#allocation5 + $0x1708] sm:$0xff]  }
 0x884   :  { %18070 = vmatpush3.bf16.msra.mxu1 %v19196_v62  ;;  %v19238_v62 = vld [vmem:[#allocation5 + $0x1748] sm:$0xff]  }
 0x885   :  { %18071 = vmatprep.subr.bf16.mxu1 %v19199_v42  ;;  %v19241_v42 = vld [vmem:[#allocation5 + $0x1788] sm:$0xff]  }
 0x886   :  { %18050 = vmatpush3.bf16.msra.mxu0 %v19198_v11  ;;  %v19240_v11 = vld [vmem:[#allocation5 + $0x17c8] sm:$0xff]  }
 0x887   :  { %18051 = vmatprep.subr.bf16.mxu0 %v19201_v6  ;;  %v19243_v6 = vld [vmem:[#allocation5 + $0x1700] sm:$0xff]  }
 0x888   :  { %18072 = vmatpush3.bf16.msra.mxu1 %v19200_v33  ;;  %v19242_v33 = vld [vmem:[#allocation5 + $0x1740] sm:$0xff]  }
 0x889   :  { %18073 = vmatprep.subr.bf16.mxu1 %v19203_v38  ;;  %v6075_v38 = vld [vmem:[#allocation4 + $0xb8] sm:$0xff] }
 0x88a   :  { %18052 = vmatpush3.bf16.msra.mxu0 %v19202_v27  ;;  %v19244_v27 = vld [vmem:[#allocation5 + $0x17c0] sm:$0xff]  }
 0x88b   :  { %18053 = vmatprep.subr.bf16.mxu0 %v19205_v12  ;;  %v19245_v12 = vld [vmem:[#allocation5 + $0x1780] sm:$0xff]  }
 0x88c   :  { %18074 = vmatpush3.bf16.msra.mxu1 %v19204_v53  ;;  %v6506_v53 = vrot.slane %v6075_v38, %v22934_v5 }
 0x88d   :  { %18075 = vmatprep.subr.bf16.mxu1 %v19207_v19  ;;  %v19246_v19 = vld [vmem:[#allocation5 + $0x1878] sm:$0xff]  }
 0x88e   :  { %18054 = vmatpush3.bf16.msra.mxu0 %v19206_v36  ;;  %v6499_v36 = vcombine.high %v6075_v38, %v6075_v38  ;;  %v19282_v38 = vld [vmem:[#allocation5 + $0x19f8] sm:$0xff]  }
 0x88f   :  { %18055 = vmatprep.subr.bf16.mxu0 %v19209_v24 }
 0x890   :  { %18076 = vmatpush3.bf16.msra.mxu1 %v19208_v2  ;;  %v6514_v2 = vcombine.high %v6506_v53, %v6506_v53  ;;  %v6513_v24 = vrot.slane %v6499_v36, %v22934_v5  ;;  %v19283_v36 = vld [vmem:[#allocation5 + $0x19b8] sm:$0xff]  }
 0x891   :  { %18077 = vmatprep.subr.bf16.mxu1 %v19211_v20  ;;  %v6775_v20 = vpack.c.bf16 %v6506_v53, %v6506_v53 }
 0x892   :  { %18056 = vmatpush3.bf16.msra.mxu0 %v19210_v49  ;;  %v19248_v49 = vld [vmem:[#allocation5 + $0x1838] sm:$0xff]   ;;  %v6776_v21 = vpack.c.bf16 %v6514_v2, %v6514_v2  ;;  %v6777_v52 = vpack.c.bf16 %v6513_v24, %v6513_v24 }
 0x893   :  { %18085 = vmatprep.subr.bf16.mxu0 %v19213_v8 }
 0x894   :  { %18078 = vmatpush3.bf16.msra.mxu1 %v19212_v22  ;;  %v6515_v22 = vcombine.high %v6513_v24, %v6513_v24  ;;  %v19284_v24 = vld [vmem:[#allocation5 + $0x1970] sm:$0xff]  }
 0x895   :  { %v17793_v54 = vpop.f32.mrf.mxu0  ;;  %15556 = vmatmul.mubr.bf16.vlgmr.msra.gmra.mxu0 %v6771_v56  ;;  %18107 = vmatprep.subr.bf16.mxu1 %v19216_v30  ;;  %v19252_v56 = vld [vmem:[#allocation5 + $0x1830] sm:$0xff]  }
 0x896   :  { %18086 = vmatpush3.bf16.msra.mxu0 %v19215_v43  ;;  %15635 = vmatprep.mubr.bf16.mxu0 %v6776_v21  ;;  %v6778_v43 = vpack.c.bf16 %v6515_v22, %v6515_v22  ;;  %v19286_v22 = vld [vmem:[#allocation5 + $0x19f0] sm:$0xff]  }
 0x897   :  { %v17794_v61 = vpop.f32.mrf.mxu0  ;;  %v17815_v15 = vpop.f32.mrf.mxu1  ;;  %15596 = vmatmul.mubr.bf16.vlgmr.msra.gmra.mxu1 %v6773_v39  ;;  %18087 = vmatprep.subr.bf16.mxu0 %v19218_v9 }
 0x898   :  { %v17795_v51 = vadd.f32 %v17794_v61, %v17793_v54  ;;  %18108 = vmatpush3.bf16.msra.mxu1 %v19217_v48  ;;  %15675 = vmatprep.mubr.bf16.mxu1 %v6778_v43  ;;  %v19254_v54 = vld [vmem:[#allocation5 + $0x18b0] sm:$0xff]   ;;  %v19288_v43 = vld [vmem:[#allocation5 + $0x1968] sm:$0xff]  }
 0x899   :  { %v17796_v23 = vpop.f32.mrf.mxu0  ;;  %v17816_v13 = vpop.f32.mrf.mxu1  ;;  %18109 = vmatprep.subr.bf16.mxu1 %v19220_v14 }
 0x89a   :  { %v15078_v1 = vadd.f32 %v17795_v51, %v23025_v16  ;;  %v17817_v28 = vadd.f32 %v17816_v13, %v17815_v15  ;;  %18088 = vmatpush3.bf16.msra.mxu0 %v19219_v26  ;;  %v19232_v16 = vld [vmem:[#allocation5 + $0x17d8] sm:$0xff]   ;;  %v19256_v15 = vld [vmem:[#allocation5 + $0x1828] sm:$0xff]  }
 0x89b   :  { %v17797_v35 = vpop.f32.mrf.mxu0  ;;  %v17818_v32 = vpop.f32.mrf.mxu1  ;;  %18089 = vmatprep.subr.bf16.mxu0 %v19222_v25  ;;  %v19257_v51 = vld [vmem:[#allocation5 + $0x18e8] sm:$0xff]   ;;  %v19259_v25 = vld [vmem:[#allocation5 + $0x1860] sm:$0xff]  }
 0x89c   :  { %v23030_v60 = vadd.f32 %v17817_v28, %v15078_v1  ;;  %18110 = vmatpush3.bf16.msra.mxu1 %v19221_v46  ;;  %v19258_v13 = vld [vmem:[#allocation5 + $0x18a8] sm:$0xff]   ;;  %v19260_v28 = vld [vmem:[#allocation5 + $0x1820] sm:$0xff]   ;;  %v19264_v32 = vld [vmem:[#allocation5 + $0x1818] sm:$0xff]  }
 0x89d   :  { %v17819_v4 = vpop.f32.mrf.mxu1  ;;  %18111 = vmatprep.subr.bf16.mxu1 %v19224_v45  ;;  %v19262_v35 = vld [vmem:[#allocation5 + $0x18a0] sm:$0xff]   ;;  %v19263_v45 = vld [vmem:[#allocation5 + $0x1858] sm:$0xff]  }
 0x89e   :  { %18090 = vmatpush3.bf16.msra.mxu0 %v19223_v3  ;;  %v19261_v3 = vld [vmem:[#allocation5 + $0x18e0] sm:$0xff]   ;;  %v19268_v4 = vld [vmem:[#allocation5 + $0x1810] sm:$0xff]  }
 0x89f   :  { %18091 = vmatprep.subr.bf16.mxu0 %v19226_v31  ;;  %v19267_v31 = vld [vmem:[#allocation5 + $0x1850] sm:$0xff]  }
 0x8a0   :  { %18112 = vmatpush3.bf16.msra.mxu1 %v19225_v40  ;;  %v19266_v40 = vld [vmem:[#allocation5 + $0x1898] sm:$0xff]  }
 0x8a1   :  { %18113 = vmatprep.subr.bf16.mxu1 %v19228_v59  ;;  %v19270_v59 = vld [vmem:[#allocation5 + $0x1890] sm:$0xff]  }
 0x8a2   :  { %18092 = vmatpush3.bf16.msra.mxu0 %v19227_v7  ;;  %v19269_v7 = vld [vmem:[#allocation5 + $0x18d0] sm:$0xff]  }
 0x8a3   :  { %18093 = vmatprep.subr.bf16.mxu0 %v19230_v44  ;;  %v19272_v44 = vld [vmem:[#allocation5 + $0x1808] sm:$0xff]  }
 0x8a4   :  { %18114 = vmatpush3.bf16.msra.mxu1 %v19229_v57  ;;  %v19271_v57 = vld [vmem:[#allocation5 + $0x1848] sm:$0xff]  }
 0x8a5   :  { %18115 = vmatprep.subr.bf16.mxu1 %v19232_v16  ;;  %v19274_v16 = vld [vmem:[#allocation5 + $0x1888] sm:$0xff]  }
 0x8a6   :  { %18094 = vmatpush3.bf16.msra.mxu0 %v19231_v34  ;;  %v19273_v34 = vld [vmem:[#allocation5 + $0x18c8] sm:$0xff]  }
 0x8a7   :  { %18095 = vmatprep.subr.bf16.mxu0 %v19234_v50  ;;  %v19276_v50 = vld [vmem:[#allocation5 + $0x1800] sm:$0xff]  }
 0x8a8   :  { %18116 = vmatpush3.bf16.msra.mxu1 %v19233_v0  ;;  %v19275_v0 = vld [vmem:[#allocation5 + $0x1840] sm:$0xff]  }
 0x8a9   :  { %18117 = vmatprep.subr.bf16.mxu1 %v19236_v18  ;;  %v6076_v18 = vld [vmem:[#allocation4 + $0xc0] sm:$0xff] }
 0x8aa   :  { %18096 = vmatpush3.bf16.msra.mxu0 %v19235_v47  ;;  %v19277_v47 = vld [vmem:[#allocation5 + $0x18c0] sm:$0xff]  }
 0x8ab   :  { %18097 = vmatprep.subr.bf16.mxu0 %v19238_v62  ;;  %v19278_v62 = vld [vmem:[#allocation5 + $0x1880] sm:$0xff]  }
 0x8ac   :  { %18118 = vmatpush3.bf16.msra.mxu1 %v19237_v17  ;;  %v6523_v17 = vrot.slane %v6076_v18, %v22934_v5 }
 0x8ad   :  { %18119 = vmatprep.subr.bf16.mxu1 %v19240_v11  ;;  %v19279_v11 = vld [vmem:[#allocation5 + $0x1978] sm:$0xff]  }
 0x8ae   :  { %18098 = vmatpush3.bf16.msra.mxu0 %v19239_v55  ;;  %v6516_v55 = vcombine.high %v6076_v18, %v6076_v18  ;;  %v19315_v18 = vld [vmem:[#allocation5 + $0x1af8] sm:$0xff]  }
 0x8af   :  { %18099 = vmatprep.subr.bf16.mxu0 %v19242_v33 }
 0x8b0   :  { %18120 = vmatpush3.bf16.msra.mxu1 %v19241_v42  ;;  %v6531_v42 = vcombine.high %v6523_v17, %v6523_v17  ;;  %v6530_v33 = vrot.slane %v6516_v55, %v22934_v5  ;;  %v19316_v55 = vld [vmem:[#allocation5 + $0x1ab8] sm:$0xff]  }
 0x8b1   :  { %18121 = vmatprep.subr.bf16.mxu1 %v19244_v27  ;;  %v6779_v27 = vpack.c.bf16 %v6523_v17, %v6523_v17 }
 0x8b2   :  { %18100 = vmatpush3.bf16.msra.mxu0 %v19243_v6  ;;  %v19281_v6 = vld [vmem:[#allocation5 + $0x1938] sm:$0xff]   ;;  %v6780_v53 = vpack.c.bf16 %v6531_v42, %v6531_v42  ;;  %v6781_v2 = vpack.c.bf16 %v6530_v33, %v6530_v33 }
 0x8b3   :  { %18129 = vmatprep.subr.bf16.mxu0 %v19246_v19 }
 0x8b4   :  { %18122 = vmatpush3.bf16.msra.mxu1 %v19245_v12  ;;  %v6532_v12 = vcombine.high %v6530_v33, %v6530_v33  ;;  %v19317_v33 = vld [vmem:[#allocation5 + $0x1a70] sm:$0xff]  }
 0x8b5   :  { %v17837_v8 = vpop.f32.mrf.mxu0  ;;  %18151 = vmatprep.subr.bf16.mxu1 %v19249_v10  ;;  %15636 = vmatmul.mubr.bf16.vlgmr.msra.gmra.mxu0 %v6775_v20  ;;  %v19285_v20 = vld [vmem:[#allocation5 + $0x1930] sm:$0xff]  }
 0x8b6   :  { %18130 = vmatpush3.bf16.msra.mxu0 %v19248_v49  ;;  %15715 = vmatprep.mubr.bf16.mxu0 %v6780_v53  ;;  %v6782_v49 = vpack.c.bf16 %v6532_v12, %v6532_v12  ;;  %v19319_v12 = vld [vmem:[#allocation5 + $0x1af0] sm:$0xff]  }
 0x8b7   :  { %v17838_v30 = vpop.f32.mrf.mxu0  ;;  %v17859_v29 = vpop.f32.mrf.mxu1  ;;  %15676 = vmatmul.mubr.bf16.vlgmr.msra.gmra.mxu1 %v6777_v52  ;;  %18131 = vmatprep.subr.bf16.mxu0 %v19251_v41 }
 0x8b8   :  { %v17839_v48 = vadd.f32 %v17838_v30, %v17837_v8  ;;  %18152 = vmatpush3.bf16.msra.mxu1 %v19250_v37  ;;  %15755 = vmatprep.mubr.bf16.mxu1 %v6782_v49  ;;  %v19287_v8 = vld [vmem:[#allocation5 + $0x19b0] sm:$0xff]   ;;  %v19321_v49 = vld [vmem:[#allocation5 + $0x1a68] sm:$0xff]  }
 0x8b9   :  { %v17840_v39 = vpop.f32.mrf.mxu0  ;;  %v17860_v9 = vpop.f32.mrf.mxu1  ;;  %18153 = vmatprep.subr.bf16.mxu1 %v19253_v63 }
 0x8ba   :  { %v15158_v26 = vadd.f32 %v17839_v48, %v23030_v60  ;;  %v17861_v61 = vadd.f32 %v17860_v9, %v17859_v29  ;;  %18132 = vmatpush3.bf16.msra.mxu0 %v19252_v56  ;;  %v19265_v60 = vld [vmem:[#allocation5 + $0x18d8] sm:$0xff]   ;;  %v19289_v29 = vld [vmem:[#allocation5 + $0x1928] sm:$0xff]  }
 0x8bb   :  { %v17841_v14 = vpop.f32.mrf.mxu0  ;;  %v17862_v46 = vpop.f32.mrf.mxu1  ;;  %18133 = vmatprep.subr.bf16.mxu0 %v19255_v58  ;;  %v19290_v48 = vld [vmem:[#allocation5 + $0x19e8] sm:$0xff]   ;;  %v19292_v58 = vld [vmem:[#allocation5 + $0x1960] sm:$0xff]  }
 0x8bc   :  { %v23035_v23 = vadd.f32 %v17861_v61, %v15158_v26  ;;  %18154 = vmatpush3.bf16.msra.mxu1 %v19254_v54  ;;  %v19291_v9 = vld [vmem:[#allocation5 + $0x19a8] sm:$0xff]   ;;  %v19293_v61 = vld [vmem:[#allocation5 + $0x1920] sm:$0xff]   ;;  %v19297_v46 = vld [vmem:[#allocation5 + $0x1918] sm:$0xff]  }
 0x8bd   :  { %v17863_v1 = vpop.f32.mrf.mxu1  ;;  %18155 = vmatprep.subr.bf16.mxu1 %v19257_v51  ;;  %v19295_v14 = vld [vmem:[#allocation5 + $0x19a0] sm:$0xff]   ;;  %v19296_v51 = vld [vmem:[#allocation5 + $0x1958] sm:$0xff]  }
 0x8be   :  { %18134 = vmatpush3.bf16.msra.mxu0 %v19256_v15  ;;  %v19294_v15 = vld [vmem:[#allocation5 + $0x19e0] sm:$0xff]   ;;  %v19301_v1 = vld [vmem:[#allocation5 + $0x1910] sm:$0xff]  }
 0x8bf   :  { %18135 = vmatprep.subr.bf16.mxu0 %v19259_v25  ;;  %v19300_v25 = vld [vmem:[#allocation5 + $0x1950] sm:$0xff]  }
 0x8c0   :  { %18156 = vmatpush3.bf16.msra.mxu1 %v19258_v13  ;;  %v19299_v13 = vld [vmem:[#allocation5 + $0x1998] sm:$0xff]  }
 0x8c1   :  { %18157 = vmatprep.subr.bf16.mxu1 %v19261_v3  ;;  %v19303_v3 = vld [vmem:[#allocation5 + $0x1990] sm:$0xff]  }
 0x8c2   :  { %18136 = vmatpush3.bf16.msra.mxu0 %v19260_v28  ;;  %v19302_v28 = vld [vmem:[#allocation5 + $0x19d0] sm:$0xff]  }
 0x8c3   :  { %18137 = vmatprep.subr.bf16.mxu0 %v19263_v45  ;;  %v19305_v45 = vld [vmem:[#allocation5 + $0x1908] sm:$0xff]  }
 0x8c4   :  { %18158 = vmatpush3.bf16.msra.mxu1 %v19262_v35  ;;  %v19304_v35 = vld [vmem:[#allocation5 + $0x1948] sm:$0xff]  }
 0x8c5   :  { %18159 = vmatprep.subr.bf16.mxu1 %v19265_v60  ;;  %v19307_v60 = vld [vmem:[#allocation5 + $0x1988] sm:$0xff]  }
 0x8c6   :  { %18138 = vmatpush3.bf16.msra.mxu0 %v19264_v32  ;;  %v19306_v32 = vld [vmem:[#allocation5 + $0x19c8] sm:$0xff]  }
 0x8c7   :  { %18139 = vmatprep.subr.bf16.mxu0 %v19267_v31  ;;  %v19309_v31 = vld [vmem:[#allocation5 + $0x1900] sm:$0xff]  }
 0x8c8   :  { %18160 = vmatpush3.bf16.msra.mxu1 %v19266_v40  ;;  %v19308_v40 = vld [vmem:[#allocation5 + $0x1940] sm:$0xff]  }
 0x8c9   :  { %18161 = vmatprep.subr.bf16.mxu1 %v19269_v7  ;;  %v6077_v7 = vld [vmem:[#allocation4 + $0xc8] sm:$0xff] }
 0x8ca   :  { %18140 = vmatpush3.bf16.msra.mxu0 %v19268_v4  ;;  %v19310_v4 = vld [vmem:[#allocation5 + $0x19c0] sm:$0xff]  }
 0x8cb   :  { %18141 = vmatprep.subr.bf16.mxu0 %v19271_v57  ;;  %v19311_v57 = vld [vmem:[#allocation5 + $0x1980] sm:$0xff]  }
 0x8cc   :  { %18162 = vmatpush3.bf16.msra.mxu1 %v19270_v59  ;;  %v6540_v59 = vrot.slane %v6077_v7, %v22934_v5 }
 0x8cd   :  { %18163 = vmatprep.subr.bf16.mxu1 %v19273_v34  ;;  %v19312_v34 = vld [vmem:[#allocation5 + $0x1a78] sm:$0xff]  }
 0x8ce   :  { %18142 = vmatpush3.bf16.msra.mxu0 %v19272_v44  ;;  %v6533_v44 = vcombine.high %v6077_v7, %v6077_v7 }
 0x8cf   :  { %18143 = vmatprep.subr.bf16.mxu0 %v19275_v0 }
 0x8d0   :  { %18164 = vmatpush3.bf16.msra.mxu1 %v19274_v16  ;;  %v6548_v16 = vcombine.high %v6540_v59, %v6540_v59  ;;  %v6547_v0 = vrot.slane %v6533_v44, %v22934_v5 }
 0x8d1   :  { %18165 = vmatprep.subr.bf16.mxu1 %v19277_v47  ;;  %v6783_v47 = vpack.c.bf16 %v6540_v59, %v6540_v59  ;;  %v19346_v59 = vld [vmem:[#allocation5 + $0x1b28] sm:$0xff]  }
 0x8d2   :  { %18144 = vmatpush3.bf16.msra.mxu0 %v19276_v50  ;;  %v19314_v50 = vld [vmem:[#allocation5 + $0x1a38] sm:$0xff]   ;;  %v6784_v17 = vpack.c.bf16 %v6548_v16, %v6548_v16  ;;  %v6785_v42 = vpack.c.bf16 %v6547_v0, %v6547_v0 }
 0x8d3   :  { %18173 = vmatprep.subr.bf16.mxu0 %v19279_v11 }
 0x8d4   :  { %18166 = vmatpush3.bf16.msra.mxu1 %v19278_v62  ;;  %v6549_v62 = vcombine.high %v6547_v0, %v6547_v0 }
 0x8d5   :  { %v17881_v19 = vpop.f32.mrf.mxu0  ;;  %15716 = vmatmul.mubr.bf16.vlgmr.msra.gmra.mxu0 %v6779_v27  ;;  %18195 = vmatprep.subr.bf16.mxu1 %v19282_v38  ;;  %v19318_v27 = vld [vmem:[#allocation5 + $0x1a30] sm:$0xff]  }
 0x8d6   :  { %18174 = vmatpush3.bf16.msra.mxu0 %v19281_v6  ;;  %15795 = vmatprep.mubr.bf16.mxu0 %v6784_v17  ;;  %v6786_v6 = vpack.c.bf16 %v6549_v62, %v6549_v62 }
 0x8d7   :  { %v17882_v10 = vpop.f32.mrf.mxu0  ;;  %v17903_v21 = vpop.f32.mrf.mxu1  ;;  %15756 = vmatmul.mubr.bf16.vlgmr.msra.gmra.mxu1 %v6781_v2  ;;  %18175 = vmatprep.subr.bf16.mxu0 %v19284_v24 }
 0x8d8   :  { %v17883_v37 = vadd.f32 %v17882_v10, %v17881_v19  ;;  %18196 = vmatpush3.bf16.msra.mxu1 %v19283_v36  ;;  %15835 = vmatprep.mubr.bf16.mxu1 %v6786_v6  ;;  %v19320_v19 = vld [vmem:[#allocation5 + $0x1ab0] sm:$0xff]  }
 0x8d9   :  { %v17884_v52 = vpop.f32.mrf.mxu0  ;;  %v17904_v41 = vpop.f32.mrf.mxu1  ;;  %18197 = vmatprep.subr.bf16.mxu1 %v19286_v22 }
 0x8da   :  { %v15238_v56 = vadd.f32 %v17883_v37, %v23035_v23  ;;  %v17905_v30 = vadd.f32 %v17904_v41, %v17903_v21  ;;  %18176 = vmatpush3.bf16.msra.mxu0 %v19285_v20  ;;  %v19298_v23 = vld [vmem:[#allocation5 + $0x19d8] sm:$0xff]   ;;  %v19322_v21 = vld [vmem:[#allocation5 + $0x1a28] sm:$0xff]  }
 0x8db   :  { %v17885_v63 = vpop.f32.mrf.mxu0  ;;  %v17906_v54 = vpop.f32.mrf.mxu1  ;;  %18177 = vmatprep.subr.bf16.mxu0 %v19288_v43  ;;  %v19323_v37 = vld [vmem:[#allocation5 + $0x1ae8] sm:$0xff]   ;;  %v19325_v43 = vld [vmem:[#allocation5 + $0x1a60] sm:$0xff]  }
 0x8dc   :  { %v23040_v39 = vadd.f32 %v17905_v30, %v15238_v56  ;;  %18198 = vmatpush3.bf16.msra.mxu1 %v19287_v8  ;;  %v19324_v41 = vld [vmem:[#allocation5 + $0x1aa8] sm:$0xff]   ;;  %v19326_v30 = vld [vmem:[#allocation5 + $0x1a20] sm:$0xff]   ;;  %v19330_v54 = vld [vmem:[#allocation5 + $0x1a18] sm:$0xff]  }
 0x8dd   :  { %v17907_v26 = vpop.f32.mrf.mxu1  ;;  %18199 = vmatprep.subr.bf16.mxu1 %v19290_v48  ;;  %v19328_v63 = vld [vmem:[#allocation5 + $0x1aa0] sm:$0xff]   ;;  %v19329_v48 = vld [vmem:[#allocation5 + $0x1a58] sm:$0xff]  }
 0x8de   :  { %18178 = vmatpush3.bf16.msra.mxu0 %v19289_v29  ;;  %v19327_v29 = vld [vmem:[#allocation5 + $0x1ae0] sm:$0xff]   ;;  %v19334_v26 = vld [vmem:[#allocation5 + $0x1a10] sm:$0xff]  }
 0x8df   :  { %18179 = vmatprep.subr.bf16.mxu0 %v19292_v58  ;;  %v19333_v58 = vld [vmem:[#allocation5 + $0x1a50] sm:$0xff]  }
 0x8e0   :  { %18200 = vmatpush3.bf16.msra.mxu1 %v19291_v9  ;;  %v19332_v9 = vld [vmem:[#allocation5 + $0x1a98] sm:$0xff]  }
 0x8e1   :  { %18201 = vmatprep.subr.bf16.mxu1 %v19294_v15  ;;  %v19336_v15 = vld [vmem:[#allocation5 + $0x1a90] sm:$0xff]  }
 0x8e2   :  { %18180 = vmatpush3.bf16.msra.mxu0 %v19293_v61  ;;  %v19335_v61 = vld [vmem:[#allocation5 + $0x1ad0] sm:$0xff]  }
 0x8e3   :  { %18181 = vmatprep.subr.bf16.mxu0 %v19296_v51  ;;  %v19338_v51 = vld [vmem:[#allocation5 + $0x1a08] sm:$0xff]  }
 0x8e4   :  { %18202 = vmatpush3.bf16.msra.mxu1 %v19295_v14  ;;  %v19337_v14 = vld [vmem:[#allocation5 + $0x1a48] sm:$0xff]  }
 0x8e5   :  { %18203 = vmatprep.subr.bf16.mxu1 %v19298_v23  ;;  %v19340_v23 = vld [vmem:[#allocation5 + $0x1a88] sm:$0xff]  }
 0x8e6   :  { %18182 = vmatpush3.bf16.msra.mxu0 %v19297_v46  ;;  %v19339_v46 = vld [vmem:[#allocation5 + $0x1ac8] sm:$0xff]  }
 0x8e7   :  { %18183 = vmatprep.subr.bf16.mxu0 %v19300_v25  ;;  %v19342_v25 = vld [vmem:[#allocation5 + $0x1a00] sm:$0xff]  }
 0x8e8   :  { %18204 = vmatpush3.bf16.msra.mxu1 %v19299_v13  ;;  %v19341_v13 = vld [vmem:[#allocation5 + $0x1a40] sm:$0xff]  }
 0x8e9   :  { %18205 = vmatprep.subr.bf16.mxu1 %v19302_v28  ;;  %v6078_v28 = vld [vmem:[#allocation4 + $0xd0] sm:$0xff] }
 0x8ea   :  { %18184 = vmatpush3.bf16.msra.mxu0 %v19301_v1  ;;  %v19343_v1 = vld [vmem:[#allocation5 + $0x1ac0] sm:$0xff]  }
 0x8eb   :  { %18185 = vmatprep.subr.bf16.mxu0 %v19304_v35  ;;  %v6550_v35 = vcombine.high %v6078_v28, %v6078_v28 }
 0x8ec   :  { %18206 = vmatpush3.bf16.msra.mxu1 %v19303_v3  ;;  %v6557_v3 = vrot.slane %v6078_v28, %v22934_v5 }
 0x8ed   :  { %18207 = vmatprep.subr.bf16.mxu1 %v19306_v32 }
 0x8ee   :  { %18186 = vmatpush3.bf16.msra.mxu0 %v19305_v45  ;;  %v19344_v45 = vld [vmem:[#allocation5 + $0x1a80] sm:$0xff]   ;;  %v6565_v32 = vcombine.high %v6557_v3, %v6557_v3 }
 0x8ef   :  { %18187 = vmatprep.subr.bf16.mxu0 %v19308_v40  ;;  %v6787_v40 = vpack.c.bf16 %v6557_v3, %v6557_v3 }
 0x8f0   :  { %18208 = vmatpush3.bf16.msra.mxu1 %v19307_v60  ;;  %v6564_v60 = vrot.slane %v6550_v35, %v22934_v5 }
 0x8f1   :  { %18209 = vmatprep.subr.bf16.mxu1 %v19310_v4  ;;  %v23687_v4 = vmov 0.0  }
 0x8f2   :  { %18188 = vmatpush3.bf16.msra.mxu0 %v19309_v31  ;;  %v6788_v31 = vpack.c.bf16 %v6565_v32, %v6565_v32  ;;  %v6566_v7 = vcombine.high %v6564_v60, %v6564_v60  ;;  %v6789_v44 = vpack.c.bf16 %v6564_v60, %v6564_v60 }
 0x8f3   :  { %18217 = vmatprep.subr.bf16.mxu0 %v19312_v34 }
 0x8f4   :  { %18210 = vmatpush3.bf16.msra.mxu1 %v19311_v57  ;;  %v6790_v34 = vpack.c.bf16 %v6566_v7, %v6566_v7 }
 0x8f5   :  { %v17925_v11 = vpop.f32.mrf.mxu0  ;;  %15796 = vmatmul.mubr.bf16.vlgmr.msra.gmra.mxu0 %v6783_v47  ;;  %18239 = vmatprep.subr.bf16.mxu1 %v19315_v18  ;;  %v19347_v47 = vld [vmem:[#allocation5 + $0x1b20] sm:$0xff]  }
 0x8f6   :  { %18218 = vmatpush3.bf16.msra.mxu0 %v19314_v50  ;;  %15875 = vmatprep.mubr.bf16.mxu0 %v6788_v31 }
 0x8f7   :  { %v17926_v38 = vpop.f32.mrf.mxu0  ;;  %v17947_v53 = vpop.f32.mrf.mxu1  ;;  %15836 = vmatmul.mubr.bf16.vlgmr.msra.gmra.mxu1 %v6785_v42  ;;  %18219 = vmatprep.subr.bf16.mxu0 %v19317_v33  ;;  %v19348_v33 = vld [vmem:[#allocation5 + $0x1b18] sm:$0xff]  }
 0x8f8   :  { %v17927_v36 = vadd.f32 %v17926_v38, %v17925_v11  ;;  %18240 = vmatpush3.bf16.msra.mxu1 %v19316_v55  ;;  %15915 = vmatprep.mubr.bf16.mxu1 %v6790_v34  ;;  %v19350_v38 = vld [vmem:[#allocation5 + $0x1b08] sm:$0xff]  }
 0x8f9   :  { %v17928_v2 = vpop.f32.mrf.mxu0  ;;  %v17948_v24 = vpop.f32.mrf.mxu1  ;;  %18241 = vmatprep.subr.bf16.mxu1 %v19319_v12  ;;  %v16143_v12 = vld.sshfl [vmem:[#allocation4 + $0xd8] sm:$0x3 pattern:$0x76325410] }
 0x8fa   :  { %v15318_v20 = vadd.f32 %v17927_v36, %v23040_v39  ;;  %v17949_v10 = vadd.f32 %v17948_v24, %v17947_v53  ;;  %18220 = vmatpush3.bf16.msra.mxu0 %v19318_v27  ;;  %v19331_v39 = vld [vmem:[#allocation5 + $0x1ad8] sm:$0xff]   ;;  %v19349_v27 = vld [vmem:[#allocation5 + $0x1b10] sm:$0xff]   ;;  %v19351_v53 = vld [vmem:[#allocation5 + $0x1b00] sm:$0xff]   ;;  %v6791_v36 = vpack.c.bf16 %v16143_v12, %v16143_v12 }
 0x8fb   :  { %v17929_v22 = vpop.f32.mrf.mxu0  ;;  %v17950_v8 = vpop.f32.mrf.mxu1  ;;  %18221 = vmatprep.subr.bf16.mxu0 %v19321_v49 }
 0x8fc   :  { %v23045_v52 = vadd.f32 %v17949_v10, %v15318_v20  ;;  %18242 = vmatpush3.bf16.msra.mxu1 %v19320_v19 }
 0x8fd   :  { %v17951_v56 = vpop.f32.mrf.mxu1  ;;  %18243 = vmatprep.subr.bf16.mxu1 %v19323_v37 }
 0x8fe   :  { %18222 = vmatpush3.bf16.msra.mxu0 %v19322_v21 }
 0x8ff   :  { %18223 = vmatprep.subr.bf16.mxu0 %v19325_v43 }
 0x900   :  { %18244 = vmatpush3.bf16.msra.mxu1 %v19324_v41 }
 0x901   :  { %18245 = vmatprep.subr.bf16.mxu1 %v19327_v29 }
 0x902   :  { %18224 = vmatpush3.bf16.msra.mxu0 %v19326_v30 }
 0x903   :  { %18225 = vmatprep.subr.bf16.mxu0 %v19329_v48 }
 0x904   :  { %18246 = vmatpush3.bf16.msra.mxu1 %v19328_v63 }
 0x905   :  { %18247 = vmatprep.subr.bf16.mxu1 %v19331_v39 }
 0x906   :  { %18226 = vmatpush3.bf16.msra.mxu0 %v19330_v54 }
 0x907   :  { %18227 = vmatprep.subr.bf16.mxu0 %v19333_v58 }
 0x908   :  { %18248 = vmatpush3.bf16.msra.mxu1 %v19332_v9 }
 0x909   :  { %18249 = vmatprep.subr.bf16.mxu1 %v19335_v61 }
 0x90a   :  { %18228 = vmatpush3.bf16.msra.mxu0 %v19334_v26 }
 0x90b   :  { %18229 = vmatprep.subr.bf16.mxu0 %v19337_v14 }
 0x90c   :  { %18250 = vmatpush3.bf16.msra.mxu1 %v19336_v15 }
 0x90d   :  { %18251 = vmatprep.subr.bf16.mxu1 %v19339_v46 }
 0x90e   :  { %18230 = vmatpush3.bf16.msra.mxu0 %v19338_v51 }
 0x90f   :  { %18231 = vmatprep.subr.bf16.mxu0 %v19341_v13 }
 0x910   :  { %18252 = vmatpush3.bf16.msra.mxu1 %v19340_v23 }
 0x911   :  { %18253 = vmatprep.subr.bf16.mxu1 %v19343_v1 }
 0x912   :  { %18232 = vmatpush3.bf16.msra.mxu0 %v19342_v25 }
 0x913   :  { %18358 = vmatprep.subr.bf16.mxu0 %v23687_v4 }
 0x914   :  { %18254 = vmatpush3.bf16.msra.mxu1 %v19344_v45 }
 0x915   :  { %v17969_v57 = vpop.f32.mrf.mxu0  ;;  %15876 = vmatmul.mubr.bf16.vlgmr.msra.gmra.mxu0 %v6787_v40 }
 0x916   :  { %18359 = vmatpush3.bf16.msra.mxu0 %v19346_v59  ;;  %18370 = vmatprep.mubr.msk.bf16.mxu0 %vm19522_vm7, %v23687_v4 }
 0x917   :  { %v17970_v16 = vpop.f32.mrf.mxu0  ;;  %v17991_v0 = vpop.f32.mrf.mxu1  ;;  %15916 = vmatmul.mubr.bf16.vlgmr.msra.gmra.mxu1 %v6789_v44  ;;  %18360 = vmatprep.subr.bf16.mxu0 %v23687_v4 }
 0x918   :  { %v17971_v50 = vadd.f32 %v17970_v16, %v17969_v57 }
 0x919   :  { %v17972_v5 = vpop.f32.mrf.mxu0  ;;  %v17992_v18 = vpop.f32.mrf.mxu1 }
 0x91a   :  { %v15398_v17 = vadd.f32 %v17971_v50, %v23045_v52  ;;  %v17993_v62 = vadd.f32 %v17992_v18, %v17991_v0  ;;  %18361 = vmatpush3.bf16.msra.mxu0 %v19347_v47 }
 0x91b   :  { %v17973_v55 = vpop.f32.mrf.mxu0  ;;  %v17994_v11 = vpop.f32.mrf.mxu1  ;;  %18362 = vmatprep.subr.bf16.mxu0 %v23687_v4 }
 0x91c   :  { %v15438_v42 = vadd.f32 %v17993_v62, %v15398_v17 }
 0x91d   :  { %v17995_v6 = vpop.f32.mrf.mxu1 }
 0x91e   :  { %18363 = vmatpush3.bf16.msra.mxu0 %v19348_v33 }
 0x91f   :  { %18364 = vmatprep.subr.bf16.mxu0 %v23687_v4 }
 0x922   :  { %18365 = vmatpush3.bf16.msra.mxu0 %v19349_v27 }
 0x923   :  { %18366 = vmatprep.subr.bf16.mxu0 %v23687_v4 }
 0x926   :  { %18367 = vmatpush3.bf16.msra.mxu0 %v19350_v38 }
 0x927   :  { %18368 = vmatprep.subr.bf16.mxu0 %v23687_v4 }
 0x92a   :  { %18369 = vmatpush3.bf16.msra.mxu0 %v19351_v53 }
 0x92d   :  { %18371 = vmatmul.mubr.msk.bf16.vlgmr.msra.gmra.mxu0 %vm13759_vm6, %v6791_v36 }
 0x935   :  { %v18013_v19 = vpop.f32.mrf.mxu0 }
 0x937   :  { %v18014_v2 = vpop.f32.mrf.mxu0  ;;  %v18035_v24 = vpop.f32.mrf.mxu1 }
 0x938   :  { %v18015_v49 = vadd.f32 %v18014_v2, %v18013_v19 }
 0x939   :  { %v18016_v20 = vpop.f32.mrf.mxu0  ;;  %v18036_v10 = vpop.f32.mrf.mxu1 }
 0x93a   :  { %v15478_v21 = vadd.f32 %v18015_v49, %v15438_v42  ;;  %v18037_v22 = vadd.f32 %v18036_v10, %v18035_v24 }
 0x93b   :  { %v18017_v37 = vpop.f32.mrf.mxu0  ;;  %v18038_v8 = vpop.f32.mrf.mxu1 }
 0x93c   :  { %v15518_v52 = vadd.f32 %v18037_v22, %v15478_v21 }
 0x93d   :  { %v18039_v41 = vpop.f32.mrf.mxu1 }
 0x93e   :  { %v17016_v41 = vld [vmem:[#allocation13] ss:$0 sm:$0xff] }
 0x955   :  { %v18057_v43 = vpop.f32.mrf.mxu0 }
 0x957   :  { %v18058_v56 = vpop.f32.mrf.mxu0  ;;  %v18079_v30 = vpop.f32.mrf.mxu1 }
 0x958   :  { %v18059_v29 = vadd.f32 %v18058_v56, %v18057_v43 }
 0x959   :  { %v18060_v63 = vpop.f32.mrf.mxu0  ;;  %v18080_v48 = vpop.f32.mrf.mxu1 }
 0x95a   :  { %v15558_v54 = vadd.f32 %v18059_v29, %v15518_v52  ;;  %v18081_v39 = vadd.f32 %v18080_v48, %v18079_v30  ;;  %v17017_v48 = vld [vmem:[#allocation7] ss:$0 sm:$0xff] }
 0x95b   :  { %v18061_v9 = vpop.f32.mrf.mxu0  ;;  %v18082_v58 = vpop.f32.mrf.mxu1 }
 0x95c   :  { %v15598_v26 = vadd.f32 %v18081_v39, %v15558_v54 }
 0x95d   :  { %v18083_v61 = vpop.f32.mrf.mxu1 }
 0x975   :  { %v18101_v15 = vpop.f32.mrf.mxu0 }
 0x977   :  { %v18102_v14 = vpop.f32.mrf.mxu0  ;;  %v18123_v51 = vpop.f32.mrf.mxu1 }
 0x978   :  { %v18103_v46 = vadd.f32 %v18102_v14, %v18101_v15 }
 0x979   :  { %v18104_v23 = vpop.f32.mrf.mxu0  ;;  %v18124_v13 = vpop.f32.mrf.mxu1 }
 0x97a   :  { %v15638_v25 = vadd.f32 %v18103_v46, %v15598_v26  ;;  %v18125_v1 = vadd.f32 %v18124_v13, %v18123_v51 }
 0x97b   :  { %v18105_v28 = vpop.f32.mrf.mxu0  ;;  %v18126_v3 = vpop.f32.mrf.mxu1 }
 0x97c   :  { %v15678_v35 = vadd.f32 %v18125_v1, %v15638_v25 }
 0x97d   :  { %v18127_v45 = vpop.f32.mrf.mxu1 }
 0x995   :  { %v18145_v32 = vpop.f32.mrf.mxu0 }
 0x997   :  { %v18146_v60 = vpop.f32.mrf.mxu0  ;;  %v18167_v40 = vpop.f32.mrf.mxu1 }
 0x998   :  { %v18147_v31 = vadd.f32 %v18146_v60, %v18145_v32 }
 0x999   :  { %v18148_v4 = vpop.f32.mrf.mxu0  ;;  %v18168_v7 = vpop.f32.mrf.mxu1 }
 0x99a   :  { %v15718_v59 = vadd.f32 %v18147_v31, %v15678_v35  ;;  %v18169_v57 = vadd.f32 %v18168_v7, %v18167_v40 }
 0x99b   :  { %v18149_v44 = vpop.f32.mrf.mxu0  ;;  %v18170_v34 = vpop.f32.mrf.mxu1 }
 0x99c   :  { %v15758_v16 = vadd.f32 %v18169_v57, %v15718_v59 }
 0x99d   :  { %v18171_v0 = vpop.f32.mrf.mxu1 }
 0x9b5   :  { %v18189_v50 = vpop.f32.mrf.mxu0 }
 0x9b7   :  { %v18190_v47 = vpop.f32.mrf.mxu0  ;;  %v18211_v5 = vpop.f32.mrf.mxu1 }
 0x9b8   :  { %v18191_v19 = vadd.f32 %v18190_v47, %v18189_v50 }
 0x9b9   :  { %v18192_v18 = vpop.f32.mrf.mxu0  ;;  %v18212_v17 = vpop.f32.mrf.mxu1 }
 0x9ba   :  { %v15798_v2 = vadd.f32 %v18191_v19, %v15758_v16  ;;  %v18213_v24 = vadd.f32 %v18212_v17, %v18211_v5 }
 0x9bb   :  { %v18193_v62 = vpop.f32.mrf.mxu0  ;;  %v18214_v55 = vpop.f32.mrf.mxu1 }
 0x9bc   :  { %v15838_v20 = vadd.f32 %v18213_v24, %v15798_v2 }
 0x9bd   :  { %v18215_v11 = vpop.f32.mrf.mxu1 }
 0x9d5   :  { %v18233_v42 = vpop.f32.mrf.mxu0 }
 0x9d7   :  { %v18234_v33 = vpop.f32.mrf.mxu0  ;;  %v18255_v6 = vpop.f32.mrf.mxu1 }
 0x9d8   :  { %v18235_v49 = vadd.f32 %v18234_v33, %v18233_v42 }
 0x9d9   :  { %v18236_v27 = vpop.f32.mrf.mxu0  ;;  %v18256_v38 = vpop.f32.mrf.mxu1 }
 0x9da   :  { %v15878_v10 = vadd.f32 %v18235_v49, %v15838_v20  ;;  %v18257_v21 = vadd.f32 %v18256_v38, %v18255_v6 }
 0x9db   :  { %v18237_v53 = vpop.f32.mrf.mxu0  ;;  %v18258_v12 = vpop.f32.mrf.mxu1 }
 0x9dc   :  { %v15918_v22 = vadd.f32 %v18257_v21, %v15878_v10 }
 0x9dd   :  { %v18259_v36 = vpop.f32.mrf.mxu1 }
 0x9ed   :  { %v15957_v37 = vpop.f32.mrf.mxu0 }
 0x9ee   :  { %v15958_v8 = vadd.f32 %v15957_v37, %v15918_v22 }
 0x9ef   :  { %v18372_v52 = vpop.f32.mrf.mxu0 }
 0x9f0   :  { %v15963_v43 = vmax.f32 %v15958_v8, 0.0 }
 0x9f1   :  { %v15960_v56 = vpop.f32.mrf.mxu0 }
 0x9f2   :  { %v15971_v30 = vmul.f32 %v17016_v41, %v15963_v43 }
 0x9f3   :  { %v18373_v29 = vpop.f32.mrf.mxu0 }
 0x9f4   :  { %v15973_v63 = vsel %vm15972_vm0, %v15971_v30, 0.0 }
 0x9f5   :  { %15974 = vadd.xlane.f32.xlu0 %v15973_v63 }
 0xa7e   :  { %v15975_v54 = vpop.xlane.xlu0 %15974 }
 0xa7f   :  { %v15983_v39 = vadd.f32 %v17017_v48, %v15975_v54 }
 0xa81   :  { %15985 = vst.msk [vmem:[%s23070_s10] sm:$0x3] %vm15984_vm8, %v15983_v39 }
 0xa82   :  { %15990 = vsyncpa [#allocation9], 1 }
 0xa83   :  { %15991 = vsyncpa [#allocation11], 1 }
 0xa84   :  { %15992 = vsyncpa [#allocation14], 1 }
 0xa85   :  { %15993 = vsyncmov [#allocation6] }
 0xa88   :  { %s15994_s24 = vpop.sfrf %15993 }
 0xa89   :  { %p17018_p11 = scmp.ne.s32.totalorder %s15994_s24, 0 }
 0xa8b   :  { %15998 = shalt.err (%p17018_p11)  }

</bundles_post_ra>
